<compile_context>
chip_gen: v5e
topology: v5e:2x2
jax: 0.10.0
libtpu: 0.0.40
codegen_flags: <defaults>
</compile_context>

<pallas_src>
import numpy as np
import jax
import jax.numpy as jnp
from jax.experimental import pallas as pl
from jax.experimental.pallas import tpu as pltpu


# ------------------------------------------------------------------ config ---
IMAGE_SIZE = 16        # opt.imageSize
NVF = 32               # opt.nvf
NOF = 32               # opt.nof
NGF = 8                # opt.ngf
MAX_CHANNELS = 64      # opt.max_channels
LATENT_DIM = 8         # opt.latent_dim
MIN_SPATIAL_RES = 2
BATCH = 2
TF_LEN = 256           # required so the Conv1d stack collapses to length 1

# (cin, cout, kernel, stride, padding) for the opacity_encoder Conv1d stack
CONV1D_SPECS = [
    (1, 16, 5, 2, 2),
    (16, 32, 5, 2, 2),
    (32, 64, 5, 2, 2),
    (64, 128, 5, 2, 2),
    (128, 128, 5, 2, 2),
    (128, 256, 8, 1, 0),
]


def _compute_all_nplanes():
    all_nplanes = [1]
    res = MIN_SPATIAL_RES // 2
    res_mult = 1
    while res != IMAGE_SIZE:
        all_nplanes.insert(0, min(NGF * res_mult, MAX_CHANNELS))
        res_mult *= 2
        res *= 2
    return all_nplanes


ALL_NPLANES = _compute_all_nplanes()          # [64, 32, 16, 8, 1] for 16x16


def _build_conv1d_meta():
    metas = []
    L = TF_LEN
    for (cin, cout, K, stride, pad) in CONV1D_SPECS:
        L_out = (L + 2 * pad - K) // stride + 1
        S = max(L_out, 8)                      # sublane-aligned tap-slab height
        metas.append(dict(cin=cin, cout=cout, K=K, stride=stride, pad=pad,
                          L=L, L_out=L_out, S=S))
        L = L_out
    return metas


CONV1D_META = _build_conv1d_meta()


def _build_decoder_meta():
    metas = []
    cur = MIN_SPATIAL_RES // 2
    rdx = 0
    while cur != IMAGE_SIZE:
        res_in = cur
        cur *= 2
        k = 1 if cur == MIN_SPATIAL_RES else 3
        pad = 0 if cur == MIN_SPATIAL_RES else 1
        cin, cout = ALL_NPLANES[rdx], ALL_NPLANES[rdx + 1]
        final = cur == IMAGE_SIZE
        metas.append(dict(cin=cin, cout=cout, k=k, pad=pad,
                          res_in=res_in, res_out=cur,
                          hw_in=res_in * res_in, hw=cur * cur,
                          ntaps=k * k, final=final,
                          # per-tap row stride inside the packed weight slab
                          # (>=16 so bf16 slices stay on (16,128) tile rows)
                          w1_stride=16 if final else max(16, cin),
                          w2_stride=max(16, cout)))
        rdx += 1
    return metas


DECODER_META = _build_decoder_meta()


# ---------------------------------------------- gather-matrix construction ---
def _conv1d_gather(meta):
    """Stacked tap-gather G (K*S, L): (G @ X)[k*S + o] = X[stride*o + k - pad]."""
    K, S, L = meta["K"], meta["S"], meta["L"]
    L_out, stride, pad = meta["L_out"], meta["stride"], meta["pad"]
    G = np.zeros((K * S, L), np.float32)
    for k in range(K):
        for o in range(L_out):
            src = stride * o + k - pad
            if 0 <= src < L:
                G[k * S + o, src] = 1.0
    return G


def _decoder_gathers(meta):
    """GU: upsample(2x nearest) fused with conv1 tap gather; G2: conv2 tap gather."""
    k, pad = meta["k"], meta["pad"]
    h_in = w_in = meta["res_in"]
    h = w = meta["res_out"]
    T = k * k
    GU = np.zeros((T * h * w, h_in * w_in), np.float32)
    G2 = np.zeros((T * h * w, h * w), np.float32)
    for kh in range(k):
        for kw in range(k):
            t = kh * k + kw
            for r in range(h):
                for c in range(w):
                    rr, cc = r + kh - pad, c + kw - pad
                    row = t * h * w + r * w + c
                    if 0 <= rr < h and 0 <= cc < w:
                        GU[row, (rr // 2) * w_in + (cc // 2)] = 1.0
                        G2[row, rr * w + cc] = 1.0
    return GU, G2


# Layer-0 im2col indices (built in the wrapper; layer 0 has Cin=1).
L0_OUT = CONV1D_META[0]["L_out"]               # 128
L0_K = CONV1D_META[0]["K"]                     # 5
_idx0 = (CONV1D_META[0]["stride"] * np.arange(L0_OUT)[:, None]
         + np.arange(L0_K)[None, :] - CONV1D_META[0]["pad"])
_L0_VALID = ((_idx0 >= 0) & (_idx0 < TF_LEN)).astype(np.float32)
_L0_IDX = np.clip(_idx0, 0, TF_LEN - 1).astype(np.int32)


# ----------------------------------------------------- slab layout planning --
# slab 0: bf16, 128 lanes  (all matrices with lane width <= 128)
# slab 1: bf16, 256 lanes  (matrices with lane width  > 128)
# slab 2: f32,  256 lanes  (biases, one row each)
_SLAB_DEFS = ((128, jnp.bfloat16, 16), (256, jnp.bfloat16, 16), (256, jnp.float32, 8))
LAYOUT = {}                                    # name -> (slab, row_off, rows, cols)
_SLAB_ROWS = [0, 0, 0]


def _round_up(x, m):
    return ((x + m - 1) // m) * m


def _reg(name, rows, cols, slab):
    lanes, _, align = _SLAB_DEFS[slab]
    assert cols <= lanes, (name, cols, lanes)
    off = _SLAB_ROWS[slab]
    LAYOUT[name] = (slab, off, rows, cols)
    _SLAB_ROWS[slab] = off + _round_up(rows, align)


def _build_layout():
    def reg_w(name, rows, cols):
        _reg(name, rows, cols, 1 if cols > 128 else 0)

    def reg_b(name, cols):
        _reg(name, 1, cols, 2)

    reg_w("v1_w", 5, NVF);   reg_b("v1_b", NVF)
    reg_w("v2_w", NVF, NVF); reg_b("v2_b", NVF)

    for i, m in enumerate(CONV1D_META):
        if i == 0:
            reg_w("op0_w", 8, m["cout"])       # im2col weight (K padded to 8 rows)
        else:
            reg_w(f"op{i}_g", m["K"] * m["S"], m["L"])
            reg_w(f"op{i}_w", m["K"] * m["cin"], m["cout"])
        reg_b(f"op{i}_b", m["cout"])

    reg_w("le_w", 256, LATENT_DIM); reg_b("le_b", LATENT_DIM)
    reg_w("ld_w", LATENT_DIM, NOF); reg_b("ld_b", NOF)

    reg_w("m1_wv", NVF, ALL_NPLANES[0])
    reg_w("m1_wo", NOF, ALL_NPLANES[0])
    reg_b("m1_b", ALL_NPLANES[0])
    reg_w("m2_w", ALL_NPLANES[0], ALL_NPLANES[0]); reg_b("m2_b", ALL_NPLANES[0])

    for s, m in enumerate(DECODER_META):
        T, cin, cout, hw, hw_in = m["ntaps"], m["cin"], m["cout"], m["hw"], m["hw_in"]
        reg_w(f"d{s}_gu", T * hw, hw_in)
        if not m["final"]:
            reg_w(f"d{s}_w1", T * m["w1_stride"], cout); reg_b(f"d{s}_b1", cout)
            reg_w(f"d{s}_g2", T * hw, hw)
            reg_w(f"d{s}_w2", T * m["w2_stride"], cout); reg_b(f"d{s}_b2", cout)
            reg_w(f"d{s}_wsc", cin, cout);               reg_b(f"d{s}_bsc", cout)
        else:
            reg_w(f"d{s}_w1r", T * m["w1_stride"], cin); reg_b(f"d{s}_b1", 1)
            reg_w(f"d{s}_m", hw, hw);                    reg_b(f"d{s}_b2", 1)
            reg_w(f"d{s}_wsc", 1, cin);                  reg_b(f"d{s}_bsc", 1)


_build_layout()


# --------------------------------------------------------- in-kernel helpers -
def _bf(x):
    return x.astype(jnp.bfloat16)


def _leaky(x):
    return jnp.where(x >= 0.0, x, 0.2 * x)


def _tree_sum(terms):
    terms = list(terms)
    while len(terms) > 1:
        nxt = [terms[i] + terms[i + 1] for i in range(0, len(terms) - 1, 2)]
        if len(terms) % 2:
            nxt.append(terms[-1])
        terms = nxt
    return terms[0]


_NT = (((1,), (1,)), ((), ()))                 # A @ B^T (contract last dims)


# ------------------------------------------------------------ fused kernel ---
def _fused_kernel(view_ref, p0_ref, w128_ref, w256_ref, bias_ref, out_ref):
    slabs = (w128_ref, w256_ref, bias_ref)

    def seg(name):                             # static slab slice (free view/load)
        sid, off, rows, cols = LAYOUT[name]
        return slabs[sid][off:off + rows, 0:cols]

    def dot(a, b):
        return jnp.dot(a, b, preferred_element_type=jnp.float32)

    def lin(x, wname, bname):
        return _leaky(dot(_bf(x), seg(wname)) + seg(bname))

    # ---- view subnet --------------------------------------------------------
    v = lin(view_ref[0], "v1_w", "v1_b")               # (1, nvf)
    v = lin(v, "v2_w", "v2_b")

    # ---- opacity encoder ----------------------------------------------------
    # layer 0 (Cin=1): im2col built in the wrapper -> single (128,8)@(8,16) matmul
    x = lin(p0_ref[0], "op0_w", "op0_b")               # (128, 16)
    for i, meta in enumerate(CONV1D_META[1:], start=1):
        K, S, L_out, cin = meta["K"], meta["S"], meta["L_out"], meta["cin"]
        p = dot(seg(f"op{i}_g"), _bf(x))               # (K*S, cin) gathered taps
        p_bf = _bf(p)                                  # hoisted cast
        w = seg(f"op{i}_w")                            # (K*cin, cout) bf16
        y = _tree_sum(dot(p_bf[k * S:(k + 1) * S, :],
                          w[k * cin:(k + 1) * cin, :]) for k in range(K))
        y = _leaky(y + seg(f"op{i}_b"))
        x = y[0:L_out, :] if L_out < S else y
    enc = x                                            # (1, 256)

    # ---- latent encode / decode ---------------------------------------------
    lat = lin(enc, "le_w", "le_b")                     # (1, latent_dim)
    opd = lin(lat, "ld_w", "ld_b")                     # (1, nof)

    # ---- merged subnet (torch.cat folded into a split matmul) ----------------
    m = _leaky(dot(_bf(v), seg("m1_wv")) + dot(_bf(opd), seg("m1_wo")) + seg("m1_b"))
    m = lin(m, "m2_w", "m2_b")                         # (1, 64) == (hw_in=1, cin)

    # ---- decoder (Upsample2x + BasicResBlock stages, gathers folded in) -----
    x = m
    for s, meta in enumerate(DECODER_META):
        T, hw, cin, cout = meta["ntaps"], meta["hw"], meta["cin"], meta["cout"]
        center = T // 2                                # centre tap == upsampled input
        p = dot(seg(f"d{s}_gu"), _bf(x))               # (T*hw, cin)
        p_bf = _bf(p)
        up = p_bf[center * hw:(center + 1) * hw, :]    # (hw, cin) shortcut input
        if not meta["final"]:
            s1, s2 = meta["w1_stride"], meta["w2_stride"]
            w1 = seg(f"d{s}_w1")
            h = _tree_sum(dot(p_bf[t * hw:(t + 1) * hw, :],
                              w1[t * s1:t * s1 + cin, :]) for t in range(T))
            h = _leaky(h + seg(f"d{s}_b1"))            # (hw, cout)
            q = dot(seg(f"d{s}_g2"), _bf(h))           # (T*hw, cout)
            q_bf = _bf(q)
            w2 = seg(f"d{s}_w2")
            y = _tree_sum(dot(q_bf[t * hw:(t + 1) * hw, :],
                              w2[t * s2:t * s2 + cout, :]) for t in range(T))
            sc = dot(up, seg(f"d{s}_wsc"))             # 1x1 shortcut conv
            x = _leaky(y + seg(f"d{s}_b2") + sc + seg(f"d{s}_bsc"))
        else:
            # Final stage (cout == 1): produce a lane-dense (1, hw) row directly.
            s1 = meta["w1_stride"]
            w1 = seg(f"d{s}_w1r")                      # (T*s1, cin), one row per tap
            h = _tree_sum(
                jax.lax.dot_general(w1[t * s1:t * s1 + 1, :],
                                    p_bf[t * hw:(t + 1) * hw, :], _NT,
                                    preferred_element_type=jnp.float32)
                for t in range(T))
            h = _leaky(h + seg(f"d{s}_b1"))            # (1, hw)
            y = dot(_bf(h), seg(f"d{s}_m"))            # conv2 folded into (hw, hw)
            sc = jax.lax.dot_general(seg(f"d{s}_wsc"), up, _NT,
                                     preferred_element_type=jnp.float32)
            x = jnp.tanh(y + seg(f"d{s}_b2") + sc + seg(f"d{s}_bsc"))

    out_ref[0] = x.astype(out_ref.dtype)               # lane-dense (1, 256) store


# ------------------------------------------------- wrapper-side weight pack --
def pack_params(params):
    """One-time packing of all weights/gathers/biases into 3 tile-aligned slabs."""
    bufs = [np.zeros((max(_SLAB_ROWS[i], _SLAB_DEFS[i][2]), _SLAB_DEFS[i][0]),
                     np.float32) for i in range(3)]

    def put(name, arr):
        sid, off, rows, cols = LAYOUT[name]
        a = np.asarray(arr, np.float32)
        assert a.ndim == 2 and a.shape[0] <= rows and a.shape[1] <= cols, name
        bufs[sid][off:off + a.shape[0], 0:a.shape[1]] = a

    def put_taps(name, taps, stride):
        sid, off, _, _ = LAYOUT[name]
        for t, a in enumerate(taps):
            a = np.asarray(a, np.float32)
            bufs[sid][off + t * stride:off + t * stride + a.shape[0], 0:a.shape[1]] = a

    def put_linear(prefix, w, b):
        put(prefix + "_w", np.asarray(w, np.float32).T)
        put(prefix + "_b", np.asarray(b, np.float32).reshape(1, -1))

    put_linear("v1", *params["view"][0])
    put_linear("v2", *params["view"][1])

    for i, ((w, b), meta) in enumerate(zip(params["op_enc"], CONV1D_META)):
        w = np.asarray(w, np.float32)                      # (cout, cin, K)
        if i == 0:
            put("op0_w", w[:, 0, :].T)                     # (K, cout)
        else:
            put(f"op{i}_g", _conv1d_gather(meta))
            put(f"op{i}_w", np.transpose(w, (2, 1, 0)).reshape(
                meta["K"] * meta["cin"], meta["cout"]))
        put(f"op{i}_b", np.asarray(b, np.float32).reshape(1, -1))

    put_linear("le", *params["lat_enc"])
    put_linear("ld", *params["lat_dec"])

    w1m, b1m = params["merged"][0]
    w1m = np.asarray(w1m, np.float32)
    put("m1_wv", w1m[:, :NVF].T)                           # view half of the cat
    put("m1_wo", w1m[:, NVF:].T)                           # opacity half
    put("m1_b", np.asarray(b1m, np.float32).reshape(1, -1))
    put_linear("m2", *params["merged"][1])

    for s, (blk, meta) in enumerate(zip(params["decoder"], DECODER_META)):
        T, cin, cout, hw = meta["ntaps"], meta["cin"], meta["cout"], meta["hw"]
        GU, G2 = _decoder_gathers(meta)
        w1, b1 = blk["c1"]
        w2, b2 = blk["c2"]
        ws, bs = blk["sc"]
        w1 = np.asarray(w1, np.float32)
        w2 = np.asarray(w2, np.float32)
        ws = np.asarray(ws, np.float32)
        put(f"d{s}_gu", GU)
        put(f"d{s}_b1", np.asarray(b1, np.float32).reshape(1, -1))
        put(f"d{s}_b2", np.asarray(b2, np.float32).reshape(1, -1))
        put(f"d{s}_bsc", np.asarray(bs, np.float32).reshape(1, -1))
        if not meta["final"]:
            put_taps(f"d{s}_w1",
                     list(np.transpose(w1, (2, 3, 1, 0)).reshape(T, cin, cout)),
                     meta["w1_stride"])
            put(f"d{s}_g2", G2)
            put_taps(f"d{s}_w2",
                     list(np.transpose(w2, (2, 3, 1, 0)).reshape(T, cout, cout)),
                     meta["w2_stride"])
            put(f"d{s}_wsc", ws[:, :, 0, 0].T)             # (cin, cout)
        else:
            put_taps(f"d{s}_w1r",
                     list(np.transpose(w1, (2, 3, 0, 1)).reshape(T, 1, cin)),
                     meta["w1_stride"])
            # Fold the 1->1-channel conv2 into a single (hw, hw) matrix.
            M = np.einsum("t,tod->do", w2.reshape(T), G2.reshape(T, hw, hw))
            put(f"d{s}_m", M)
            put(f"d{s}_wsc", ws[:, :, 0, 0])               # (1, cin)

    return {"w128": jnp.asarray(bufs[0], _SLAB_DEFS[0][1]),
            "w256": jnp.asarray(bufs[1], _SLAB_DEFS[1][1]),
            "bias": jnp.asarray(bufs[2], _SLAB_DEFS[2][1])}


# ------------------------------------------------------------------ forward --
def _im2col_opacity(opacity_tf):
    """(B, 1, 256) -> (B, 128, 8) im2col slab for conv1d layer 0 (lanes 5..7 zero)."""
    x = opacity_tf.reshape(opacity_tf.shape[0], TF_LEN).astype(jnp.float32)
    p0 = x[:, _L0_IDX] * _L0_VALID                         # (B, 128, 5)
    return jnp.pad(p0, ((0, 0), (0, 0), (0, 8 - L0_K)))


def _forward(view_params, opacity_tf, packed):
    B = view_params.shape[0]
    view3 = view_params.astype(jnp.float32).reshape(B, 1, 5)
    p0 = _im2col_opacity(opacity_tf)
    w128, w256, bias = packed["w128"], packed["w256"], packed["bias"]
    out = pl.pallas_call(
        _fused_kernel,
        out_shape=jax.ShapeDtypeStruct((B, 1, IMAGE_SIZE * IMAGE_SIZE), jnp.float32),
        grid=(B,),
        in_specs=[
            pl.BlockSpec((1, 1, 5), lambda b: (b, 0, 0)),
            pl.BlockSpec((1, L0_OUT, 8), lambda b: (b, 0, 0)),
            pl.BlockSpec(w128.shape, lambda b: (0, 0)),     # weight slabs: resident
            pl.BlockSpec(w256.shape, lambda b: (0, 0)),
            pl.BlockSpec(bias.shape, lambda b: (0, 0)),
        ],
        out_specs=pl.BlockSpec((1, 1, IMAGE_SIZE * IMAGE_SIZE), lambda b: (b, 0, 0)),
        compiler_params=pltpu.CompilerParams(
            dimension_semantics=("parallel",),
            vmem_limit_bytes=32 * 1024 * 1024),
    )(view3, p0, w128, w256, bias)
    return out.reshape(B, 1, IMAGE_SIZE, IMAGE_SIZE)


forward = jax.jit(_forward)


# -------------------------------------------------------------- parameters --
def _uinit(key, shape, fan_in):
    bound = 1.0 / np.sqrt(float(fan_in))
    return jax.random.uniform(key, shape, jnp.float32, -bound, bound)


def init_params(key):
    keys = iter(jax.random.split(key, 128))

    def lin(out_f, in_f):
        return (_uinit(next(keys), (out_f, in_f), in_f),
                _uinit(next(keys), (out_f,), in_f))

    def conv1d(cout, cin, k):
        return (_uinit(next(keys), (cout, cin, k), cin * k),
                _uinit(next(keys), (cout,), cin * k))

    def conv2d(cout, cin, k):
        return (_uinit(next(keys), (cout, cin, k, k), cin * k * k),
                _uinit(next(keys), (cout,), cin * k * k))

    return {
        "view": [lin(NVF, 5), lin(NVF, NVF)],
        "op_enc": [conv1d(co, ci, k) for (ci, co, k, _, _) in CONV1D_SPECS],
        "lat_enc": lin(LATENT_DIM, 256),
        "lat_dec": lin(NOF, LATENT_DIM),
        "merged": [lin(ALL_NPLANES[0], NVF + NOF),
                   lin(ALL_NPLANES[0], ALL_NPLANES[0])],
        "decoder": [
            {"c1": conv2d(m["cout"], m["cin"], m["k"]),
             "c2": conv2d(m["cout"], m["cout"], m["k"]),
             "sc": conv2d(m["cout"], m["cin"], 1)}
            for m in DECODER_META
        ],
    }


# ------------------------------------------------------------------- main ---
if __name__ == "__main__":
    root = jax.random.PRNGKey(0)
    pkey, vkey, tkey = jax.random.split(root, 3)

    params = init_params(pkey)
    packed = pack_params(params)                 # one-time weight packing (numpy)

    # input[0]: view parameters (B, 5);  input[1]: opacity transfer fn (B, 1, 256)
    view_params = jax.random.normal(vkey, (BATCH, 5), jnp.float32)
    opacity_tf = jax.random.uniform(tkey, (BATCH, 1, TF_LEN), jnp.float32)

    out = forward(view_params, opacity_tf, packed)
    out = jax.block_until_ready(out)

    assert out.shape == (BATCH, 1, IMAGE_SIZE, IMAGE_SIZE), out.shape
    assert out.dtype == jnp.float32
    assert bool(jnp.all(jnp.isfinite(out)))
    assert bool(jnp.all(jnp.abs(out) <= 1.0))    # final tanh range

    print("KERNEL_OK")
</pallas_src>

<mosaic_0001>
module attributes {stable_mosaic.version = 11 : i64} {
  func.func @_fused_kernel(%arg0: i32, %arg1: memref<1x1x5xf32, #tpu.memory_space<vmem>>, %arg2: memref<1x128x8xf32, #tpu.memory_space<vmem>>, %arg3: memref<7200x128xbf16, #tpu.memory_space<vmem>>, %arg4: memref<1280x256xbf16, #tpu.memory_space<vmem>>, %arg5: memref<192x256xf32, #tpu.memory_space<vmem>>, %arg6: memref<1x1x256xf32, #tpu.memory_space<vmem>>) attributes {dimension_semantics = [#tpu.dimension_semantics<parallel>], iteration_bounds = array<i64: 2>, scalar_prefetch = 0 : i64, scratch_operands = 0 : i64, tpu.core_type = #tpu.core_type<tc>, window_params = [{transform_indices = @transform_0, window_bounds = array<i64: 1, 1, 5>}, {transform_indices = @transform_1, window_bounds = array<i64: 1, 128, 8>}, {pipeline_mode = #tpu.pipeline_mode<synchronous>, transform_indices = @transform_2, window_bounds = array<i64: 7200, 128>}, {pipeline_mode = #tpu.pipeline_mode<synchronous>, transform_indices = @transform_3, window_bounds = array<i64: 1280, 256>}, {pipeline_mode = #tpu.pipeline_mode<synchronous>, transform_indices = @transform_4, window_bounds = array<i64: 192, 256>}, {transform_indices = @transform_5, window_bounds = array<i64: 1, 1, 256>}]} {
    %c0 = arith.constant 0 : index
    %c0_0 = arith.constant 0 : index
    %c0_1 = arith.constant 0 : index
    %0 = vector.load %arg1[%c0, %c0_0, %c0_1] : memref<1x1x5xf32, #tpu.memory_space<vmem>>, vector<1x1x5xf32>
    %1 = vector.shape_cast %0 : vector<1x1x5xf32> to vector<1x5xf32>
    %2 = arith.truncf %1 : vector<1x5xf32> to vector<1x5xbf16>
    %c0_2 = arith.constant 0 : index
    %c0_3 = arith.constant 0 : index
    %3 = vector.load %arg3[%c0_2, %c0_3] : memref<7200x128xbf16, #tpu.memory_space<vmem>>, vector<5x32xbf16>
    %cst = arith.constant dense<0.000000e+00> : vector<1x32xf32>
    %4 = tpu.matmul %2, %3, %cst {dimension_numbers = #tpu.dot_dimension_numbers<[1], [0], [0], [1], [0, 0, 1, 1], [], []>} : vector<1x5xbf16>, vector<5x32xbf16>, vector<1x32xf32> -> vector<1x32xf32>
    %c0_4 = arith.constant 0 : index
    %c0_5 = arith.constant 0 : index
    %5 = vector.load %arg5[%c0_4, %c0_5] : memref<192x256xf32, #tpu.memory_space<vmem>>, vector<1x32xf32>
    %6 = arith.addf %4, %5 : vector<1x32xf32>
    %cst_6 = arith.constant 0.000000e+00 : f32
    %7 = vector.broadcast %cst_6 : f32 to vector<1x32xf32>
    %8 = arith.cmpf oge, %6, %7 : vector<1x32xf32>
    %cst_7 = arith.constant 2.000000e-01 : f32
    %9 = vector.broadcast %cst_7 : f32 to vector<1x32xf32>
    %10 = arith.mulf %9, %6 : vector<1x32xf32>
    %11 = arith.select %8, %6, %10 : vector<1x32xi1>, vector<1x32xf32>
    %12 = arith.truncf %11 : vector<1x32xf32> to vector<1x32xbf16>
    %c16 = arith.constant 16 : index
    %c0_8 = arith.constant 0 : index
    %13 = vector.load %arg3[%c16, %c0_8] : memref<7200x128xbf16, #tpu.memory_space<vmem>>, vector<32x32xbf16>
    %cst_9 = arith.constant dense<0.000000e+00> : vector<1x32xf32>
    %14 = tpu.matmul %12, %13, %cst_9 {dimension_numbers = #tpu.dot_dimension_numbers<[1], [0], [0], [1], [0, 0, 1, 1], [], []>} : vector<1x32xbf16>, vector<32x32xbf16>, vector<1x32xf32> -> vector<1x32xf32>
    %c8 = arith.constant 8 : index
    %c0_10 = arith.constant 0 : index
    %15 = vector.load %arg5[%c8, %c0_10] : memref<192x256xf32, #tpu.memory_space<vmem>>, vector<1x32xf32>
    %16 = arith.addf %14, %15 : vector<1x32xf32>
    %cst_11 = arith.constant 0.000000e+00 : f32
    %17 = vector.broadcast %cst_11 : f32 to vector<1x32xf32>
    %18 = arith.cmpf oge, %16, %17 : vector<1x32xf32>
    %cst_12 = arith.constant 2.000000e-01 : f32
    %19 = vector.broadcast %cst_12 : f32 to vector<1x32xf32>
    %20 = arith.mulf %19, %16 : vector<1x32xf32>
    %21 = arith.select %18, %16, %20 : vector<1x32xi1>, vector<1x32xf32>
    %c0_13 = arith.constant 0 : index
    %c0_14 = arith.constant 0 : index
    %c0_15 = arith.constant 0 : index
    %22 = vector.load %arg2[%c0_13, %c0_14, %c0_15] : memref<1x128x8xf32, #tpu.memory_space<vmem>>, vector<1x128x8xf32>
    %23 = vector.shape_cast %22 : vector<1x128x8xf32> to vector<128x8xf32>
    %24 = arith.truncf %23 : vector<128x8xf32> to vector<128x8xbf16>
    %c48 = arith.constant 48 : index
    %c0_16 = arith.constant 0 : index
    %25 = vector.load %arg3[%c48, %c0_16] : memref<7200x128xbf16, #tpu.memory_space<vmem>>, vector<8x16xbf16>
    %cst_17 = arith.constant dense<0.000000e+00> : vector<128x16xf32>
    %26 = tpu.matmul %24, %25, %cst_17 {dimension_numbers = #tpu.dot_dimension_numbers<[1], [0], [0], [1], [0, 0, 1, 1], [], []>} : vector<128x8xbf16>, vector<8x16xbf16>, vector<128x16xf32> -> vector<128x16xf32>
    %c16_18 = arith.constant 16 : index
    %c0_19 = arith.constant 0 : index
    %27 = vector.load %arg5[%c16_18, %c0_19] : memref<192x256xf32, #tpu.memory_space<vmem>>, vector<1x16xf32>
    %28 = vector.broadcast %27 : vector<1x16xf32> to vector<128x16xf32>
    %29 = arith.addf %26, %28 : vector<128x16xf32>
    %cst_20 = arith.constant 0.000000e+00 : f32
    %30 = vector.broadcast %cst_20 : f32 to vector<128x16xf32>
    %31 = arith.cmpf oge, %29, %30 : vector<128x16xf32>
    %cst_21 = arith.constant 2.000000e-01 : f32
    %32 = vector.broadcast %cst_21 : f32 to vector<128x16xf32>
    %33 = arith.mulf %32, %29 : vector<128x16xf32>
    %34 = arith.select %31, %29, %33 : vector<128x16xi1>, vector<128x16xf32>
    %c64 = arith.constant 64 : index
    %c0_22 = arith.constant 0 : index
    %35 = vector.load %arg3[%c64, %c0_22] : memref<7200x128xbf16, #tpu.memory_space<vmem>>, vector<320x128xbf16>
    %36 = arith.truncf %34 : vector<128x16xf32> to vector<128x16xbf16>
    %cst_23 = arith.constant dense<0.000000e+00> : vector<320x16xf32>
    %37 = tpu.matmul %35, %36, %cst_23 {dimension_numbers = #tpu.dot_dimension_numbers<[1], [0], [0], [1], [0, 0, 1, 1], [], []>} : vector<320x128xbf16>, vector<128x16xbf16>, vector<320x16xf32> -> vector<320x16xf32>
    %38 = arith.truncf %37 : vector<320x16xf32> to vector<320x16xbf16>
    %c384 = arith.constant 384 : index
    %c0_24 = arith.constant 0 : index
    %39 = vector.load %arg3[%c384, %c0_24] : memref<7200x128xbf16, #tpu.memory_space<vmem>>, vector<80x32xbf16>
    %40 = vector.extract_strided_slice %38 {offsets = [0, 0], sizes = [64, 16], strides = [1, 1]} : vector<320x16xbf16> to vector<64x16xbf16>
    %41 = vector.extract_strided_slice %39 {offsets = [0, 0], sizes = [16, 32], strides = [1, 1]} : vector<80x32xbf16> to vector<16x32xbf16>
    %cst_25 = arith.constant dense<0.000000e+00> : vector<64x32xf32>
    %42 = tpu.matmul %40, %41, %cst_25 {dimension_numbers = #tpu.dot_dimension_numbers<[1], [0], [0], [1], [0, 0, 1, 1], [], []>} : vector<64x16xbf16>, vector<16x32xbf16>, vector<64x32xf32> -> vector<64x32xf32>
    %43 = vector.extract_strided_slice %38 {offsets = [64, 0], sizes = [64, 16], strides = [1, 1]} : vector<320x16xbf16> to vector<64x16xbf16>
    %44 = vector.extract_strided_slice %39 {offsets = [16, 0], sizes = [16, 32], strides = [1, 1]} : vector<80x32xbf16> to vector<16x32xbf16>
    %cst_26 = arith.constant dense<0.000000e+00> : vector<64x32xf32>
    %45 = tpu.matmul %43, %44, %cst_26 {dimension_numbers = #tpu.dot_dimension_numbers<[1], [0], [0], [1], [0, 0, 1, 1], [], []>} : vector<64x16xbf16>, vector<16x32xbf16>, vector<64x32xf32> -> vector<64x32xf32>
    %46 = vector.extract_strided_slice %38 {offsets = [128, 0], sizes = [64, 16], strides = [1, 1]} : vector<320x16xbf16> to vector<64x16xbf16>
    %47 = vector.extract_strided_slice %39 {offsets = [32, 0], sizes = [16, 32], strides = [1, 1]} : vector<80x32xbf16> to vector<16x32xbf16>
    %cst_27 = arith.constant dense<0.000000e+00> : vector<64x32xf32>
    %48 = tpu.matmul %46, %47, %cst_27 {dimension_numbers = #tpu.dot_dimension_numbers<[1], [0], [0], [1], [0, 0, 1, 1], [], []>} : vector<64x16xbf16>, vector<16x32xbf16>, vector<64x32xf32> -> vector<64x32xf32>
    %49 = vector.extract_strided_slice %38 {offsets = [192, 0], sizes = [64, 16], strides = [1, 1]} : vector<320x16xbf16> to vector<64x16xbf16>
    %50 = vector.extract_strided_slice %39 {offsets = [48, 0], sizes = [16, 32], strides = [1, 1]} : vector<80x32xbf16> to vector<16x32xbf16>
    %cst_28 = arith.constant dense<0.000000e+00> : vector<64x32xf32>
    %51 = tpu.matmul %49, %50, %cst_28 {dimension_numbers = #tpu.dot_dimension_numbers<[1], [0], [0], [1], [0, 0, 1, 1], [], []>} : vector<64x16xbf16>, vector<16x32xbf16>, vector<64x32xf32> -> vector<64x32xf32>
    %52 = vector.extract_strided_slice %38 {offsets = [256, 0], sizes = [64, 16], strides = [1, 1]} : vector<320x16xbf16> to vector<64x16xbf16>
    %53 = vector.extract_strided_slice %39 {offsets = [64, 0], sizes = [16, 32], strides = [1, 1]} : vector<80x32xbf16> to vector<16x32xbf16>
    %cst_29 = arith.constant dense<0.000000e+00> : vector<64x32xf32>
    %54 = tpu.matmul %52, %53, %cst_29 {dimension_numbers = #tpu.dot_dimension_numbers<[1], [0], [0], [1], [0, 0, 1, 1], [], []>} : vector<64x16xbf16>, vector<16x32xbf16>, vector<64x32xf32> -> vector<64x32xf32>
    %55 = arith.addf %42, %45 : vector<64x32xf32>
    %56 = arith.addf %48, %51 : vector<64x32xf32>
    %57 = arith.addf %55, %56 : vector<64x32xf32>
    %58 = arith.addf %57, %54 : vector<64x32xf32>
    %c24 = arith.constant 24 : index
    %c0_30 = arith.constant 0 : index
    %59 = vector.load %arg5[%c24, %c0_30] : memref<192x256xf32, #tpu.memory_space<vmem>>, vector<1x32xf32>
    %60 = vector.broadcast %59 : vector<1x32xf32> to vector<64x32xf32>
    %61 = arith.addf %58, %60 : vector<64x32xf32>
    %cst_31 = arith.constant 0.000000e+00 : f32
    %62 = vector.broadcast %cst_31 : f32 to vector<64x32xf32>
    %63 = arith.cmpf oge, %61, %62 : vector<64x32xf32>
    %cst_32 = arith.constant 2.000000e-01 : f32
    %64 = vector.broadcast %cst_32 : f32 to vector<64x32xf32>
    %65 = arith.mulf %64, %61 : vector<64x32xf32>
    %66 = arith.select %63, %61, %65 : vector<64x32xi1>, vector<64x32xf32>
    %c464 = arith.constant 464 : index
    %c0_33 = arith.constant 0 : index
    %67 = vector.load %arg3[%c464, %c0_33] : memref<7200x128xbf16, #tpu.memory_space<vmem>>, vector<160x64xbf16>
    %68 = arith.truncf %66 : vector<64x32xf32> to vector<64x32xbf16>
    %cst_34 = arith.constant dense<0.000000e+00> : vector<160x32xf32>
    %69 = tpu.matmul %67, %68, %cst_34 {dimension_numbers = #tpu.dot_dimension_numbers<[1], [0], [0], [1], [0, 0, 1, 1], [], []>} : vector<160x64xbf16>, vector<64x32xbf16>, vector<160x32xf32> -> vector<160x32xf32>
    %70 = arith.truncf %69 : vector<160x32xf32> to vector<160x32xbf16>
    %c624 = arith.constant 624 : index
    %c0_35 = arith.constant 0 : index
    %71 = vector.load %arg3[%c624, %c0_35] : memref<7200x128xbf16, #tpu.memory_space<vmem>>, vector<160x64xbf16>
    %72 = vector.extract_strided_slice %70 {offsets = [0, 0], sizes = [32, 32], strides = [1, 1]} : vector<160x32xbf16> to vector<32x32xbf16>
    %73 = vector.extract_strided_slice %71 {offsets = [0, 0], sizes = [32, 64], strides = [1, 1]} : vector<160x64xbf16> to vector<32x64xbf16>
    %cst_36 = arith.constant dense<0.000000e+00> : vector<32x64xf32>
    %74 = tpu.matmul %72, %73, %cst_36 {dimension_numbers = #tpu.dot_dimension_numbers<[1], [0], [0], [1], [0, 0, 1, 1], [], []>} : vector<32x32xbf16>, vector<32x64xbf16>, vector<32x64xf32> -> vector<32x64xf32>
    %75 = vector.extract_strided_slice %70 {offsets = [32, 0], sizes = [32, 32], strides = [1, 1]} : vector<160x32xbf16> to vector<32x32xbf16>
    %76 = vector.extract_strided_slice %71 {offsets = [32, 0], sizes = [32, 64], strides = [1, 1]} : vector<160x64xbf16> to vector<32x64xbf16>
    %cst_37 = arith.constant dense<0.000000e+00> : vector<32x64xf32>
    %77 = tpu.matmul %75, %76, %cst_37 {dimension_numbers = #tpu.dot_dimension_numbers<[1], [0], [0], [1], [0, 0, 1, 1], [], []>} : vector<32x32xbf16>, vector<32x64xbf16>, vector<32x64xf32> -> vector<32x64xf32>
    %78 = vector.extract_strided_slice %70 {offsets = [64, 0], sizes = [32, 32], strides = [1, 1]} : vector<160x32xbf16> to vector<32x32xbf16>
    %79 = vector.extract_strided_slice %71 {offsets = [64, 0], sizes = [32, 64], strides = [1, 1]} : vector<160x64xbf16> to vector<32x64xbf16>
    %cst_38 = arith.constant dense<0.000000e+00> : vector<32x64xf32>
    %80 = tpu.matmul %78, %79, %cst_38 {dimension_numbers = #tpu.dot_dimension_numbers<[1], [0], [0], [1], [0, 0, 1, 1], [], []>} : vector<32x32xbf16>, vector<32x64xbf16>, vector<32x64xf32> -> vector<32x64xf32>
    %81 = vector.extract_strided_slice %70 {offsets = [96, 0], sizes = [32, 32], strides = [1, 1]} : vector<160x32xbf16> to vector<32x32xbf16>
    %82 = vector.extract_strided_slice %71 {offsets = [96, 0], sizes = [32, 64], strides = [1, 1]} : vector<160x64xbf16> to vector<32x64xbf16>
    %cst_39 = arith.constant dense<0.000000e+00> : vector<32x64xf32>
    %83 = tpu.matmul %81, %82, %cst_39 {dimension_numbers = #tpu.dot_dimension_numbers<[1], [0], [0], [1], [0, 0, 1, 1], [], []>} : vector<32x32xbf16>, vector<32x64xbf16>, vector<32x64xf32> -> vector<32x64xf32>
    %84 = vector.extract_strided_slice %70 {offsets = [128, 0], sizes = [32, 32], strides = [1, 1]} : vector<160x32xbf16> to vector<32x32xbf16>
    %85 = vector.extract_strided_slice %71 {offsets = [128, 0], sizes = [32, 64], strides = [1, 1]} : vector<160x64xbf16> to vector<32x64xbf16>
    %cst_40 = arith.constant dense<0.000000e+00> : vector<32x64xf32>
    %86 = tpu.matmul %84, %85, %cst_40 {dimension_numbers = #tpu.dot_dimension_numbers<[1], [0], [0], [1], [0, 0, 1, 1], [], []>} : vector<32x32xbf16>, vector<32x64xbf16>, vector<32x64xf32> -> vector<32x64xf32>
    %87 = arith.addf %74, %77 : vector<32x64xf32>
    %88 = arith.addf %80, %83 : vector<32x64xf32>
    %89 = arith.addf %87, %88 : vector<32x64xf32>
    %90 = arith.addf %89, %86 : vector<32x64xf32>
    %c32 = arith.constant 32 : index
    %c0_41 = arith.constant 0 : index
    %91 = vector.load %arg5[%c32, %c0_41] : memref<192x256xf32, #tpu.memory_space<vmem>>, vector<1x64xf32>
    %92 = vector.broadcast %91 : vector<1x64xf32> to vector<32x64xf32>
    %93 = arith.addf %90, %92 : vector<32x64xf32>
    %cst_42 = arith.constant 0.000000e+00 : f32
    %94 = vector.broadcast %cst_42 : f32 to vector<32x64xf32>
    %95 = arith.cmpf oge, %93, %94 : vector<32x64xf32>
    %cst_43 = arith.constant 2.000000e-01 : f32
    %96 = vector.broadcast %cst_43 : f32 to vector<32x64xf32>
    %97 = arith.mulf %96, %93 : vector<32x64xf32>
    %98 = arith.select %95, %93, %97 : vector<32x64xi1>, vector<32x64xf32>
    %c784 = arith.constant 784 : index
    %c0_44 = arith.constant 0 : index
    %99 = vector.load %arg3[%c784, %c0_44] : memref<7200x128xbf16, #tpu.memory_space<vmem>>, vector<80x32xbf16>
    %100 = arith.truncf %98 : vector<32x64xf32> to vector<32x64xbf16>
    %cst_45 = arith.constant dense<0.000000e+00> : vector<80x64xf32>
    %101 = tpu.matmul %99, %100, %cst_45 {dimension_numbers = #tpu.dot_dimension_numbers<[1], [0], [0], [1], [0, 0, 1, 1], [], []>} : vector<80x32xbf16>, vector<32x64xbf16>, vector<80x64xf32> -> vector<80x64xf32>
    %102 = arith.truncf %101 : vector<80x64xf32> to vector<80x64xbf16>
    %c864 = arith.constant 864 : index
    %c0_46 = arith.constant 0 : index
    %103 = vector.load %arg3[%c864, %c0_46] : memref<7200x128xbf16, #tpu.memory_space<vmem>>, vector<320x128xbf16>
    %104 = vector.extract_strided_slice %102 {offsets = [0, 0], sizes = [16, 64], strides = [1, 1]} : vector<80x64xbf16> to vector<16x64xbf16>
    %105 = vector.extract_strided_slice %103 {offsets = [0, 0], sizes = [64, 128], strides = [1, 1]} : vector<320x128xbf16> to vector<64x128xbf16>
    %cst_47 = arith.constant dense<0.000000e+00> : vector<16x128xf32>
    %106 = tpu.matmul %104, %105, %cst_47 {dimension_numbers = #tpu.dot_dimension_numbers<[1], [0], [0], [1], [0, 0, 1, 1], [], []>} : vector<16x64xbf16>, vector<64x128xbf16>, vector<16x128xf32> -> vector<16x128xf32>
    %107 = vector.extract_strided_slice %102 {offsets = [16, 0], sizes = [16, 64], strides = [1, 1]} : vector<80x64xbf16> to vector<16x64xbf16>
    %108 = vector.extract_strided_slice %103 {offsets = [64, 0], sizes = [64, 128], strides = [1, 1]} : vector<320x128xbf16> to vector<64x128xbf16>
    %cst_48 = arith.constant dense<0.000000e+00> : vector<16x128xf32>
    %109 = tpu.matmul %107, %108, %cst_48 {dimension_numbers = #tpu.dot_dimension_numbers<[1], [0], [0], [1], [0, 0, 1, 1], [], []>} : vector<16x64xbf16>, vector<64x128xbf16>, vector<16x128xf32> -> vector<16x128xf32>
    %110 = vector.extract_strided_slice %102 {offsets = [32, 0], sizes = [16, 64], strides = [1, 1]} : vector<80x64xbf16> to vector<16x64xbf16>
    %111 = vector.extract_strided_slice %103 {offsets = [128, 0], sizes = [64, 128], strides = [1, 1]} : vector<320x128xbf16> to vector<64x128xbf16>
    %cst_49 = arith.constant dense<0.000000e+00> : vector<16x128xf32>
    %112 = tpu.matmul %110, %111, %cst_49 {dimension_numbers = #tpu.dot_dimension_numbers<[1], [0], [0], [1], [0, 0, 1, 1], [], []>} : vector<16x64xbf16>, vector<64x128xbf16>, vector<16x128xf32> -> vector<16x128xf32>
    %113 = vector.extract_strided_slice %102 {offsets = [48, 0], sizes = [16, 64], strides = [1, 1]} : vector<80x64xbf16> to vector<16x64xbf16>
    %114 = vector.extract_strided_slice %103 {offsets = [192, 0], sizes = [64, 128], strides = [1, 1]} : vector<320x128xbf16> to vector<64x128xbf16>
    %cst_50 = arith.constant dense<0.000000e+00> : vector<16x128xf32>
    %115 = tpu.matmul %113, %114, %cst_50 {dimension_numbers = #tpu.dot_dimension_numbers<[1], [0], [0], [1], [0, 0, 1, 1], [], []>} : vector<16x64xbf16>, vector<64x128xbf16>, vector<16x128xf32> -> vector<16x128xf32>
    %116 = vector.extract_strided_slice %102 {offsets = [64, 0], sizes = [16, 64], strides = [1, 1]} : vector<80x64xbf16> to vector<16x64xbf16>
    %117 = vector.extract_strided_slice %103 {offsets = [256, 0], sizes = [64, 128], strides = [1, 1]} : vector<320x128xbf16> to vector<64x128xbf16>
    %cst_51 = arith.constant dense<0.000000e+00> : vector<16x128xf32>
    %118 = tpu.matmul %116, %117, %cst_51 {dimension_numbers = #tpu.dot_dimension_numbers<[1], [0], [0], [1], [0, 0, 1, 1], [], []>} : vector<16x64xbf16>, vector<64x128xbf16>, vector<16x128xf32> -> vector<16x128xf32>
    %119 = arith.addf %106, %109 : vector<16x128xf32>
    %120 = arith.addf %112, %115 : vector<16x128xf32>
    %121 = arith.addf %119, %120 : vector<16x128xf32>
    %122 = arith.addf %121, %118 : vector<16x128xf32>
    %c40 = arith.constant 40 : index
    %c0_52 = arith.constant 0 : index
    %123 = vector.load %arg5[%c40, %c0_52] : memref<192x256xf32, #tpu.memory_space<vmem>>, vector<1x128xf32>
    %124 = vector.broadcast %123 : vector<1x128xf32> to vector<16x128xf32>
    %125 = arith.addf %122, %124 : vector<16x128xf32>
    %cst_53 = arith.constant 0.000000e+00 : f32
    %126 = vector.broadcast %cst_53 : f32 to vector<16x128xf32>
    %127 = arith.cmpf oge, %125, %126 : vector<16x128xf32>
    %cst_54 = arith.constant 2.000000e-01 : f32
    %128 = vector.broadcast %cst_54 : f32 to vector<16x128xf32>
    %129 = arith.mulf %128, %125 : vector<16x128xf32>
    %130 = arith.select %127, %125, %129 : vector<16x128xi1>, vector<16x128xf32>
    %c1184 = arith.constant 1184 : index
    %c0_55 = arith.constant 0 : index
    %131 = vector.load %arg3[%c1184, %c0_55] : memref<7200x128xbf16, #tpu.memory_space<vmem>>, vector<40x16xbf16>
    %132 = arith.truncf %130 : vector<16x128xf32> to vector<16x128xbf16>
    %cst_56 = arith.constant dense<0.000000e+00> : vector<40x128xf32>
    %133 = tpu.matmul %131, %132, %cst_56 {dimension_numbers = #tpu.dot_dimension_numbers<[1], [0], [0], [1], [0, 0, 1, 1], [], []>} : vector<40x16xbf16>, vector<16x128xbf16>, vector<40x128xf32> -> vector<40x128xf32>
    %134 = arith.truncf %133 : vector<40x128xf32> to vector<40x128xbf16>
    %c1232 = arith.constant 1232 : index
    %c0_57 = arith.constant 0 : index
    %135 = vector.load %arg3[%c1232, %c0_57] : memref<7200x128xbf16, #tpu.memory_space<vmem>>, vector<640x128xbf16>
    %136 = vector.extract_strided_slice %134 {offsets = [0, 0], sizes = [8, 128], strides = [1, 1]} : vector<40x128xbf16> to vector<8x128xbf16>
    %137 = vector.extract_strided_slice %135 {offsets = [0, 0], sizes = [128, 128], strides = [1, 1]} : vector<640x128xbf16> to vector<128x128xbf16>
    %cst_58 = arith.constant dense<0.000000e+00> : vector<8x128xf32>
    %138 = tpu.matmul %136, %137, %cst_58 {dimension_numbers = #tpu.dot_dimension_numbers<[1], [0], [0], [1], [0, 0, 1, 1], [], []>} : vector<8x128xbf16>, vector<128x128xbf16>, vector<8x128xf32> -> vector<8x128xf32>
    %139 = vector.extract_strided_slice %134 {offsets = [8, 0], sizes = [8, 128], strides = [1, 1]} : vector<40x128xbf16> to vector<8x128xbf16>
    %140 = vector.extract_strided_slice %135 {offsets = [128, 0], sizes = [128, 128], strides = [1, 1]} : vector<640x128xbf16> to vector<128x128xbf16>
    %cst_59 = arith.constant dense<0.000000e+00> : vector<8x128xf32>
    %141 = tpu.matmul %139, %140, %cst_59 {dimension_numbers = #tpu.dot_dimension_numbers<[1], [0], [0], [1], [0, 0, 1, 1], [], []>} : vector<8x128xbf16>, vector<128x128xbf16>, vector<8x128xf32> -> vector<8x128xf32>
    %142 = vector.extract_strided_slice %134 {offsets = [16, 0], sizes = [8, 128], strides = [1, 1]} : vector<40x128xbf16> to vector<8x128xbf16>
    %143 = vector.extract_strided_slice %135 {offsets = [256, 0], sizes = [128, 128], strides = [1, 1]} : vector<640x128xbf16> to vector<128x128xbf16>
    %cst_60 = arith.constant dense<0.000000e+00> : vector<8x128xf32>
    %144 = tpu.matmul %142, %143, %cst_60 {dimension_numbers = #tpu.dot_dimension_numbers<[1], [0], [0], [1], [0, 0, 1, 1], [], []>} : vector<8x128xbf16>, vector<128x128xbf16>, vector<8x128xf32> -> vector<8x128xf32>
    %145 = vector.extract_strided_slice %134 {offsets = [24, 0], sizes = [8, 128], strides = [1, 1]} : vector<40x128xbf16> to vector<8x128xbf16>
    %146 = vector.extract_strided_slice %135 {offsets = [384, 0], sizes = [128, 128], strides = [1, 1]} : vector<640x128xbf16> to vector<128x128xbf16>
    %cst_61 = arith.constant dense<0.000000e+00> : vector<8x128xf32>
    %147 = tpu.matmul %145, %146, %cst_61 {dimension_numbers = #tpu.dot_dimension_numbers<[1], [0], [0], [1], [0, 0, 1, 1], [], []>} : vector<8x128xbf16>, vector<128x128xbf16>, vector<8x128xf32> -> vector<8x128xf32>
    %148 = vector.extract_strided_slice %134 {offsets = [32, 0], sizes = [8, 128], strides = [1, 1]} : vector<40x128xbf16> to vector<8x128xbf16>
    %149 = vector.extract_strided_slice %135 {offsets = [512, 0], sizes = [128, 128], strides = [1, 1]} : vector<640x128xbf16> to vector<128x128xbf16>
    %cst_62 = arith.constant dense<0.000000e+00> : vector<8x128xf32>
    %150 = tpu.matmul %148, %149, %cst_62 {dimension_numbers = #tpu.dot_dimension_numbers<[1], [0], [0], [1], [0, 0, 1, 1], [], []>} : vector<8x128xbf16>, vector<128x128xbf16>, vector<8x128xf32> -> vector<8x128xf32>
    %151 = arith.addf %138, %141 : vector<8x128xf32>
    %152 = arith.addf %144, %147 : vector<8x128xf32>
    %153 = arith.addf %151, %152 : vector<8x128xf32>
    %154 = arith.addf %153, %150 : vector<8x128xf32>
    %c48_63 = arith.constant 48 : index
    %c0_64 = arith.constant 0 : index
    %155 = vector.load %arg5[%c48_63, %c0_64] : memref<192x256xf32, #tpu.memory_space<vmem>>, vector<1x128xf32>
    %156 = vector.broadcast %155 : vector<1x128xf32> to vector<8x128xf32>
    %157 = arith.addf %154, %156 : vector<8x128xf32>
    %cst_65 = arith.constant 0.000000e+00 : f32
    %158 = vector.broadcast %cst_65 : f32 to vector<8x128xf32>
    %159 = arith.cmpf oge, %157, %158 : vector<8x128xf32>
    %cst_66 = arith.constant 2.000000e-01 : f32
    %160 = vector.broadcast %cst_66 : f32 to vector<8x128xf32>
    %161 = arith.mulf %160, %157 : vector<8x128xf32>
    %162 = arith.select %159, %157, %161 : vector<8x128xi1>, vector<8x128xf32>
    %c1872 = arith.constant 1872 : index
    %c0_67 = arith.constant 0 : index
    %163 = vector.load %arg3[%c1872, %c0_67] : memref<7200x128xbf16, #tpu.memory_space<vmem>>, vector<64x8xbf16>
    %164 = arith.truncf %162 : vector<8x128xf32> to vector<8x128xbf16>
    %cst_68 = arith.constant dense<0.000000e+00> : vector<64x128xf32>
    %165 = tpu.matmul %163, %164, %cst_68 {dimension_numbers = #tpu.dot_dimension_numbers<[1], [0], [0], [1], [0, 0, 1, 1], [], []>} : vector<64x8xbf16>, vector<8x128xbf16>, vector<64x128xf32> -> vector<64x128xf32>
    %166 = arith.truncf %165 : vector<64x128xf32> to vector<64x128xbf16>
    %c0_69 = arith.constant 0 : index
    %c0_70 = arith.constant 0 : index
    %167 = vector.load %arg4[%c0_69, %c0_70] : memref<1280x256xbf16, #tpu.memory_space<vmem>>, vector<1024x256xbf16>
    %168 = vector.extract_strided_slice %166 {offsets = [0, 0], sizes = [8, 128], strides = [1, 1]} : vector<64x128xbf16> to vector<8x128xbf16>
    %169 = vector.extract_strided_slice %167 {offsets = [0, 0], sizes = [128, 256], strides = [1, 1]} : vector<1024x256xbf16> to vector<128x256xbf16>
    %cst_71 = arith.constant dense<0.000000e+00> : vector<8x256xf32>
    %170 = tpu.matmul %168, %169, %cst_71 {dimension_numbers = #tpu.dot_dimension_numbers<[1], [0], [0], [1], [0, 0, 1, 1], [], []>} : vector<8x128xbf16>, vector<128x256xbf16>, vector<8x256xf32> -> vector<8x256xf32>
    %171 = vector.extract_strided_slice %166 {offsets = [8, 0], sizes = [8, 128], strides = [1, 1]} : vector<64x128xbf16> to vector<8x128xbf16>
    %172 = vector.extract_strided_slice %167 {offsets = [128, 0], sizes = [128, 256], strides = [1, 1]} : vector<1024x256xbf16> to vector<128x256xbf16>
    %cst_72 = arith.constant dense<0.000000e+00> : vector<8x256xf32>
    %173 = tpu.matmul %171, %172, %cst_72 {dimension_numbers = #tpu.dot_dimension_numbers<[1], [0], [0], [1], [0, 0, 1, 1], [], []>} : vector<8x128xbf16>, vector<128x256xbf16>, vector<8x256xf32> -> vector<8x256xf32>
    %174 = vector.extract_strided_slice %166 {offsets = [16, 0], sizes = [8, 128], strides = [1, 1]} : vector<64x128xbf16> to vector<8x128xbf16>
    %175 = vector.extract_strided_slice %167 {offsets = [256, 0], sizes = [128, 256], strides = [1, 1]} : vector<1024x256xbf16> to vector<128x256xbf16>
    %cst_73 = arith.constant dense<0.000000e+00> : vector<8x256xf32>
    %176 = tpu.matmul %174, %175, %cst_73 {dimension_numbers = #tpu.dot_dimension_numbers<[1], [0], [0], [1], [0, 0, 1, 1], [], []>} : vector<8x128xbf16>, vector<128x256xbf16>, vector<8x256xf32> -> vector<8x256xf32>
    %177 = vector.extract_strided_slice %166 {offsets = [24, 0], sizes = [8, 128], strides = [1, 1]} : vector<64x128xbf16> to vector<8x128xbf16>
    %178 = vector.extract_strided_slice %167 {offsets = [384, 0], sizes = [128, 256], strides = [1, 1]} : vector<1024x256xbf16> to vector<128x256xbf16>
    %cst_74 = arith.constant dense<0.000000e+00> : vector<8x256xf32>
    %179 = tpu.matmul %177, %178, %cst_74 {dimension_numbers = #tpu.dot_dimension_numbers<[1], [0], [0], [1], [0, 0, 1, 1], [], []>} : vector<8x128xbf16>, vector<128x256xbf16>, vector<8x256xf32> -> vector<8x256xf32>
    %180 = vector.extract_strided_slice %166 {offsets = [32, 0], sizes = [8, 128], strides = [1, 1]} : vector<64x128xbf16> to vector<8x128xbf16>
    %181 = vector.extract_strided_slice %167 {offsets = [512, 0], sizes = [128, 256], strides = [1, 1]} : vector<1024x256xbf16> to vector<128x256xbf16>
    %cst_75 = arith.constant dense<0.000000e+00> : vector<8x256xf32>
    %182 = tpu.matmul %180, %181, %cst_75 {dimension_numbers = #tpu.dot_dimension_numbers<[1], [0], [0], [1], [0, 0, 1, 1], [], []>} : vector<8x128xbf16>, vector<128x256xbf16>, vector<8x256xf32> -> vector<8x256xf32>
    %183 = vector.extract_strided_slice %166 {offsets = [40, 0], sizes = [8, 128], strides = [1, 1]} : vector<64x128xbf16> to vector<8x128xbf16>
    %184 = vector.extract_strided_slice %167 {offsets = [640, 0], sizes = [128, 256], strides = [1, 1]} : vector<1024x256xbf16> to vector<128x256xbf16>
    %cst_76 = arith.constant dense<0.000000e+00> : vector<8x256xf32>
    %185 = tpu.matmul %183, %184, %cst_76 {dimension_numbers = #tpu.dot_dimension_numbers<[1], [0], [0], [1], [0, 0, 1, 1], [], []>} : vector<8x128xbf16>, vector<128x256xbf16>, vector<8x256xf32> -> vector<8x256xf32>
    %186 = vector.extract_strided_slice %166 {offsets = [48, 0], sizes = [8, 128], strides = [1, 1]} : vector<64x128xbf16> to vector<8x128xbf16>
    %187 = vector.extract_strided_slice %167 {offsets = [768, 0], sizes = [128, 256], strides = [1, 1]} : vector<1024x256xbf16> to vector<128x256xbf16>
    %cst_77 = arith.constant dense<0.000000e+00> : vector<8x256xf32>
    %188 = tpu.matmul %186, %187, %cst_77 {dimension_numbers = #tpu.dot_dimension_numbers<[1], [0], [0], [1], [0, 0, 1, 1], [], []>} : vector<8x128xbf16>, vector<128x256xbf16>, vector<8x256xf32> -> vector<8x256xf32>
    %189 = vector.extract_strided_slice %166 {offsets = [56, 0], sizes = [8, 128], strides = [1, 1]} : vector<64x128xbf16> to vector<8x128xbf16>
    %190 = vector.extract_strided_slice %167 {offsets = [896, 0], sizes = [128, 256], strides = [1, 1]} : vector<1024x256xbf16> to vector<128x256xbf16>
    %cst_78 = arith.constant dense<0.000000e+00> : vector<8x256xf32>
    %191 = tpu.matmul %189, %190, %cst_78 {dimension_numbers = #tpu.dot_dimension_numbers<[1], [0], [0], [1], [0, 0, 1, 1], [], []>} : vector<8x128xbf16>, vector<128x256xbf16>, vector<8x256xf32> -> vector<8x256xf32>
    %192 = arith.addf %170, %173 : vector<8x256xf32>
    %193 = arith.addf %176, %179 : vector<8x256xf32>
    %194 = arith.addf %182, %185 : vector<8x256xf32>
    %195 = arith.addf %188, %191 : vector<8x256xf32>
    %196 = arith.addf %192, %193 : vector<8x256xf32>
    %197 = arith.addf %194, %195 : vector<8x256xf32>
    %198 = arith.addf %196, %197 : vector<8x256xf32>
    %c56 = arith.constant 56 : index
    %c0_79 = arith.constant 0 : index
    %199 = vector.load %arg5[%c56, %c0_79] : memref<192x256xf32, #tpu.memory_space<vmem>>, vector<1x256xf32>
    %200 = vector.broadcast %199 : vector<1x256xf32> to vector<8x256xf32>
    %201 = arith.addf %198, %200 : vector<8x256xf32>
    %cst_80 = arith.constant 0.000000e+00 : f32
    %202 = vector.broadcast %cst_80 : f32 to vector<8x256xf32>
    %203 = arith.cmpf oge, %201, %202 : vector<8x256xf32>
    %cst_81 = arith.constant 2.000000e-01 : f32
    %204 = vector.broadcast %cst_81 : f32 to vector<8x256xf32>
    %205 = arith.mulf %204, %201 : vector<8x256xf32>
    %206 = arith.select %203, %201, %205 : vector<8x256xi1>, vector<8x256xf32>
    %207 = vector.extract_strided_slice %206 {offsets = [0, 0], sizes = [1, 256], strides = [1, 1]} : vector<8x256xf32> to vector<1x256xf32>
    %208 = arith.truncf %207 : vector<1x256xf32> to vector<1x256xbf16>
    %c1936 = arith.constant 1936 : index
    %c0_82 = arith.constant 0 : index
    %209 = vector.load %arg3[%c1936, %c0_82] : memref<7200x128xbf16, #tpu.memory_space<vmem>>, vector<256x8xbf16>
    %cst_83 = arith.constant dense<0.000000e+00> : vector<1x8xf32>
    %210 = tpu.matmul %208, %209, %cst_83 {dimension_numbers = #tpu.dot_dimension_numbers<[1], [0], [0], [1], [0, 0, 1, 1], [], []>} : vector<1x256xbf16>, vector<256x8xbf16>, vector<1x8xf32> -> vector<1x8xf32>
    %c64_84 = arith.constant 64 : index
    %c0_85 = arith.constant 0 : index
    %211 = vector.load %arg5[%c64_84, %c0_85] : memref<192x256xf32, #tpu.memory_space<vmem>>, vector<1x8xf32>
    %212 = arith.addf %210, %211 : vector<1x8xf32>
    %cst_86 = arith.constant 0.000000e+00 : f32
    %213 = vector.broadcast %cst_86 : f32 to vector<1x8xf32>
    %214 = arith.cmpf oge, %212, %213 : vector<1x8xf32>
    %cst_87 = arith.constant 2.000000e-01 : f32
    %215 = vector.broadcast %cst_87 : f32 to vector<1x8xf32>
    %216 = arith.mulf %215, %212 : vector<1x8xf32>
    %217 = arith.select %214, %212, %216 : vector<1x8xi1>, vector<1x8xf32>
    %218 = arith.truncf %217 : vector<1x8xf32> to vector<1x8xbf16>
    %c2192 = arith.constant 2192 : index
    %c0_88 = arith.constant 0 : index
    %219 = vector.load %arg3[%c2192, %c0_88] : memref<7200x128xbf16, #tpu.memory_space<vmem>>, vector<8x32xbf16>
    %cst_89 = arith.constant dense<0.000000e+00> : vector<1x32xf32>
    %220 = tpu.matmul %218, %219, %cst_89 {dimension_numbers = #tpu.dot_dimension_numbers<[1], [0], [0], [1], [0, 0, 1, 1], [], []>} : vector<1x8xbf16>, vector<8x32xbf16>, vector<1x32xf32> -> vector<1x32xf32>
    %c72 = arith.constant 72 : index
    %c0_90 = arith.constant 0 : index
    %221 = vector.load %arg5[%c72, %c0_90] : memref<192x256xf32, #tpu.memory_space<vmem>>, vector<1x32xf32>
    %222 = arith.addf %220, %221 : vector<1x32xf32>
    %cst_91 = arith.constant 0.000000e+00 : f32
    %223 = vector.broadcast %cst_91 : f32 to vector<1x32xf32>
    %224 = arith.cmpf oge, %222, %223 : vector<1x32xf32>
    %cst_92 = arith.constant 2.000000e-01 : f32
    %225 = vector.broadcast %cst_92 : f32 to vector<1x32xf32>
    %226 = arith.mulf %225, %222 : vector<1x32xf32>
    %227 = arith.select %224, %222, %226 : vector<1x32xi1>, vector<1x32xf32>
    %228 = arith.truncf %21 : vector<1x32xf32> to vector<1x32xbf16>
    %c2208 = arith.constant 2208 : index
    %c0_93 = arith.constant 0 : index
    %229 = vector.load %arg3[%c2208, %c0_93] : memref<7200x128xbf16, #tpu.memory_space<vmem>>, vector<32x64xbf16>
    %cst_94 = arith.constant dense<0.000000e+00> : vector<1x64xf32>
    %230 = tpu.matmul %228, %229, %cst_94 {dimension_numbers = #tpu.dot_dimension_numbers<[1], [0], [0], [1], [0, 0, 1, 1], [], []>} : vector<1x32xbf16>, vector<32x64xbf16>, vector<1x64xf32> -> vector<1x64xf32>
    %231 = arith.truncf %227 : vector<1x32xf32> to vector<1x32xbf16>
    %c2240 = arith.constant 2240 : index
    %c0_95 = arith.constant 0 : index
    %232 = vector.load %arg3[%c2240, %c0_95] : memref<7200x128xbf16, #tpu.memory_space<vmem>>, vector<32x64xbf16>
    %cst_96 = arith.constant dense<0.000000e+00> : vector<1x64xf32>
    %233 = tpu.matmul %231, %232, %cst_96 {dimension_numbers = #tpu.dot_dimension_numbers<[1], [0], [0], [1], [0, 0, 1, 1], [], []>} : vector<1x32xbf16>, vector<32x64xbf16>, vector<1x64xf32> -> vector<1x64xf32>
    %234 = arith.addf %230, %233 : vector<1x64xf32>
    %c80 = arith.constant 80 : index
    %c0_97 = arith.constant 0 : index
    %235 = vector.load %arg5[%c80, %c0_97] : memref<192x256xf32, #tpu.memory_space<vmem>>, vector<1x64xf32>
    %236 = arith.addf %234, %235 : vector<1x64xf32>
    %cst_98 = arith.constant 0.000000e+00 : f32
    %237 = vector.broadcast %cst_98 : f32 to vector<1x64xf32>
    %238 = arith.cmpf oge, %236, %237 : vector<1x64xf32>
    %cst_99 = arith.constant 2.000000e-01 : f32
    %239 = vector.broadcast %cst_99 : f32 to vector<1x64xf32>
    %240 = arith.mulf %239, %236 : vector<1x64xf32>
    %241 = arith.select %238, %236, %240 : vector<1x64xi1>, vector<1x64xf32>
    %242 = arith.truncf %241 : vector<1x64xf32> to vector<1x64xbf16>
    %c2272 = arith.constant 2272 : index
    %c0_100 = arith.constant 0 : index
    %243 = vector.load %arg3[%c2272, %c0_100] : memref<7200x128xbf16, #tpu.memory_space<vmem>>, vector<64x64xbf16>
    %cst_101 = arith.constant dense<0.000000e+00> : vector<1x64xf32>
    %244 = tpu.matmul %242, %243, %cst_101 {dimension_numbers = #tpu.dot_dimension_numbers<[1], [0], [0], [1], [0, 0, 1, 1], [], []>} : vector<1x64xbf16>, vector<64x64xbf16>, vector<1x64xf32> -> vector<1x64xf32>
    %c88 = arith.constant 88 : index
    %c0_102 = arith.constant 0 : index
    %245 = vector.load %arg5[%c88, %c0_102] : memref<192x256xf32, #tpu.memory_space<vmem>>, vector<1x64xf32>
    %246 = arith.addf %244, %245 : vector<1x64xf32>
    %cst_103 = arith.constant 0.000000e+00 : f32
    %247 = vector.broadcast %cst_103 : f32 to vector<1x64xf32>
    %248 = arith.cmpf oge, %246, %247 : vector<1x64xf32>
    %cst_104 = arith.constant 2.000000e-01 : f32
    %249 = vector.broadcast %cst_104 : f32 to vector<1x64xf32>
    %250 = arith.mulf %249, %246 : vector<1x64xf32>
    %251 = arith.select %248, %246, %250 : vector<1x64xi1>, vector<1x64xf32>
    %c2336 = arith.constant 2336 : index
    %c0_105 = arith.constant 0 : index
    %252 = vector.load %arg3[%c2336, %c0_105] : memref<7200x128xbf16, #tpu.memory_space<vmem>>, vector<4x1xbf16>
    %253 = arith.truncf %251 : vector<1x64xf32> to vector<1x64xbf16>
    %cst_106 = arith.constant dense<0.000000e+00> : vector<4x64xf32>
    %254 = tpu.matmul %252, %253, %cst_106 {dimension_numbers = #tpu.dot_dimension_numbers<[1], [0], [0], [1], [0, 0, 1, 1], [], []>} : vector<4x1xbf16>, vector<1x64xbf16>, vector<4x64xf32> -> vector<4x64xf32>
    %255 = arith.truncf %254 : vector<4x64xf32> to vector<4x64xbf16>
    %c2352 = arith.constant 2352 : index
    %c0_107 = arith.constant 0 : index
    %256 = vector.load %arg3[%c2352, %c0_107] : memref<7200x128xbf16, #tpu.memory_space<vmem>>, vector<64x32xbf16>
    %cst_108 = arith.constant dense<0.000000e+00> : vector<4x32xf32>
    %257 = tpu.matmul %255, %256, %cst_108 {dimension_numbers = #tpu.dot_dimension_numbers<[1], [0], [0], [1], [0, 0, 1, 1], [], []>} : vector<4x64xbf16>, vector<64x32xbf16>, vector<4x32xf32> -> vector<4x32xf32>
    %c96 = arith.constant 96 : index
    %c0_109 = arith.constant 0 : index
    %258 = vector.load %arg5[%c96, %c0_109] : memref<192x256xf32, #tpu.memory_space<vmem>>, vector<1x32xf32>
    %259 = vector.broadcast %258 : vector<1x32xf32> to vector<4x32xf32>
    %260 = arith.addf %257, %259 : vector<4x32xf32>
    %cst_110 = arith.constant 0.000000e+00 : f32
    %261 = vector.broadcast %cst_110 : f32 to vector<4x32xf32>
    %262 = arith.cmpf oge, %260, %261 : vector<4x32xf32>
    %cst_111 = arith.constant 2.000000e-01 : f32
    %263 = vector.broadcast %cst_111 : f32 to vector<4x32xf32>
    %264 = arith.mulf %263, %260 : vector<4x32xf32>
    %265 = arith.select %262, %260, %264 : vector<4x32xi1>, vector<4x32xf32>
    %c2416 = arith.constant 2416 : index
    %c0_112 = arith.constant 0 : index
    %266 = vector.load %arg3[%c2416, %c0_112] : memref<7200x128xbf16, #tpu.memory_space<vmem>>, vector<4x4xbf16>
    %267 = arith.truncf %265 : vector<4x32xf32> to vector<4x32xbf16>
    %cst_113 = arith.constant dense<0.000000e+00> : vector<4x32xf32>
    %268 = tpu.matmul %266, %267, %cst_113 {dimension_numbers = #tpu.dot_dimension_numbers<[1], [0], [0], [1], [0, 0, 1, 1], [], []>} : vector<4x4xbf16>, vector<4x32xbf16>, vector<4x32xf32> -> vector<4x32xf32>
    %269 = arith.truncf %268 : vector<4x32xf32> to vector<4x32xbf16>
    %c2432 = arith.constant 2432 : index
    %c0_114 = arith.constant 0 : index
    %270 = vector.load %arg3[%c2432, %c0_114] : memref<7200x128xbf16, #tpu.memory_space<vmem>>, vector<32x32xbf16>
    %cst_115 = arith.constant dense<0.000000e+00> : vector<4x32xf32>
    %271 = tpu.matmul %269, %270, %cst_115 {dimension_numbers = #tpu.dot_dimension_numbers<[1], [0], [0], [1], [0, 0, 1, 1], [], []>} : vector<4x32xbf16>, vector<32x32xbf16>, vector<4x32xf32> -> vector<4x32xf32>
    %c2464 = arith.constant 2464 : index
    %c0_116 = arith.constant 0 : index
    %272 = vector.load %arg3[%c2464, %c0_116] : memref<7200x128xbf16, #tpu.memory_space<vmem>>, vector<64x32xbf16>
    %cst_117 = arith.constant dense<0.000000e+00> : vector<4x32xf32>
    %273 = tpu.matmul %255, %272, %cst_117 {dimension_numbers = #tpu.dot_dimension_numbers<[1], [0], [0], [1], [0, 0, 1, 1], [], []>} : vector<4x64xbf16>, vector<64x32xbf16>, vector<4x32xf32> -> vector<4x32xf32>
    %c104 = arith.constant 104 : index
    %c0_118 = arith.constant 0 : index
    %274 = vector.load %arg5[%c104, %c0_118] : memref<192x256xf32, #tpu.memory_space<vmem>>, vector<1x32xf32>
    %275 = vector.broadcast %274 : vector<1x32xf32> to vector<4x32xf32>
    %276 = arith.addf %271, %275 : vector<4x32xf32>
    %277 = arith.addf %276, %273 : vector<4x32xf32>
    %c112 = arith.constant 112 : index
    %c0_119 = arith.constant 0 : index
    %278 = vector.load %arg5[%c112, %c0_119] : memref<192x256xf32, #tpu.memory_space<vmem>>, vector<1x32xf32>
    %279 = vector.broadcast %278 : vector<1x32xf32> to vector<4x32xf32>
    %280 = arith.addf %277, %279 : vector<4x32xf32>
    %cst_120 = arith.constant 0.000000e+00 : f32
    %281 = vector.broadcast %cst_120 : f32 to vector<4x32xf32>
    %282 = arith.cmpf oge, %280, %281 : vector<4x32xf32>
    %cst_121 = arith.constant 2.000000e-01 : f32
    %283 = vector.broadcast %cst_121 : f32 to vector<4x32xf32>
    %284 = arith.mulf %283, %280 : vector<4x32xf32>
    %285 = arith.select %282, %280, %284 : vector<4x32xi1>, vector<4x32xf32>
    %c2528 = arith.constant 2528 : index
    %c0_122 = arith.constant 0 : index
    %286 = vector.load %arg3[%c2528, %c0_122] : memref<7200x128xbf16, #tpu.memory_space<vmem>>, vector<144x4xbf16>
    %287 = arith.truncf %285 : vector<4x32xf32> to vector<4x32xbf16>
    %cst_123 = arith.constant dense<0.000000e+00> : vector<144x32xf32>
    %288 = tpu.matmul %286, %287, %cst_123 {dimension_numbers = #tpu.dot_dimension_numbers<[1], [0], [0], [1], [0, 0, 1, 1], [], []>} : vector<144x4xbf16>, vector<4x32xbf16>, vector<144x32xf32> -> vector<144x32xf32>
    %289 = arith.truncf %288 : vector<144x32xf32> to vector<144x32xbf16>
    %290 = vector.extract_strided_slice %289 {offsets = [64, 0], sizes = [16, 32], strides = [1, 1]} : vector<144x32xbf16> to vector<16x32xbf16>
    %c2672 = arith.constant 2672 : index
    %c0_124 = arith.constant 0 : index
    %291 = vector.load %arg3[%c2672, %c0_124] : memref<7200x128xbf16, #tpu.memory_space<vmem>>, vector<288x16xbf16>
    %292 = vector.extract_strided_slice %289 {offsets = [0, 0], sizes = [16, 32], strides = [1, 1]} : vector<144x32xbf16> to vector<16x32xbf16>
    %293 = vector.extract_strided_slice %291 {offsets = [0, 0], sizes = [32, 16], strides = [1, 1]} : vector<288x16xbf16> to vector<32x16xbf16>
    %cst_125 = arith.constant dense<0.000000e+00> : vector<16x16xf32>
    %294 = tpu.matmul %292, %293, %cst_125 {dimension_numbers = #tpu.dot_dimension_numbers<[1], [0], [0], [1], [0, 0, 1, 1], [], []>} : vector<16x32xbf16>, vector<32x16xbf16>, vector<16x16xf32> -> vector<16x16xf32>
    %295 = vector.extract_strided_slice %289 {offsets = [16, 0], sizes = [16, 32], strides = [1, 1]} : vector<144x32xbf16> to vector<16x32xbf16>
    %296 = vector.extract_strided_slice %291 {offsets = [32, 0], sizes = [32, 16], strides = [1, 1]} : vector<288x16xbf16> to vector<32x16xbf16>
    %cst_126 = arith.constant dense<0.000000e+00> : vector<16x16xf32>
    %297 = tpu.matmul %295, %296, %cst_126 {dimension_numbers = #tpu.dot_dimension_numbers<[1], [0], [0], [1], [0, 0, 1, 1], [], []>} : vector<16x32xbf16>, vector<32x16xbf16>, vector<16x16xf32> -> vector<16x16xf32>
    %298 = vector.extract_strided_slice %289 {offsets = [32, 0], sizes = [16, 32], strides = [1, 1]} : vector<144x32xbf16> to vector<16x32xbf16>
    %299 = vector.extract_strided_slice %291 {offsets = [64, 0], sizes = [32, 16], strides = [1, 1]} : vector<288x16xbf16> to vector<32x16xbf16>
    %cst_127 = arith.constant dense<0.000000e+00> : vector<16x16xf32>
    %300 = tpu.matmul %298, %299, %cst_127 {dimension_numbers = #tpu.dot_dimension_numbers<[1], [0], [0], [1], [0, 0, 1, 1], [], []>} : vector<16x32xbf16>, vector<32x16xbf16>, vector<16x16xf32> -> vector<16x16xf32>
    %301 = vector.extract_strided_slice %289 {offsets = [48, 0], sizes = [16, 32], strides = [1, 1]} : vector<144x32xbf16> to vector<16x32xbf16>
    %302 = vector.extract_strided_slice %291 {offsets = [96, 0], sizes = [32, 16], strides = [1, 1]} : vector<288x16xbf16> to vector<32x16xbf16>
    %cst_128 = arith.constant dense<0.000000e+00> : vector<16x16xf32>
    %303 = tpu.matmul %301, %302, %cst_128 {dimension_numbers = #tpu.dot_dimension_numbers<[1], [0], [0], [1], [0, 0, 1, 1], [], []>} : vector<16x32xbf16>, vector<32x16xbf16>, vector<16x16xf32> -> vector<16x16xf32>
    %304 = vector.extract_strided_slice %289 {offsets = [64, 0], sizes = [16, 32], strides = [1, 1]} : vector<144x32xbf16> to vector<16x32xbf16>
    %305 = vector.extract_strided_slice %291 {offsets = [128, 0], sizes = [32, 16], strides = [1, 1]} : vector<288x16xbf16> to vector<32x16xbf16>
    %cst_129 = arith.constant dense<0.000000e+00> : vector<16x16xf32>
    %306 = tpu.matmul %304, %305, %cst_129 {dimension_numbers = #tpu.dot_dimension_numbers<[1], [0], [0], [1], [0, 0, 1, 1], [], []>} : vector<16x32xbf16>, vector<32x16xbf16>, vector<16x16xf32> -> vector<16x16xf32>
    %307 = vector.extract_strided_slice %289 {offsets = [80, 0], sizes = [16, 32], strides = [1, 1]} : vector<144x32xbf16> to vector<16x32xbf16>
    %308 = vector.extract_strided_slice %291 {offsets = [160, 0], sizes = [32, 16], strides = [1, 1]} : vector<288x16xbf16> to vector<32x16xbf16>
    %cst_130 = arith.constant dense<0.000000e+00> : vector<16x16xf32>
    %309 = tpu.matmul %307, %308, %cst_130 {dimension_numbers = #tpu.dot_dimension_numbers<[1], [0], [0], [1], [0, 0, 1, 1], [], []>} : vector<16x32xbf16>, vector<32x16xbf16>, vector<16x16xf32> -> vector<16x16xf32>
    %310 = vector.extract_strided_slice %289 {offsets = [96, 0], sizes = [16, 32], strides = [1, 1]} : vector<144x32xbf16> to vector<16x32xbf16>
    %311 = vector.extract_strided_slice %291 {offsets = [192, 0], sizes = [32, 16], strides = [1, 1]} : vector<288x16xbf16> to vector<32x16xbf16>
    %cst_131 = arith.constant dense<0.000000e+00> : vector<16x16xf32>
    %312 = tpu.matmul %310, %311, %cst_131 {dimension_numbers = #tpu.dot_dimension_numbers<[1], [0], [0], [1], [0, 0, 1, 1], [], []>} : vector<16x32xbf16>, vector<32x16xbf16>, vector<16x16xf32> -> vector<16x16xf32>
    %313 = vector.extract_strided_slice %289 {offsets = [112, 0], sizes = [16, 32], strides = [1, 1]} : vector<144x32xbf16> to vector<16x32xbf16>
    %314 = vector.extract_strided_slice %291 {offsets = [224, 0], sizes = [32, 16], strides = [1, 1]} : vector<288x16xbf16> to vector<32x16xbf16>
    %cst_132 = arith.constant dense<0.000000e+00> : vector<16x16xf32>
    %315 = tpu.matmul %313, %314, %cst_132 {dimension_numbers = #tpu.dot_dimension_numbers<[1], [0], [0], [1], [0, 0, 1, 1], [], []>} : vector<16x32xbf16>, vector<32x16xbf16>, vector<16x16xf32> -> vector<16x16xf32>
    %316 = vector.extract_strided_slice %289 {offsets = [128, 0], sizes = [16, 32], strides = [1, 1]} : vector<144x32xbf16> to vector<16x32xbf16>
    %317 = vector.extract_strided_slice %291 {offsets = [256, 0], sizes = [32, 16], strides = [1, 1]} : vector<288x16xbf16> to vector<32x16xbf16>
    %cst_133 = arith.constant dense<0.000000e+00> : vector<16x16xf32>
    %318 = tpu.matmul %316, %317, %cst_133 {dimension_numbers = #tpu.dot_dimension_numbers<[1], [0], [0], [1], [0, 0, 1, 1], [], []>} : vector<16x32xbf16>, vector<32x16xbf16>, vector<16x16xf32> -> vector<16x16xf32>
    %319 = arith.addf %294, %297 : vector<16x16xf32>
    %320 = arith.addf %300, %303 : vector<16x16xf32>
    %321 = arith.addf %306, %309 : vector<16x16xf32>
    %322 = arith.addf %312, %315 : vector<16x16xf32>
    %323 = arith.addf %319, %320 : vector<16x16xf32>
    %324 = arith.addf %321, %322 : vector<16x16xf32>
    %325 = arith.addf %323, %324 : vector<16x16xf32>
    %326 = arith.addf %325, %318 : vector<16x16xf32>
    %c120 = arith.constant 120 : index
    %c0_134 = arith.constant 0 : index
    %327 = vector.load %arg5[%c120, %c0_134] : memref<192x256xf32, #tpu.memory_space<vmem>>, vector<1x16xf32>
    %328 = vector.broadcast %327 : vector<1x16xf32> to vector<16x16xf32>
    %329 = arith.addf %326, %328 : vector<16x16xf32>
    %cst_135 = arith.constant 0.000000e+00 : f32
    %330 = vector.broadcast %cst_135 : f32 to vector<16x16xf32>
    %331 = arith.cmpf oge, %329, %330 : vector<16x16xf32>
    %cst_136 = arith.constant 2.000000e-01 : f32
    %332 = vector.broadcast %cst_136 : f32 to vector<16x16xf32>
    %333 = arith.mulf %332, %329 : vector<16x16xf32>
    %334 = arith.select %331, %329, %333 : vector<16x16xi1>, vector<16x16xf32>
    %c2960 = arith.constant 2960 : index
    %c0_137 = arith.constant 0 : index
    %335 = vector.load %arg3[%c2960, %c0_137] : memref<7200x128xbf16, #tpu.memory_space<vmem>>, vector<144x16xbf16>
    %336 = arith.truncf %334 : vector<16x16xf32> to vector<16x16xbf16>
    %cst_138 = arith.constant dense<0.000000e+00> : vector<144x16xf32>
    %337 = tpu.matmul %335, %336, %cst_138 {dimension_numbers = #tpu.dot_dimension_numbers<[1], [0], [0], [1], [0, 0, 1, 1], [], []>} : vector<144x16xbf16>, vector<16x16xbf16>, vector<144x16xf32> -> vector<144x16xf32>
    %338 = arith.truncf %337 : vector<144x16xf32> to vector<144x16xbf16>
    %c3104 = arith.constant 3104 : index
    %c0_139 = arith.constant 0 : index
    %339 = vector.load %arg3[%c3104, %c0_139] : memref<7200x128xbf16, #tpu.memory_space<vmem>>, vector<144x16xbf16>
    %340 = vector.extract_strided_slice %338 {offsets = [0, 0], sizes = [16, 16], strides = [1, 1]} : vector<144x16xbf16> to vector<16x16xbf16>
    %341 = vector.extract_strided_slice %339 {offsets = [0, 0], sizes = [16, 16], strides = [1, 1]} : vector<144x16xbf16> to vector<16x16xbf16>
    %cst_140 = arith.constant dense<0.000000e+00> : vector<16x16xf32>
    %342 = tpu.matmul %340, %341, %cst_140 {dimension_numbers = #tpu.dot_dimension_numbers<[1], [0], [0], [1], [0, 0, 1, 1], [], []>} : vector<16x16xbf16>, vector<16x16xbf16>, vector<16x16xf32> -> vector<16x16xf32>
    %343 = vector.extract_strided_slice %338 {offsets = [16, 0], sizes = [16, 16], strides = [1, 1]} : vector<144x16xbf16> to vector<16x16xbf16>
    %344 = vector.extract_strided_slice %339 {offsets = [16, 0], sizes = [16, 16], strides = [1, 1]} : vector<144x16xbf16> to vector<16x16xbf16>
    %cst_141 = arith.constant dense<0.000000e+00> : vector<16x16xf32>
    %345 = tpu.matmul %343, %344, %cst_141 {dimension_numbers = #tpu.dot_dimension_numbers<[1], [0], [0], [1], [0, 0, 1, 1], [], []>} : vector<16x16xbf16>, vector<16x16xbf16>, vector<16x16xf32> -> vector<16x16xf32>
    %346 = vector.extract_strided_slice %338 {offsets = [32, 0], sizes = [16, 16], strides = [1, 1]} : vector<144x16xbf16> to vector<16x16xbf16>
    %347 = vector.extract_strided_slice %339 {offsets = [32, 0], sizes = [16, 16], strides = [1, 1]} : vector<144x16xbf16> to vector<16x16xbf16>
    %cst_142 = arith.constant dense<0.000000e+00> : vector<16x16xf32>
    %348 = tpu.matmul %346, %347, %cst_142 {dimension_numbers = #tpu.dot_dimension_numbers<[1], [0], [0], [1], [0, 0, 1, 1], [], []>} : vector<16x16xbf16>, vector<16x16xbf16>, vector<16x16xf32> -> vector<16x16xf32>
    %349 = vector.extract_strided_slice %338 {offsets = [48, 0], sizes = [16, 16], strides = [1, 1]} : vector<144x16xbf16> to vector<16x16xbf16>
    %350 = vector.extract_strided_slice %339 {offsets = [48, 0], sizes = [16, 16], strides = [1, 1]} : vector<144x16xbf16> to vector<16x16xbf16>
    %cst_143 = arith.constant dense<0.000000e+00> : vector<16x16xf32>
    %351 = tpu.matmul %349, %350, %cst_143 {dimension_numbers = #tpu.dot_dimension_numbers<[1], [0], [0], [1], [0, 0, 1, 1], [], []>} : vector<16x16xbf16>, vector<16x16xbf16>, vector<16x16xf32> -> vector<16x16xf32>
    %352 = vector.extract_strided_slice %338 {offsets = [64, 0], sizes = [16, 16], strides = [1, 1]} : vector<144x16xbf16> to vector<16x16xbf16>
    %353 = vector.extract_strided_slice %339 {offsets = [64, 0], sizes = [16, 16], strides = [1, 1]} : vector<144x16xbf16> to vector<16x16xbf16>
    %cst_144 = arith.constant dense<0.000000e+00> : vector<16x16xf32>
    %354 = tpu.matmul %352, %353, %cst_144 {dimension_numbers = #tpu.dot_dimension_numbers<[1], [0], [0], [1], [0, 0, 1, 1], [], []>} : vector<16x16xbf16>, vector<16x16xbf16>, vector<16x16xf32> -> vector<16x16xf32>
    %355 = vector.extract_strided_slice %338 {offsets = [80, 0], sizes = [16, 16], strides = [1, 1]} : vector<144x16xbf16> to vector<16x16xbf16>
    %356 = vector.extract_strided_slice %339 {offsets = [80, 0], sizes = [16, 16], strides = [1, 1]} : vector<144x16xbf16> to vector<16x16xbf16>
    %cst_145 = arith.constant dense<0.000000e+00> : vector<16x16xf32>
    %357 = tpu.matmul %355, %356, %cst_145 {dimension_numbers = #tpu.dot_dimension_numbers<[1], [0], [0], [1], [0, 0, 1, 1], [], []>} : vector<16x16xbf16>, vector<16x16xbf16>, vector<16x16xf32> -> vector<16x16xf32>
    %358 = vector.extract_strided_slice %338 {offsets = [96, 0], sizes = [16, 16], strides = [1, 1]} : vector<144x16xbf16> to vector<16x16xbf16>
    %359 = vector.extract_strided_slice %339 {offsets = [96, 0], sizes = [16, 16], strides = [1, 1]} : vector<144x16xbf16> to vector<16x16xbf16>
    %cst_146 = arith.constant dense<0.000000e+00> : vector<16x16xf32>
    %360 = tpu.matmul %358, %359, %cst_146 {dimension_numbers = #tpu.dot_dimension_numbers<[1], [0], [0], [1], [0, 0, 1, 1], [], []>} : vector<16x16xbf16>, vector<16x16xbf16>, vector<16x16xf32> -> vector<16x16xf32>
    %361 = vector.extract_strided_slice %338 {offsets = [112, 0], sizes = [16, 16], strides = [1, 1]} : vector<144x16xbf16> to vector<16x16xbf16>
    %362 = vector.extract_strided_slice %339 {offsets = [112, 0], sizes = [16, 16], strides = [1, 1]} : vector<144x16xbf16> to vector<16x16xbf16>
    %cst_147 = arith.constant dense<0.000000e+00> : vector<16x16xf32>
    %363 = tpu.matmul %361, %362, %cst_147 {dimension_numbers = #tpu.dot_dimension_numbers<[1], [0], [0], [1], [0, 0, 1, 1], [], []>} : vector<16x16xbf16>, vector<16x16xbf16>, vector<16x16xf32> -> vector<16x16xf32>
    %364 = vector.extract_strided_slice %338 {offsets = [128, 0], sizes = [16, 16], strides = [1, 1]} : vector<144x16xbf16> to vector<16x16xbf16>
    %365 = vector.extract_strided_slice %339 {offsets = [128, 0], sizes = [16, 16], strides = [1, 1]} : vector<144x16xbf16> to vector<16x16xbf16>
    %cst_148 = arith.constant dense<0.000000e+00> : vector<16x16xf32>
    %366 = tpu.matmul %364, %365, %cst_148 {dimension_numbers = #tpu.dot_dimension_numbers<[1], [0], [0], [1], [0, 0, 1, 1], [], []>} : vector<16x16xbf16>, vector<16x16xbf16>, vector<16x16xf32> -> vector<16x16xf32>
    %367 = arith.addf %342, %345 : vector<16x16xf32>
    %368 = arith.addf %348, %351 : vector<16x16xf32>
    %369 = arith.addf %354, %357 : vector<16x16xf32>
    %370 = arith.addf %360, %363 : vector<16x16xf32>
    %371 = arith.addf %367, %368 : vector<16x16xf32>
    %372 = arith.addf %369, %370 : vector<16x16xf32>
    %373 = arith.addf %371, %372 : vector<16x16xf32>
    %374 = arith.addf %373, %366 : vector<16x16xf32>
    %c3248 = arith.constant 3248 : index
    %c0_149 = arith.constant 0 : index
    %375 = vector.load %arg3[%c3248, %c0_149] : memref<7200x128xbf16, #tpu.memory_space<vmem>>, vector<32x16xbf16>
    %cst_150 = arith.constant dense<0.000000e+00> : vector<16x16xf32>
    %376 = tpu.matmul %290, %375, %cst_150 {dimension_numbers = #tpu.dot_dimension_numbers<[1], [0], [0], [1], [0, 0, 1, 1], [], []>} : vector<16x32xbf16>, vector<32x16xbf16>, vector<16x16xf32> -> vector<16x16xf32>
    %c128 = arith.constant 128 : index
    %c0_151 = arith.constant 0 : index
    %377 = vector.load %arg5[%c128, %c0_151] : memref<192x256xf32, #tpu.memory_space<vmem>>, vector<1x16xf32>
    %378 = vector.broadcast %377 : vector<1x16xf32> to vector<16x16xf32>
    %379 = arith.addf %374, %378 : vector<16x16xf32>
    %380 = arith.addf %379, %376 : vector<16x16xf32>
    %c136 = arith.constant 136 : index
    %c0_152 = arith.constant 0 : index
    %381 = vector.load %arg5[%c136, %c0_152] : memref<192x256xf32, #tpu.memory_space<vmem>>, vector<1x16xf32>
    %382 = vector.broadcast %381 : vector<1x16xf32> to vector<16x16xf32>
    %383 = arith.addf %380, %382 : vector<16x16xf32>
    %cst_153 = arith.constant 0.000000e+00 : f32
    %384 = vector.broadcast %cst_153 : f32 to vector<16x16xf32>
    %385 = arith.cmpf oge, %383, %384 : vector<16x16xf32>
    %cst_154 = arith.constant 2.000000e-01 : f32
    %386 = vector.broadcast %cst_154 : f32 to vector<16x16xf32>
    %387 = arith.mulf %386, %383 : vector<16x16xf32>
    %388 = arith.select %385, %383, %387 : vector<16x16xi1>, vector<16x16xf32>
    %c3280 = arith.constant 3280 : index
    %c0_155 = arith.constant 0 : index
    %389 = vector.load %arg3[%c3280, %c0_155] : memref<7200x128xbf16, #tpu.memory_space<vmem>>, vector<576x16xbf16>
    %390 = arith.truncf %388 : vector<16x16xf32> to vector<16x16xbf16>
    %cst_156 = arith.constant dense<0.000000e+00> : vector<576x16xf32>
    %391 = tpu.matmul %389, %390, %cst_156 {dimension_numbers = #tpu.dot_dimension_numbers<[1], [0], [0], [1], [0, 0, 1, 1], [], []>} : vector<576x16xbf16>, vector<16x16xbf16>, vector<576x16xf32> -> vector<576x16xf32>
    %392 = arith.truncf %391 : vector<576x16xf32> to vector<576x16xbf16>
    %393 = vector.extract_strided_slice %392 {offsets = [256, 0], sizes = [64, 16], strides = [1, 1]} : vector<576x16xbf16> to vector<64x16xbf16>
    %c3856 = arith.constant 3856 : index
    %c0_157 = arith.constant 0 : index
    %394 = vector.load %arg3[%c3856, %c0_157] : memref<7200x128xbf16, #tpu.memory_space<vmem>>, vector<144x8xbf16>
    %395 = vector.extract_strided_slice %392 {offsets = [0, 0], sizes = [64, 16], strides = [1, 1]} : vector<576x16xbf16> to vector<64x16xbf16>
    %396 = vector.extract_strided_slice %394 {offsets = [0, 0], sizes = [16, 8], strides = [1, 1]} : vector<144x8xbf16> to vector<16x8xbf16>
    %cst_158 = arith.constant dense<0.000000e+00> : vector<64x8xf32>
    %397 = tpu.matmul %395, %396, %cst_158 {dimension_numbers = #tpu.dot_dimension_numbers<[1], [0], [0], [1], [0, 0, 1, 1], [], []>} : vector<64x16xbf16>, vector<16x8xbf16>, vector<64x8xf32> -> vector<64x8xf32>
    %398 = vector.extract_strided_slice %392 {offsets = [64, 0], sizes = [64, 16], strides = [1, 1]} : vector<576x16xbf16> to vector<64x16xbf16>
    %399 = vector.extract_strided_slice %394 {offsets = [16, 0], sizes = [16, 8], strides = [1, 1]} : vector<144x8xbf16> to vector<16x8xbf16>
    %cst_159 = arith.constant dense<0.000000e+00> : vector<64x8xf32>
    %400 = tpu.matmul %398, %399, %cst_159 {dimension_numbers = #tpu.dot_dimension_numbers<[1], [0], [0], [1], [0, 0, 1, 1], [], []>} : vector<64x16xbf16>, vector<16x8xbf16>, vector<64x8xf32> -> vector<64x8xf32>
    %401 = vector.extract_strided_slice %392 {offsets = [128, 0], sizes = [64, 16], strides = [1, 1]} : vector<576x16xbf16> to vector<64x16xbf16>
    %402 = vector.extract_strided_slice %394 {offsets = [32, 0], sizes = [16, 8], strides = [1, 1]} : vector<144x8xbf16> to vector<16x8xbf16>
    %cst_160 = arith.constant dense<0.000000e+00> : vector<64x8xf32>
    %403 = tpu.matmul %401, %402, %cst_160 {dimension_numbers = #tpu.dot_dimension_numbers<[1], [0], [0], [1], [0, 0, 1, 1], [], []>} : vector<64x16xbf16>, vector<16x8xbf16>, vector<64x8xf32> -> vector<64x8xf32>
    %404 = vector.extract_strided_slice %392 {offsets = [192, 0], sizes = [64, 16], strides = [1, 1]} : vector<576x16xbf16> to vector<64x16xbf16>
    %405 = vector.extract_strided_slice %394 {offsets = [48, 0], sizes = [16, 8], strides = [1, 1]} : vector<144x8xbf16> to vector<16x8xbf16>
    %cst_161 = arith.constant dense<0.000000e+00> : vector<64x8xf32>
    %406 = tpu.matmul %404, %405, %cst_161 {dimension_numbers = #tpu.dot_dimension_numbers<[1], [0], [0], [1], [0, 0, 1, 1], [], []>} : vector<64x16xbf16>, vector<16x8xbf16>, vector<64x8xf32> -> vector<64x8xf32>
    %407 = vector.extract_strided_slice %392 {offsets = [256, 0], sizes = [64, 16], strides = [1, 1]} : vector<576x16xbf16> to vector<64x16xbf16>
    %408 = vector.extract_strided_slice %394 {offsets = [64, 0], sizes = [16, 8], strides = [1, 1]} : vector<144x8xbf16> to vector<16x8xbf16>
    %cst_162 = arith.constant dense<0.000000e+00> : vector<64x8xf32>
    %409 = tpu.matmul %407, %408, %cst_162 {dimension_numbers = #tpu.dot_dimension_numbers<[1], [0], [0], [1], [0, 0, 1, 1], [], []>} : vector<64x16xbf16>, vector<16x8xbf16>, vector<64x8xf32> -> vector<64x8xf32>
    %410 = vector.extract_strided_slice %392 {offsets = [320, 0], sizes = [64, 16], strides = [1, 1]} : vector<576x16xbf16> to vector<64x16xbf16>
    %411 = vector.extract_strided_slice %394 {offsets = [80, 0], sizes = [16, 8], strides = [1, 1]} : vector<144x8xbf16> to vector<16x8xbf16>
    %cst_163 = arith.constant dense<0.000000e+00> : vector<64x8xf32>
    %412 = tpu.matmul %410, %411, %cst_163 {dimension_numbers = #tpu.dot_dimension_numbers<[1], [0], [0], [1], [0, 0, 1, 1], [], []>} : vector<64x16xbf16>, vector<16x8xbf16>, vector<64x8xf32> -> vector<64x8xf32>
    %413 = vector.extract_strided_slice %392 {offsets = [384, 0], sizes = [64, 16], strides = [1, 1]} : vector<576x16xbf16> to vector<64x16xbf16>
    %414 = vector.extract_strided_slice %394 {offsets = [96, 0], sizes = [16, 8], strides = [1, 1]} : vector<144x8xbf16> to vector<16x8xbf16>
    %cst_164 = arith.constant dense<0.000000e+00> : vector<64x8xf32>
    %415 = tpu.matmul %413, %414, %cst_164 {dimension_numbers = #tpu.dot_dimension_numbers<[1], [0], [0], [1], [0, 0, 1, 1], [], []>} : vector<64x16xbf16>, vector<16x8xbf16>, vector<64x8xf32> -> vector<64x8xf32>
    %416 = vector.extract_strided_slice %392 {offsets = [448, 0], sizes = [64, 16], strides = [1, 1]} : vector<576x16xbf16> to vector<64x16xbf16>
    %417 = vector.extract_strided_slice %394 {offsets = [112, 0], sizes = [16, 8], strides = [1, 1]} : vector<144x8xbf16> to vector<16x8xbf16>
    %cst_165 = arith.constant dense<0.000000e+00> : vector<64x8xf32>
    %418 = tpu.matmul %416, %417, %cst_165 {dimension_numbers = #tpu.dot_dimension_numbers<[1], [0], [0], [1], [0, 0, 1, 1], [], []>} : vector<64x16xbf16>, vector<16x8xbf16>, vector<64x8xf32> -> vector<64x8xf32>
    %419 = vector.extract_strided_slice %392 {offsets = [512, 0], sizes = [64, 16], strides = [1, 1]} : vector<576x16xbf16> to vector<64x16xbf16>
    %420 = vector.extract_strided_slice %394 {offsets = [128, 0], sizes = [16, 8], strides = [1, 1]} : vector<144x8xbf16> to vector<16x8xbf16>
    %cst_166 = arith.constant dense<0.000000e+00> : vector<64x8xf32>
    %421 = tpu.matmul %419, %420, %cst_166 {dimension_numbers = #tpu.dot_dimension_numbers<[1], [0], [0], [1], [0, 0, 1, 1], [], []>} : vector<64x16xbf16>, vector<16x8xbf16>, vector<64x8xf32> -> vector<64x8xf32>
    %422 = arith.addf %397, %400 : vector<64x8xf32>
    %423 = arith.addf %403, %406 : vector<64x8xf32>
    %424 = arith.addf %409, %412 : vector<64x8xf32>
    %425 = arith.addf %415, %418 : vector<64x8xf32>
    %426 = arith.addf %422, %423 : vector<64x8xf32>
    %427 = arith.addf %424, %425 : vector<64x8xf32>
    %428 = arith.addf %426, %427 : vector<64x8xf32>
    %429 = arith.addf %428, %421 : vector<64x8xf32>
    %c144 = arith.constant 144 : index
    %c0_167 = arith.constant 0 : index
    %430 = vector.load %arg5[%c144, %c0_167] : memref<192x256xf32, #tpu.memory_space<vmem>>, vector<1x8xf32>
    %431 = vector.broadcast %430 : vector<1x8xf32> to vector<64x8xf32>
    %432 = arith.addf %429, %431 : vector<64x8xf32>
    %cst_168 = arith.constant 0.000000e+00 : f32
    %433 = vector.broadcast %cst_168 : f32 to vector<64x8xf32>
    %434 = arith.cmpf oge, %432, %433 : vector<64x8xf32>
    %cst_169 = arith.constant 2.000000e-01 : f32
    %435 = vector.broadcast %cst_169 : f32 to vector<64x8xf32>
    %436 = arith.mulf %435, %432 : vector<64x8xf32>
    %437 = arith.select %434, %432, %436 : vector<64x8xi1>, vector<64x8xf32>
    %c4000 = arith.constant 4000 : index
    %c0_170 = arith.constant 0 : index
    %438 = vector.load %arg3[%c4000, %c0_170] : memref<7200x128xbf16, #tpu.memory_space<vmem>>, vector<576x64xbf16>
    %439 = arith.truncf %437 : vector<64x8xf32> to vector<64x8xbf16>
    %cst_171 = arith.constant dense<0.000000e+00> : vector<576x8xf32>
    %440 = tpu.matmul %438, %439, %cst_171 {dimension_numbers = #tpu.dot_dimension_numbers<[1], [0], [0], [1], [0, 0, 1, 1], [], []>} : vector<576x64xbf16>, vector<64x8xbf16>, vector<576x8xf32> -> vector<576x8xf32>
    %441 = arith.truncf %440 : vector<576x8xf32> to vector<576x8xbf16>
    %c4576 = arith.constant 4576 : index
    %c0_172 = arith.constant 0 : index
    %442 = vector.load %arg3[%c4576, %c0_172] : memref<7200x128xbf16, #tpu.memory_space<vmem>>, vector<144x8xbf16>
    %443 = vector.extract_strided_slice %441 {offsets = [0, 0], sizes = [64, 8], strides = [1, 1]} : vector<576x8xbf16> to vector<64x8xbf16>
    %444 = vector.extract_strided_slice %442 {offsets = [0, 0], sizes = [8, 8], strides = [1, 1]} : vector<144x8xbf16> to vector<8x8xbf16>
    %cst_173 = arith.constant dense<0.000000e+00> : vector<64x8xf32>
    %445 = tpu.matmul %443, %444, %cst_173 {dimension_numbers = #tpu.dot_dimension_numbers<[1], [0], [0], [1], [0, 0, 1, 1], [], []>} : vector<64x8xbf16>, vector<8x8xbf16>, vector<64x8xf32> -> vector<64x8xf32>
    %446 = vector.extract_strided_slice %441 {offsets = [64, 0], sizes = [64, 8], strides = [1, 1]} : vector<576x8xbf16> to vector<64x8xbf16>
    %447 = vector.extract_strided_slice %442 {offsets = [16, 0], sizes = [8, 8], strides = [1, 1]} : vector<144x8xbf16> to vector<8x8xbf16>
    %cst_174 = arith.constant dense<0.000000e+00> : vector<64x8xf32>
    %448 = tpu.matmul %446, %447, %cst_174 {dimension_numbers = #tpu.dot_dimension_numbers<[1], [0], [0], [1], [0, 0, 1, 1], [], []>} : vector<64x8xbf16>, vector<8x8xbf16>, vector<64x8xf32> -> vector<64x8xf32>
    %449 = vector.extract_strided_slice %441 {offsets = [128, 0], sizes = [64, 8], strides = [1, 1]} : vector<576x8xbf16> to vector<64x8xbf16>
    %450 = vector.extract_strided_slice %442 {offsets = [32, 0], sizes = [8, 8], strides = [1, 1]} : vector<144x8xbf16> to vector<8x8xbf16>
    %cst_175 = arith.constant dense<0.000000e+00> : vector<64x8xf32>
    %451 = tpu.matmul %449, %450, %cst_175 {dimension_numbers = #tpu.dot_dimension_numbers<[1], [0], [0], [1], [0, 0, 1, 1], [], []>} : vector<64x8xbf16>, vector<8x8xbf16>, vector<64x8xf32> -> vector<64x8xf32>
    %452 = vector.extract_strided_slice %441 {offsets = [192, 0], sizes = [64, 8], strides = [1, 1]} : vector<576x8xbf16> to vector<64x8xbf16>
    %453 = vector.extract_strided_slice %442 {offsets = [48, 0], sizes = [8, 8], strides = [1, 1]} : vector<144x8xbf16> to vector<8x8xbf16>
    %cst_176 = arith.constant dense<0.000000e+00> : vector<64x8xf32>
    %454 = tpu.matmul %452, %453, %cst_176 {dimension_numbers = #tpu.dot_dimension_numbers<[1], [0], [0], [1], [0, 0, 1, 1], [], []>} : vector<64x8xbf16>, vector<8x8xbf16>, vector<64x8xf32> -> vector<64x8xf32>
    %455 = vector.extract_strided_slice %441 {offsets = [256, 0], sizes = [64, 8], strides = [1, 1]} : vector<576x8xbf16> to vector<64x8xbf16>
    %456 = vector.extract_strided_slice %442 {offsets = [64, 0], sizes = [8, 8], strides = [1, 1]} : vector<144x8xbf16> to vector<8x8xbf16>
    %cst_177 = arith.constant dense<0.000000e+00> : vector<64x8xf32>
    %457 = tpu.matmul %455, %456, %cst_177 {dimension_numbers = #tpu.dot_dimension_numbers<[1], [0], [0], [1], [0, 0, 1, 1], [], []>} : vector<64x8xbf16>, vector<8x8xbf16>, vector<64x8xf32> -> vector<64x8xf32>
    %458 = vector.extract_strided_slice %441 {offsets = [320, 0], sizes = [64, 8], strides = [1, 1]} : vector<576x8xbf16> to vector<64x8xbf16>
    %459 = vector.extract_strided_slice %442 {offsets = [80, 0], sizes = [8, 8], strides = [1, 1]} : vector<144x8xbf16> to vector<8x8xbf16>
    %cst_178 = arith.constant dense<0.000000e+00> : vector<64x8xf32>
    %460 = tpu.matmul %458, %459, %cst_178 {dimension_numbers = #tpu.dot_dimension_numbers<[1], [0], [0], [1], [0, 0, 1, 1], [], []>} : vector<64x8xbf16>, vector<8x8xbf16>, vector<64x8xf32> -> vector<64x8xf32>
    %461 = vector.extract_strided_slice %441 {offsets = [384, 0], sizes = [64, 8], strides = [1, 1]} : vector<576x8xbf16> to vector<64x8xbf16>
    %462 = vector.extract_strided_slice %442 {offsets = [96, 0], sizes = [8, 8], strides = [1, 1]} : vector<144x8xbf16> to vector<8x8xbf16>
    %cst_179 = arith.constant dense<0.000000e+00> : vector<64x8xf32>
    %463 = tpu.matmul %461, %462, %cst_179 {dimension_numbers = #tpu.dot_dimension_numbers<[1], [0], [0], [1], [0, 0, 1, 1], [], []>} : vector<64x8xbf16>, vector<8x8xbf16>, vector<64x8xf32> -> vector<64x8xf32>
    %464 = vector.extract_strided_slice %441 {offsets = [448, 0], sizes = [64, 8], strides = [1, 1]} : vector<576x8xbf16> to vector<64x8xbf16>
    %465 = vector.extract_strided_slice %442 {offsets = [112, 0], sizes = [8, 8], strides = [1, 1]} : vector<144x8xbf16> to vector<8x8xbf16>
    %cst_180 = arith.constant dense<0.000000e+00> : vector<64x8xf32>
    %466 = tpu.matmul %464, %465, %cst_180 {dimension_numbers = #tpu.dot_dimension_numbers<[1], [0], [0], [1], [0, 0, 1, 1], [], []>} : vector<64x8xbf16>, vector<8x8xbf16>, vector<64x8xf32> -> vector<64x8xf32>
    %467 = vector.extract_strided_slice %441 {offsets = [512, 0], sizes = [64, 8], strides = [1, 1]} : vector<576x8xbf16> to vector<64x8xbf16>
    %468 = vector.extract_strided_slice %442 {offsets = [128, 0], sizes = [8, 8], strides = [1, 1]} : vector<144x8xbf16> to vector<8x8xbf16>
    %cst_181 = arith.constant dense<0.000000e+00> : vector<64x8xf32>
    %469 = tpu.matmul %467, %468, %cst_181 {dimension_numbers = #tpu.dot_dimension_numbers<[1], [0], [0], [1], [0, 0, 1, 1], [], []>} : vector<64x8xbf16>, vector<8x8xbf16>, vector<64x8xf32> -> vector<64x8xf32>
    %470 = arith.addf %445, %448 : vector<64x8xf32>
    %471 = arith.addf %451, %454 : vector<64x8xf32>
    %472 = arith.addf %457, %460 : vector<64x8xf32>
    %473 = arith.addf %463, %466 : vector<64x8xf32>
    %474 = arith.addf %470, %471 : vector<64x8xf32>
    %475 = arith.addf %472, %473 : vector<64x8xf32>
    %476 = arith.addf %474, %475 : vector<64x8xf32>
    %477 = arith.addf %476, %469 : vector<64x8xf32>
    %c4720 = arith.constant 4720 : index
    %c0_182 = arith.constant 0 : index
    %478 = vector.load %arg3[%c4720, %c0_182] : memref<7200x128xbf16, #tpu.memory_space<vmem>>, vector<16x8xbf16>
    %cst_183 = arith.constant dense<0.000000e+00> : vector<64x8xf32>
    %479 = tpu.matmul %393, %478, %cst_183 {dimension_numbers = #tpu.dot_dimension_numbers<[1], [0], [0], [1], [0, 0, 1, 1], [], []>} : vector<64x16xbf16>, vector<16x8xbf16>, vector<64x8xf32> -> vector<64x8xf32>
    %c152 = arith.constant 152 : index
    %c0_184 = arith.constant 0 : index
    %480 = vector.load %arg5[%c152, %c0_184] : memref<192x256xf32, #tpu.memory_space<vmem>>, vector<1x8xf32>
    %481 = vector.broadcast %480 : vector<1x8xf32> to vector<64x8xf32>
    %482 = arith.addf %477, %481 : vector<64x8xf32>
    %483 = arith.addf %482, %479 : vector<64x8xf32>
    %c160 = arith.constant 160 : index
    %c0_185 = arith.constant 0 : index
    %484 = vector.load %arg5[%c160, %c0_185] : memref<192x256xf32, #tpu.memory_space<vmem>>, vector<1x8xf32>
    %485 = vector.broadcast %484 : vector<1x8xf32> to vector<64x8xf32>
    %486 = arith.addf %483, %485 : vector<64x8xf32>
    %cst_186 = arith.constant 0.000000e+00 : f32
    %487 = vector.broadcast %cst_186 : f32 to vector<64x8xf32>
    %488 = arith.cmpf oge, %486, %487 : vector<64x8xf32>
    %cst_187 = arith.constant 2.000000e-01 : f32
    %489 = vector.broadcast %cst_187 : f32 to vector<64x8xf32>
    %490 = arith.mulf %489, %486 : vector<64x8xf32>
    %491 = arith.select %488, %486, %490 : vector<64x8xi1>, vector<64x8xf32>
    %c4736 = arith.constant 4736 : index
    %c0_188 = arith.constant 0 : index
    %492 = vector.load %arg3[%c4736, %c0_188] : memref<7200x128xbf16, #tpu.memory_space<vmem>>, vector<2304x64xbf16>
    %493 = arith.truncf %491 : vector<64x8xf32> to vector<64x8xbf16>
    %cst_189 = arith.constant dense<0.000000e+00> : vector<2304x8xf32>
    %494 = tpu.matmul %492, %493, %cst_189 {dimension_numbers = #tpu.dot_dimension_numbers<[1], [0], [0], [1], [0, 0, 1, 1], [], []>} : vector<2304x64xbf16>, vector<64x8xbf16>, vector<2304x8xf32> -> vector<2304x8xf32>
    %495 = arith.truncf %494 : vector<2304x8xf32> to vector<2304x8xbf16>
    %496 = vector.extract_strided_slice %495 {offsets = [1024, 0], sizes = [256, 8], strides = [1, 1]} : vector<2304x8xbf16> to vector<256x8xbf16>
    %c7040 = arith.constant 7040 : index
    %c0_190 = arith.constant 0 : index
    %497 = vector.load %arg3[%c7040, %c0_190] : memref<7200x128xbf16, #tpu.memory_space<vmem>>, vector<144x8xbf16>
    %498 = vector.extract_strided_slice %497 {offsets = [0, 0], sizes = [1, 8], strides = [1, 1]} : vector<144x8xbf16> to vector<1x8xbf16>
    %499 = vector.extract_strided_slice %495 {offsets = [0, 0], sizes = [256, 8], strides = [1, 1]} : vector<2304x8xbf16> to vector<256x8xbf16>
    %cst_191 = arith.constant dense<0.000000e+00> : vector<1x256xf32>
    %500 = tpu.matmul %498, %499, %cst_191 {dimension_numbers = #tpu.dot_dimension_numbers<[1], [1], [0], [0], [0, 0, 1, 0], [], []>} : vector<1x8xbf16>, vector<256x8xbf16>, vector<1x256xf32> -> vector<1x256xf32>
    %501 = vector.extract_strided_slice %497 {offsets = [16, 0], sizes = [1, 8], strides = [1, 1]} : vector<144x8xbf16> to vector<1x8xbf16>
    %502 = vector.extract_strided_slice %495 {offsets = [256, 0], sizes = [256, 8], strides = [1, 1]} : vector<2304x8xbf16> to vector<256x8xbf16>
    %cst_192 = arith.constant dense<0.000000e+00> : vector<1x256xf32>
    %503 = tpu.matmul %501, %502, %cst_192 {dimension_numbers = #tpu.dot_dimension_numbers<[1], [1], [0], [0], [0, 0, 1, 0], [], []>} : vector<1x8xbf16>, vector<256x8xbf16>, vector<1x256xf32> -> vector<1x256xf32>
    %504 = vector.extract_strided_slice %497 {offsets = [32, 0], sizes = [1, 8], strides = [1, 1]} : vector<144x8xbf16> to vector<1x8xbf16>
    %505 = vector.extract_strided_slice %495 {offsets = [512, 0], sizes = [256, 8], strides = [1, 1]} : vector<2304x8xbf16> to vector<256x8xbf16>
    %cst_193 = arith.constant dense<0.000000e+00> : vector<1x256xf32>
    %506 = tpu.matmul %504, %505, %cst_193 {dimension_numbers = #tpu.dot_dimension_numbers<[1], [1], [0], [0], [0, 0, 1, 0], [], []>} : vector<1x8xbf16>, vector<256x8xbf16>, vector<1x256xf32> -> vector<1x256xf32>
    %507 = vector.extract_strided_slice %497 {offsets = [48, 0], sizes = [1, 8], strides = [1, 1]} : vector<144x8xbf16> to vector<1x8xbf16>
    %508 = vector.extract_strided_slice %495 {offsets = [768, 0], sizes = [256, 8], strides = [1, 1]} : vector<2304x8xbf16> to vector<256x8xbf16>
    %cst_194 = arith.constant dense<0.000000e+00> : vector<1x256xf32>
    %509 = tpu.matmul %507, %508, %cst_194 {dimension_numbers = #tpu.dot_dimension_numbers<[1], [1], [0], [0], [0, 0, 1, 0], [], []>} : vector<1x8xbf16>, vector<256x8xbf16>, vector<1x256xf32> -> vector<1x256xf32>
    %510 = vector.extract_strided_slice %497 {offsets = [64, 0], sizes = [1, 8], strides = [1, 1]} : vector<144x8xbf16> to vector<1x8xbf16>
    %511 = vector.extract_strided_slice %495 {offsets = [1024, 0], sizes = [256, 8], strides = [1, 1]} : vector<2304x8xbf16> to vector<256x8xbf16>
    %cst_195 = arith.constant dense<0.000000e+00> : vector<1x256xf32>
    %512 = tpu.matmul %510, %511, %cst_195 {dimension_numbers = #tpu.dot_dimension_numbers<[1], [1], [0], [0], [0, 0, 1, 0], [], []>} : vector<1x8xbf16>, vector<256x8xbf16>, vector<1x256xf32> -> vector<1x256xf32>
    %513 = vector.extract_strided_slice %497 {offsets = [80, 0], sizes = [1, 8], strides = [1, 1]} : vector<144x8xbf16> to vector<1x8xbf16>
    %514 = vector.extract_strided_slice %495 {offsets = [1280, 0], sizes = [256, 8], strides = [1, 1]} : vector<2304x8xbf16> to vector<256x8xbf16>
    %cst_196 = arith.constant dense<0.000000e+00> : vector<1x256xf32>
    %515 = tpu.matmul %513, %514, %cst_196 {dimension_numbers = #tpu.dot_dimension_numbers<[1], [1], [0], [0], [0, 0, 1, 0], [], []>} : vector<1x8xbf16>, vector<256x8xbf16>, vector<1x256xf32> -> vector<1x256xf32>
    %516 = vector.extract_strided_slice %497 {offsets = [96, 0], sizes = [1, 8], strides = [1, 1]} : vector<144x8xbf16> to vector<1x8xbf16>
    %517 = vector.extract_strided_slice %495 {offsets = [1536, 0], sizes = [256, 8], strides = [1, 1]} : vector<2304x8xbf16> to vector<256x8xbf16>
    %cst_197 = arith.constant dense<0.000000e+00> : vector<1x256xf32>
    %518 = tpu.matmul %516, %517, %cst_197 {dimension_numbers = #tpu.dot_dimension_numbers<[1], [1], [0], [0], [0, 0, 1, 0], [], []>} : vector<1x8xbf16>, vector<256x8xbf16>, vector<1x256xf32> -> vector<1x256xf32>
    %519 = vector.extract_strided_slice %497 {offsets = [112, 0], sizes = [1, 8], strides = [1, 1]} : vector<144x8xbf16> to vector<1x8xbf16>
    %520 = vector.extract_strided_slice %495 {offsets = [1792, 0], sizes = [256, 8], strides = [1, 1]} : vector<2304x8xbf16> to vector<256x8xbf16>
    %cst_198 = arith.constant dense<0.000000e+00> : vector<1x256xf32>
    %521 = tpu.matmul %519, %520, %cst_198 {dimension_numbers = #tpu.dot_dimension_numbers<[1], [1], [0], [0], [0, 0, 1, 0], [], []>} : vector<1x8xbf16>, vector<256x8xbf16>, vector<1x256xf32> -> vector<1x256xf32>
    %522 = vector.extract_strided_slice %497 {offsets = [128, 0], sizes = [1, 8], strides = [1, 1]} : vector<144x8xbf16> to vector<1x8xbf16>
    %523 = vector.extract_strided_slice %495 {offsets = [2048, 0], sizes = [256, 8], strides = [1, 1]} : vector<2304x8xbf16> to vector<256x8xbf16>
    %cst_199 = arith.constant dense<0.000000e+00> : vector<1x256xf32>
    %524 = tpu.matmul %522, %523, %cst_199 {dimension_numbers = #tpu.dot_dimension_numbers<[1], [1], [0], [0], [0, 0, 1, 0], [], []>} : vector<1x8xbf16>, vector<256x8xbf16>, vector<1x256xf32> -> vector<1x256xf32>
    %525 = arith.addf %500, %503 : vector<1x256xf32>
    %526 = arith.addf %506, %509 : vector<1x256xf32>
    %527 = arith.addf %512, %515 : vector<1x256xf32>
    %528 = arith.addf %518, %521 : vector<1x256xf32>
    %529 = arith.addf %525, %526 : vector<1x256xf32>
    %530 = arith.addf %527, %528 : vector<1x256xf32>
    %531 = arith.addf %529, %530 : vector<1x256xf32>
    %532 = arith.addf %531, %524 : vector<1x256xf32>
    %c168 = arith.constant 168 : index
    %c0_200 = arith.constant 0 : index
    %533 = vector.load %arg5[%c168, %c0_200] : memref<192x256xf32, #tpu.memory_space<vmem>>, vector<1x1xf32>
    %534 = vector.broadcast %533 : vector<1x1xf32> to vector<1x256xf32>
    %535 = arith.addf %532, %534 : vector<1x256xf32>
    %cst_201 = arith.constant 0.000000e+00 : f32
    %536 = vector.broadcast %cst_201 : f32 to vector<1x256xf32>
    %537 = arith.cmpf oge, %535, %536 : vector<1x256xf32>
    %cst_202 = arith.constant 2.000000e-01 : f32
    %538 = vector.broadcast %cst_202 : f32 to vector<1x256xf32>
    %539 = arith.mulf %538, %535 : vector<1x256xf32>
    %540 = arith.select %537, %535, %539 : vector<1x256xi1>, vector<1x256xf32>
    %541 = arith.truncf %540 : vector<1x256xf32> to vector<1x256xbf16>
    %c1024 = arith.constant 1024 : index
    %c0_203 = arith.constant 0 : index
    %542 = vector.load %arg4[%c1024, %c0_203] : memref<1280x256xbf16, #tpu.memory_space<vmem>>, vector<256x256xbf16>
    %cst_204 = arith.constant dense<0.000000e+00> : vector<1x256xf32>
    %543 = tpu.matmul %541, %542, %cst_204 {dimension_numbers = #tpu.dot_dimension_numbers<[1], [0], [0], [1], [0, 0, 1, 1], [], []>} : vector<1x256xbf16>, vector<256x256xbf16>, vector<1x256xf32> -> vector<1x256xf32>
    %c7184 = arith.constant 7184 : index
    %c0_205 = arith.constant 0 : index
    %544 = vector.load %arg3[%c7184, %c0_205] : memref<7200x128xbf16, #tpu.memory_space<vmem>>, vector<1x8xbf16>
    %cst_206 = arith.constant dense<0.000000e+00> : vector<1x256xf32>
    %545 = tpu.matmul %544, %496, %cst_206 {dimension_numbers = #tpu.dot_dimension_numbers<[1], [1], [0], [0], [0, 0, 1, 0], [], []>} : vector<1x8xbf16>, vector<256x8xbf16>, vector<1x256xf32> -> vector<1x256xf32>
    %c176 = arith.constant 176 : index
    %c0_207 = arith.constant 0 : index
    %546 = vector.load %arg5[%c176, %c0_207] : memref<192x256xf32, #tpu.memory_space<vmem>>, vector<1x1xf32>
    %547 = vector.broadcast %546 : vector<1x1xf32> to vector<1x256xf32>
    %548 = arith.addf %543, %547 : vector<1x256xf32>
    %549 = arith.addf %548, %545 : vector<1x256xf32>
    %c184 = arith.constant 184 : index
    %c0_208 = arith.constant 0 : index
    %550 = vector.load %arg5[%c184, %c0_208] : memref<192x256xf32, #tpu.memory_space<vmem>>, vector<1x1xf32>
    %551 = vector.broadcast %550 : vector<1x1xf32> to vector<1x256xf32>
    %552 = arith.addf %549, %551 : vector<1x256xf32>
    %553 = math.tanh %552 : vector<1x256xf32>
    %c0_209 = arith.constant 0 : index
    %c0_210 = arith.constant 0 : index
    %c0_211 = arith.constant 0 : index
    %554 = vector.load %arg6[%c0_209, %c0_210, %c0_211] : memref<1x1x256xf32, #tpu.memory_space<vmem>>, vector<1x1x256xf32>
    %555 = vector.shape_cast %554 : vector<1x1x256xf32> to vector<1x256xf32>
    %556 = vector.shape_cast %553 : vector<1x256xf32> to vector<1x1x256xf32>
    tpu.vector_store %arg6[%c0_209, %c0_210, %c0_211], %556 {strides = array<i32>} : memref<1x1x256xf32, #tpu.memory_space<vmem>>, vector<1x1x256xf32>,
    return
  }
  func.func @transform_0(%arg0: i32) -> (i32, i32, i32) {
    %c0_i32 = arith.constant 0 : i32
    %c0_i32_0 = arith.constant 0 : i32
    %c0_i32_1 = arith.constant 0 : i32
    return %arg0, %c0_i32, %c0_i32_0 : i32, i32, i32
  }
  func.func @transform_1(%arg0: i32) -> (i32, i32, i32) {
    %c0_i32 = arith.constant 0 : i32
    %c0_i32_0 = arith.constant 0 : i32
    %c0_i32_1 = arith.constant 0 : i32
    return %arg0, %c0_i32, %c0_i32_0 : i32, i32, i32
  }
  func.func @transform_2(%arg0: i32) -> (i32, i32) {
    %c0_i32 = arith.constant 0 : i32
    %c0_i32_0 = arith.constant 0 : i32
    %c0_i32_1 = arith.constant 0 : i32
    return %c0_i32, %c0_i32_0 : i32, i32
  }
  func.func @transform_3(%arg0: i32) -> (i32, i32) {
    %c0_i32 = arith.constant 0 : i32
    %c0_i32_0 = arith.constant 0 : i32
    %c0_i32_1 = arith.constant 0 : i32
    return %c0_i32, %c0_i32_0 : i32, i32
  }
  func.func @transform_4(%arg0: i32) -> (i32, i32) {
    %c0_i32 = arith.constant 0 : i32
    %c0_i32_0 = arith.constant 0 : i32
    %c0_i32_1 = arith.constant 0 : i32
    return %c0_i32, %c0_i32_0 : i32, i32
  }
  func.func @transform_5(%arg0: i32) -> (i32, i32, i32) {
    %c0_i32 = arith.constant 0 : i32
    %c0_i32_0 = arith.constant 0 : i32
    %c0_i32_1 = arith.constant 0 : i32
    return %arg0, %c0_i32, %c0_i32_0 : i32, i32, i32
  }
}

</mosaic_0001>

<bundles_post_ra>
// kernel: _forward.1
= control target key start
LH: loop header
LB: loop body
LE: loop exit
PB: predicated region body
PF: predicated region fallthrough
CT: control target
= control target key end

     0   :  { %10 = vsyncpa [#allocation3], 0  ;;  %s15459_s18 = smov 0   ;;  %s19794_s0 = inlined_call_operand.vmem [shape: f32[2,1,5], index: 0, kind: input, shape index: {}]   ;;  %s19795_s1 = inlined_call_operand.vmem [shape: f32[2,128,8], index: 1, kind: input, shape index: {}]   ;;  %s19796_s2 = inlined_call_operand.vmem [shape: bf16[7200,128], index: 2, kind: input, shape index: {}]   ;;  %s19797_s3 = inlined_call_operand.hbm [shape: bf16[1280,256], index: 3, kind: input, shape index: {}]   ;;  %s19798_s4 = inlined_call_operand.vmem [shape: f32[192,256], index: 4, kind: input, shape index: {}]   ;;  %s19799_s5 = inlined_call_operand.vmem [shape: f32[2,1,256], index: 5, kind: output, shape index: {}]  }
   0x1 LB: > { %s176_s21 = sshll.u32 %s19797_s3, 4  ;;  %s11981_s22 = sadd.s32 4294967295, %s15422_s18   ;;  %s15422_s18 = sphi %s15459_s18, %s16_s18   ;;  %s177_s21 = int_to_ptr.hbm [resolvable:$true] %s176_s21 }
   0x2   : > { %p11983_p0 = scmp.ge.s32.totalorder %s15422_s18, 1  ;;  %p162_p1 = scmp.lt.s32.totalorder %s15422_s18, 3 }
   0x3   : > { %p15361_p2 = scmp.eq.s32.totalorder %s11981_s22, 0  ;;  %s15424_s23 = smov [#allocation2]  }
   0x4   : > { %p163_p3 = pnand %p11983_p0, %p162_p1  ;;  %s178_s24 = sshll.u32 %s15424_s23, 4  ;;  %s179_s24 = int_to_ptr.vmem [resolvable:$true] %s178_s24 }
   0x5   : > { %s15425_s25 = smov 128   ;;  %s15426_s26 = smov 8  }
   0x6   : > { %p15357_p4 = pneg %p163_p3  ;;  %211 = sbr.rel (%p163_p3) target bundleno = 8304 (0x2070), region = 40 }
   0x8   : > { %p15358_p5 = pnand %p15361_p2, %p15357_p4 }
   0xa   : > { %15360 = dma.hbm_to_vmem [thread:$0]  (!%p15358_p5), %s177_s21, 20480, %s179_s24, [#allocation3], %s15425_s25, %s15425_s25, %s15426_s26  }
   0xb   : > { %15417 = dma.done.wait (%p15361_p2), [#allocation3], 20480  }
   0xc   : > { %15419 = vsyncadd (%p15361_p2), [#allocation3], 4294946816  ;;  %p242_p6 = scmp.lt.s32.totalorder %s11981_s22, 1  ;;  %vm375_vm0 = vcmask 1043456   ;;  %v348_v0 = vld [vmem:[%s19796_s2 + $0x18] sm:$0xf] }
   0xd   : > { %v377_v3 = vsel %vm375_vm0, %v348_v0, 0  ;;  %vm350_vm1 = vcmask 64512   ;;  %v15515_v41 = vld [vmem:[%s19798_s4 + $0x20] ss:$0 sm:$0xff] }
   0xe   : > { %s20368_s22 = smov (!%p242_p6, %s11981_s22), 1  ;;  %386 = vmatpush.bf16.msra.mxu2 %v377_v3 }
   0xf   : > { %s14759_s27 = sshll.u32 %s20368_s22, 7  ;;  %s244_s11 = scalar_lea.vmem %s19794_s0, %s20368_s22 }
  0x10   : > { %s15476_s30 = scalar_lea.vmem %s19795_s1, %s14759_s27  ;;  %s11990_s14 = sshll.u32 %s20368_s22, 1 }
  0x11   : > { %v324_v1 = vld [vmem:[%s15476_s30] sm:$0xff]  ;;  %v325_v2 = vld [vmem:[%s15476_s30 + $0x8] sm:$0xff]  ;;  %v326_v5 = vld [vmem:[%s15476_s30 + $0x10] sm:$0xff]  ;;  %s253_s17 = scalar_lea.vmem %s19799_s5, %s11990_s14 }
  0x12   : > { %v340_v4 = vpack.c.bf16 %v325_v2, %v324_v1  ;;  %v327_v6 = vld [vmem:[%s15476_s30 + $0x18] sm:$0xff]  ;;  %v328_v8 = vld [vmem:[%s15476_s30 + $0x20] sm:$0xff]  ;;  %v329_v9 = vld [vmem:[%s15476_s30 + $0x28] sm:$0xff] }
  0x13   : > { %v341_v7 = vpack.c.bf16 %v327_v6, %v326_v5  ;;  %v342_v10 = vpack.c.bf16 %v329_v9, %v328_v8  ;;  %v330_v11 = vld [vmem:[%s15476_s30 + $0x30] sm:$0xff]  ;;  %v331_v12 = vld [vmem:[%s15476_s30 + $0x38] sm:$0xff]  ;;  %v332_v14 = vld [vmem:[%s15476_s30 + $0x40] sm:$0xff] }
  0x14   : > { %12001 = vmatmul.msk.bf16.vlgmr.msra.gmra.mxu2 %vm350_vm1, %v340_v4  ;;  %v343_v13 = vpack.c.bf16 %v331_v12, %v330_v11  ;;  %v333_v15 = vld [vmem:[%s15476_s30 + $0x48] sm:$0xff]  ;;  %v334_v17 = vld [vmem:[%s15476_s30 + $0x50] sm:$0xff]  ;;  %v335_v18 = vld [vmem:[%s15476_s30 + $0x58] sm:$0xff] }
  0x15   : > { %v344_v16 = vpack.c.bf16 %v333_v15, %v332_v14  ;;  %v345_v19 = vpack.c.bf16 %v335_v18, %v334_v17  ;;  %v336_v20 = vld [vmem:[%s15476_s30 + $0x60] sm:$0xff]  ;;  %v337_v21 = vld [vmem:[%s15476_s30 + $0x68] sm:$0xff]  ;;  %v338_v23 = vld [vmem:[%s15476_s30 + $0x70] sm:$0xff] }
  0x16   : > { %v346_v22 = vpack.c.bf16 %v337_v21, %v336_v20  ;;  %v339_v24 = vld [vmem:[%s15476_s30 + $0x78] sm:$0xff] }
  0x17   : > { %v347_v25 = vpack.c.bf16 %v339_v24, %v338_v23 }
  0x24   : > { %12002 = vmatmul.msk.bf16.gmra.mxu2 %vm350_vm1, %v341_v7 }
  0x34   : > { %12003 = vmatmul.msk.bf16.gmra.mxu2 %vm350_vm1, %v342_v10 }
  0x44   : > { %12004 = vmatmul.msk.bf16.gmra.mxu2 %vm350_vm1, %v343_v13 }
  0x54   : > { %12005 = vmatmul.msk.bf16.gmra.mxu2 %vm350_vm1, %v344_v16 }
  0x64   : > { %12006 = vmatmul.msk.bf16.gmra.mxu2 %vm350_vm1, %v345_v19 }
  0x74   : > { %12007 = vmatmul.msk.bf16.gmra.mxu2 %vm350_vm1, %v346_v22 }
  0x84   : > { %12008 = vmatmul.msk.bf16.gmra.mxu2 %vm350_vm1, %v347_v25 }
  0x97   : > { %v15506_v26 = vpop.f32.mrf.mxu2 }
  0x98   : > { %v389_v23 = vadd.f32 %v15506_v26, %v15515_v41  ;;  %v14762_v26 = vld [vmem:[%s19796_s2 + $0x20] sm:$0xff] }
  0x9f   : > { %v15508_v27 = vpop.f32.mrf.mxu2 }
  0xa0   : > { %v391_v20 = vadd.f32 %v15508_v27, %v15515_v41 }
  0xa7   : > { %v15510_v28 = vpop.f32.mrf.mxu2 }
  0xa8   : > { %v394_v16 = vadd.f32 %v15510_v28, %v15515_v41 }
  0xaa   : > { %v446_v24 = vmul.f32 0.2, %v394_v16  ;;  %vm430_vm15 = vcmp.ge.f32.partialorder %v394_v16, 0.0 }
  0xaf   : > { %v395_v29 = vpop.f32.mrf.mxu2 }
  0xb0   : > { %v396_v13 = vadd.f32 %v395_v29, %v15515_v41 }
  0xb2   : > { %v447_v21 = vmul.f32 0.2, %v396_v13  ;;  %vm431_vm14 = vcmp.ge.f32.partialorder %v396_v13, 0.0 }
  0xb4   : > { %v463_v28 = vsel %vm431_vm14, %v396_v13, %v447_v21 }
  0xb7   : > { %v398_v30 = vpop.f32.mrf.mxu2 }
  0xb8   : > { %v399_v9 = vadd.f32 %v398_v30, %v15515_v41  ;;  %v445_v30 = vmul.f32 0.2, %v391_v20 }
  0xba   : > { %v448_v17 = vmul.f32 0.2, %v399_v9  ;;  %vm432_vm13 = vcmp.ge.f32.partialorder %v399_v9, 0.0 }
  0xbc   : > { %v464_v25 = vsel %vm432_vm13, %v399_v9, %v448_v17 }
  0xbf   : > { %v400_v31 = vpop.f32.mrf.mxu2 }
  0xc0   : > { %v401_v6 = vadd.f32 %v400_v31, %v15515_v41  ;;  %v444_v31 = vmul.f32 0.2, %v389_v23 }
  0xc2   : > { %v449_v14 = vmul.f32 0.2, %v401_v6  ;;  %vm433_vm12 = vcmp.ge.f32.partialorder %v401_v6, 0.0 }
  0xc4   : > { %v465_v22 = vsel %vm433_vm12, %v401_v6, %v449_v14 }
  0xc5   : > { %v518_v29 = vpack.c.bf16 %v465_v22, %v464_v25 }
  0xc7   : > { %v403_v32 = vpop.f32.mrf.mxu2 }
  0xc8   : > { %v404_v2 = vadd.f32 %v403_v32, %v15515_v41  ;;  %v462_v32 = vsel %vm430_vm15, %v394_v16, %v446_v24  ;;  %v14774_v16 = vld [vmem:[%s19796_s2 + $0x80] sm:$0xff]  ;;  %v14775_v24 = vld [vmem:[%s19796_s2 + $0x88] sm:$0xff] }
  0xca   : > { %v450_v10 = vmul.f32 0.2, %v404_v2  ;;  %vm434_vm11 = vcmp.ge.f32.partialorder %v404_v2, 0.0 }
  0xcc   : > { %v466_v18 = vsel %vm434_vm11, %v404_v2, %v450_v10 }
  0xcf   : > { %v405_v33 = vpop.f32.mrf.mxu2 }
  0xd0   : > { %v406_v63 = vadd.f32 %v405_v33, %v15515_v41  ;;  %v517_v33 = vpack.c.bf16 %v463_v28, %v462_v32 }
  0xd2   : > { %v451_v7 = vmul.f32 0.2, %v406_v63  ;;  %vm435_vm10 = vcmp.ge.f32.partialorder %v406_v63, 0.0 }
  0xd4   : > { %v467_v15 = vsel %vm435_vm10, %v406_v63, %v451_v7  ;;  %v14772_v63 = vld [vmem:[%s19796_s2 + $0x70] sm:$0xff]  ;;  %v14773_v7 = vld [vmem:[%s19796_s2 + $0x78] sm:$0xff] }
  0xd5   : > { %v519_v19 = vpack.c.bf16 %v467_v15, %v466_v18 }
  0xd7   : > { %v408_v34 = vpop.f32.mrf.mxu2 }
  0xd8   : > { %v409_v59 = vadd.f32 %v408_v34, %v15515_v41 }
  0xda   : > { %v452_v3 = vmul.f32 0.2, %v409_v59  ;;  %vm436_vm9 = vcmp.ge.f32.partialorder %v409_v59, 0.0 }
  0xdc   : > { %v468_v11 = vsel %vm436_vm9, %v409_v59, %v452_v3  ;;  %vm304_vm9 = vcmask 261120  }
  0xdf   : > { %v410_v35 = vpop.f32.mrf.mxu2 }
  0xe0   : > { %v411_v56 = vadd.f32 %v410_v35, %v15515_v41 }
  0xe2   : > { %v453_v0 = vmul.f32 0.2, %v411_v56  ;;  %vm437_vm8 = vcmp.ge.f32.partialorder %v411_v56, 0.0 }
  0xe4   : > { %v469_v8 = vsel %vm437_vm8, %v411_v56, %v453_v0 }
  0xe5   : > { %v520_v12 = vpack.c.bf16 %v469_v8, %v468_v11  ;;  %v14783_v8 = vld [vmem:[%s19796_s2 + $0xc8] sm:$0xff] }
  0xe7   : > { %v413_v36 = vpop.f32.mrf.mxu2 }
  0xe8   : > { %v414_v51 = vadd.f32 %v413_v36, %v15515_v41  ;;  %v14763_v36 = vld [vmem:[%s19796_s2 + $0x28] sm:$0xff] }
  0xea   : > { %v454_v60 = vmul.f32 0.2, %v414_v51  ;;  %vm438_vm7 = vcmp.ge.f32.partialorder %v414_v51, 0.0 }
  0xec   : > { %v470_v4 = vsel %vm438_vm7, %v414_v51, %v454_v60  ;;  %v257_v51 = vld [vmem:[%s19796_s2] sm:$0x7]  ;;  %vm829_vm7 = vcmask 130048  }
  0xef   : > { %v415_v37 = vpop.f32.mrf.mxu2 }
  0xf0   : > { %v416_v48 = vadd.f32 %v415_v37, %v15515_v41  ;;  %v14764_v37 = vld [vmem:[%s19796_s2 + $0x30] sm:$0xff] }
  0xf2   : > { %v455_v57 = vmul.f32 0.2, %v416_v48  ;;  %vm439_vm6 = vcmp.ge.f32.partialorder %v416_v48, 0.0 }
  0xf4   : > { %v471_v1 = vsel %vm439_vm6, %v416_v48, %v455_v57  ;;  %v14771_v48 = vld [vmem:[%s19796_s2 + $0x68] sm:$0xff]  ;;  %v255_v57 = vld [vmem:[%s244_s11] sm:$0x1]  ;;  %vm259_vm6 = vcmask 39936  }
  0xf5   : > { %v521_v5 = vpack.c.bf16 %v471_v1, %v470_v4 }
  0xf7   : > { %v418_v38 = vpop.f32.mrf.mxu2 }
  0xf8   : > { %v419_v45 = vadd.f32 %v418_v38, %v15515_v41  ;;  %v14765_v38 = vld [vmem:[%s19796_s2 + $0x38] sm:$0xff] }
  0xfa   : > { %v456_v52 = vmul.f32 0.2, %v419_v45  ;;  %vm440_vm5 = vcmp.ge.f32.partialorder %v419_v45, 0.0 }
  0xfc   : > { %v472_v61 = vsel %vm440_vm5, %v419_v45, %v456_v52  ;;  %vm264_vm5 = vcmask 1042432  }
  0xff   : > { %v420_v39 = vpop.f32.mrf.mxu2 }
 0x100   : > { %v421_v43 = vadd.f32 %v420_v39, %v15515_v41  ;;  %v14766_v39 = vld [vmem:[%s19796_s2 + $0x40] sm:$0xff] }
 0x102   : > { %v457_v49 = vmul.f32 0.2, %v421_v43  ;;  %vm441_vm4 = vcmp.ge.f32.partialorder %v421_v43, 0.0 }
 0x104   : > { %v473_v58 = vsel %vm441_vm4, %v421_v43, %v457_v49  ;;  %v14770_v43 = vld [vmem:[%s19796_s2 + $0x60] sm:$0xff]  ;;  %vm263_vm4 = vcmask 1041408   ;;  %v15427_v49 = vmov 65535  }
 0x105   : > { %v522_v62 = vpack.c.bf16 %v473_v58, %v472_v61  ;;  %v256_v58 = vpack.c.bf16 %v255_v57, %v255_v57 }
 0x107   : > { %v423_v40 = vpop.f32.mrf.mxu2 }
 0x108   : > { %v424_v42 = vadd.f32 %v423_v40, %v15515_v41  ;;  %v14767_v40 = vld [vmem:[%s19796_s2 + $0x48] sm:$0xff] }
 0x10a   : > { %v458_v46 = vmul.f32 0.2, %v424_v42  ;;  %vm442_vm2 = vcmp.ge.f32.partialorder %v424_v42, 0.0 }
 0x10c   : > { %v474_v53 = vsel %vm442_vm2, %v424_v42, %v458_v46  ;;  %vm429_vm2 = vcmp.ge.f32.partialorder %v391_v20, 0.0  ;;  %v14769_v42 = vld [vmem:[%s19796_s2 + $0x58] sm:$0xff] }
 0x10d   : > { %v461_v27 = vsel %vm429_vm2, %v391_v20, %v445_v30 }
 0x10f   : > { %v425_v44 = vpop.f32.mrf.mxu2 }
 0x110   : > { %v426_v47 = vadd.f32 %v425_v44, %v15515_v41  ;;  %v14768_v41 = vld [vmem:[%s19796_s2 + $0x50] sm:$0xff] }
 0x112   : > { %vm443_vm3 = vcmp.ge.f32.partialorder %v426_v47, 0.0  ;;  %v459_v50 = vmul.f32 0.2, %v426_v47 }
 0x114   : > { %v475_v54 = vsel %vm443_vm3, %v426_v47, %v459_v50  ;;  %vm428_vm3 = vcmp.ge.f32.partialorder %v389_v23, 0.0  ;;  %v265_v50 = vsel %vm263_vm4, 4294967295, %v15427_v49  ;;  %v14778_v49 = vld [vmem:[%s19796_s2 + $0xa0] sm:$0xff] }
 0x115   : > { %v523_v55 = vpack.c.bf16 %v475_v54, %v474_v53  ;;  %v460_v34 = vsel %vm428_vm3, %v389_v23, %v444_v31  ;;  %v266_v52 = vsel %vm264_vm5, %v265_v50, 0  ;;  %vm1262_vm5 = vcmask 523264  }
 0x116   : > { %v516_v35 = vpack.c.bf16 %v461_v27, %v460_v34  ;;  %v14776_v27 = vld [vmem:[%s19796_s2 + $0x90] sm:$0xff] }
 0x117   : > { %644 = vmatpush.bf16.msra.mxu3 %v523_v55  ;;  %v268_v55 = vand.u32 %v266_v52, %v257_v51 }
 0x119   : > { %277 = vmatpush.bf16.msra.mxu0 %v268_v55 }
 0x11b   : > { %645 = vmatpush.bf16.msra.mxu3 %v522_v62 }
 0x11c   : > { %11991 = vmatmul.msk.bf16.vlgmr.msra.gmra.mxu0 %vm259_vm6, %v256_v58 }
 0x11d   : > { %849 = vmatpush.bf16.msrb.mxu0 %v14783_v8 }
 0x11f   : > { %646 = vmatpush.bf16.msra.mxu3 %v521_v5 }
 0x123   : > { %647 = vmatpush.bf16.msra.mxu3 %v520_v12 }
 0x127   : > { %648 = vmatpush.bf16.msra.mxu3 %v519_v19 }
 0x12b   : > { %649 = vmatpush.bf16.msra.mxu3 %v518_v29 }
 0x12f   : > { %650 = vmatpush.bf16.msra.mxu3 %v517_v33 }
 0x133   : > { %651 = vmatpush.bf16.msra.mxu3 %v516_v35 }
 0x136   : > { %652 = vmatmul.bf16.vlgmr.msra.gmra.mxu3 %v14762_v26 }
 0x146   : > { %657 = vmatmul.bf16.gmra.mxu3 %v14763_v36 }
 0x156   : > { %662 = vmatmul.bf16.gmra.mxu3 %v14764_v37 }
 0x166   : > { %667 = vmatmul.bf16.gmra.mxu3 %v14765_v38 }
 0x176   : > { %672 = vmatmul.bf16.gmra.mxu3 %v14766_v39 }
 0x186   : > { %677 = vmatmul.bf16.gmra.mxu3 %v14767_v40  ;;  %v14777_v40 = vld [vmem:[%s19796_s2 + $0x98] sm:$0xff] }
 0x196   : > { %682 = vmatmul.bf16.gmra.mxu3 %v14768_v41  ;;  %v14784_v41 = vld [vmem:[%s19796_s2 + $0xd0] sm:$0xff] }
 0x197   : > { %1117 = vmatpush.bf16.msrb.mxu2 %v14784_v41 }
 0x1a6   : > { %687 = vmatmul.bf16.gmra.mxu3 %v14769_v42 }
 0x1b6   : > { %692 = vmatmul.bf16.gmra.mxu3 %v14770_v43 }
 0x1b9   : > { %v653_v44 = vpop.f32.mrf.mxu3 }
 0x1ba   : > { %v753_v45 = vpack.c.bf16 %v653_v44, %v653_v44 }
 0x1bc   : > { %v15574_v53 = vunpack.c.l.b16 %v753_v45 }
 0x1c1   : > { %v655_v46 = vpop.f32.mrf.mxu3 }
 0x1c2   : > { %v754_v47 = vpack.c.bf16 %v655_v46, %v655_v46 }
 0x1c4   : > { %v15576_v54 = vunpack.c.l.b16 %v754_v47 }
 0x1c6   : > { %v1021_v56 = vpack.c.b16 %v15576_v54, %v15574_v53  ;;  %697 = vmatmul.bf16.gmra.mxu3 %v14771_v48 }
 0x1c9   : > { %v658_v59 = vpop.f32.mrf.mxu3 }
 0x1ca   : > { %v755_v60 = vpack.c.bf16 %v658_v59, %v658_v59 }
 0x1cc   : > { %v15583_v0 = vunpack.c.l.b16 %v755_v60  ;;  %v14779_v60 = vld [vmem:[%s19796_s2 + $0xa8] sm:$0xff] }
 0x1d1   : > { %v660_v61 = vpop.f32.mrf.mxu3 }
 0x1d2   : > { %v756_v62 = vpack.c.bf16 %v660_v61, %v660_v61 }
 0x1d4   : > { %v15585_v1 = vunpack.c.l.b16 %v756_v62 }
 0x1d6   : > { %702 = vmatmul.bf16.gmra.mxu3 %v14772_v63  ;;  %v1022_v2 = vpack.c.b16 %v15585_v1, %v15583_v0  ;;  %v258_v63 = vld [vmem:[%s19798_s4] ss:$0 sm:$0xff] }
 0x1d9   : > { %v663_v3 = vpop.f32.mrf.mxu3 }
 0x1da   : > { %v757_v4 = vpack.c.bf16 %v663_v3, %v663_v3  ;;  %v14761_v3 = vld [vmem:[%s19796_s2 + $0x10] sm:$0xff] }
 0x1db   : > { %314 = vmatpush.bf16.msra.mxu1 %v14761_v3  ;;  %v14782_v3 = vld [vmem:[%s19796_s2 + $0xc0] sm:$0xff] }
 0x1dc   : > { %v15595_v9 = vunpack.c.l.b16 %v757_v4 }
 0x1e1   : > { %v665_v5 = vpop.f32.mrf.mxu3 }
 0x1e2   : > { %v758_v6 = vpack.c.bf16 %v665_v5, %v665_v5  ;;  %v279_v5 = vpop.f32.mrf.mxu0 }
 0x1e4   : > { %v15597_v10 = vunpack.c.l.b16 %v758_v6  ;;  %v280_v6 = vadd.f32 %v279_v5, %v258_v63  ;;  %v14786_v63 = vld [vmem:[%s19796_s2 + $0xe0] sm:$0xff] }
 0x1e5   : > { %983 = vmatpush.bf16.msra.mxu0 %v14786_v63 }
 0x1e6   : > { %707 = vmatmul.bf16.gmra.mxu3 %v14773_v7  ;;  %v1023_v11 = vpack.c.b16 %v15597_v10, %v15595_v9  ;;  %vm283_vm8 = vcmp.ge.f32.partialorder %v280_v6, 0.0  ;;  %v284_v8 = vmul.f32 0.2, %v280_v6 }
 0x1e9   : > { %v668_v12 = vpop.f32.mrf.mxu3 }
 0x1ea   : > { %v759_v13 = vpack.c.bf16 %v668_v12, %v668_v12  ;;  %v14760_v12 = vld [vmem:[%s19796_s2 + $0x8] sm:$0xff] }
 0x1eb   : > { %315 = vmatpush.bf16.msra.mxu1 %v14760_v12 }
 0x1ec   : > { %v15604_v17 = vunpack.c.l.b16 %v759_v13  ;;  %v285_v13 = vsel %vm283_vm8, %v280_v6, %v284_v8 }
 0x1f1   : > { %v670_v14 = vpop.f32.mrf.mxu3 }
 0x1f2   : > { %v760_v15 = vpack.c.bf16 %v670_v14, %v670_v14  ;;  %v286_v14 = vpack.c.bf16 %v285_v13, %v285_v13 }
 0x1f4   : > { %v15606_v18 = vunpack.c.l.b16 %v760_v15  ;;  %12000 = vmatmul.msk.bf16.vlgmr.msra.gmra.mxu1 %vm304_vm9, %v286_v14  ;;  %v281_v15 = vpop.f32.mrf.mxu0 }
 0x1f6   : > { %712 = vmatmul.bf16.gmra.mxu3 %v14774_v16  ;;  %v1024_v19 = vpack.c.b16 %v15606_v18, %v15604_v17 }
 0x1f9   : > { %v673_v20 = vpop.f32.mrf.mxu3 }
 0x1fa   : > { %v761_v21 = vpack.c.bf16 %v673_v20, %v673_v20 }
 0x1fc   : > { %v811_v25 = vunpack.c.l.b16 %v761_v21 }
 0x201   : > { %v675_v22 = vpop.f32.mrf.mxu3 }
 0x202   : > { %v762_v23 = vpack.c.bf16 %v675_v22, %v675_v22  ;;  %v14780_v22 = vld [vmem:[%s19796_s2 + $0xb0] sm:$0xff] }
 0x204   : > { %v812_v29 = vunpack.c.l.b16 %v762_v23 }
 0x206   : > { %v819_v30 = vpack.c.b16 %v812_v29, %v811_v25  ;;  %717 = vmatmul.bf16.gmra.mxu3 %v14775_v24 }
 0x208   : > { %12093 = vmatmul.msk.bf16.vlgmr.msrb.gmra.mxu0 %vm829_vm7, %v819_v30 }
 0x209   : > { %v678_v28 = vpop.f32.mrf.mxu3 }
 0x20a   : > { %v763_v31 = vpack.c.bf16 %v678_v28, %v678_v28 }
 0x20c   : > { %v813_v34 = vunpack.c.l.b16 %v763_v31 }
 0x211   : > { %v680_v32 = vpop.f32.mrf.mxu3 }
 0x212   : > { %v764_v33 = vpack.c.bf16 %v680_v32, %v680_v32  ;;  %v14781_v32 = vld [vmem:[%s19796_s2 + $0xb8] sm:$0xff] }
 0x214   : > { %v814_v35 = vunpack.c.l.b16 %v764_v33  ;;  %v14785_v33 = vld [vmem:[%s19796_s2 + $0xd8] sm:$0xff] }
 0x215   : > { %916 = vmatpush.bf16.msrb.mxu1 %v14785_v33 }
 0x216   : > { %722 = vmatmul.bf16.gmra.mxu3 %v14776_v27  ;;  %v820_v26 = vpack.c.b16 %v814_v35, %v813_v34 }
 0x218   : > { %12094 = vmatmul.msk.bf16.gmra.mxu0 %vm829_vm7, %v820_v26 }
 0x219   : > { %v683_v36 = vpop.f32.mrf.mxu3  ;;  %1050 = vmatpush.bf16.msra.mxu1 %v14782_v3 }
 0x21a   : > { %v765_v37 = vpack.c.bf16 %v683_v36, %v683_v36 }
 0x21c   : > { %v815_v42 = vunpack.c.l.b16 %v765_v37 }
 0x221   : > { %v685_v38 = vpop.f32.mrf.mxu3 }
 0x222   : > { %v766_v39 = vpack.c.bf16 %v685_v38, %v685_v38 }
 0x224   : > { %v816_v43 = vunpack.c.l.b16 %v766_v39 }
 0x226   : > { %727 = vmatmul.bf16.gmra.mxu3 %v14777_v40  ;;  %v821_v44 = vpack.c.b16 %v816_v43, %v815_v42 }
 0x228   : > { %12095 = vmatmul.msk.bf16.gmra.mxu0 %vm829_vm7, %v821_v44 }
 0x229   : > { %v688_v45 = vpop.f32.mrf.mxu3 }
 0x22a   : > { %v767_v46 = vpack.c.bf16 %v688_v45, %v688_v45 }
 0x22c   : > { %v817_v50 = vunpack.c.l.b16 %v767_v46 }
 0x231   : > { %v690_v47 = vpop.f32.mrf.mxu3 }
 0x232   : > { %v768_v48 = vpack.c.bf16 %v690_v47, %v690_v47 }
 0x234   : > { %v818_v51 = vunpack.c.l.b16 %v768_v48 }
 0x236   : > { %732 = vmatmul.bf16.gmra.mxu3 %v14778_v49  ;;  %v822_v52 = vpack.c.b16 %v818_v51, %v817_v50 }
 0x238   : > { %12096 = vmatmul.msk.bf16.gmra.mxu0 %vm829_vm7, %v822_v52 }
 0x239   : > { %v693_v55 = vpop.f32.mrf.mxu3 }
 0x23a   : > { %v769_v57 = vpack.c.bf16 %v693_v55, %v693_v55 }
 0x23c   : > { %v1080_v61 = vunpack.c.l.b16 %v769_v57 }
 0x241   : > { %v695_v58 = vpop.f32.mrf.mxu3 }
 0x242   : > { %v770_v59 = vpack.c.bf16 %v695_v58, %v695_v58 }
 0x244   : > { %v1081_v62 = vunpack.c.l.b16 %v770_v59 }
 0x246   : > { %v1088_v4 = vpack.c.b16 %v1081_v62, %v1080_v61  ;;  %737 = vmatmul.bf16.gmra.mxu3 %v14779_v60 }
 0x248   : > { %12125 = vmatmul.msk.bf16.vlgmr.msrb.gmra.mxu2 %vm829_vm7, %v1088_v4 }
 0x249   : > { %v698_v7 = vpop.f32.mrf.mxu3 }
 0x24a   : > { %v771_v16 = vpack.c.bf16 %v698_v7, %v698_v7 }
 0x24c   : > { %v1082_v23 = vunpack.c.l.b16 %v771_v16 }
 0x251   : > { %v700_v20 = vpop.f32.mrf.mxu3 }
 0x252   : > { %v772_v21 = vpack.c.bf16 %v700_v20, %v700_v20 }
 0x254   : > { %v1083_v24 = vunpack.c.l.b16 %v772_v21 }
 0x256   : > { %742 = vmatmul.bf16.gmra.mxu3 %v14780_v22  ;;  %v1089_v25 = vpack.c.b16 %v1083_v24, %v1082_v23 }
 0x258   : > { %12126 = vmatmul.msk.bf16.gmra.mxu2 %vm829_vm7, %v1089_v25 }
 0x259   : > { %v703_v29 = vpop.f32.mrf.mxu3 }
 0x25a   : > { %v773_v30 = vpack.c.bf16 %v703_v29, %v703_v29 }
 0x25c   : > { %v1084_v27 = vunpack.c.l.b16 %v773_v30 }
 0x261   : > { %v705_v28 = vpop.f32.mrf.mxu3 }
 0x262   : > { %v774_v31 = vpack.c.bf16 %v705_v28, %v705_v28 }
 0x264   : > { %v1085_v34 = vunpack.c.l.b16 %v774_v31 }
 0x266   : > { %747 = vmatmul.bf16.gmra.mxu3 %v14781_v32  ;;  %v1090_v35 = vpack.c.b16 %v1085_v34, %v1084_v27 }
 0x268   : > { %12127 = vmatmul.msk.bf16.gmra.mxu2 %vm829_vm7, %v1090_v35 }
 0x269   : > { %v708_v26 = vpop.f32.mrf.mxu3 }
 0x26a   : > { %v775_v36 = vpack.c.bf16 %v708_v26, %v708_v26 }
 0x26c   : > { %v1086_v39 = vunpack.c.l.b16 %v775_v36 }
 0x271   : > { %v710_v37 = vpop.f32.mrf.mxu3  ;;  %v15670_v28 = vpop.f32.mrf.mxu1 }
 0x272   : > { %v776_v38 = vpack.c.bf16 %v710_v37, %v710_v37 }
 0x274   : > { %v1087_v40 = vunpack.c.l.b16 %v776_v38 }
 0x276   : > { %v1091_v41 = vpack.c.b16 %v1087_v40, %v1086_v39 }
 0x278   : > { %12128 = vmatmul.msk.bf16.gmra.mxu2 %vm829_vm7, %v1091_v41 }
 0x279   : > { %v713_v42 = vpop.f32.mrf.mxu3  ;;  %v319_v27 = vpop.f32.mrf.mxu1 }
 0x27a   : > { %v777_v43 = vpack.c.bf16 %v713_v42, %v713_v42 }
 0x27c   : > { %v879_v46 = vunpack.c.l.b16 %v777_v43 }
 0x281   : > { %v715_v44 = vpop.f32.mrf.mxu3 }
 0x282   : > { %v778_v45 = vpack.c.bf16 %v715_v44, %v715_v44 }
 0x284   : > { %v880_v47 = vunpack.c.l.b16 %v778_v45 }
 0x285   : > { %v851_v44 = vpop.f32.mrf.mxu0 }
 0x286   : > { %v887_v48 = vpack.c.b16 %v880_v47, %v879_v46 }
 0x288   : > { %12101 = vmatmul.msk.bf16.vlgmr.msrb.gmra.mxu1 %vm829_vm7, %v887_v48 }
 0x289   : > { %v718_v49 = vpop.f32.mrf.mxu3 }
 0x28a   : > { %v779_v50 = vpack.c.bf16 %v718_v49, %v718_v49 }
 0x28c   : > { %v881_v55 = vunpack.c.l.b16 %v779_v50 }
 0x28d   : > { %v853_v45 = vpop.f32.mrf.mxu0 }
 0x291   : > { %v720_v51 = vpop.f32.mrf.mxu3 }
 0x292   : > { %v780_v52 = vpack.c.bf16 %v720_v51, %v720_v51 }
 0x294   : > { %v882_v57 = vunpack.c.l.b16 %v780_v52 }
 0x296   : > { %v888_v58 = vpack.c.b16 %v882_v57, %v881_v55 }
 0x298   : > { %12102 = vmatmul.msk.bf16.gmra.mxu1 %vm829_vm7, %v888_v58 }
 0x299   : > { %v723_v59 = vpop.f32.mrf.mxu3 }
 0x29a   : > { %v781_v60 = vpack.c.bf16 %v723_v59, %v723_v59 }
 0x29c   : > { %v883_v4 = vunpack.c.l.b16 %v781_v60 }
 0x2a1   : > { %v725_v61 = vpop.f32.mrf.mxu3 }
 0x2a2   : > { %v782_v62 = vpack.c.bf16 %v725_v61, %v725_v61 }
 0x2a4   : > { %v884_v5 = vunpack.c.l.b16 %v782_v62 }
 0x2a6   : > { %v889_v6 = vpack.c.b16 %v884_v5, %v883_v4 }
 0x2a8   : > { %12103 = vmatmul.msk.bf16.gmra.mxu1 %vm829_vm7, %v889_v6 }
 0x2a9   : > { %v728_v7 = vpop.f32.mrf.mxu3 }
 0x2aa   : > { %v783_v8 = vpack.c.bf16 %v728_v7, %v728_v7 }
 0x2ac   : > { %v885_v14 = vunpack.c.l.b16 %v783_v8 }
 0x2b1   : > { %v730_v12 = vpop.f32.mrf.mxu3 }
 0x2b2   : > { %v784_v13 = vpack.c.bf16 %v730_v12, %v730_v12 }
 0x2b4   : > { %v886_v15 = vunpack.c.l.b16 %v784_v13 }
 0x2b6   : > { %v890_v16 = vpack.c.b16 %v886_v15, %v885_v14 }
 0x2b8   : > { %12104 = vmatmul.msk.bf16.gmra.mxu1 %vm829_vm7, %v890_v16 }
 0x2b9   : > { %v733_v20 = vpop.f32.mrf.mxu3 }
 0x2ba   : > { %v785_v21 = vpack.c.bf16 %v733_v20, %v733_v20 }
 0x2bc   : > { %v946_v24 = vunpack.c.l.b16 %v785_v21 }
 0x2c1   : > { %v735_v22 = vpop.f32.mrf.mxu3 }
 0x2c2   : > { %v786_v23 = vpack.c.bf16 %v735_v22, %v735_v22 }
 0x2c4   : > { %v947_v25 = vunpack.c.l.b16 %v786_v23 }
 0x2c6   : > { %v954_v29 = vpack.c.b16 %v947_v25, %v946_v24 }
 0x2c8   : > { %12109 = vmatmul.msk.bf16.vlgmr.msra.gmra.mxu0 %vm829_vm7, %v954_v29  ;;  %12117 = vmatmul.msk.bf16.vlgmr.msra.gmra.mxu1 %vm829_vm7, %v1021_v56 }
 0x2c9   : > { %v738_v30 = vpop.f32.mrf.mxu3 }
 0x2ca   : > { %v787_v31 = vpack.c.bf16 %v738_v30, %v738_v30 }
 0x2cb   : > { %v1119_v46 = vpop.f32.mrf.mxu2 }
 0x2cc   : > { %v948_v34 = vunpack.c.l.b16 %v787_v31 }
 0x2d1   : > { %v740_v32 = vpop.f32.mrf.mxu3 }
 0x2d2   : > { %v788_v33 = vpack.c.bf16 %v740_v32, %v740_v32 }
 0x2d3   : > { %v1121_v17 = vpop.f32.mrf.mxu2 }
 0x2d4   : > { %v949_v35 = vunpack.c.l.b16 %v788_v33 }
 0x2d6   : > { %v955_v26 = vpack.c.b16 %v949_v35, %v948_v34 }
 0x2d8   : > { %12110 = vmatmul.msk.bf16.gmra.mxu0 %vm829_vm7, %v955_v26  ;;  %12118 = vmatmul.msk.bf16.gmra.mxu1 %vm829_vm7, %v1022_v2 }
 0x2d9   : > { %v743_v53 = vpop.f32.mrf.mxu3 }
 0x2da   : > { %v789_v54 = vpack.c.bf16 %v743_v53, %v743_v53 }
 0x2db   : > { %v1124_v3 = vpop.f32.mrf.mxu2 }
 0x2dc   : > { %v950_v37 = vunpack.c.l.b16 %v789_v54 }
 0x2e1   : > { %v745_v56 = vpop.f32.mrf.mxu3 }
 0x2e2   : > { %v790_v36 = vpack.c.bf16 %v745_v56, %v745_v56 }
 0x2e3   : > { %v1126_v7 = vpop.f32.mrf.mxu2 }
 0x2e4   : > { %v951_v38 = vunpack.c.l.b16 %v790_v36 }
 0x2e6   : > { %v956_v39 = vpack.c.b16 %v951_v38, %v950_v37 }
 0x2e8   : > { %12111 = vmatmul.msk.bf16.gmra.mxu0 %vm829_vm7, %v956_v39  ;;  %12119 = vmatmul.msk.bf16.gmra.mxu1 %vm829_vm7, %v1023_v11  ;;  %v856_v11 = vpop.f32.mrf.mxu0 }
 0x2e9   : > { %v748_v40 = vpop.f32.mrf.mxu3 }
 0x2ea   : > { %v791_v41 = vpack.c.bf16 %v748_v40, %v748_v40 }
 0x2eb   : > { %v1129_v15 = vpop.f32.mrf.mxu2 }
 0x2ec   : > { %v952_v1 = vunpack.c.l.b16 %v791_v41 }
 0x2f0   : > { %v858_v48 = vpop.f32.mrf.mxu0 }
 0x2f1   : > { %v750_v42 = vpop.f32.mrf.mxu3 }
 0x2f2   : > { %v792_v0 = vpack.c.bf16 %v750_v42, %v750_v42 }
 0x2f3   : > { %v1131_v21 = vpop.f32.mrf.mxu2 }
 0x2f4   : > { %v953_v2 = vunpack.c.l.b16 %v792_v0 }
 0x2f6   : > { %v957_v43 = vpack.c.b16 %v953_v2, %v952_v1 }
 0x2f8   : > { %12112 = vmatmul.msk.bf16.gmra.mxu0 %vm829_vm7, %v957_v43  ;;  %12120 = vmatmul.msk.bf16.gmra.mxu1 %vm829_vm7, %v1024_v19  ;;  %v861_v51 = vpop.f32.mrf.mxu0 }
 0x2fb   : > { %v1134_v24 = vpop.f32.mrf.mxu2 }
 0x300   : > { %v863_v55 = vpop.f32.mrf.mxu0 }
 0x303   : > { %v1136_v38 = vpop.f32.mrf.mxu2 }
 0x305   : > { %v918_v9 = vpop.f32.mrf.mxu1 }
 0x306   : > { %v1120_v10 = vadd.f32 %v1119_v46, %v918_v9 }
 0x308   : > { %v866_v58 = vpop.f32.mrf.mxu0 }
 0x30d   : > { %v920_v47 = vpop.f32.mrf.mxu1 }
 0x30e   : > { %v1122_v43 = vadd.f32 %v1121_v17, %v920_v47 }
 0x310   : > { %v868_v60 = vpop.f32.mrf.mxu0 }
 0x315   : > { %v923_v49 = vpop.f32.mrf.mxu1 }
 0x316   : > { %v1125_v39 = vadd.f32 %v1124_v3, %v923_v49 }
 0x31d   : > { %v925_v50 = vpop.f32.mrf.mxu1 }
 0x31e   : > { %v1127_v54 = vadd.f32 %v1126_v7, %v925_v50 }
 0x325   : > { %v928_v52 = vpop.f32.mrf.mxu1 }
 0x326   : > { %v1130_v35 = vadd.f32 %v1129_v15, %v928_v52 }
 0x32d   : > { %v930_v57 = vpop.f32.mrf.mxu1 }
 0x32e   : > { %v1132_v33 = vadd.f32 %v1131_v21, %v930_v57 }
 0x335   : > { %v933_v59 = vpop.f32.mrf.mxu1 }
 0x336   : > { %v1135_v29 = vadd.f32 %v1134_v24, %v933_v59 }
 0x33d   : > { %v935_v61 = vpop.f32.mrf.mxu1 }
 0x33e   : > { %v1137_v42 = vadd.f32 %v1136_v38, %v935_v61 }
 0x345   : > { %v985_v18 = vpop.f32.mrf.mxu0  ;;  %v1052_v19 = vpop.f32.mrf.mxu1 }
 0x346   : > { %v1053_v62 = vadd.f32 %v1052_v19, %v851_v44  ;;  %v1155_v44 = vld [vmem:[%s19798_s4 + $0x30] ss:$0 sm:$0xff] }
 0x348   : > { %v1139_v63 = vadd.f32 %v1120_v10, %v1053_v62 }
 0x34a   : > { %v15687_v4 = vadd.f32 %v1139_v63, %v985_v18 }
 0x34d   : > { %v987_v5 = vpop.f32.mrf.mxu0  ;;  %v1054_v6 = vpop.f32.mrf.mxu1 }
 0x34e   : > { %v1055_v40 = vadd.f32 %v1054_v6, %v853_v45 }
 0x355   : > { %v990_v8 = vpop.f32.mrf.mxu0  ;;  %v1057_v12 = vpop.f32.mrf.mxu1 }
 0x356   : > { %v1058_v56 = vadd.f32 %v1057_v12, %v856_v11  ;;  %v1140_v11 = vadd.f32 %v1122_v43, %v1055_v40 }
 0x358   : > { %v1141_v46 = vadd.f32 %v1125_v39, %v1058_v56  ;;  %v1148_v59 = vadd.f32 %v1140_v11, %v987_v5  ;;  %v14799_v56 = vld [vmem:[%s19796_s2 + $0x148] sm:$0xff] }
 0x35a   : > { %v1149_v45 = vadd.f32 %v1141_v46, %v990_v8  ;;  %v1157_v3 = vadd.f32 %v1155_v44, %v1148_v59  ;;  %v1156_v8 = vadd.f32 %v1155_v44, %v15687_v4  ;;  %v14787_v4 = vld [vmem:[%s19796_s2 + $0xe8] sm:$0xff] }
 0x35c   : > { %v1158_v17 = vadd.f32 %v1155_v44, %v1149_v45  ;;  %v1173_v15 = vmul.f32 0.2, %v1157_v3  ;;  %vm1165_vm2 = vcmp.ge.f32.partialorder %v1157_v3, 0.0  ;;  %vm1164_vm3 = vcmp.ge.f32.partialorder %v1156_v8, 0.0 }
 0x35d   : > { %v992_v13 = vpop.f32.mrf.mxu0  ;;  %v1059_v14 = vpop.f32.mrf.mxu1 }
 0x35e   : > { %v1060_v26 = vadd.f32 %v1059_v14, %v858_v48  ;;  %v1174_v12 = vmul.f32 0.2, %v1158_v17  ;;  %vm1166_vm15 = vcmp.ge.f32.partialorder %v1158_v17, 0.0 }
 0x360   : > { %v1142_v0 = vadd.f32 %v1127_v54, %v1060_v26  ;;  %v14800_v26 = vld [vmem:[%s19796_s2 + $0x150] sm:$0xff] }
 0x361   : > { %1426 = vmatpush.bf16.msrb.mxu1 %v14800_v26  ;;  %v14796_v54 = vld [vmem:[%s19796_s2 + $0x130] sm:$0xff] }
 0x365   : > { %v995_v16 = vpop.f32.mrf.mxu0  ;;  %v1062_v20 = vpop.f32.mrf.mxu1  ;;  %1427 = vmatpush.bf16.msrb.mxu1 %v14799_v56 }
 0x366   : > { %v1063_v27 = vadd.f32 %v1062_v20, %v861_v51  ;;  %v1150_v51 = vadd.f32 %v1142_v0, %v992_v13  ;;  %v1172_v20 = vmul.f32 0.2, %v1156_v8 }
 0x368   : > { %v1143_v36 = vadd.f32 %v1130_v35, %v1063_v27  ;;  %v1159_v47 = vadd.f32 %v1155_v44, %v1150_v51  ;;  %v14794_v27 = vld [vmem:[%s19796_s2 + $0x120] sm:$0xff] }
 0x36a   : > { %v1151_v9 = vadd.f32 %v1143_v36, %v995_v16  ;;  %v1175_v7 = vmul.f32 0.2, %v1159_v47  ;;  %vm1167_vm14 = vcmp.ge.f32.partialorder %v1159_v47, 0.0  ;;  %v1182_v16 = vsel %vm1166_vm15, %v1158_v17, %v1174_v12  ;;  %v14797_v17 = vld [vmem:[%s19796_s2 + $0x138] sm:$0xff] }
 0x36c   : > { %v1183_v14 = vsel %vm1167_vm14, %v1159_v47, %v1175_v7 }
 0x36d   : > { %v997_v22 = vpop.f32.mrf.mxu0  ;;  %v1064_v23 = vpop.f32.mrf.mxu1  ;;  %v1209_v21 = vpack.c.bf16 %v1183_v14, %v1182_v16 }
 0x36e   : > { %v1065_v30 = vadd.f32 %v1064_v23, %v863_v55  ;;  %v1160_v55 = vadd.f32 %v1155_v44, %v1151_v9  ;;  %v1180_v23 = vsel %vm1164_vm3, %v1156_v8, %v1172_v20 }
 0x370   : > { %v1144_v53 = vadd.f32 %v1132_v33, %v1065_v30  ;;  %v1176_v62 = vmul.f32 0.2, %v1160_v55  ;;  %vm1168_vm13 = vcmp.ge.f32.partialorder %v1160_v55, 0.0  ;;  %v14790_v30 = vld [vmem:[%s19796_s2 + $0x100] sm:$0xff]  ;;  %v14793_v33 = vld [vmem:[%s19796_s2 + $0x118] sm:$0xff] }
 0x372   : > { %v1152_v1 = vadd.f32 %v1144_v53, %v997_v22  ;;  %v1184_v5 = vsel %vm1168_vm13, %v1160_v55, %v1176_v62  ;;  %v1181_v22 = vsel %vm1165_vm2, %v1157_v3, %v1173_v15 }
 0x373   : > { %v1208_v24 = vpack.c.bf16 %v1181_v22, %v1180_v23 }
 0x374   : > { %v1161_v52 = vadd.f32 %v1155_v44, %v1152_v1 }
 0x375   : > { %v1067_v25 = vpop.f32.mrf.mxu1  ;;  %v1000_v32 = vpop.f32.mrf.mxu0 }
 0x376   : > { %v1068_v31 = vadd.f32 %v1067_v25, %v866_v58  ;;  %v1177_v61 = vmul.f32 0.2, %v1161_v52  ;;  %vm1169_vm12 = vcmp.ge.f32.partialorder %v1161_v52, 0.0  ;;  %v14788_v25 = vld [vmem:[%s19796_s2 + $0xf0] sm:$0xff] }
 0x378   : > { %v1145_v34 = vadd.f32 %v1135_v29, %v1068_v31  ;;  %v1185_v6 = vsel %vm1169_vm12, %v1161_v52, %v1177_v61  ;;  %v14789_v29 = vld [vmem:[%s19796_s2 + $0xf8] sm:$0xff]  ;;  %v14791_v31 = vld [vmem:[%s19796_s2 + $0x108] sm:$0xff] }
 0x379   : > { %v1210_v13 = vpack.c.bf16 %v1185_v6, %v1184_v5  ;;  %v14803_v52 = vld [vmem:[%s19796_s2 + $0x168] sm:$0xff]  ;;  %v14805_v61 = vld [vmem:[%s19796_s2 + $0x178] sm:$0xff] }
 0x37a   : > { %v1153_v37 = vadd.f32 %v1145_v34, %v1000_v32  ;;  %v14792_v32 = vld [vmem:[%s19796_s2 + $0x110] sm:$0xff]  ;;  %v14795_v34 = vld [vmem:[%s19796_s2 + $0x128] sm:$0xff] }
 0x37c   : > { %v1162_v10 = vadd.f32 %v1155_v44, %v1153_v37 }
 0x37d   : > { %v1069_v41 = vpop.f32.mrf.mxu1  ;;  %v1002_v50 = vpop.f32.mrf.mxu0 }
 0x37e   : > { %v1070_v2 = vadd.f32 %v1069_v41, %v868_v60  ;;  %v1178_v57 = vmul.f32 0.2, %v1162_v10  ;;  %vm1170_vm10 = vcmp.ge.f32.partialorder %v1162_v10, 0.0 }
 0x380   : > { %v1146_v48 = vadd.f32 %v1137_v42, %v1070_v2  ;;  %v1186_v18 = vsel %vm1170_vm10, %v1162_v10, %v1178_v57  ;;  %v14806_v57 = vld [vmem:[%s19796_s2 + $0x180] sm:$0xff] }
 0x382   : > { %v1154_v49 = vadd.f32 %v1146_v48, %v1002_v50  ;;  %v14804_v50 = vld [vmem:[%s19796_s2 + $0x170] sm:$0xff] }
 0x383   : > { %1473 = vmatpush.bf16.msra.mxu1 %v14804_v50 }
 0x384   : > { %v1163_v58 = vadd.f32 %v1155_v44, %v1154_v49 }
 0x386   : > { %v1179_v60 = vmul.f32 0.2, %v1163_v58  ;;  %vm1171_vm11 = vcmp.ge.f32.partialorder %v1163_v58, 0.0 }
 0x387   : > { %1474 = vmatpush.bf16.msra.mxu1 %v14803_v52 }
 0x388   : > { %v1187_v19 = vsel %vm1171_vm11, %v1163_v58, %v1179_v60  ;;  %v14798_v58 = vld [vmem:[%s19796_s2 + $0x140] sm:$0xff] }
 0x389   : > { %v1211_v63 = vpack.c.bf16 %v1187_v19, %v1186_v18 }
 0x38b   : > { %1297 = vmatpush.bf16.msra.mxu2 %v1211_v63 }
 0x38f   : > { %1298 = vmatpush.bf16.msra.mxu2 %v1210_v13  ;;  %v14802_v13 = vld [vmem:[%s19796_s2 + $0x160] sm:$0xff] }
 0x393   : > { %1299 = vmatpush.bf16.msra.mxu2 %v1209_v21 }
 0x397   : > { %1300 = vmatpush.bf16.msra.mxu2 %v1208_v24  ;;  %v14801_v24 = vld [vmem:[%s19796_s2 + $0x158] sm:$0xff] }
 0x39a   : > { %12169 = vmatmul.msk.bf16.vlgmr.msra.gmra.mxu2 %vm1262_vm5, %v14787_v4 }
 0x39b   : > { %1520 = vmatpush.bf16.msrb.mxu2 %v14806_v57 }
 0x39f   : > { %1521 = vmatpush.bf16.msrb.mxu2 %v14805_v61 }
 0x3a3   : > { %1614 = vmatpush.bf16.msra.mxu2 %v14802_v13 }
 0x3a7   : > { %1615 = vmatpush.bf16.msra.mxu2 %v14801_v24 }
 0x3aa   : > { %12170 = vmatmul.msk.bf16.gmra.mxu2 %vm1262_vm5, %v14788_v25 }
 0x3ba   : > { %12171 = vmatmul.msk.bf16.gmra.mxu2 %vm1262_vm5, %v14789_v29 }
 0x3ca   : > { %12172 = vmatmul.msk.bf16.gmra.mxu2 %vm1262_vm5, %v14790_v30 }
 0x3da   : > { %12173 = vmatmul.msk.bf16.gmra.mxu2 %vm1262_vm5, %v14791_v31 }
 0x3ea   : > { %12174 = vmatmul.msk.bf16.gmra.mxu2 %vm1262_vm5, %v14792_v32 }
 0x3fa   : > { %12175 = vmatmul.msk.bf16.gmra.mxu2 %vm1262_vm5, %v14793_v33 }
 0x40a   : > { %12176 = vmatmul.msk.bf16.gmra.mxu2 %vm1262_vm5, %v14794_v27 }
 0x41a   : > { %12177 = vmatmul.msk.bf16.gmra.mxu2 %vm1262_vm5, %v14795_v34 }
 0x41d   : > { %v15729_v35 = vpop.f32.mrf.mxu2 }
 0x41e   : > { %v1352_v16 = vpack.c.bf16 %v15729_v35, %v15729_v35 }
 0x420   : > { %v1537_v4 = vunpack.c.l.b16 %v1352_v16 }
 0x425   : > { %v15734_v53 = vpop.f32.mrf.mxu2 }
 0x426   : > { %v1353_v15 = vpack.c.bf16 %v15734_v53, %v15734_v53 }
 0x428   : > { %v1538_v22 = vunpack.c.l.b16 %v1353_v15 }
 0x42a   : > { %12178 = vmatmul.msk.bf16.gmra.mxu2 %vm1262_vm5, %v14796_v54  ;;  %v1541_v30 = vpack.c.b16 %v1538_v22, %v1537_v4  ;;  %v1635_v22 = vld [vmem:[%s19798_s4 + $0x40] ss:$0 sm:$0xff] }
 0x42d   : > { %v15743_v36 = vpop.f32.mrf.mxu2 }
 0x42e   : > { %v1354_v27 = vpack.c.bf16 %v15743_v36, %v15743_v36 }
 0x430   : > { %v1539_v54 = vunpack.c.l.b16 %v1354_v27 }
 0x435   : > { %v15745_v37 = vpop.f32.mrf.mxu2 }
 0x436   : > { %v1355_v33 = vpack.c.bf16 %v15745_v37, %v15745_v37 }
 0x438   : > { %v1540_v26 = vunpack.c.l.b16 %v1355_v33 }
 0x43d   : > { %v1312_v38 = vpop.f32.mrf.mxu2 }
 0x43e   : > { %v1356_v39 = vpack.c.bf16 %v1312_v38, %v1312_v38 }
 0x440   : > { %v1396_v42 = vunpack.c.l.b16 %v1356_v39  ;;  %v1542_v39 = vpack.c.b16 %v1540_v26, %v1539_v54 }
 0x445   : > { %v1314_v40 = vpop.f32.mrf.mxu2 }
 0x446   : > { %v1357_v41 = vpack.c.bf16 %v1314_v40, %v1314_v40 }
 0x448   : > { %v1397_v0 = vunpack.c.l.b16 %v1357_v41 }
 0x44a   : > { %v1400_v1 = vpack.c.b16 %v1397_v0, %v1396_v42 }
 0x44c   : > { %12187 = vmatmul.msk.bf16.vlgmr.msrb.gmra.mxu1 %vm304_vm9, %v1400_v1 }
 0x44d   : > { %v1317_v2 = vpop.f32.mrf.mxu2  ;;  %1567 = vmatpush.bf16.msrb.mxu1 %v14798_v58 }
 0x44e   : > { %v1358_v43 = vpack.c.bf16 %v1317_v2, %v1317_v2 }
 0x450   : > { %v1398_v9 = vunpack.c.l.b16 %v1358_v43 }
 0x451   : > { %1568 = vmatpush.bf16.msrb.mxu1 %v14797_v17 }
 0x455   : > { %v1319_v44 = vpop.f32.mrf.mxu2 }
 0x456   : > { %v1359_v46 = vpack.c.bf16 %v1319_v44, %v1319_v44 }
 0x458   : > { %v1399_v10 = vunpack.c.l.b16 %v1359_v46 }
 0x45a   : > { %v1401_v48 = vpack.c.b16 %v1399_v10, %v1398_v9 }
 0x45c   : > { %12188 = vmatmul.msk.bf16.gmra.mxu1 %vm304_vm9, %v1401_v48 }
 0x45d   : > { %v15749_v11 = vpop.f32.mrf.mxu2 }
 0x45e   : > { %v1360_v37 = vpack.c.bf16 %v15749_v11, %v15749_v11 }
 0x460   : > { %v1584_v42 = vunpack.c.l.b16 %v1360_v37  ;;  %v14810_v37 = vld [vmem:[%s19796_s2 + $0x1a0] sm:$0xff] }
 0x465   : > { %v15754_v51 = vpop.f32.mrf.mxu2 }
 0x466   : > { %v1361_v41 = vpack.c.bf16 %v15754_v51, %v15754_v51 }
 0x468   : > { %v1585_v36 = vunpack.c.l.b16 %v1361_v41  ;;  %v14809_v41 = vld [vmem:[%s19796_s2 + $0x198] sm:$0xff] }
 0x46a   : > { %v1588_v0 = vpack.c.b16 %v1585_v36, %v1584_v42  ;;  %v14811_v36 = vld [vmem:[%s19796_s2 + $0x1a8] sm:$0xff] }
 0x46b   : > { %v14815_v42 = vld [vmem:[%s19796_s2 + $0x1c8] sm:$0xff] }
 0x46c   : > { %1962 = vmatpush.bf16.msrb.mxu0 %v14815_v42 }
 0x46d   : > { %v15759_v49 = vpop.f32.mrf.mxu2 }
 0x46e   : > { %v1362_v2 = vpack.c.bf16 %v15759_v49, %v15759_v49 }
 0x470   : > { %v1586_v44 = vunpack.c.l.b16 %v1362_v2  ;;  %v14812_v2 = vld [vmem:[%s19796_s2 + $0x1b0] sm:$0xff] }
 0x475   : > { %v15761_v45 = vpop.f32.mrf.mxu2 }
 0x476   : > { %v1363_v1 = vpack.c.bf16 %v15761_v45, %v15761_v45 }
 0x478   : > { %v1587_v43 = vunpack.c.l.b16 %v1363_v1  ;;  %v14813_v1 = vld [vmem:[%s19796_s2 + $0x1b8] sm:$0xff] }
 0x47a   : > { %v1589_v46 = vpack.c.b16 %v1587_v43, %v1586_v44  ;;  %v14819_v43 = vld [vmem:[%s19796_s2 + $0x1e8] sm:$0xff]  ;;  %v14818_v44 = vld [vmem:[%s19796_s2 + $0x1e0] sm:$0xff] }
 0x47d   : > { %v1332_v55 = vpop.f32.mrf.mxu2 }
 0x47e   : > { %v1364_v59 = vpack.c.bf16 %v1332_v55, %v1332_v55 }
 0x480   : > { %v1443_v18 = vunpack.c.l.b16 %v1364_v59 }
 0x485   : > { %v1334_v47 = vpop.f32.mrf.mxu2 }
 0x486   : > { %v1365_v60 = vpack.c.bf16 %v1334_v47, %v1334_v47 }
 0x488   : > { %v1444_v19 = vunpack.c.l.b16 %v1365_v60 }
 0x48a   : > { %v1447_v62 = vpack.c.b16 %v1444_v19, %v1443_v18 }
 0x48c   : > { %12197 = vmatmul.msk.bf16.vlgmr.msra.gmra.mxu1 %vm304_vm9, %v1447_v62 }
 0x48d   : > { %v1337_v63 = vpop.f32.mrf.mxu2 }
 0x48e   : > { %v1366_v3 = vpack.c.bf16 %v1337_v63, %v1337_v63 }
 0x490   : > { %v1445_v8 = vunpack.c.l.b16 %v1366_v3 }
 0x495   : > { %v1339_v6 = vpop.f32.mrf.mxu2 }
 0x496   : > { %v1367_v7 = vpack.c.bf16 %v1339_v6, %v1339_v6 }
 0x498   : > { %v1446_v5 = vunpack.c.l.b16 %v1367_v7 }
 0x49a   : > { %v1448_v12 = vpack.c.b16 %v1446_v5, %v1445_v8 }
 0x49c   : > { %12198 = vmatmul.msk.bf16.gmra.mxu1 %vm304_vm9, %v1448_v12 }
 0x49d   : > { %v1342_v14 = vpop.f32.mrf.mxu2 }
 0x49e   : > { %v1368_v20 = vpack.c.bf16 %v1342_v14, %v1342_v14 }
 0x4a0   : > { %v1490_v25 = vunpack.c.l.b16 %v1368_v20 }
 0x4a5   : > { %v1344_v21 = vpop.f32.mrf.mxu2 }
 0x4a6   : > { %v1369_v23 = vpack.c.bf16 %v1344_v21, %v1344_v21 }
 0x4a8   : > { %v1491_v29 = vunpack.c.l.b16 %v1369_v23 }
 0x4aa   : > { %v1494_v31 = vpack.c.b16 %v1491_v29, %v1490_v25 }
 0x4ac   : > { %12207 = vmatmul.msk.bf16.vlgmr.msrb.gmra.mxu2 %vm304_vm9, %v1494_v31  ;;  %12217 = vmatmul.msk.bf16.vlgmr.msrb.gmra.mxu1 %vm304_vm9, %v1541_v30 }
 0x4ad   : > { %v1347_v32 = vpop.f32.mrf.mxu2  ;;  %1824 = vmatpush.bf16.msrb.mxu2 %v14819_v43 }
 0x4ae   : > { %v1370_v34 = vpack.c.bf16 %v1347_v32, %v1347_v32 }
 0x4b0   : > { %v1492_v56 = vunpack.c.l.b16 %v1370_v34 }
 0x4b1   : > { %1825 = vmatpush.bf16.msrb.mxu2 %v14818_v44  ;;  %v2022_v44 = vld [vmem:[%s19798_s4 + $0x50] ss:$0 sm:$0xff] }
 0x4b5   : > { %v1349_v35 = vpop.f32.mrf.mxu2 }
 0x4b6   : > { %v1371_v53 = vpack.c.bf16 %v1349_v35, %v1349_v35 }
 0x4b8   : > { %v1493_v38 = vunpack.c.l.b16 %v1371_v53 }
 0x4ba   : > { %v1495_v40 = vpack.c.b16 %v1493_v38, %v1492_v56 }
 0x4bc   : > { %12208 = vmatmul.msk.bf16.gmra.mxu2 %vm304_vm9, %v1495_v40  ;;  %12218 = vmatmul.msk.bf16.gmra.mxu1 %vm304_vm9, %v1542_v39  ;;  %v14807_v39 = vld [vmem:[%s19796_s2 + $0x188] sm:$0xff]  ;;  %v14808_v40 = vld [vmem:[%s19796_s2 + $0x190] sm:$0xff] }
 0x4c9   : > { %v1429_v9 = vpop.f32.mrf.mxu1 }
 0x4cc   : > { %12227 = vmatmul.msk.bf16.vlgmr.msra.gmra.mxu2 %vm304_vm9, %v1588_v0  ;;  %v14814_v0 = vld [vmem:[%s19796_s2 + $0x1c0] sm:$0xff] }
 0x4cd   : > { %1963 = vmatpush.bf16.msrb.mxu0 %v14814_v0 }
 0x4d1   : > { %v1431_v10 = vpop.f32.mrf.mxu1  ;;  %1964 = vmatpush.bf16.msrb.mxu0 %v14813_v1 }
 0x4d5   : > { %1965 = vmatpush.bf16.msrb.mxu0 %v14812_v2 }
 0x4d9   : > { %v1434_v48 = vpop.f32.mrf.mxu1 }
 0x4dc   : > { %12228 = vmatmul.msk.bf16.gmra.mxu2 %vm304_vm9, %v1589_v46  ;;  %v14817_v46 = vld [vmem:[%s19796_s2 + $0x1d8] sm:$0xff] }
 0x4dd   : > { %1826 = vmatpush.bf16.msrb.mxu2 %v14817_v46 }
 0x4e1   : > { %v1436_v11 = vpop.f32.mrf.mxu1 }
 0x509   : > { %v1476_v50 = vpop.f32.mrf.mxu1 }
 0x511   : > { %v1478_v51 = vpop.f32.mrf.mxu1 }
 0x519   : > { %v1481_v55 = vpop.f32.mrf.mxu1 }
 0x521   : > { %v1483_v58 = vpop.f32.mrf.mxu1 }
 0x529   : > { %v1570_v45 = vpop.f32.mrf.mxu1 }
 0x52a   : > { %v1571_v8 = vadd.f32 %v1570_v45, %v1429_v9  ;;  %v14816_v9 = vld [vmem:[%s19796_s2 + $0x1d0] sm:$0xff]  ;;  %v14825_v45 = vld [vmem:[%s19796_s2 + $0x218] sm:$0xff] }
 0x52b   : > { %1827 = vmatpush.bf16.msrb.mxu2 %v14816_v9 }
 0x52f   : > { %v1523_v52 = vpop.f32.mrf.mxu2 }
 0x531   : > { %v1572_v49 = vpop.f32.mrf.mxu1 }
 0x532   : > { %v1573_v3 = vadd.f32 %v1572_v49, %v1431_v10 }
 0x537   : > { %v1525_v57 = vpop.f32.mrf.mxu2 }
 0x539   : > { %v1575_v17 = vpop.f32.mrf.mxu1 }
 0x53a   : > { %v1576_v19 = vadd.f32 %v1575_v17, %v1434_v48 }
 0x53f   : > { %v1528_v59 = vpop.f32.mrf.mxu2 }
 0x541   : > { %v1577_v12 = vpop.f32.mrf.mxu1 }
 0x542   : > { %v1578_v16 = vadd.f32 %v1577_v12, %v1436_v11 }
 0x547   : > { %v1530_v47 = vpop.f32.mrf.mxu2 }
 0x54f   : > { %v1617_v60 = vpop.f32.mrf.mxu2 }
 0x550   : > { %v1618_v6 = vadd.f32 %v1617_v60, %v1476_v50 }
 0x552   : > { %v1627_v13 = vadd.f32 %v1618_v6, %v1571_v8  ;;  %v14829_v6 = vld [vmem:[%s19796_s2 + $0x238] sm:$0xff]  ;;  %v14828_v8 = vld [vmem:[%s19796_s2 + $0x230] sm:$0xff] }
 0x554   : > { %v1631_v23 = vadd.f32 %v1627_v13, %v1523_v52 }
 0x556   : > { %v1636_v30 = vadd.f32 %v1635_v22, %v1631_v23  ;;  %v14822_v23 = vld [vmem:[%s19796_s2 + $0x200] sm:$0xff] }
 0x557   : > { %v1619_v61 = vpop.f32.mrf.mxu2 }
 0x558   : > { %v1620_v62 = vadd.f32 %v1619_v61, %v1478_v51  ;;  %v1644_v26 = vmul.f32 0.2, %v1636_v30  ;;  %vm1640_vm11 = vcmp.ge.f32.partialorder %v1636_v30, 0.0  ;;  %v14824_v61 = vld [vmem:[%s19796_s2 + $0x210] sm:$0xff] }
 0x55a   : > { %v1628_v5 = vadd.f32 %v1620_v62, %v1573_v3  ;;  %v1648_v56 = vsel %vm1640_vm11, %v1636_v30, %v1644_v26  ;;  %v14831_v62 = vld [vmem:[%s19796_s2 + $0x248] sm:$0xff]  ;;  %v14830_v3 = vld [vmem:[%s19796_s2 + $0x240] sm:$0xff]  ;;  %vm3872_vm11 = vcmask 1040384  }
 0x55c   : > { %v1632_v20 = vadd.f32 %v1628_v5, %v1525_v57  ;;  %v14827_v57 = vld [vmem:[%s19796_s2 + $0x228] sm:$0xff] }
 0x55d   : > { %1870 = vmatpush.bf16.msra.mxu2 %v14827_v57 }
 0x55e   : > { %v1637_v25 = vadd.f32 %v1635_v22, %v1632_v20  ;;  %v14823_v20 = vld [vmem:[%s19796_s2 + $0x208] sm:$0xff] }
 0x55f   : > { %v1622_v18 = vpop.f32.mrf.mxu2 }
 0x560   : > { %v1623_v63 = vadd.f32 %v1622_v18, %v1481_v55  ;;  %v1645_v27 = vmul.f32 0.2, %v1637_v25  ;;  %vm1641_vm10 = vcmp.ge.f32.partialorder %v1637_v25, 0.0 }
 0x562   : > { %v1629_v7 = vadd.f32 %v1623_v63, %v1576_v19  ;;  %v1649_v54 = vsel %vm1641_vm10, %v1637_v25, %v1645_v27 }
 0x563   : > { %v1662_v38 = vpack.c.bf16 %v1649_v54, %v1648_v56 }
 0x564   : > { %v1633_v14 = vadd.f32 %v1629_v7, %v1528_v59  ;;  %v14826_v59 = vld [vmem:[%s19796_s2 + $0x220] sm:$0xff] }
 0x565   : > { %1871 = vmatpush.bf16.msra.mxu2 %v14826_v59 }
 0x566   : > { %v1638_v24 = vadd.f32 %v1635_v22, %v1633_v14 }
 0x567   : > { %v1624_v15 = vpop.f32.mrf.mxu2 }
 0x568   : > { %v1625_v21 = vadd.f32 %v1624_v15, %v1483_v58  ;;  %v1646_v31 = vmul.f32 0.2, %v1638_v24  ;;  %vm1642_vm6 = vcmp.ge.f32.partialorder %v1638_v24, 0.0 }
 0x569   : > { %1872 = vmatpush.bf16.msra.mxu2 %v14825_v45  ;;  %v14832_v45 = vld [vmem:[%s19796_s2 + $0x250] sm:$0xff] }
 0x56a   : > { %v1630_v4 = vadd.f32 %v1625_v21, %v1578_v16  ;;  %v1650_v34 = vsel %vm1642_vm6, %v1638_v24, %v1646_v31  ;;  %v14821_v24 = vld [vmem:[%s19796_s2 + $0x1f8] sm:$0xff] }
 0x56c   : > { %v1634_v29 = vadd.f32 %v1630_v4, %v1530_v47 }
 0x56d   : > { %1873 = vmatpush.bf16.msra.mxu2 %v14824_v61  ;;  %v14865_v61 = vld [vmem:[%s19796_s2 + $0x360] sm:$0xff] }
 0x56e   : > { %v1639_v32 = vadd.f32 %v1635_v22, %v1634_v29  ;;  %v14820_v29 = vld [vmem:[%s19796_s2 + $0x1f0] sm:$0xff] }
 0x570   : > { %v1647_v33 = vmul.f32 0.2, %v1639_v32  ;;  %vm1643_vm8 = vcmp.ge.f32.partialorder %v1639_v32, 0.0 }
 0x572   : > { %v1651_v35 = vsel %vm1643_vm8, %v1639_v32, %v1647_v33 }
 0x573   : > { %v1663_v53 = vpack.c.bf16 %v1651_v35, %v1650_v34 }
 0x575   : > { %1710 = vmatpush.bf16.msra.mxu1 %v1663_v53 }
 0x579   : > { %1711 = vmatpush.bf16.msra.mxu1 %v1662_v38 }
 0x57c   : > { %12249 = vmatmul.msk.bf16.vlgmr.msra.gmra.mxu1 %vm304_vm9, %v14807_v39 }
 0x58c   : > { %12250 = vmatmul.msk.bf16.gmra.mxu1 %vm304_vm9, %v14808_v40 }
 0x59c   : > { %12251 = vmatmul.msk.bf16.gmra.mxu1 %vm304_vm9, %v14809_v41 }
 0x5ac   : > { %12252 = vmatmul.msk.bf16.gmra.mxu1 %vm304_vm9, %v14810_v37 }
 0x5bc   : > { %12253 = vmatmul.msk.bf16.gmra.mxu1 %vm304_vm9, %v14811_v36 }
 0x5f9   : > { %v1713_v10 = vpop.f32.mrf.mxu1 }
 0x5fa   : > { %v1738_v48 = vpack.c.bf16 %v1713_v10, %v1713_v10 }
 0x5fc   : > { %v1928_v51 = vunpack.c.l.b16 %v1738_v48 }
 0x601   : > { %v1715_v11 = vpop.f32.mrf.mxu1 }
 0x602   : > { %v1739_v50 = vpack.c.bf16 %v1715_v11, %v1715_v11 }
 0x604   : > { %v1929_v52 = vunpack.c.l.b16 %v1739_v50 }
 0x606   : > { %v1930_v55 = vpack.c.b16 %v1929_v52, %v1928_v51 }
 0x608   : > { %12321 = vmatmul.msk.bf16.vlgmr.msrb.gmra.mxu0 %vm1262_vm5, %v1930_v55 }
 0x609   : > { %v1718_v58 = vpop.f32.mrf.mxu1 }
 0x60a   : > { %v1740_v47 = vpack.c.bf16 %v1718_v58, %v1718_v58 }
 0x60c   : > { %v1790_v17 = vunpack.c.l.b16 %v1740_v47  ;;  %v14849_v47 = vld [vmem:[%s19796_s2 + $0x2e0] sm:$0xff] }
 0x60d   : > { %2215 = vmatpush.bf16.msrb.mxu1 %v14849_v47 }
 0x611   : > { %v1720_v60 = vpop.f32.mrf.mxu1 }
 0x612   : > { %v1741_v49 = vpack.c.bf16 %v1720_v60, %v1720_v60  ;;  %v14848_v60 = vld [vmem:[%s19796_s2 + $0x2d8] sm:$0xff] }
 0x613   : > { %2216 = vmatpush.bf16.msrb.mxu1 %v14848_v60 }
 0x614   : > { %v1791_v18 = vunpack.c.l.b16 %v1741_v49  ;;  %v14857_v49 = vld [vmem:[%s19796_s2 + $0x320] sm:$0xff] }
 0x616   : > { %v1792_v19 = vpack.c.b16 %v1791_v18, %v1790_v17  ;;  %v14856_v17 = vld [vmem:[%s19796_s2 + $0x318] sm:$0xff]  ;;  %v14847_v18 = vld [vmem:[%s19796_s2 + $0x2d0] sm:$0xff] }
 0x617   : > { %2217 = vmatpush.bf16.msrb.mxu1 %v14847_v18 }
 0x618   : > { %12270 = vmatmul.msk.bf16.vlgmr.msrb.gmra.mxu2 %vm1262_vm5, %v1792_v19  ;;  %v14855_v19 = vld [vmem:[%s19796_s2 + $0x310] sm:$0xff] }
 0x619   : > { %v1723_v63 = vpop.f32.mrf.mxu1  ;;  %1916 = vmatpush.bf16.msrb.mxu2 %v14831_v62  ;;  %v14846_v62 = vld [vmem:[%s19796_s2 + $0x2c8] sm:$0xff] }
 0x61a   : > { %v1742_v34 = vpack.c.bf16 %v1723_v63, %v1723_v63  ;;  %v14833_v63 = vld [vmem:[%s19796_s2 + $0x258] sm:$0xff] }
 0x61b   : > { %2218 = vmatpush.bf16.msrb.mxu1 %v14846_v62 }
 0x61c   : > { %v1974_v26 = vunpack.c.l.b16 %v1742_v34  ;;  %v14860_v34 = vld [vmem:[%s19796_s2 + $0x338] sm:$0xff] }
 0x61d   : > { %1917 = vmatpush.bf16.msrb.mxu2 %v14830_v3  ;;  %v14845_v3 = vld [vmem:[%s19796_s2 + $0x2c0] sm:$0xff] }
 0x61f   : > { %2219 = vmatpush.bf16.msrb.mxu1 %v14845_v3 }
 0x621   : > { %v1725_v7 = vpop.f32.mrf.mxu1  ;;  %1918 = vmatpush.bf16.msrb.mxu2 %v14829_v6  ;;  %v14844_v6 = vld [vmem:[%s19796_s2 + $0x2b8] sm:$0xff] }
 0x622   : > { %v1743_v27 = vpack.c.bf16 %v1725_v7, %v1725_v7  ;;  %v2035_v7 = vld [vmem:[%s19796_s2 + $0x260] sm:$0xf] }
 0x623   : > { %2220 = vmatpush.bf16.msrb.mxu1 %v14844_v6 }
 0x624   : > { %v1975_v35 = vunpack.c.l.b16 %v1743_v27  ;;  %v14851_v27 = vld [vmem:[%s19796_s2 + $0x2f0] sm:$0xff] }
 0x625   : > { %1919 = vmatpush.bf16.msrb.mxu2 %v14828_v8  ;;  %v14843_v8 = vld [vmem:[%s19796_s2 + $0x2b0] sm:$0xff] }
 0x626   : > { %v1976_v53 = vpack.c.b16 %v1975_v35, %v1974_v26  ;;  %v14870_v35 = vld [vmem:[%s19796_s2 + $0x388] sm:$0xff]  ;;  %v14836_v26 = vld [vmem:[%s19796_s2 + $0x278] sm:$0xff] }
 0x627   : > { %2221 = vmatpush.bf16.msrb.mxu1 %v14843_v8  ;;  %v14874_v8 = vld [vmem:[%s19796_s2 + $0x3a8] sm:$0xff] }
 0x629   : > { %v1728_v5 = vpop.f32.mrf.mxu1 }
 0x62a   : > { %v1744_v12 = vpack.c.bf16 %v1728_v5, %v1728_v5  ;;  %v2046_v5 = vunpack.c.l.b16 %v2035_v7 }
 0x62c   : > { %v1836_v15 = vunpack.c.l.b16 %v1744_v12  ;;  %v14842_v12 = vld [vmem:[%s19796_s2 + $0x2a8] sm:$0xff] }
 0x62d   : > { %2222 = vmatpush.bf16.msrb.mxu1 %v14842_v12  ;;  %v12588_v12 = vld [vmem:[#allocation2 + $0xf0] sm:$0xf] }
 0x631   : > { %v1730_v13 = vpop.f32.mrf.mxu1 }
 0x632   : > { %v1745_v14 = vpack.c.bf16 %v1730_v13, %v1730_v13  ;;  %v14841_v13 = vld [vmem:[%s19796_s2 + $0x2a0] sm:$0xff] }
 0x633   : > { %2398 = vmatpush.bf16.msra.mxu1 %v14841_v13  ;;  %v14909_v13 = vld [vmem:[#allocation2 + $0xf4] sm:$0xf0] }
 0x634   : > { %v1837_v16 = vunpack.c.l.b16 %v1745_v14  ;;  %v2049_v14 = vpack.c.b16 %v2046_v5, %v2046_v5  ;;  %v14875_v5 = vld [vmem:[%s19796_s2 + $0x3b0] sm:$0xff] }
 0x636   : > { %v1838_v21 = vpack.c.b16 %v1837_v16, %v1836_v15  ;;  %v14864_v15 = vld [vmem:[%s19796_s2 + $0x358] sm:$0xff] }
 0x637   : > { %v14840_v16 = vld [vmem:[%s19796_s2 + $0x298] sm:$0xff] }
 0x638   : > { %12287 = vmatmul.msk.bf16.vlgmr.msra.gmra.mxu2 %vm1262_vm5, %v1838_v21  ;;  %2399 = vmatpush.bf16.msra.mxu1 %v14840_v16  ;;  %v14863_v21 = vld [vmem:[%s19796_s2 + $0x350] sm:$0xff]  ;;  %v14907_v16 = vld [vmem:[#allocation2 + $0xe4] sm:$0xf0] }
 0x639   : > { %v1733_v22 = vpop.f32.mrf.mxu1  ;;  %2008 = vmatpush.bf16.msra.mxu2 %v14823_v20  ;;  %v14854_v20 = vld [vmem:[%s19796_s2 + $0x308] sm:$0xff] }
 0x63a   : > { %v1746_v4 = vpack.c.bf16 %v1733_v22, %v1733_v22  ;;  %v14873_v22 = vld [vmem:[%s19796_s2 + $0x3a0] sm:$0xff] }
 0x63b   : > { %2337 = vmatpush.bf16.msrb.mxu3 %v14873_v22 }
 0x63c   : > { %v1882_v31 = vunpack.c.l.b16 %v1746_v4  ;;  %v14862_v4 = vld [vmem:[%s19796_s2 + $0x348] sm:$0xff] }
 0x63d   : > { %2009 = vmatpush.bf16.msra.mxu2 %v14822_v23  ;;  %v14839_v23 = vld [vmem:[%s19796_s2 + $0x290] sm:$0xff] }
 0x63e   : > { %2400 = vmatpush.bf16.msra.mxu1 %v14839_v23  ;;  %v14906_v23 = vld [vmem:[#allocation2 + $0xe4] sm:$0xf] }
 0x641   : > { %v1735_v25 = vpop.f32.mrf.mxu1  ;;  %2010 = vmatpush.bf16.msra.mxu2 %v14821_v24  ;;  %v14853_v24 = vld [vmem:[%s19796_s2 + $0x300] sm:$0xff] }
 0x642   : > { %v1747_v30 = vpack.c.bf16 %v1735_v25, %v1735_v25  ;;  %v14872_v25 = vld [vmem:[%s19796_s2 + $0x398] sm:$0xff] }
 0x643   : > { %2338 = vmatpush.bf16.msrb.mxu3 %v14872_v25  ;;  %v12572_v25 = vld [vmem:[#allocation2 + $0xd0] sm:$0xf] }
 0x644   : > { %v1883_v32 = vunpack.c.l.b16 %v1747_v30  ;;  %v14852_v30 = vld [vmem:[%s19796_s2 + $0x2f8] sm:$0xff] }
 0x645   : > { %2011 = vmatpush.bf16.msra.mxu2 %v14820_v29  ;;  %v14838_v29 = vld [vmem:[%s19796_s2 + $0x288] sm:$0xff] }
 0x646   : > { %v1884_v33 = vpack.c.b16 %v1883_v32, %v1882_v31  ;;  %2401 = vmatpush.bf16.msra.mxu1 %v14838_v29  ;;  %v14861_v31 = vld [vmem:[%s19796_s2 + $0x340] sm:$0xff]  ;;  %v14871_v32 = vld [vmem:[%s19796_s2 + $0x390] sm:$0xff]  ;;  %v14905_v29 = vld [vmem:[#allocation2 + $0xd4] sm:$0xf0] }
 0x647   : > { %2339 = vmatpush.bf16.msrb.mxu3 %v14871_v32  ;;  %v12574_v32 = vld [vmem:[#allocation2 + $0xd8] sm:$0xf0] }
 0x648   : > { %12304 = vmatmul.msk.bf16.vlgmr.msrb.gmra.mxu2 %vm1262_vm5, %v1884_v33  ;;  %v14837_v33 = vld [vmem:[%s19796_s2 + $0x280] sm:$0xff] }
 0x649   : > { %2276 = vmatpush.bf16.msrb.mxu2 %v14865_v61 }
 0x64a   : > { %2402 = vmatpush.bf16.msra.mxu1 %v14837_v33  ;;  %v12573_v33 = vor.u32 %v14905_v29, %v12572_v25  ;;  %v12654_v25 = vld [vmem:[#allocation2 + $0x1f8] sm:$0xf0]  ;;  %v14894_v29 = vld [vmem:[#allocation2 + $0x84] sm:$0xf] }
 0x64b   : > { %2340 = vmatpush.bf16.msrb.mxu3 %v14870_v35  ;;  %v12564_v35 = vld [vmem:[#allocation2 + $0xc0] sm:$0xf] }
 0x64d   : > { %2277 = vmatpush.bf16.msrb.mxu2 %v14864_v15  ;;  %v12589_v15 = vor.u32 %v14909_v13, %v12588_v12  ;;  %v12612_v13 = vld [vmem:[#allocation2 + $0x1a0] sm:$0xf] }
 0x64e   : > { %2403 = vmatpush.bf16.msra.mxu1 %v14836_v26  ;;  %v14903_v26 = vld [vmem:[#allocation2 + $0xc4] sm:$0xf0] }
 0x651   : > { %2278 = vmatpush.bf16.msrb.mxu2 %v14863_v21  ;;  %v12590_v21 = vld [vmem:[#allocation2 + $0xf8] sm:$0xf0] }
 0x655   : > { %2279 = vmatpush.bf16.msrb.mxu2 %v14862_v4  ;;  %v12582_v4 = vld [vmem:[#allocation2 + $0xe8] sm:$0xf0] }
 0x658   : > { %12338 = vmatmul.msk.bf16.vlgmr.msra.gmra.mxu2 %vm1262_vm5, %v1976_v53  ;;  %v14850_v53 = vld [vmem:[%s19796_s2 + $0x2e8] sm:$0xff] }
 0x659   : > { %2280 = vmatpush.bf16.msrb.mxu2 %v14861_v31  ;;  %v14904_v31 = vld [vmem:[#allocation2 + $0xd4] sm:$0xf] }
 0x65d   : > { %2281 = vmatpush.bf16.msrb.mxu2 %v14860_v34  ;;  %v14941_v34 = vld [vmem:[#allocation2 + $0x1f4] sm:$0xf0] }
 0x685   : > { %v1967_v37 = vpop.f32.mrf.mxu0 }
 0x68d   : > { %v1969_v43 = vpop.f32.mrf.mxu0 }
 0x69b   : > { %v1829_v54 = vpop.f32.mrf.mxu2 }
 0x69c   : > { %v1968_v42 = vadd.f32 %v1967_v37, %v1829_v54  ;;  %v14859_v54 = vld [vmem:[%s19796_s2 + $0x330] sm:$0xff] }
 0x69d   : > { %2282 = vmatpush.bf16.msrb.mxu2 %v14859_v54  ;;  %v14867_v37 = vld [vmem:[%s19796_s2 + $0x370] sm:$0xff]  ;;  %v14902_v54 = vld [vmem:[#allocation2 + $0xc4] sm:$0xf] }
 0x6a3   : > { %v1831_v56 = vpop.f32.mrf.mxu2 }
 0x6a4   : > { %v1970_v9 = vadd.f32 %v1969_v43, %v1831_v56  ;;  %v14869_v56 = vld [vmem:[%s19796_s2 + $0x380] sm:$0xff] }
 0x6a5   : > { %2341 = vmatpush.bf16.msrb.mxu3 %v14869_v56 }
 0x6bb   : > { %v1875_v38 = vpop.f32.mrf.mxu2 }
 0x6c3   : > { %v1877_v39 = vpop.f32.mrf.mxu2 }
 0x6cb   : > { %v1921_v40 = vpop.f32.mrf.mxu2 }
 0x6d3   : > { %v1923_v41 = vpop.f32.mrf.mxu2 }
 0x6db   : > { %v2013_v36 = vpop.f32.mrf.mxu2 }
 0x6dc   : > { %v2014_v0 = vadd.f32 %v2013_v36, %v1875_v38  ;;  %v14835_v38 = vld [vmem:[%s19796_s2 + $0x270] sm:$0xff]  ;;  %v14866_v36 = vld [vmem:[%s19796_s2 + $0x368] sm:$0xff] }
 0x6dd   : > { %2404 = vmatpush.bf16.msra.mxu1 %v14835_v38  ;;  %v12566_v38 = vld [vmem:[#allocation2 + $0xc8] sm:$0xf0] }
 0x6de   : > { %v2018_v1 = vadd.f32 %v2014_v0, %v1968_v42 }
 0x6e0   : > { %v2020_v2 = vadd.f32 %v2018_v1, %v1921_v40  ;;  %v14868_v40 = vld [vmem:[%s19796_s2 + $0x378] sm:$0xff] }
 0x6e1   : > { %2342 = vmatpush.bf16.msrb.mxu3 %v14868_v40  ;;  %v14939_v40 = vld [vmem:[#allocation2 + $0x1e4] sm:$0xf0] }
 0x6e2   : > { %v2023_v48 = vadd.f32 %v2022_v44, %v2020_v2 }
 0x6e3   : > { %v2015_v46 = vpop.f32.mrf.mxu2 }
 0x6e4   : > { %v2016_v10 = vadd.f32 %v2015_v46, %v1877_v39  ;;  %v2027_v51 = vmul.f32 0.2, %v2023_v48  ;;  %vm2025_vm12 = vcmp.ge.f32.partialorder %v2023_v48, 0.0  ;;  %v14858_v39 = vld [vmem:[%s19796_s2 + $0x328] sm:$0xff] }
 0x6e5   : > { %2283 = vmatpush.bf16.msrb.mxu2 %v14858_v39  ;;  %2343 = vmatpush.bf16.msrb.mxu3 %v14867_v37  ;;  %v12644_v39 = vld [vmem:[#allocation2 + $0x1e0] sm:$0xf]  ;;  %v12565_v37 = vor.u32 %v14903_v26, %v12564_v35  ;;  %v12604_v35 = vld [vmem:[#allocation2 + $0x190] sm:$0xf]  ;;  %v14929_v26 = vld [vmem:[#allocation2 + $0x194] sm:$0xf0] }
 0x6e6   : > { %v2019_v11 = vadd.f32 %v2016_v10, %v1970_v9  ;;  %v2029_v57 = vsel %vm2025_vm12, %v2023_v48, %v2027_v51 }
 0x6e8   : > { %v2021_v50 = vadd.f32 %v2019_v11, %v1923_v41  ;;  %v14834_v41 = vld [vmem:[%s19796_s2 + $0x268] sm:$0xff] }
 0x6e9   : > { %2405 = vmatpush.bf16.msra.mxu1 %v14834_v41  ;;  %2344 = vmatpush.bf16.msrb.mxu3 %v14866_v36  ;;  %v12645_v41 = vor.u32 %v14939_v40, %v12644_v39  ;;  %v12636_v36 = vld [vmem:[#allocation2 + $0x1d0] sm:$0xf]  ;;  %v12646_v39 = vld [vmem:[#allocation2 + $0x1e8] sm:$0xf0] }
 0x6ea   : > { %v2024_v52 = vadd.f32 %v2022_v44, %v2021_v50 }
 0x6ec   : > { %v2028_v55 = vmul.f32 0.2, %v2024_v52  ;;  %vm2026_vm13 = vcmp.ge.f32.partialorder %v2024_v52, 0.0 }
 0x6ed   : > { %2768 = vmatpush.bf16.msra.mxu3 %v12589_v15 }
 0x6ee   : > { %v2030_v58 = vsel %vm2026_vm13, %v2024_v52, %v2028_v55  ;;  %vm3868_vm13 = vcmask 7168  }
 0x6ef   : > { %v2036_v59 = vpack.c.bf16 %v2030_v58, %v2029_v57 }
 0x6f1   : > { %2066 = vmatpush.bf16.msra.mxu0 %v2036_v59 }
 0x6f4   : > { %12347 = vmatmul.msk.bf16.vlgmr.msra.gmra.mxu0 %vm829_vm7, %v14832_v45 }
 0x6f5   : > { %2459 = vmatpush.bf16.msrb.mxu0 %v14857_v49 }
 0x6f9   : > { %2460 = vmatpush.bf16.msrb.mxu0 %v14856_v17  ;;  %v2474_v17 = vld [vmem:[%s19798_s4 + $0x60] ss:$0 sm:$0xff] }
 0x6fd   : > { %2461 = vmatpush.bf16.msrb.mxu0 %v14855_v19 }
 0x701   : > { %2462 = vmatpush.bf16.msrb.mxu0 %v14854_v20  ;;  %v14908_v20 = vld [vmem:[#allocation2 + $0xf4] sm:$0xf] }
 0x702   : > { %v12593_v22 = vor.u32 %v14908_v20, %v12590_v21  ;;  %v12692_v20 = vld [vmem:[#allocation2 + $0x2c0] sm:$0xf]  ;;  %v14967_v21 = vld [vmem:[#allocation2 + $0x2c4] sm:$0xf0] }
 0x704   : > { %12348 = vmatmul.msk.bf16.gmra.mxu0 %vm829_vm7, %v14833_v63 }
 0x705   : > { %2463 = vmatpush.bf16.msrb.mxu0 %v14853_v24 }
 0x709   : > { %2464 = vmatpush.bf16.msrb.mxu0 %v14852_v30  ;;  %v12585_v30 = vor.u32 %v14906_v23, %v12582_v4  ;;  %v14895_v23 = vld [vmem:[#allocation2 + $0x84] sm:$0xf0]  ;;  %v14940_v4 = vld [vmem:[#allocation2 + $0x1f4] sm:$0xf] }
 0x70d   : > { %2465 = vmatpush.bf16.msrb.mxu0 %v14851_v27  ;;  %v12652_v27 = vld [vmem:[#allocation2 + $0x1f0] sm:$0xf] }
 0x70e   : > { %v12653_v56 = vor.u32 %v14941_v34, %v12652_v27  ;;  %v12718_v34 = vld [vmem:[#allocation2 + $0x2f8] sm:$0xf0] }
 0x711   : > { %2466 = vmatpush.bf16.msrb.mxu0 %v14850_v53  ;;  %v12577_v53 = vor.u32 %v14904_v31, %v12574_v32  ;;  %v14972_v31 = vld [vmem:[#allocation2 + $0x2f4] sm:$0xf] }
 0x712   : > { %v12721_v40 = vor.u32 %v14972_v31, %v12718_v34 }
 0x714   : > { %12349 = vmatmul.msk.bf16.gmra.mxu0 %vm829_vm7, %v2049_v14  ;;  %v12580_v14 = vld [vmem:[#allocation2 + $0xe0] sm:$0xf] }
 0x715   : > { %v12581_v24 = vor.u32 %v14907_v16, %v12580_v14  ;;  %2874 = vmatpush.bf16.msra.mxu0 %v12653_v56  ;;  %v14931_v16 = vld [vmem:[#allocation2 + $0x1a4] sm:$0xf0] }
 0x716   : > { %v12613_v32 = vor.u32 %v14931_v16, %v12612_v13  ;;  %v12676_v13 = vld [vmem:[#allocation2 + $0x2a0] sm:$0xf] }
 0x717   : > { %2769 = vmatpush.bf16.msra.mxu3 %v12581_v24 }
 0x719   : > { %2875 = vmatpush.bf16.msra.mxu0 %v12645_v41  ;;  %v12605_v41 = vor.u32 %v14929_v26, %v12604_v35  ;;  %v12764_v26 = vld [vmem:[#allocation2 + $0x3d0] sm:$0xf] }
 0x71b   : > { %2770 = vmatpush.bf16.msra.mxu3 %v12573_v33  ;;  %v12693_v33 = vor.u32 %v14967_v21, %v12692_v20  ;;  %v14962_v20 = vld [vmem:[#allocation2 + $0x2a4] sm:$0xf]  ;;  %v12678_v21 = vld [vmem:[#allocation2 + $0x2a8] sm:$0xf0] }
 0x71f   : > { %2771 = vmatpush.bf16.msra.mxu3 %v12565_v37  ;;  %v14970_v37 = vld [vmem:[#allocation2 + $0x2e4] sm:$0xf] }
 0x771   : > { %v2068_v42 = vpop.f32.mrf.mxu0 }
 0x772   : > { %v2082_v46 = vpack.c.bf16 %v2068_v42, %v2068_v42  ;;  %v14937_v42 = vld [vmem:[#allocation2 + $0x1d4] sm:$0xf0] }
 0x779   : > { %v2070_v0 = vpop.f32.mrf.mxu0 }
 0x77a   : > { %v2083_v1 = vpack.c.bf16 %v2070_v0, %v2070_v0  ;;  %v14876_v0 = vld [vmem:[%s19796_s2 + $0x3b8] sm:$0xff] }
 0x77c   : > { %2223 = vmatmul.bf16.vlgmr.msrb.gmra.mxu1 %v2083_v1  ;;  %v12556_v1 = vld [vmem:[#allocation2 + $0xb0] sm:$0xf] }
 0x77d   : > { %2781 = vmatpush.bf16.msrb.mxu1 %v12593_v22  ;;  %v12532_v22 = vld [vmem:[#allocation2 + $0x80] sm:$0xf] }
 0x77e   : > { %v12533_v27 = vor.u32 %v14895_v23, %v12532_v22  ;;  %v12772_v22 = vld [vmem:[#allocation2 + $0x3e0] sm:$0xf]  ;;  %v12681_v23 = vor.u32 %v14962_v20, %v12678_v21  ;;  %v14881_v20 = vld [vmem:[#allocation2 + $0x14] sm:$0xf0] }
 0x781   : > { %v2073_v2 = vpop.f32.mrf.mxu0  ;;  %2782 = vmatpush.bf16.msrb.mxu1 %v12585_v30  ;;  %v12534_v30 = vld [vmem:[#allocation2 + $0x88] sm:$0xf0] }
 0x782   : > { %v2084_v43 = vpack.c.bf16 %v2073_v2, %v2073_v2  ;;  %v14901_v2 = vld [vmem:[#allocation2 + $0xb4] sm:$0xf0]  ;;  %v12537_v56 = vor.u32 %v14894_v29, %v12534_v30  ;;  %v12598_v29 = vld [vmem:[#allocation2 + $0x188] sm:$0xf0]  ;;  %v12668_v30 = vld [vmem:[#allocation2 + $0x290] sm:$0xf] }
 0x784   : > { %2467 = vmatmul.bf16.vlgmr.msrb.gmra.mxu0 %v2084_v43  ;;  %v12569_v43 = vor.u32 %v14902_v54, %v12566_v38  ;;  %v12657_v54 = vor.u32 %v14940_v4, %v12654_v25  ;;  %v14938_v38 = vld [vmem:[#allocation2 + $0x1e4] sm:$0xf] }
 0x785   : > { %2783 = vmatpush.bf16.msrb.mxu1 %v12577_v53  ;;  %v14877_v53 = vld [vmem:[%s19796_s2 + $0x3c0] sm:$0xff] }
 0x786   : > { %v14926_v25 = vld [vmem:[#allocation2 + $0x184] sm:$0xf] }
 0x787   : > { %v12601_v31 = vor.u32 %v14926_v25, %v12598_v29  ;;  %v14890_v29 = vld [vmem:[#allocation2 + $0x64] sm:$0xf] }
 0x789   : > { %v2075_v44 = vpop.f32.mrf.mxu0  ;;  %2784 = vmatpush.bf16.msrb.mxu1 %v12569_v43  ;;  %v14968_v43 = vld [vmem:[#allocation2 + $0x2d4] sm:$0xf] }
 0x78a   : > { %v2085_v9 = vpack.c.bf16 %v2075_v44, %v2075_v44  ;;  %v14900_v44 = vld [vmem:[#allocation2 + $0xb4] sm:$0xf] }
 0x78c   : > { %2284 = vmatmul.bf16.vlgmr.msrb.gmra.mxu2 %v2085_v9  ;;  %2406 = vmatmul.bf16.vlgmr.msra.gmra.mxu1 %v2082_v46  ;;  %v12558_v46 = vld [vmem:[#allocation2 + $0xb8] sm:$0xf0]  ;;  %v12637_v9 = vor.u32 %v14937_v42, %v12636_v36  ;;  %v12710_v36 = vld [vmem:[#allocation2 + $0x2e8] sm:$0xf0]  ;;  %v12649_v42 = vor.u32 %v14938_v38, %v12646_v39  ;;  %v14959_v38 = vld [vmem:[#allocation2 + $0x284] sm:$0xf0] }
 0x78d   : > { %v14958_v39 = vld [vmem:[#allocation2 + $0x284] sm:$0xf] }
 0x78e   : > { %2876 = vmatpush.bf16.msra.mxu0 %v12637_v9  ;;  %v14934_v9 = vld [vmem:[#allocation2 + $0x1c4] sm:$0xf] }
 0x791   : > { %v2078_v10 = vpop.f32.mrf.mxu0 }
 0x792   : > { %v2086_v48 = vpack.c.bf16 %v2078_v10, %v2078_v10  ;;  %v12716_v10 = vld [vmem:[#allocation2 + $0x2f0] sm:$0xf] }
 0x794   : > { %2345 = vmatmul.bf16.vlgmr.msrb.gmra.mxu3 %v2086_v48  ;;  %v12557_v48 = vor.u32 %v14901_v2, %v12556_v1  ;;  %v12638_v1 = vld [vmem:[#allocation2 + $0x1d8] sm:$0xf0]  ;;  %v12713_v2 = vor.u32 %v14970_v37, %v12710_v36  ;;  %v12756_v37 = vld [vmem:[#allocation2 + $0x3c0] sm:$0xf]  ;;  %v14999_v36 = vld [vmem:[#allocation2 + $0x3c4] sm:$0xf0] }
 0x796   : > { %2772 = vmatpush.bf16.msra.mxu3 %v12557_v48 }
 0x799   : > { %v2080_v11 = vpop.f32.mrf.mxu0 }
 0x79a   : > { %v12628_v11 = vld [vmem:[#allocation2 + $0x1c0] sm:$0xf] }
 0x7f9   : > { %v2224_v50 = vpop.f32.mrf.mxu1 }
 0x801   : > { %v2226_v51 = vpop.f32.mrf.mxu1  ;;  %v2468_v52 = vpop.f32.mrf.mxu0 }
 0x802   : > { %v14973_v51 = vld [vmem:[#allocation2 + $0x2f4] sm:$0xf0] }
 0x809   : > { %v2407_v55 = vpop.f32.mrf.mxu1  ;;  %v2470_v57 = vpop.f32.mrf.mxu0 }
 0x80a   : > { %v2408_v47 = vadd.f32 %v2407_v55, %v2224_v50  ;;  %v14935_v50 = vld [vmem:[#allocation2 + $0x1c4] sm:$0xf0]  ;;  %v12561_v57 = vor.u32 %v14900_v44, %v12558_v46  ;;  %v12702_v44 = vld [vmem:[#allocation2 + $0x2d8] sm:$0xf0] }
 0x80b   : > { %v14899_v55 = vld [vmem:[#allocation2 + $0xa4] sm:$0xf0]  ;;  %v12705_v48 = vor.u32 %v14968_v43, %v12702_v44  ;;  %v12748_v44 = vld [vmem:[#allocation2 + $0x3b0] sm:$0xf] }
 0x80c   : > { %2785 = vmatpush.bf16.msrb.mxu1 %v12561_v57 }
 0x80f   : > { %v2285_v58 = vpop.f32.mrf.mxu2 }
 0x810   : > { %v2469_v45 = vadd.f32 %v2468_v52, %v2285_v58  ;;  %v12548_v52 = vld [vmem:[#allocation2 + $0xa0] sm:$0xf]  ;;  %v14898_v58 = vld [vmem:[#allocation2 + $0xa4] sm:$0xf] }
 0x811   : > { %v2409_v59 = vpop.f32.mrf.mxu1 }
 0x812   : > { %v2472_v60 = vadd.f32 %v2469_v45, %v2408_v47  ;;  %v12717_v59 = vor.u32 %v14973_v51, %v12716_v10  ;;  %v12550_v45 = vld [vmem:[#allocation2 + $0xa8] sm:$0xf0]  ;;  %v12708_v47 = vld [vmem:[#allocation2 + $0x2e0] sm:$0xf] }
 0x813   : > { %v12630_v10 = vld [vmem:[#allocation2 + $0x1c8] sm:$0xf0] }
 0x814   : > { %v12633_v51 = vor.u32 %v14934_v9, %v12630_v10  ;;  %v12836_v10 = vld [vmem:[#allocation2 + $0x60] sm:$0xf] }
 0x817   : > { %v2287_v49 = vpop.f32.mrf.mxu2  ;;  %v2346_v61 = vpop.f32.mrf.mxu3 }
 0x818   : > { %v2473_v18 = vadd.f32 %v2472_v60, %v2346_v61  ;;  %v14971_v60 = vld [vmem:[#allocation2 + $0x2e4] sm:$0xf0]  ;;  %v12629_v49 = vor.u32 %v14935_v50, %v12628_v11  ;;  %v14966_v11 = vld [vmem:[#allocation2 + $0x2c4] sm:$0xf]  ;;  %v12694_v50 = vld [vmem:[#allocation2 + $0x2c8] sm:$0xf0] }
 0x819   : > { %v12709_v61 = vor.u32 %v14971_v60, %v12708_v47  ;;  %v12697_v57 = vor.u32 %v14966_v11, %v12694_v50  ;;  %v14930_v60 = vld [vmem:[#allocation2 + $0x1a4] sm:$0xf]  ;;  %v12740_v50 = vld [vmem:[#allocation2 + $0x3a0] sm:$0xf] }
 0x81a   : > { %v2475_v19 = vadd.f32 %v2474_v17, %v2473_v18  ;;  %v12549_v17 = vor.u32 %v14899_v55, %v12548_v52  ;;  %v12540_v18 = vld [vmem:[#allocation2 + $0x90] sm:$0xf]  ;;  %2877 = vmatpush.bf16.msra.mxu0 %v12629_v49  ;;  %v14932_v52 = vld [vmem:[#allocation2 + $0x1b4] sm:$0xf]  ;;  %v12622_v55 = vld [vmem:[#allocation2 + $0x1b8] sm:$0xf0] }
 0x81b   : > { %v12614_v49 = vld [vmem:[#allocation2 + $0x1a8] sm:$0xf0] }
 0x81c   : > { %vm2476_vm14 = vcmp.ge.f32.partialorder %v2475_v19, 0.0  ;;  %v2477_v62 = vmul.f32 0.2, %v2475_v19  ;;  %2773 = vmatpush.bf16.msra.mxu3 %v12549_v17  ;;  %v12617_v17 = vor.u32 %v14930_v60, %v12614_v49  ;;  %v12820_v60 = vld [vmem:[#allocation2 + $0x40] sm:$0xf] }
 0x81d   : > { %v14887_v49 = vld [vmem:[#allocation2 + $0x44] sm:$0xf0] }
 0x81e   : > { %v2478_v63 = vsel %vm2476_vm14, %v2475_v19, %v2477_v62  ;;  %v12620_v19 = vld [vmem:[#allocation2 + $0x1b0] sm:$0xf]  ;;  %v14933_v62 = vld [vmem:[#allocation2 + $0x1b4] sm:$0xf0] }
 0x81f   : > { %v2348_v3 = vpop.f32.mrf.mxu3  ;;  %v2487_v6 = vpack.c.bf16 %v2478_v63, %v2478_v63  ;;  %v14897_v63 = vld [vmem:[#allocation2 + $0x94] sm:$0xf0]  ;;  %v12621_v12 = vor.u32 %v14933_v62, %v12620_v19  ;;  %v14964_v19 = vld [vmem:[#allocation2 + $0x2b4] sm:$0xf]  ;;  %v12686_v62 = vld [vmem:[#allocation2 + $0x2b8] sm:$0xf0] }
 0x820   : > { %v12553_v3 = vor.u32 %v14898_v58, %v12550_v45  ;;  %v12541_v15 = vor.u32 %v14897_v63, %v12540_v18  ;;  %v12625_v58 = vor.u32 %v14932_v52, %v12622_v55  ;;  %v14927_v45 = vld [vmem:[#allocation2 + $0x184] sm:$0xf0]  ;;  %v14965_v18 = vld [vmem:[#allocation2 + $0x2b4] sm:$0xf0]  ;;  %v12828_v55 = vld [vmem:[#allocation2 + $0x50] sm:$0xf] }
 0x821   : > { %v2521_v7 = vsel %vm375_vm0, %v2487_v6, 0  ;;  %v12700_v6 = vld [vmem:[#allocation2 + $0x2d0] sm:$0xf]  ;;  %2878 = vmatpush.bf16.msra.mxu0 %v12621_v12  ;;  %v12606_v12 = vld [vmem:[#allocation2 + $0x198] sm:$0xf0] }
 0x822   : > { %2530 = vmatpush.bf16.msra.mxu2 %v2521_v7  ;;  %v14969_v7 = vld [vmem:[#allocation2 + $0x2d4] sm:$0xf0]  ;;  %2786 = vmatpush.bf16.msrb.mxu1 %v12553_v3  ;;  %v12689_v3 = vor.u32 %v14964_v19, %v12686_v62  ;;  %v12812_v62 = vld [vmem:[#allocation2 + $0x30] sm:$0xf] }
 0x823   : > { %v12701_v14 = vor.u32 %v14969_v7, %v12700_v6  ;;  %2774 = vmatpush.bf16.msra.mxu3 %v12541_v15  ;;  %v12780_v6 = vld [vmem:[#allocation2 + $0x3f0] sm:$0xf]  ;;  %v15005_v7 = vld [vmem:[#allocation2 + $0x3f4] sm:$0xf0] }
 0x825   : > { %12526 = vmatmul.msk.bf16.vlgmr.msra.gmra.mxu2 %vm350_vm1, %v14874_v8  ;;  %v14896_v8 = vld [vmem:[#allocation2 + $0x94] sm:$0xf]  ;;  %2879 = vmatpush.bf16.msra.mxu0 %v12613_v32  ;;  %v14961_v32 = vld [vmem:[#allocation2 + $0x294] sm:$0xf0] }
 0x826   : > { %2980 = vmatpush.bf16.msrb.mxu2 %v12717_v59  ;;  %v12596_v59 = vld [vmem:[#allocation2 + $0x180] sm:$0xf]  ;;  %v12669_v34 = vor.u32 %v14961_v32, %v12668_v30 }
 0x827   : > { %2775 = vmatpush.bf16.msra.mxu3 %v12533_v27  ;;  %v12597_v47 = vor.u32 %v14927_v45, %v12596_v59  ;;  %v12670_v27 = vld [vmem:[#allocation2 + $0x298] sm:$0xf0]  ;;  %v12732_v59 = vld [vmem:[#allocation2 + $0x390] sm:$0xf]  ;;  %v14993_v45 = vld [vmem:[#allocation2 + $0x394] sm:$0xf0] }
 0x828   : > { %v12788_v32 = vld [vmem:[#allocation2] sm:$0xf] }
 0x829   : > { %2880 = vmatpush.bf16.msra.mxu0 %v12605_v41  ;;  %v12662_v41 = vld [vmem:[#allocation2 + $0x288] sm:$0xf0] }
 0x82a   : > { %2981 = vmatpush.bf16.msrb.mxu2 %v12709_v61  ;;  %v12684_v61 = vld [vmem:[#allocation2 + $0x2b0] sm:$0xf] }
 0x82b   : > { %2887 = vmatpush.bf16.msrb.mxu3 %v12657_v54  ;;  %v12685_v63 = vor.u32 %v14965_v18, %v12684_v61  ;;  %v12821_v61 = vor.u32 %v14887_v49, %v12820_v60  ;;  %v14991_v18 = vld [vmem:[#allocation2 + $0x384] sm:$0xf0]  ;;  %v14992_v49 = vld [vmem:[#allocation2 + $0x394] sm:$0xf] }
 0x82d   : > { %2881 = vmatpush.bf16.msra.mxu0 %v12597_v47  ;;  %v12733_v47 = vor.u32 %v14993_v45, %v12732_v59  ;;  %v12806_v59 = vld [vmem:[#allocation2 + $0x28] sm:$0xf0]  ;;  %v12900_v45 = vld [vmem:[#allocation2 + $0x160] sm:$0xf] }
 0x82e   : > { %2982 = vmatpush.bf16.msrb.mxu2 %v12701_v14  ;;  %v14963_v14 = vld [vmem:[#allocation2 + $0x2a4] sm:$0xf0] }
 0x82f   : > { %2888 = vmatpush.bf16.msrb.mxu3 %v12649_v42  ;;  %v12677_v16 = vor.u32 %v14963_v14, %v12676_v13  ;;  %v12665_v42 = vor.u32 %v14958_v39, %v12662_v41  ;;  %v12782_v13 = vld [vmem:[#allocation2 + $0x3f8] sm:$0xf0]  ;;  %v14892_v14 = vld [vmem:[#allocation2 + $0x74] sm:$0xf] }
 0x832   : > { %2983 = vmatpush.bf16.msrb.mxu2 %v12693_v33  ;;  %v14960_v33 = vld [vmem:[#allocation2 + $0x294] sm:$0xf] }
 0x833   : > { %v12673_v35 = vor.u32 %v14960_v33, %v12670_v27  ;;  %v14879_v33 = vld [vmem:[#allocation2 + $0x4] sm:$0xf0] }
 0x834   : > { %v12789_v27 = vor.u32 %v14879_v33, %v12788_v32  ;;  %v14957_v32 = vld [vmem:[#allocation2 + $0x274] sm:$0xf0]  ;;  %v14956_v33 = vld [vmem:[#allocation2 + $0x274] sm:$0xf] }
 0x835   : > { %12527 = vmatmul.msk.bf16.gmra.mxu2 %vm350_vm1, %v14875_v5  ;;  %v12542_v5 = vld [vmem:[#allocation2 + $0x98] sm:$0xf0] }
 0x836   : > { %v12545_v24 = vor.u32 %v14896_v8, %v12542_v5  ;;  %v14928_v8 = vld [vmem:[#allocation2 + $0x194] sm:$0xf]  ;;  %v12781_v5 = vor.u32 %v15005_v7, %v12780_v6  ;;  %2984 = vmatpush.bf16.msrb.mxu2 %v12685_v63  ;;  %v14885_v63 = vld [vmem:[#allocation2 + $0x34] sm:$0xf0]  ;;  %v12804_v7 = vld [vmem:[#allocation2 + $0x20] sm:$0xf] }
 0x837   : > { %v12609_v15 = vor.u32 %v14928_v8, %v12606_v12  ;;  %v14883_v8 = vld [vmem:[#allocation2 + $0x24] sm:$0xf0]  ;;  %v15004_v12 = vld [vmem:[#allocation2 + $0x3f4] sm:$0xf] }
 0x838   : > { %2787 = vmatpush.bf16.msrb.mxu1 %v12545_v24  ;;  %3086 = vmatpush.bf16.msrb.mxu0 %v12781_v5  ;;  %v15003_v24 = vld [vmem:[#allocation2 + $0x3e4] sm:$0xf0]  ;;  %v12805_v5 = vor.u32 %v14883_v8, %v12804_v7 }
 0x839   : > { %v12773_v4 = vor.u32 %v15003_v24, %v12772_v22  ;;  %v15002_v24 = vld [vmem:[#allocation2 + $0x3e4] sm:$0xf] }
 0x83a   : > { %2985 = vmatpush.bf16.msrb.mxu2 %v12677_v16  ;;  %v12796_v16 = vld [vmem:[#allocation2 + $0x10] sm:$0xf] }
 0x83b   : > { %v12797_v21 = vor.u32 %v14881_v20, %v12796_v16  ;;  %v14878_v16 = vld [vmem:[#allocation2 + $0x4] sm:$0xf]  ;;  %v12790_v20 = vld [vmem:[#allocation2 + $0x8] sm:$0xf0] }
 0x83c   : > { %2788 = vmatpush.bf16.msrb.mxu1 %v12537_v56  ;;  %3087 = vmatpush.bf16.msrb.mxu0 %v12773_v4  ;;  %v12660_v56 = vld [vmem:[#allocation2 + $0x280] sm:$0xf]  ;;  %v12774_v4 = vld [vmem:[#allocation2 + $0x3e8] sm:$0xf0] }
 0x83e   : > { %2986 = vmatpush.bf16.msrb.mxu2 %v12669_v34  ;;  %v12777_v34 = vor.u32 %v15002_v24, %v12774_v4  ;;  %v12793_v4 = vor.u32 %v14878_v16, %v12790_v20  ;;  %v14914_v16 = vld [vmem:[#allocation2 + $0x124] sm:$0xf]  ;;  %v12870_v20 = vld [vmem:[#allocation2 + $0x128] sm:$0xf0] }
 0x840   : > { %2993 = vmatpush.bf16.msra.mxu1 %v12721_v40  ;;  %v12661_v40 = vor.u32 %v14959_v38, %v12660_v56  ;;  %v12830_v56 = vld [vmem:[#allocation2 + $0x58] sm:$0xf0] }
 0x842   : > { %2987 = vmatpush.bf16.msrb.mxu2 %v12661_v40  ;;  %v14998_v40 = vld [vmem:[#allocation2 + $0x3c4] sm:$0xf] }
 0x844   : > { %2994 = vmatpush.bf16.msra.mxu1 %v12713_v2  ;;  %v14893_v2 = vld [vmem:[#allocation2 + $0x74] sm:$0xf0] }
 0x845   : > { %12528 = vmatmul.msk.bf16.gmra.mxu2 %vm350_vm1, %v14876_v0  ;;  %v14936_v0 = vld [vmem:[#allocation2 + $0x1d4] sm:$0xf] }
 0x846   : > { %v12641_v46 = vor.u32 %v14936_v0, %v12638_v1  ;;  %v12757_v0 = vor.u32 %v14999_v36, %v12756_v37  ;;  %v12844_v1 = vld [vmem:[#allocation2 + $0x70] sm:$0xf]  ;;  %v12758_v37 = vld [vmem:[#allocation2 + $0x3c8] sm:$0xf0]  ;;  %v14886_v36 = vld [vmem:[#allocation2 + $0x44] sm:$0xf] }
 0x847   : > { %v12845_v43 = vor.u32 %v14893_v2, %v12844_v1  ;;  %v14996_v1 = vld [vmem:[#allocation2 + $0x3b4] sm:$0xf] }
 0x848   : > { %2889 = vmatpush.bf16.msrb.mxu3 %v12641_v46  ;;  %2995 = vmatpush.bf16.msra.mxu1 %v12705_v48  ;;  %v14997_v46 = vld [vmem:[#allocation2 + $0x3b4] sm:$0xf0]  ;;  %v14891_v48 = vld [vmem:[#allocation2 + $0x64] sm:$0xf0] }
 0x849   : > { %v12749_v9 = vor.u32 %v14997_v46, %v12748_v44  ;;  %3192 = vmatpush.bf16.msra.mxu2 %v12845_v43  ;;  %v12837_v11 = vor.u32 %v14891_v48, %v12836_v10  ;;  %v12750_v43 = vld [vmem:[#allocation2 + $0x3b8] sm:$0xf0]  ;;  %v14884_v44 = vld [vmem:[#allocation2 + $0x34] sm:$0xf]  ;;  %v14925_v10 = vld [vmem:[#allocation2 + $0x174] sm:$0xf0] }
 0x84a   : > { %v12814_v46 = vld [vmem:[#allocation2 + $0x38] sm:$0xf0] }
 0x84c   : > { %2890 = vmatpush.bf16.msrb.mxu3 %v12633_v51  ;;  %2996 = vmatpush.bf16.msra.mxu1 %v12697_v57  ;;  %v14995_v51 = vld [vmem:[#allocation2 + $0x3a4] sm:$0xf0]  ;;  %v14889_v57 = vld [vmem:[#allocation2 + $0x54] sm:$0xf0] }
 0x84d   : > { %v12741_v52 = vor.u32 %v14995_v51, %v12740_v50  ;;  %3193 = vmatpush.bf16.msra.mxu2 %v12837_v11  ;;  %v12753_v11 = vor.u32 %v14996_v1, %v12750_v43  ;;  %v14994_v50 = vld [vmem:[#allocation2 + $0x3a4] sm:$0xf]  ;;  %v12817_v51 = vor.u32 %v14884_v44, %v12814_v46  ;;  %v12966_v1 = vld [vmem:[#allocation2 + $0x268] sm:$0xf0]  ;;  %v12868_v43 = vld [vmem:[#allocation2 + $0x120] sm:$0xf] }
 0x84e   : > { %v14915_v44 = vld [vmem:[#allocation2 + $0x124] sm:$0xf0] }
 0x850   : > { %2891 = vmatpush.bf16.msrb.mxu3 %v12625_v58  ;;  %2997 = vmatpush.bf16.msra.mxu1 %v12689_v3  ;;  %v12829_v58 = vor.u32 %v14889_v57, %v12828_v55  ;;  %v12813_v3 = vor.u32 %v14885_v63, %v12812_v62  ;;  %v12742_v55 = vld [vmem:[#allocation2 + $0x3a8] sm:$0xf0]  ;;  %v12798_v62 = vld [vmem:[#allocation2 + $0x18] sm:$0xf0]  ;;  %v12892_v63 = vld [vmem:[#allocation2 + $0x150] sm:$0xf] }
 0x851   : > { %v12745_v60 = vor.u32 %v14994_v50, %v12742_v55  ;;  %v12869_v50 = vor.u32 %v14915_v44, %v12868_v43  ;;  %v12958_v55 = vld [vmem:[#allocation2 + $0x258] sm:$0xf0]  ;;  %v14945_v43 = vld [vmem:[#allocation2 + $0x214] sm:$0xf0]  ;;  %v14944_v44 = vld [vmem:[#allocation2 + $0x214] sm:$0xf] }
 0x852   : > { %3194 = vmatpush.bf16.msra.mxu2 %v12829_v58  ;;  %v14882_v58 = vld [vmem:[#allocation2 + $0x24] sm:$0xf] }
 0x854   : > { %2892 = vmatpush.bf16.msrb.mxu3 %v12617_v17  ;;  %2998 = vmatpush.bf16.msra.mxu1 %v12681_v23  ;;  %v12724_v17 = vld [vmem:[#allocation2 + $0x380] sm:$0xf]  ;;  %v12785_v23 = vor.u32 %v15004_v12, %v12782_v13  ;;  %v12726_v12 = vld [vmem:[#allocation2 + $0x388] sm:$0xf0] }
 0x855   : > { %12529 = vmatmul.msk.bf16.gmra.mxu2 %vm350_vm1, %v14877_v53  ;;  %v15001_v53 = vld [vmem:[#allocation2 + $0x3d4] sm:$0xf0]  ;;  %v12725_v19 = vor.u32 %v14991_v18, %v12724_v17  ;;  %v12734_v17 = vld [vmem:[#allocation2 + $0x398] sm:$0xf0] }
 0x856   : > { %v12765_v54 = vor.u32 %v15001_v53, %v12764_v26  ;;  %3195 = vmatpush.bf16.msra.mxu2 %v12821_v61  ;;  %v12766_v53 = vld [vmem:[#allocation2 + $0x3d8] sm:$0xf0]  ;;  %v12809_v61 = vor.u32 %v14882_v58, %v12806_v59  ;;  %v12737_v8 = vor.u32 %v14992_v49, %v12734_v17  ;;  %v12860_v58 = vld [vmem:[#allocation2 + $0x110] sm:$0xf]  ;;  %v14913_v59 = vld [vmem:[#allocation2 + $0x114] sm:$0xf0] }
 0x857   : > { %v14916_v49 = vld [vmem:[#allocation2 + $0x134] sm:$0xf] }
 0x858   : > { %2893 = vmatpush.bf16.msrb.mxu3 %v12609_v15  ;;  %2999 = vmatpush.bf16.msra.mxu1 %v12673_v35  ;;  %v12846_v15 = vld [vmem:[#allocation2 + $0x78] sm:$0xf0]  ;;  %v15000_v35 = vld [vmem:[#allocation2 + $0x3d4] sm:$0xf] }
 0x859   : > { %3088 = vmatpush.bf16.msrb.mxu0 %v12765_v54  ;;  %v12849_v25 = vor.u32 %v14892_v14, %v12846_v15  ;;  %v14888_v54 = vld [vmem:[#allocation2 + $0x54] sm:$0xf]  ;;  %v12769_v39 = vor.u32 %v15000_v35, %v12766_v53  ;;  %v12876_v35 = vld [vmem:[#allocation2 + $0x130] sm:$0xf] }
 0x85a   : > { %3196 = vmatpush.bf16.msra.mxu2 %v12813_v3  ;;  %v12833_v41 = vor.u32 %v14888_v54, %v12830_v56  ;;  %v14921_v3 = vld [vmem:[#allocation2 + $0x154] sm:$0xf0]  ;;  %v14924_v15 = vld [vmem:[#allocation2 + $0x174] sm:$0xf] }
 0x85b   : > { %v12893_v14 = vor.u32 %v14921_v3, %v12892_v63  ;;  %v12950_v63 = vld [vmem:[#allocation2 + $0x248] sm:$0xf0]  ;;  %v12878_v3 = vld [vmem:[#allocation2 + $0x138] sm:$0xf0] }
 0x85c   : > { %2894 = vmatpush.bf16.msrb.mxu3 %v12601_v31  ;;  %3000 = vmatpush.bf16.msra.mxu1 %v12665_v42  ;;  %v12838_v31 = vld [vmem:[#allocation2 + $0x68] sm:$0xf0] }
 0x85d   : > { %3089 = vmatpush.bf16.msrb.mxu0 %v12757_v0  ;;  %v12841_v26 = vor.u32 %v14890_v29, %v12838_v31  ;;  %v12822_v42 = vld [vmem:[#allocation2 + $0x48] sm:$0xf0]  ;;  %v12761_v0 = vor.u32 %v14998_v40, %v12758_v37  ;;  %v12972_v29 = vld [vmem:[#allocation2 + $0x270] sm:$0xf]  ;;  %v12964_v40 = vld [vmem:[#allocation2 + $0x260] sm:$0xf] }
 0x85e   : > { %3197 = vmatpush.bf16.msra.mxu2 %v12805_v5  ;;  %v12825_v2 = vor.u32 %v14886_v36, %v12822_v42  ;;  %v14990_v5 = vld [vmem:[#allocation2 + $0x384] sm:$0xf]  ;;  %v12973_v54 = vor.u32 %v14957_v32, %v12972_v29  ;;  %v14955_v42 = vld [vmem:[#allocation2 + $0x264] sm:$0xf0] }
 0x85f   : > { %v12729_v24 = vor.u32 %v14990_v5, %v12726_v12  ;;  %v12965_v46 = vor.u32 %v14955_v42, %v12964_v40  ;;  %v14911_v5 = vld [vmem:[#allocation2 + $0x104] sm:$0xf0]  ;;  %v13028_v40 = vld [vmem:[#allocation2 + $0x360] sm:$0xf]  ;;  %v14910_v42 = vld [vmem:[#allocation2 + $0x104] sm:$0xf] }
 0x861   : > { %3090 = vmatpush.bf16.msrb.mxu0 %v12749_v9  ;;  %v12908_v9 = vld [vmem:[#allocation2 + $0x170] sm:$0xf] }
 0x862   : > { %3198 = vmatpush.bf16.msra.mxu2 %v12797_v21  ;;  %v12909_v57 = vor.u32 %v14925_v10, %v12908_v9  ;;  %v12910_v21 = vld [vmem:[#allocation2 + $0x178] sm:$0xf0]  ;;  %v14918_v10 = vld [vmem:[#allocation2 + $0x144] sm:$0xf] }
 0x865   : > { %3091 = vmatpush.bf16.msrb.mxu0 %v12741_v52 }
 0x866   : > { %3199 = vmatpush.bf16.msra.mxu2 %v12789_v27  ;;  %v12974_v27 = vld [vmem:[#allocation2 + $0x278] sm:$0xf0] }
 0x867   : > { %v12977_v56 = vor.u32 %v14956_v33, %v12974_v27  ;;  %v14912_v33 = vld [vmem:[#allocation2 + $0x114] sm:$0xf]  ;;  %v12862_v27 = vld [vmem:[#allocation2 + $0x118] sm:$0xf0] }
 0x869   : > { %3092 = vmatpush.bf16.msrb.mxu0 %v12733_v47  ;;  %v14923_v47 = vld [vmem:[#allocation2 + $0x164] sm:$0xf0] }
 0x86a   : > { %v12901_v18 = vor.u32 %v14923_v47, %v12900_v45 }
 0x86d   : > { %3093 = vmatpush.bf16.msrb.mxu0 %v12725_v19  ;;  %v14880_v19 = vld [vmem:[#allocation2 + $0x14] sm:$0xf] }
 0x86e   : > { %v12801_v13 = vor.u32 %v14880_v19, %v12798_v62  ;;  %v14951_v19 = vld [vmem:[#allocation2 + $0x244] sm:$0xf0]  ;;  %v14950_v62 = vld [vmem:[#allocation2 + $0x244] sm:$0xf] }
 0x8a8   : > { %v16048_v6 = vpop.f32.mrf.mxu2 }
 0x8b0   : > { %v2534_v22 = vpop.f32.mrf.mxu2 }
 0x8b1   : > { %v2553_v30 = vpack.c.bf16 %v2534_v22, %v2534_v22  ;;  %v12884_v22 = vld [vmem:[#allocation2 + $0x140] sm:$0xf] }
 0x8b3   : > { %2776 = vmatmul.bf16.vlgmr.msra.gmra.mxu3 %v2553_v30  ;;  %2789 = vmatmul.bf16.vlgmr.msrb.gmra.mxu1 %v2553_v30  ;;  %v12913_v30 = vor.u32 %v14924_v15, %v12910_v21  ;;  %v12940_v21 = vld [vmem:[#allocation2 + $0x230] sm:$0xf] }
 0x8b4   : > { %3099 = vmatpush.bf16.msra.mxu3 %v12785_v23  ;;  %3205 = vmatpush.bf16.msrb.mxu1 %v12849_v25  ;;  %v14919_v23 = vld [vmem:[#allocation2 + $0x144] sm:$0xf0]  ;;  %v14922_v25 = vld [vmem:[#allocation2 + $0x164] sm:$0xf] }
 0x8b5   : > { %v12885_v31 = vor.u32 %v14919_v23, %v12884_v22  ;;  %v14949_v22 = vld [vmem:[#allocation2 + $0x234] sm:$0xf0]  ;;  %v14948_v23 = vld [vmem:[#allocation2 + $0x234] sm:$0xf] }
 0x8b6   : > { %v12941_v32 = vor.u32 %v14949_v22, %v12940_v21  ;;  %v12996_v21 = vld [vmem:[#allocation2 + $0x320] sm:$0xf]  ;;  %v14979_v22 = vld [vmem:[#allocation2 + $0x324] sm:$0xf0] }
 0x8b8   : > { %3100 = vmatpush.bf16.msra.mxu3 %v12777_v34  ;;  %v16050_v38 = vpop.f32.mrf.mxu2  ;;  %3206 = vmatpush.bf16.msrb.mxu1 %v12841_v26  ;;  %v12902_v34 = vld [vmem:[#allocation2 + $0x168] sm:$0xf0]  ;;  %v14917_v26 = vld [vmem:[#allocation2 + $0x134] sm:$0xf0] }
 0x8b9   : > { %v12905_v37 = vor.u32 %v14922_v25, %v12902_v34  ;;  %v12877_v36 = vor.u32 %v14917_v26, %v12876_v35  ;;  %v14989_v25 = vld [vmem:[#allocation2 + $0x374] sm:$0xf0]  ;;  %v2552_v34 = vpack.c.bf16 %v16048_v6, %v16048_v6 }
 0x8bc   : > { %3101 = vmatpush.bf16.msra.mxu3 %v12769_v39  ;;  %3207 = vmatpush.bf16.msrb.mxu1 %v12833_v41  ;;  %v14920_v39 = vld [vmem:[#allocation2 + $0x154] sm:$0xf] }
 0x8c0   : > { %3102 = vmatpush.bf16.msra.mxu3 %v12761_v0  ;;  %v2539_v48 = vpop.f32.mrf.mxu2  ;;  %3208 = vmatpush.bf16.msrb.mxu1 %v12825_v2  ;;  %v14954_v0 = vld [vmem:[#allocation2 + $0x264] sm:$0xf]  ;;  %v12894_v2 = vld [vmem:[#allocation2 + $0x158] sm:$0xf0] }
 0x8c1   : > { %v2555_v52 = vpack.c.bf16 %v2539_v48, %v2539_v48  ;;  %v12969_v9 = vor.u32 %v14954_v0, %v12966_v1  ;;  %v12956_v48 = vld [vmem:[#allocation2 + $0x250] sm:$0xf]  ;;  %v12854_v0 = vld [vmem:[#allocation2 + $0x108] sm:$0xf0] }
 0x8c3   : > { %2882 = vmatmul.bf16.vlgmr.msra.gmra.mxu0 %v2555_v52  ;;  %2895 = vmatmul.bf16.vlgmr.msrb.gmra.mxu3 %v2555_v52  ;;  %v14952_v52 = vld [vmem:[#allocation2 + $0x254] sm:$0xf] }
 0x8c4   : > { %3103 = vmatpush.bf16.msra.mxu3 %v12753_v11  ;;  %3209 = vmatpush.bf16.msrb.mxu1 %v12817_v51  ;;  %v12897_v11 = vor.u32 %v14920_v39, %v12894_v2  ;;  %v14953_v51 = vld [vmem:[#allocation2 + $0x254] sm:$0xf0]  ;;  %v12934_v39 = vld [vmem:[#allocation2 + $0x228] sm:$0xf0]  ;;  %v12924_v2 = vld [vmem:[#allocation2 + $0x210] sm:$0xf] }
 0x8c5   : > { %3298 = vmatpush.bf16.msra.mxu0 %v12909_v57  ;;  %v12886_v57 = vld [vmem:[#allocation2 + $0x148] sm:$0xf0]  ;;  %v12957_v47 = vor.u32 %v14953_v51, %v12956_v48  ;;  %v14988_v48 = vld [vmem:[#allocation2 + $0x374] sm:$0xf]  ;;  %v12925_v51 = vor.u32 %v14945_v43, %v12924_v2 }
 0x8c6   : > { %v12889_v17 = vor.u32 %v14918_v10, %v12886_v57  ;;  %v14985_v10 = vld [vmem:[#allocation2 + $0x354] sm:$0xf0]  ;;  %v12916_v57 = vld [vmem:[#allocation2 + $0x200] sm:$0xf] }
 0x8c8   : > { %3104 = vmatpush.bf16.msra.mxu3 %v12745_v60  ;;  %v16052_v7 = vpop.f32.mrf.mxu2  ;;  %3210 = vmatpush.bf16.msrb.mxu1 %v12809_v61  ;;  %v12961_v60 = vor.u32 %v14952_v52, %v12958_v55  ;;  %v12948_v61 = vld [vmem:[#allocation2 + $0x240] sm:$0xf] }
 0x8c9   : > { %3299 = vmatpush.bf16.msra.mxu0 %v12901_v18  ;;  %v12861_v18 = vor.u32 %v14913_v59, %v12860_v58  ;;  %v12949_v12 = vor.u32 %v14951_v19, %v12948_v61  ;;  %v14943_v58 = vld [vmem:[#allocation2 + $0x204] sm:$0xf0]  ;;  %v14942_v59 = vld [vmem:[#allocation2 + $0x204] sm:$0xf] }
 0x8ca   : > { %v14983_v61 = vld [vmem:[#allocation2 + $0x344] sm:$0xf0]  ;;  %v12917_v19 = vor.u32 %v14943_v58, %v12916_v57  ;;  %v15009_v57 = vld [vmem:[%s19796_s2 + $0x3e0] sm:$0xff] }
 0x8cc   : > { %3105 = vmatpush.bf16.msra.mxu3 %v12737_v8  ;;  %3211 = vmatpush.bf16.msrb.mxu1 %v12801_v13  ;;  %v12852_v8 = vld [vmem:[#allocation2 + $0x100] sm:$0xf]  ;;  %v12953_v13 = vor.u32 %v14950_v62, %v12950_v63 }
 0x8cd   : > { %3300 = vmatpush.bf16.msra.mxu0 %v12893_v14  ;;  %v12881_v14 = vor.u32 %v14916_v49, %v12878_v3  ;;  %v12853_v15 = vor.u32 %v14911_v5, %v12852_v8  ;;  %v13012_v49 = vld [vmem:[#allocation2 + $0x340] sm:$0xf]  ;;  %v13004_v8 = vld [vmem:[#allocation2 + $0x330] sm:$0xf]  ;;  %v14981_v5 = vld [vmem:[#allocation2 + $0x334] sm:$0xf0] }
 0x8ce   : > { %v13013_v63 = vor.u32 %v14983_v61, %v13012_v49  ;;  %v15019_v61 = vld [vmem:[%s19796_s2 + $0x430] sm:$0xff] }
 0x8d0   : > { %3106 = vmatpush.bf16.msra.mxu3 %v12729_v24  ;;  %v2544_v53 = vpop.f32.mrf.mxu2  ;;  %3212 = vmatpush.bf16.msrb.mxu1 %v12793_v4  ;;  %v12942_v24 = vld [vmem:[#allocation2 + $0x238] sm:$0xf0]  ;;  %v13036_v4 = vld [vmem:[#allocation2 + $0x370] sm:$0xf] }
 0x8d1   : > { %v2557_v41 = vpack.c.bf16 %v2544_v53, %v2544_v53  ;;  %3301 = vmatpush.bf16.msra.mxu0 %v12885_v31  ;;  %v12873_v31 = vor.u32 %v14914_v16, %v12870_v20  ;;  %v12945_v35 = vor.u32 %v14948_v23, %v12942_v24  ;;  %v13037_v26 = vor.u32 %v14989_v25, %v13036_v4  ;;  %v12932_v53 = vld [vmem:[#allocation2 + $0x220] sm:$0xf]  ;;  %v14982_v23 = vld [vmem:[#allocation2 + $0x344] sm:$0xf]  ;;  %v13014_v24 = vld [vmem:[#allocation2 + $0x348] sm:$0xf0] }
 0x8d2   : > { %v13005_v16 = vor.u32 %v14981_v5, %v13004_v8  ;;  %v12997_v4 = vor.u32 %v14979_v22, %v12996_v21  ;;  %v12988_v25 = vld [vmem:[#allocation2 + $0x310] sm:$0xf]  ;;  %v15017_v5 = vld [vmem:[%s19796_s2 + $0x420] sm:$0xff] }
 0x8d3   : > { %2988 = vmatmul.bf16.vlgmr.msrb.gmra.mxu2 %v2557_v41  ;;  %3001 = vmatmul.bf16.vlgmr.msra.gmra.mxu1 %v2557_v41  ;;  %v14987_v41 = vld [vmem:[#allocation2 + $0x364] sm:$0xf0]  ;;  %v15015_v22 = vld [vmem:[%s19796_s2 + $0x410] sm:$0xff] }
 0x8d4   : > { %3311 = vmatpush.bf16.msrb.mxu3 %v12913_v30  ;;  %3404 = vmatpush.bf16.msrb.mxu2 %v12973_v54  ;;  %v14947_v54 = vld [vmem:[#allocation2 + $0x224] sm:$0xf0]  ;;  %v13029_v1 = vor.u32 %v14987_v41, %v13028_v40  ;;  %v14974_v41 = vld [vmem:[#allocation2 + $0x304] sm:$0xf] }
 0x8d5   : > { %3417 = vmatpush.bf16.msra.mxu1 %v12977_v56  ;;  %3302 = vmatpush.bf16.msra.mxu0 %v12877_v36  ;;  %v14946_v56 = vld [vmem:[#allocation2 + $0x224] sm:$0xf]  ;;  %v12933_v36 = vor.u32 %v14947_v54, %v12932_v53  ;;  %v14976_v54 = vld [vmem:[#allocation2 + $0x314] sm:$0xf] }
 0x8d6   : > { %v12937_v6 = vor.u32 %v14946_v56, %v12934_v39  ;;  %v12990_v56 = vld [vmem:[#allocation2 + $0x318] sm:$0xf0] }
 0x8d7   : > { %v12993_v40 = vor.u32 %v14976_v54, %v12990_v56 }
 0x8d8   : > { %3312 = vmatpush.bf16.msrb.mxu3 %v12905_v37  ;;  %v16054_v45 = vpop.f32.mrf.mxu2  ;;  %3405 = vmatpush.bf16.msrb.mxu2 %v12965_v46  ;;  %v12865_v37 = vor.u32 %v14912_v33, %v12862_v27  ;;  %v12926_v46 = vld [vmem:[#allocation2 + $0x218] sm:$0xf0]  ;;  %v12980_v33 = vld [vmem:[#allocation2 + $0x300] sm:$0xf]  ;;  %v14975_v27 = vld [vmem:[#allocation2 + $0x304] sm:$0xf0] }
 0x8d9   : > { %3418 = vmatpush.bf16.msra.mxu1 %v12969_v9  ;;  %3303 = vmatpush.bf16.msra.mxu0 %v12869_v50  ;;  %v13020_v9 = vld [vmem:[#allocation2 + $0x350] sm:$0xf]  ;;  %v12857_v50 = vor.u32 %v14910_v42, %v12854_v0  ;;  %v12929_v52 = vor.u32 %v14944_v44, %v12926_v46  ;;  %v2558_v39 = vpack.c.bf16 %v16054_v45, %v16054_v45  ;;  %v15013_v45 = vld [vmem:[%s19796_s2 + $0x400] sm:$0xff] }
 0x8da   : > { %v13021_v55 = vor.u32 %v14985_v10, %v13020_v9  ;;  %v15012_v10 = vld [vmem:[%s19796_s2 + $0x3f8] sm:$0xff] }
 0x8dc   : > { %3313 = vmatpush.bf16.msrb.mxu3 %v12897_v11  ;;  %3406 = vmatpush.bf16.msrb.mxu2 %v12957_v47  ;;  %v13038_v11 = vld [vmem:[#allocation2 + $0x378] sm:$0xf0] }
 0x8dd   : > { %3419 = vmatpush.bf16.msra.mxu1 %v12961_v60  ;;  %3304 = vmatpush.bf16.msra.mxu0 %v12861_v18  ;;  %v13041_v47 = vor.u32 %v14988_v48, %v13038_v11  ;;  %v12918_v60 = vld [vmem:[#allocation2 + $0x208] sm:$0xf0]  ;;  %v15011_v11 = vld [vmem:[%s19796_s2 + $0x3f0] sm:$0xff] }
 0x8de   : > { %v13030_v18 = vld [vmem:[#allocation2 + $0x368] sm:$0xf0]  ;;  %v12921_v62 = vor.u32 %v14942_v59, %v12918_v60  ;;  %v15008_v60 = vld [vmem:[%s19796_s2 + $0x3d8] sm:$0xff] }
 0x8e0   : > { %3314 = vmatpush.bf16.msrb.mxu3 %v12889_v17  ;;  %v2549_v29 = vpop.f32.mrf.mxu2  ;;  %3407 = vmatpush.bf16.msrb.mxu2 %v12949_v12  ;;  %v14986_v17 = vld [vmem:[#allocation2 + $0x364] sm:$0xf]  ;;  %v14984_v12 = vld [vmem:[#allocation2 + $0x354] sm:$0xf] }
 0x8e1   : > { %3420 = vmatpush.bf16.msra.mxu1 %v12953_v13  ;;  %v2559_v30 = vpack.c.bf16 %v2549_v29, %v2549_v29  ;;  %3305 = vmatpush.bf16.msra.mxu0 %v12853_v15  ;;  %v13033_v3 = vor.u32 %v14986_v17, %v13030_v18  ;;  %v13022_v13 = vld [vmem:[#allocation2 + $0x358] sm:$0xf0]  ;;  %v2556_v15 = vpack.c.bf16 %v16052_v7, %v16052_v7  ;;  %v14977_v29 = vld [vmem:[#allocation2 + $0x314] sm:$0xf0]  ;;  %v14980_v7 = vld [vmem:[#allocation2 + $0x334] sm:$0xf] }
 0x8e2   : > { %v13025_v20 = vor.u32 %v14984_v12, %v13022_v13  ;;  %v15007_v18 = vld [vmem:[%s19796_s2 + $0x3d0] sm:$0xff] }
 0x8e3   : > { %3094 = vmatmul.bf16.vlgmr.msrb.gmra.mxu0 %v2559_v30  ;;  %3107 = vmatmul.bf16.vlgmr.msra.gmra.mxu3 %v2559_v30  ;;  %v13006_v30 = vld [vmem:[#allocation2 + $0x338] sm:$0xf0] }
 0x8e4   : > { %3315 = vmatpush.bf16.msrb.mxu3 %v12881_v14  ;;  %3200 = vmatmul.bf16.vlgmr.msra.gmra.mxu2 %v2552_v34  ;;  %v2554_v14 = vpack.c.bf16 %v16050_v38, %v16050_v38  ;;  %v13017_v38 = vor.u32 %v14982_v23, %v13014_v24 }
 0x8e5   : > { %3213 = vmatmul.bf16.vlgmr.msrb.gmra.mxu1 %v2552_v34  ;;  %3408 = vmatpush.bf16.msrb.mxu2 %v12941_v32  ;;  %v13009_v32 = vor.u32 %v14980_v7, %v13006_v30  ;;  %v14978_v34 = vld [vmem:[#allocation2 + $0x324] sm:$0xf]  ;;  %v15014_v30 = vld [vmem:[%s19796_s2 + $0x408] sm:$0xff] }
 0x8e6   : > { %3421 = vmatpush.bf16.msra.mxu1 %v12945_v35  ;;  %3510 = vmatpush.bf16.msrb.mxu0 %v13037_v26  ;;  %v12998_v35 = vld [vmem:[#allocation2 + $0x328] sm:$0xf0]  ;;  %v12981_v26 = vor.u32 %v14975_v27, %v12980_v33  ;;  %v13042_v27 = vld [vmem:[%s19798_s4 + $0x70] ss:$8 sm:$0x3] }
 0x8e7   : > { %v13001_v53 = vor.u32 %v14978_v34, %v12998_v35 }
 0x8e8   : > { %3316 = vmatpush.bf16.msrb.mxu3 %v12873_v31  ;;  %v12989_v31 = vor.u32 %v14977_v29, %v12988_v25 }
 0x8e9   : > { %3409 = vmatpush.bf16.msrb.mxu2 %v12933_v36 }
 0x8ea   : > { %3422 = vmatpush.bf16.msra.mxu1 %v12937_v6  ;;  %3511 = vmatpush.bf16.msrb.mxu0 %v13029_v1 }
 0x8ec   : > { %3317 = vmatpush.bf16.msrb.mxu3 %v12865_v37  ;;  %v12982_v37 = vld [vmem:[#allocation2 + $0x308] sm:$0xf0] }
 0x8ed   : > { %3410 = vmatpush.bf16.msrb.mxu2 %v12925_v51  ;;  %v12985_v36 = vor.u32 %v14974_v41, %v12982_v37  ;;  %v15010_v51 = vld [vmem:[%s19796_s2 + $0x3e8] sm:$0xff] }
 0x8ee   : > { %3423 = vmatpush.bf16.msra.mxu1 %v12929_v52  ;;  %3512 = vmatpush.bf16.msrb.mxu0 %v13021_v55  ;;  %v15021_v55 = vld [vmem:[%s19796_s2 + $0x440] sm:$0xff] }
 0x8f0   : > { %3318 = vmatpush.bf16.msrb.mxu3 %v12857_v50 }
 0x8f1   : > { %3411 = vmatpush.bf16.msrb.mxu2 %v12917_v19 }
 0x8f2   : > { %3424 = vmatpush.bf16.msra.mxu1 %v12921_v62  ;;  %3513 = vmatpush.bf16.msrb.mxu0 %v13013_v63  ;;  %v15018_v63 = vld [vmem:[%s19796_s2 + $0x428] sm:$0xff] }
 0x8f3   : > { %3306 = vmatmul.bf16.vlgmr.msra.gmra.mxu0 %v2554_v14  ;;  %3319 = vmatmul.bf16.vlgmr.msrb.gmra.mxu3 %v2554_v14 }
 0x8f4   : > { %3523 = vmatpush.bf16.msra.mxu3 %v13041_v47  ;;  %3412 = vmatmul.bf16.vlgmr.msrb.gmra.mxu2 %v2556_v15  ;;  %v15020_v47 = vld [vmem:[%s19796_s2 + $0x438] sm:$0xff] }
 0x8f5   : > { %3425 = vmatmul.bf16.vlgmr.msra.gmra.mxu1 %v2556_v15  ;;  %3688 = vmatpush.bf16.msra.mxu2 %v15013_v45 }
 0x8f6   : > { %3514 = vmatpush.bf16.msrb.mxu0 %v13005_v16  ;;  %3701 = vmatpush.bf16.msrb.mxu1 %v15021_v55 }
 0x8f8   : > { %3524 = vmatpush.bf16.msra.mxu3 %v13033_v3  ;;  %v15006_v3 = vld [vmem:[%s19796_s2 + $0x3c8] sm:$0xff] }
 0x8f9   : > { %3689 = vmatpush.bf16.msra.mxu2 %v15012_v10 }
 0x8fa   : > { %3515 = vmatpush.bf16.msrb.mxu0 %v12997_v4  ;;  %3702 = vmatpush.bf16.msrb.mxu1 %v15020_v47 }
 0x8fc   : > { %3525 = vmatpush.bf16.msra.mxu3 %v13025_v20  ;;  %v15016_v20 = vld [vmem:[%s19796_s2 + $0x418] sm:$0xff] }
 0x8fd   : > { %3690 = vmatpush.bf16.msra.mxu2 %v15011_v11 }
 0x8fe   : > { %3516 = vmatpush.bf16.msrb.mxu0 %v12989_v31  ;;  %3703 = vmatpush.bf16.msrb.mxu1 %v15019_v61  ;;  %v15024_v61 = vld [vmem:[%s19796_s2 + $0x460] sm:$0xff] }
 0x900   : > { %3526 = vmatpush.bf16.msra.mxu3 %v13017_v38 }
 0x901   : > { %3691 = vmatpush.bf16.msra.mxu2 %v15010_v51 }
 0x902   : > { %3517 = vmatpush.bf16.msrb.mxu0 %v12981_v26  ;;  %3704 = vmatpush.bf16.msrb.mxu1 %v15018_v63 }
 0x904   : > { %3527 = vmatpush.bf16.msra.mxu3 %v13009_v32 }
 0x905   : > { %3518 = vmatmul.bf16.vlgmr.msrb.gmra.mxu0 %v2558_v39  ;;  %3692 = vmatpush.bf16.msra.mxu2 %v15009_v57 }
 0x906   : > { %3705 = vmatpush.bf16.msrb.mxu1 %v15017_v5 }
 0x908   : > { %3528 = vmatpush.bf16.msra.mxu3 %v13001_v53  ;;  %v3545_v53 = vperm.slane %v13042_v27, 0 }
 0x909   : > { %3693 = vmatpush.bf16.msra.mxu2 %v15008_v60 }
 0x90a   : > { %3706 = vmatpush.bf16.msrb.mxu1 %v15016_v20 }
 0x90c   : > { %3529 = vmatpush.bf16.msra.mxu3 %v12993_v40 }
 0x90d   : > { %3694 = vmatpush.bf16.msra.mxu2 %v15007_v18  ;;  %v15022_v18 = vld [vmem:[%s19796_s2 + $0x450] sm:$0xff] }
 0x90e   : > { %3707 = vmatpush.bf16.msrb.mxu1 %v15015_v22  ;;  %v15028_v22 = vld [vmem:[%s19796_s2 + $0x480] sm:$0xff] }
 0x910   : > { %3530 = vmatpush.bf16.msra.mxu3 %v12985_v36 }
 0x911   : > { %3695 = vmatpush.bf16.msra.mxu2 %v15006_v3 }
 0x912   : > { %3708 = vmatpush.bf16.msrb.mxu1 %v15014_v30 }
 0x913   : > { %3531 = vmatmul.bf16.vlgmr.msra.gmra.mxu3 %v2558_v39 }
 0x930   : > { %v2790_v42 = vpop.f32.mrf.mxu1 }
 0x936   : > { %v2777_v0 = vpop.f32.mrf.mxu3 }
 0x938   : > { %v2792_v6 = vpop.f32.mrf.mxu1 }
 0x93e   : > { %v2779_v1 = vpop.f32.mrf.mxu3 }
 0x93f   : > { %v3546_v1 = vperm.slane %v13042_v27, 1  ;;  %v15428_v27 = vmov 0  }
 0x940   : > { %v2883_v2 = vpop.f32.mrf.mxu0  ;;  %15376 = vset.pattern.permute.xlu0 %v15428_v27  ;;  %15377 = vset.pattern.permute.xlu1 %v15428_v27 }
 0x946   : > { %v2896_v43 = vpop.f32.mrf.mxu3 }
 0x948   : > { %v2885_v44 = vpop.f32.mrf.mxu0 }
 0x94e   : > { %v2898_v46 = vpop.f32.mrf.mxu3 }
 0x950   : > { %v16067_v9 = vpop.f32.mrf.mxu1 }
 0x956   : > { %v2989_v48 = vpop.f32.mrf.mxu2 }
 0x958   : > { %v3004_v50 = vpop.f32.mrf.mxu1 }
 0x95e   : > { %v2991_v52 = vpop.f32.mrf.mxu2 }
 0x960   : > { %v3095_v58 = vpop.f32.mrf.mxu0 }
 0x962   : > { %v3214_v59 = vpop.f32.mrf.mxu1 }
 0x963   : > { %v3215_v4 = vadd.f32 %v3214_v59, %v2790_v42 }
 0x966   : > { %v3108_v49 = vpop.f32.mrf.mxu3 }
 0x967   : > { %v3201_v17 = vpop.f32.mrf.mxu2 }
 0x968   : > { %v3097_v19 = vpop.f32.mrf.mxu0  ;;  %v3202_v14 = vadd.f32 %v3201_v17, %v2777_v0  ;;  %v15023_v17 = vld [vmem:[%s19796_s2 + $0x458] sm:$0xff] }
 0x969   : > { %v3719_v19 = vld [vmem:[%s19798_s4 + $0x90] ss:$0 sm:$0xff] }
 0x96a   : > { %v3216_v62 = vpop.f32.mrf.mxu1 }
 0x96e   : > { %v3110_v8 = vpop.f32.mrf.mxu3 }
 0x96f   : > { %v3203_v12 = vpop.f32.mrf.mxu2 }
 0x970   : > { %v3307_v13 = vpop.f32.mrf.mxu0  ;;  %v291_v12 = vld [vmem:[%s19798_s4 + $0x10] ss:$0 sm:$0xff] }
 0x971   : > { %v3308_v15 = vadd.f32 %v3307_v13, %v2883_v2 }
 0x972   : > { %v3426_v16 = vpop.f32.mrf.mxu1 }
 0x973   : > { %v3536_v21 = vadd.f32 %v3308_v15, %v3202_v14  ;;  %v3427_v42 = vadd.f32 %v3426_v16, %v16067_v9  ;;  %v3591_v9 = vld [vmem:[%s19798_s4 + $0x80] ss:$0 sm:$0xff]  ;;  %v318_v14 = vadd.f32 %v15670_v28, %v291_v12  ;;  %v15027_v28 = vld [vmem:[%s19796_s2 + $0x478] sm:$0xff] }
 0x975   : > { %v322_v15 = vmul.f32 0.2, %v318_v14  ;;  %vm321_vm8 = vcmp.ge.f32.partialorder %v318_v14, 0.0 }
 0x976   : > { %v3320_v23 = vpop.f32.mrf.mxu3 }
 0x977   : > { %v3413_v24 = vpop.f32.mrf.mxu2  ;;  %v3321_v38 = vadd.f32 %v3320_v23, %v2896_v43  ;;  %v323_v16 = vsel %vm321_vm8, %v318_v14, %v322_v15  ;;  %v15026_v23 = vld [vmem:[%s19796_s2 + $0x470] sm:$0xff] }
 0x978   : > { %v3309_v25 = vpop.f32.mrf.mxu0  ;;  %v3414_v34 = vadd.f32 %v3413_v24, %v2989_v48  ;;  %v3718_v48 = vld [vmem:[%s19796_s2 + $0x448] sm:$0xf]  ;;  %v3742_v20 = vpack.c.bf16 %v323_v16, %v323_v16 }
 0x979   : > { %v3537_v29 = vadd.f32 %v3321_v38, %v3215_v4  ;;  %v3724_v11 = vsel %vm375_vm0, %v3718_v48, 0  ;;  %v3808_v25 = vld [vmem:[%s19798_s4 + $0xa0] ss:$0 sm:$0xff]  ;;  %v15035_v48 = vld [vmem:[%s19796_s2 + $0x4c8] sm:$0xff] }
 0x97a   : > { %v3428_v7 = vpop.f32.mrf.mxu1  ;;  %3733 = vmatpush.bf16.msra.mxu0 %v3724_v11  ;;  %v3900_v11 = vld [vmem:[%s19798_s4 + $0xc0] ss:$0 sm:$0xff] }
 0x97e   : > { %v3322_v31 = vpop.f32.mrf.mxu3 }
 0x97f   : > { %v3415_v32 = vpop.f32.mrf.mxu2 }
 0x982   : > { %v3519_v33 = vpop.f32.mrf.mxu0 }
 0x983   : > { %v3520_v35 = vadd.f32 %v3519_v33, %v3095_v58 }
 0x985   : > { %v3538_v26 = vadd.f32 %v3520_v35, %v3414_v34  ;;  %v15033_v34 = vld [vmem:[%s19796_s2 + $0x4b0] sm:$0xff]  ;;  %v15039_v35 = vld [vmem:[%s19796_s2 + $0x4e8] sm:$0xff] }
 0x986   : > { %3932 = vmatpush.bf16.msrb.mxu3 %v15033_v34 }
 0x987   : > { %v3540_v54 = vadd.f32 %v3538_v26, %v3536_v21  ;;  %v15029_v21 = vld [vmem:[%s19796_s2 + $0x488] sm:$0xff] }
 0x988   : > { %3854 = vmatpush.bf16.msrb.mxu2 %v15029_v21  ;;  %v15032_v26 = vld [vmem:[%s19796_s2 + $0x4a8] sm:$0xff]  ;;  %v15041_v21 = vld [vmem:[%s19796_s2 + $0x4f8] sm:$0xff] }
 0x989   : > { %v3549_v56 = vadd.f32 %v3545_v53, %v3540_v54  ;;  %v15038_v53 = vld [vmem:[%s19796_s2 + $0x4e0] sm:$0xff] }
 0x98a   : > { %v3521_v39 = vpop.f32.mrf.mxu0  ;;  %3933 = vmatpush.bf16.msrb.mxu3 %v15032_v26  ;;  %v15031_v54 = vld [vmem:[%s19796_s2 + $0x4a0] sm:$0xff]  ;;  %v15055_v26 = vld [vmem:[%s19796_s2 + $0x568] sm:$0xff] }
 0x98b   : > { %vm3551_vm15 = vcmp.ge.f32.partialorder %v3549_v56, 0.0  ;;  %v3553_v40 = vmul.f32 0.2, %v3549_v56  ;;  %v3822_v39 = vld [vmem:[%s19798_s4 + $0xb0] ss:$0 sm:$0xff] }
 0x98c   : > { %3855 = vmatpush.bf16.msrb.mxu2 %v15028_v22  ;;  %v15042_v22 = vld [vmem:[%s19796_s2 + $0x500] sm:$0xff] }
 0x98d   : > { %v3555_v41 = vsel %vm3551_vm15, %v3549_v56, %v3553_v40  ;;  %v15037_v56 = vld [vmem:[%s19796_s2 + $0x4d8] sm:$0xff]  ;;  %vm3946_vm15 = vcmask 31744  }
 0x98e   : > { %v3557_v37 = vpack.c.bf16 %v3555_v41, %v3555_v41  ;;  %3934 = vmatpush.bf16.msrb.mxu3 %v15031_v54 }
 0x990   : > { %3696 = vmatmul.bf16.vlgmr.msra.gmra.mxu2 %v3557_v37 }
 0x991   : > { %3856 = vmatpush.bf16.msrb.mxu2 %v15027_v28  ;;  %v15043_v28 = vld [vmem:[%s19796_s2 + $0x508] sm:$0xff] }
 0x995   : > { %3857 = vmatpush.bf16.msrb.mxu2 %v15026_v23  ;;  %v15044_v23 = vld [vmem:[%s19796_s2 + $0x510] sm:$0xff] }
 0x996   : > { %v3532_v36 = vpop.f32.mrf.mxu3 }
 0x997   : > { %v3533_v0 = vadd.f32 %v3532_v36, %v3108_v49  ;;  %v15025_v49 = vld [vmem:[%s19796_s2 + $0x468] sm:$0xff] }
 0x998   : > { %3773 = vmatpush.bf16.msrb.mxu0 %v15025_v49  ;;  %v15034_v49 = vld [vmem:[%s19796_s2 + $0x4c0] sm:$0xff] }
 0x999   : > { %v3539_v6 = vadd.f32 %v3533_v0, %v3427_v42  ;;  %4007 = vmatpush.bf16.msra.mxu2 %v15039_v35  ;;  %v3874_v42 = vsel %vm3872_vm11, 65535, %v15428_v27 }
 0x99b   : > { %v3541_v2 = vadd.f32 %v3539_v6, %v3537_v29 }
 0x99c   : > { %3774 = vmatpush.bf16.msrb.mxu0 %v15024_v61 }
 0x99d   : > { %v3550_v43 = vadd.f32 %v3546_v1, %v3541_v2  ;;  %4008 = vmatpush.bf16.msra.mxu2 %v15038_v53  ;;  %v3866_v2 = vld [vmem:[%s19796_s2 + $0x490] sm:$0x3] }
 0x99e   : > { %v3534_v44 = vpop.f32.mrf.mxu3 }
 0x99f   : > { %vm3552_vm2 = vcmp.ge.f32.partialorder %v3550_v43, 0.0  ;;  %v3554_v46 = vmul.f32 0.2, %v3550_v43  ;;  %v15036_v44 = vld [vmem:[%s19796_s2 + $0x4d0] sm:$0xff] }
 0x9a1   : > { %v3556_v45 = vsel %vm3552_vm2, %v3550_v43, %v3554_v46  ;;  %4009 = vmatpush.bf16.msra.mxu2 %v15037_v56  ;;  %v15030_v43 = vld [vmem:[%s19796_s2 + $0x498] sm:$0xff] }
 0x9a2   : > { %v3558_v10 = vpack.c.bf16 %v3556_v45, %v3556_v45  ;;  %3935 = vmatpush.bf16.msrb.mxu3 %v15030_v43 }
 0x9a4   : > { %3709 = vmatmul.bf16.vlgmr.msrb.gmra.mxu1 %v3558_v10 }
 0x9a5   : > { %4010 = vmatpush.bf16.msra.mxu2 %v15036_v44 }
 0xa13   : > { %v3697_v50 = vpop.f32.mrf.mxu2 }
 0xa14   : > { %v3698_v51 = vadd.f32 %v3697_v50, %v3591_v9 }
 0xa1b   : > { %v3699_v52 = vpop.f32.mrf.mxu2 }
 0xa21   : > { %v3710_v55 = vpop.f32.mrf.mxu1 }
 0xa22   : > { %v3711_v57 = vadd.f32 %v3710_v55, %v3698_v51 }
 0xa24   : > { %vm3714_vm3 = vcmp.ge.f32.partialorder %v3711_v57, 0.0  ;;  %v3715_v58 = vmul.f32 0.2, %v3711_v57 }
 0xa26   : > { %v3716_v59 = vsel %vm3714_vm3, %v3711_v57, %v3715_v58 }
 0xa27   : > { %v3717_v47 = vpack.c.bf16 %v3716_v59, %v3716_v59 }
 0xa29   : > { %v3712_v60 = vpop.f32.mrf.mxu1  ;;  %13107 = vmatmul.msk.bf16.vlgmr.msra.gmra.mxu0 %vm350_vm1, %v3717_v47 }
 0xa2a   : > { %3801 = vmatpush.bf16.msra.mxu0 %v15023_v17  ;;  %v3944_v60 = vld [vmem:[%s19796_s2 + $0x4b8] sm:$0x3] }
 0xa2e   : > { %3802 = vmatpush.bf16.msra.mxu0 %v15022_v18 }
 0xaa6   : > { %v3735_v62 = vpop.f32.mrf.mxu0 }
 0xaa7   : > { %v3736_v63 = vadd.f32 %v3735_v62, %v3719_v19  ;;  %v4016_v19 = vld [vmem:[%s19798_s4 + $0xd0] ss:$0 sm:$0xff] }
 0xaa9   : > { %vm3739_vm6 = vcmp.ge.f32.partialorder %v3736_v63, 0.0  ;;  %v3740_v3 = vmul.f32 0.2, %v3736_v63 }
 0xaab   : > { %v3741_v8 = vsel %vm3739_vm6, %v3736_v63, %v3740_v3  ;;  %v4046_v3 = vld [vmem:[%s19798_s4 + $0xe0] ss:$0 sm:$0xff] }
 0xaac   : > { %v3747_v5 = vpack.c.bf16 %v3741_v8, %v3741_v8 }
 0xaae   : > { %v3737_v13 = vpop.f32.mrf.mxu0  ;;  %13116 = vmatmul.msk.bf16.vlgmr.msrb.gmra.mxu0 %vm304_vm9, %v3747_v5 }
 0xabe   : > { %13125 = vmatmul.msk.bf16.vlgmr.msra.gmra.mxu0 %vm304_vm9, %v3742_v20  ;;  %v15040_v20 = vld [vmem:[%s19796_s2 + $0x4f0] sm:$0xff] }
 0xb2b   : > { %v3776_v24 = vpop.f32.mrf.mxu0 }
 0xb33   : > { %v3778_v4 = vpop.f32.mrf.mxu0 }
 0xb34   : > { %v15046_v4 = vld [vmem:[%s19796_s2 + $0x520] sm:$0xff] }
 0xb3b   : > { %v3804_v38 = vpop.f32.mrf.mxu0 }
 0xb3c   : > { %v3805_v29 = vadd.f32 %v3804_v38, %v3776_v24  ;;  %v15045_v24 = vld [vmem:[%s19796_s2 + $0x518] sm:$0xff]  ;;  %v15047_v38 = vld [vmem:[%s19796_s2 + $0x528] sm:$0xff] }
 0xb3e   : > { %v3809_v7 = vadd.f32 %v3808_v25, %v3805_v29  ;;  %v15052_v25 = vld [vmem:[%s19796_s2 + $0x550] sm:$0xff] }
 0xb3f   : > { %v15048_v29 = vld [vmem:[%s19796_s2 + $0x530] sm:$0xff] }
 0xb40   : > { %vm3810_vm10 = vcmp.ge.f32.partialorder %v3809_v7, 0.0  ;;  %v3811_v30 = vmul.f32 0.2, %v3809_v7 }
 0xb42   : > { %v3812_v31 = vsel %vm3810_vm10, %v3809_v7, %v3811_v30  ;;  %v15051_v7 = vld [vmem:[%s19796_s2 + $0x548] sm:$0xff] }
 0xb43   : > { %v3813_v32 = vpack.c.bf16 %v3812_v31, %v3812_v31  ;;  %v3806_v33 = vpop.f32.mrf.mxu0 }
 0xb44   : > { %v15056_v33 = vld [vmem:[%s19796_s2 + $0x570] sm:$0xff] }
 0xb45   : > { %13142 = vmatmul.msk.bf16.vlgmr.msrb.gmra.mxu2 %vm1262_vm5, %v3813_v32 }
 0xb46   : > { %4313 = vmatpush.bf16.msrb.mxu2 %v15056_v33 }
 0xb4a   : > { %4314 = vmatpush.bf16.msrb.mxu2 %v15055_v26 }
 0xbc8   : > { %v3859_v40 = vpop.f32.mrf.mxu2 }
 0xbc9   : > { %v3860_v41 = vadd.f32 %v3859_v40, %v3822_v39 }
 0xbcb   : > { %vm3863_vm12 = vcmp.ge.f32.partialorder %v3860_v41, 0.0  ;;  %v3864_v37 = vmul.f32 0.2, %v3860_v41 }
 0xbcd   : > { %v3865_v36 = vsel %vm3863_vm12, %v3860_v41, %v3864_v37  ;;  %v15060_v37 = vld [vmem:[%s19796_s2 + $0x590] sm:$0xff] }
 0xbce   : > { %v3867_v0 = vpack.c.bf16 %v3865_v36, %v3865_v36 }
 0xbd0   : > { %v3876_v6 = vand.u32 %v3874_v42, %v3867_v0  ;;  %v3861_v1 = vpop.f32.mrf.mxu2 }
 0xbd2   : > { %3885 = vmatpush.bf16.msra.mxu1 %v3876_v6  ;;  %v15059_v6 = vld [vmem:[%s19796_s2 + $0x588] sm:$0xff] }
 0xbd5   : > { %13143 = vmatmul.msk.bf16.vlgmr.msra.gmra.mxu1 %vm3868_vm13, %v3866_v2 }
 0xbd6   : > { %4038 = vmatpush.bf16.msrb.mxu1 %v15035_v48 }
 0xbda   : > { %4039 = vmatpush.bf16.msrb.mxu1 %v15034_v49 }
 0xbde   : > { %4347 = vmatpush.bf16.msra.mxu1 %v15060_v37 }
 0xbe2   : > { %4348 = vmatpush.bf16.msra.mxu1 %v15059_v6 }
 0xc52   : > { %v3887_v46 = vpop.f32.mrf.mxu1 }
 0xc53   : > { %v3891_v45 = vpack.c.bf16 %v3887_v46, %v3887_v46  ;;  %v15050_v46 = vld [vmem:[%s19796_s2 + $0x540] sm:$0xff] }
 0xc55   : > { %13160 = vmatmul.msk.bf16.vlgmr.msrb.gmra.mxu3 %vm1262_vm5, %v3891_v45  ;;  %13178 = vmatmul.msk.bf16.vlgmr.msra.gmra.mxu2 %vm1262_vm5, %v3891_v45 }
 0xc5a   : > { %v3889_v10 = vpop.f32.mrf.mxu1 }
 0xc5b   : > { %v15049_v10 = vld [vmem:[%s19796_s2 + $0x538] sm:$0xff] }
 0xcd8   : > { %v3937_v50 = vpop.f32.mrf.mxu3  ;;  %v4012_v9 = vpop.f32.mrf.mxu2 }
 0xcd9   : > { %v3938_v51 = vadd.f32 %v3937_v50, %v3900_v11  ;;  %v15064_v11 = vld [vmem:[%s19796_s2 + $0x5b0] sm:$0xff] }
 0xcdb   : > { %vm3941_vm14 = vcmp.ge.f32.partialorder %v3938_v51, 0.0  ;;  %v3942_v52 = vmul.f32 0.2, %v3938_v51 }
 0xcdd   : > { %v3943_v55 = vsel %vm3941_vm14, %v3938_v51, %v3942_v52  ;;  %v15063_v52 = vld [vmem:[%s19796_s2 + $0x5a8] sm:$0xff] }
 0xcde   : > { %v3945_v57 = vpack.c.bf16 %v3943_v55, %v3943_v55 }
 0xce0   : > { %v3939_v58 = vpop.f32.mrf.mxu3  ;;  %v4014_v59 = vpop.f32.mrf.mxu2  ;;  %v3951_v47 = vsel %vm263_vm4, %v3945_v57, 0 }
 0xce1   : > { %3960 = vmatpush.bf16.msrb.mxu0 %v3951_v47  ;;  %v15062_v58 = vld [vmem:[%s19796_s2 + $0x5a0] sm:$0xff] }
 0xce4   : > { %13161 = vmatmul.msk.bf16.vlgmr.msrb.gmra.mxu0 %vm3946_vm15, %v3944_v60  ;;  %v15061_v60 = vld [vmem:[%s19796_s2 + $0x598] sm:$0xff] }
 0xce5   : > { %4279 = vmatpush.bf16.msra.mxu0 %v15052_v25 }
 0xce9   : > { %4280 = vmatpush.bf16.msra.mxu0 %v15051_v7 }
 0xced   : > { %4381 = vmatpush.bf16.msrb.mxu0 %v15064_v11 }
 0xcf1   : > { %4382 = vmatpush.bf16.msrb.mxu0 %v15063_v52 }
 0xd61   : > { %v3962_v61 = vpop.f32.mrf.mxu0 }
 0xd62   : > { %v3966_v17 = vpack.c.bf16 %v3962_v61, %v3962_v61  ;;  %v15066_v61 = vld [vmem:[%s19796_s2 + $0x5c0] sm:$0xff] }
 0xd63   : > { %4415 = vmatpush.bf16.msra.mxu2 %v15066_v61 }
 0xd64   : > { %13187 = vmatmul.msk.bf16.vlgmr.msrb.gmra.mxu1 %vm304_vm9, %v3966_v17  ;;  %v15054_v17 = vld [vmem:[%s19796_s2 + $0x560] sm:$0xff] }
 0xd65   : > { %4449 = vmatpush.bf16.msrb.mxu1 %v15050_v46 }
 0xd69   : > { %v3964_v18 = vpop.f32.mrf.mxu0  ;;  %4450 = vmatpush.bf16.msrb.mxu1 %v15049_v10 }
 0xde1   : > { %v4041_v62 = vpop.f32.mrf.mxu1 }
 0xde2   : > { %v4042_v63 = vadd.f32 %v4041_v62, %v4016_v19 }
 0xde4   : > { %v4045_v8 = vadd.f32 %v4042_v63, %v4012_v9  ;;  %v15065_v63 = vld [vmem:[%s19796_s2 + $0x5b8] sm:$0xff] }
 0xde5   : > { %4416 = vmatpush.bf16.msra.mxu2 %v15065_v63 }
 0xde6   : > { %v4047_v5 = vadd.f32 %v4046_v3, %v4045_v8  ;;  %v15053_v3 = vld [vmem:[%s19796_s2 + $0x558] sm:$0xff] }
 0xde8   : > { %v4049_v12 = vmul.f32 0.2, %v4047_v5  ;;  %vm4048_vm2 = vcmp.ge.f32.partialorder %v4047_v5, 0.0 }
 0xde9   : > { %v4043_v13 = vpop.f32.mrf.mxu1 }
 0xdea   : > { %v4050_v14 = vsel %vm4048_vm2, %v4047_v5, %v4049_v12  ;;  %v15058_v12 = vld [vmem:[%s19796_s2 + $0x580] sm:$0xff] }
 0xdeb   : > { %v4069_v15 = vpack.c.bf16 %v4050_v14, %v4050_v14 }
 0xded   : > { %v4143_v16 = vsel %vm263_vm4, %v4069_v15, 0 }
 0xdee   : > { %4152 = vmatpush.bf16.msra.mxu3 %v4143_v16 }
 0xdf1   : > { %13224 = vmatmul.msk.bf16.vlgmr.msra.gmra.mxu3 %vm3946_vm15, %v15040_v20 }
 0xe01   : > { %13225 = vmatmul.msk.bf16.gmra.mxu3 %vm3946_vm15, %v15041_v21 }
 0xe11   : > { %13226 = vmatmul.msk.bf16.gmra.mxu3 %vm3946_vm15, %v15042_v22 }
 0xe21   : > { %13227 = vmatmul.msk.bf16.gmra.mxu3 %vm3946_vm15, %v15043_v28  ;;  %v15057_v28 = vld [vmem:[%s19796_s2 + $0x578] sm:$0xff] }
 0xe31   : > { %13228 = vmatmul.msk.bf16.gmra.mxu3 %vm3946_vm15, %v15044_v23 }
 0xe41   : > { %13229 = vmatmul.msk.bf16.gmra.mxu3 %vm3946_vm15, %v15045_v24 }
 0xe51   : > { %13230 = vmatmul.msk.bf16.gmra.mxu3 %vm3946_vm15, %v15046_v4 }
 0xe61   : > { %13231 = vmatmul.msk.bf16.gmra.mxu3 %vm3946_vm15, %v15047_v38 }
 0xe71   : > { %13232 = vmatmul.msk.bf16.gmra.mxu3 %vm3946_vm15, %v15048_v29 }
 0xe74   : > { %v4154_v30 = vpop.f32.mrf.mxu3 }
 0xe75   : > { %v4199_v18 = vpack.c.bf16 %v4154_v30, %v4154_v30 }
 0xe77   : > { %v4425_v8 = vunpack.c.l.b16 %v4199_v18 }
 0xe7c   : > { %v4156_v31 = vpop.f32.mrf.mxu3 }
 0xe7d   : > { %v4200_v49 = vpack.c.bf16 %v4156_v31, %v4156_v31 }
 0xe7f   : > { %v4426_v62 = vunpack.c.l.b16 %v4200_v49 }
 0xe81   : > { %v4427_v5 = vpack.c.b16 %v4426_v62, %v4425_v8 }
 0xe84   : > { %v4159_v32 = vpop.f32.mrf.mxu3 }
 0xe85   : > { %v4201_v27 = vpack.c.bf16 %v4159_v32, %v4159_v32 }
 0xe87   : > { %v4255_v53 = vunpack.c.l.b16 %v4201_v27 }
 0xe8c   : > { %v4161_v34 = vpop.f32.mrf.mxu3 }
 0xe8d   : > { %v4202_v35 = vpack.c.bf16 %v4161_v34, %v4161_v34 }
 0xe8f   : > { %v4256_v54 = vunpack.c.l.b16 %v4202_v35 }
 0xe91   : > { %v4257_v56 = vpack.c.b16 %v4256_v54, %v4255_v53 }
 0xe93   : > { %13241 = vmatmul.msk.bf16.vlgmr.msra.gmra.mxu0 %vm304_vm9, %v4257_v56 }
 0xe94   : > { %v16267_v39 = vpop.f32.mrf.mxu3  ;;  %4483 = vmatpush.bf16.msra.mxu0 %v15054_v17 }
 0xe95   : > { %v4203_v30 = vpack.c.bf16 %v16267_v39, %v16267_v39 }
 0xe97   : > { %v4459_v34 = vunpack.c.l.b16 %v4203_v30  ;;  %v15074_v30 = vld [vmem:[%s19796_s2 + $0x600] sm:$0xff] }
 0xe98   : > { %4484 = vmatpush.bf16.msra.mxu0 %v15053_v3  ;;  %v4567_v3 = vld [vmem:[%s19798_s4 + $0xf0] ss:$0 sm:$0xff] }
 0xe9c   : > { %v16269_v40 = vpop.f32.mrf.mxu3 }
 0xe9d   : > { %v4204_v7 = vpack.c.bf16 %v16269_v40, %v16269_v40 }
 0xe9f   : > { %v4460_v33 = vunpack.c.l.b16 %v4204_v7  ;;  %v15073_v7 = vld [vmem:[%s19796_s2 + $0x5f8] sm:$0xff] }
 0xea1   : > { %v4461_v53 = vpack.c.b16 %v4460_v33, %v4459_v34 }
 0xea4   : > { %v4169_v41 = vpop.f32.mrf.mxu3 }
 0xea5   : > { %v4205_v36 = vpack.c.bf16 %v4169_v41, %v4169_v41 }
 0xea7   : > { %v4289_v1 = vunpack.c.l.b16 %v4205_v36 }
 0xeac   : > { %v4171_v42 = vpop.f32.mrf.mxu3 }
 0xead   : > { %v4206_v0 = vpack.c.bf16 %v4171_v42, %v4171_v42 }
 0xeaf   : > { %v4290_v2 = vunpack.c.l.b16 %v4206_v0 }
 0xeb1   : > { %v4291_v43 = vpack.c.b16 %v4290_v2, %v4289_v1 }
 0xeb3   : > { %13250 = vmatmul.msk.bf16.vlgmr.msrb.gmra.mxu2 %vm304_vm9, %v4291_v43 }
 0xeb4   : > { %v16278_v44 = vpop.f32.mrf.mxu3  ;;  %4517 = vmatpush.bf16.msrb.mxu2 %v15058_v12 }
 0xeb5   : > { %v4207_v40 = vpack.c.bf16 %v16278_v44, %v16278_v44 }
 0xeb7   : > { %v4493_v41 = vunpack.c.l.b16 %v4207_v40 }
 0xeb8   : > { %4518 = vmatpush.bf16.msrb.mxu2 %v15057_v28 }
 0xebc   : > { %v16283_v45 = vpop.f32.mrf.mxu3 }
 0xebd   : > { %v4208_v56 = vpack.c.bf16 %v16283_v45, %v16283_v45 }
 0xebf   : > { %v4494_v39 = vunpack.c.l.b16 %v4208_v56 }
 0xec1   : > { %v16332_v37 = vpack.c.b16 %v4494_v39, %v4493_v41 }
 0xec4   : > { %v4179_v48 = vpop.f32.mrf.mxu3 }
 0xec5   : > { %v4209_v50 = vpack.c.bf16 %v4179_v48, %v4179_v48 }
 0xec7   : > { %v4323_v55 = vunpack.c.l.b16 %v4209_v50 }
 0xecc   : > { %v4181_v9 = vpop.f32.mrf.mxu3 }
 0xecd   : > { %v4210_v51 = vpack.c.bf16 %v4181_v9, %v4181_v9 }
 0xecf   : > { %v4324_v57 = vunpack.c.l.b16 %v4210_v51 }
 0xed1   : > { %v4325_v59 = vpack.c.b16 %v4324_v57, %v4323_v55 }
 0xed3   : > { %13259 = vmatmul.msk.bf16.vlgmr.msra.gmra.mxu1 %vm304_vm9, %v4325_v59 }
 0xed4   : > { %v4184_v47 = vpop.f32.mrf.mxu3  ;;  %4551 = vmatpush.bf16.msra.mxu1 %v15062_v58 }
 0xed5   : > { %v4211_v15 = vpack.c.bf16 %v4184_v47, %v4184_v47 }
 0xed7   : > { %v4527_v23 = vunpack.c.l.b16 %v4211_v15 }
 0xed8   : > { %4552 = vmatpush.bf16.msra.mxu1 %v15061_v60 }
 0xedc   : > { %v4186_v19 = vpop.f32.mrf.mxu3 }
 0xedd   : > { %v4212_v14 = vpack.c.bf16 %v4186_v19, %v4186_v19 }
 0xedf   : > { %v4528_v21 = vunpack.c.l.b16 %v4212_v14 }
 0xee1   : > { %v4529_v38 = vpack.c.b16 %v4528_v21, %v4527_v23  ;;  %v15067_v23 = vld [vmem:[%s19796_s2 + $0x5c8] sm:$0xff] }
 0xee3   : > { %13286 = vmatmul.msk.bf16.vlgmr.msrb.gmra.mxu1 %vm304_vm9, %v4427_v5 }
 0xee4   : > { %v4189_v13 = vpop.f32.mrf.mxu3 }
 0xee5   : > { %v4213_v16 = vpack.c.bf16 %v4189_v13, %v4189_v13 }
 0xee7   : > { %v4357_v24 = vunpack.c.l.b16 %v4213_v16 }
 0xeec   : > { %v4191_v20 = vpop.f32.mrf.mxu3 }
 0xeed   : > { %v4214_v22 = vpack.c.bf16 %v4191_v20, %v4191_v20 }
 0xeef   : > { %v4358_v4 = vunpack.c.l.b16 %v4214_v22 }
 0xef1   : > { %v4359_v25 = vpack.c.b16 %v4358_v4, %v4357_v24  ;;  %v15068_v24 = vld [vmem:[%s19796_s2 + $0x5d0] sm:$0xff]  ;;  %v15069_v4 = vld [vmem:[%s19796_s2 + $0x5d8] sm:$0xff] }
 0xef3   : > { %13268 = vmatmul.msk.bf16.vlgmr.msrb.gmra.mxu0 %vm304_vm9, %v4359_v25  ;;  %13313 = vmatmul.msk.bf16.vlgmr.msra.gmra.mxu1 %vm304_vm9, %v4529_v38  ;;  %v15070_v38 = vld [vmem:[%s19796_s2 + $0x5e0] sm:$0xff]  ;;  %v15071_v25 = vld [vmem:[%s19796_s2 + $0x5e8] sm:$0xff] }
 0xef4   : > { %v4194_v29 = vpop.f32.mrf.mxu3 }
 0xef5   : > { %v4215_v31 = vpack.c.bf16 %v4194_v29, %v4194_v29  ;;  %v15072_v29 = vld [vmem:[%s19796_s2 + $0x5f0] sm:$0xff] }
 0xef7   : > { %v4391_v35 = vunpack.c.l.b16 %v4215_v31  ;;  %v15077_v31 = vld [vmem:[%s19796_s2 + $0x618] sm:$0xff] }
 0xefc   : > { %v4196_v32 = vpop.f32.mrf.mxu3 }
 0xefd   : > { %v4216_v27 = vpack.c.bf16 %v4196_v32, %v4196_v32  ;;  %v15075_v32 = vld [vmem:[%s19796_s2 + $0x608] sm:$0xff] }
 0xeff   : > { %v4392_v26 = vunpack.c.l.b16 %v4216_v27 }
 0xf01   : > { %v4393_v54 = vpack.c.b16 %v4392_v26, %v4391_v35 }
 0xf03   : > { %13277 = vmatmul.msk.bf16.vlgmr.msra.gmra.mxu2 %vm304_vm9, %v4393_v54  ;;  %13295 = vmatmul.msk.bf16.vlgmr.msra.gmra.mxu0 %vm304_vm9, %v4461_v53  ;;  %v15079_v54 = vld [vmem:[%s19796_s2 + $0x628] sm:$0xff] }
 0xf04   : > { %4778 = vmatpush.bf16.msra.mxu2 %v15077_v31  ;;  %4806 = vmatpush.bf16.msrb.mxu1 %v15079_v54 }
 0xf10   : > { %v4282_v36 = vpop.f32.mrf.mxu0 }
 0xf13   : > { %13304 = vmatmul.msk.bf16.vlgmr.msrb.gmra.mxu2 %vm304_vm9, %v16332_v37 }
 0xf18   : > { %v4284_v0 = vpop.f32.mrf.mxu0 }
 0xf36   : > { %v4316_v6 = vpop.f32.mrf.mxu2 }
 0xf3e   : > { %v4318_v43 = vpop.f32.mrf.mxu2 }
 0xf50   : > { %v4350_v42 = vpop.f32.mrf.mxu1 }
 0xf58   : > { %v4352_v1 = vpop.f32.mrf.mxu1 }
 0xf60   : > { %v4452_v46 = vpop.f32.mrf.mxu1 }
 0xf61   : > { %v4453_v52 = vadd.f32 %v4452_v46, %v4282_v36 }
 0xf68   : > { %v4454_v48 = vpop.f32.mrf.mxu1 }
 0xf69   : > { %v4455_v18 = vadd.f32 %v4454_v48, %v4284_v0 }
 0xf70   : > { %v4384_v2 = vpop.f32.mrf.mxu0  ;;  %v4554_v50 = vpop.f32.mrf.mxu1 }
 0xf71   : > { %v4555_v55 = vadd.f32 %v4554_v50, %v4384_v2  ;;  %v15081_v2 = vld [vmem:[%s19796_s2 + $0x638] sm:$0xff] }
 0xf72   : > { %4834 = vmatpush.bf16.msrb.mxu2 %v15081_v2 }
 0xf78   : > { %v4386_v10 = vpop.f32.mrf.mxu0  ;;  %v4556_v49 = vpop.f32.mrf.mxu1 }
 0xf79   : > { %v4557_v19 = vadd.f32 %v4556_v49, %v4386_v10  ;;  %v15078_v49 = vld [vmem:[%s19796_s2 + $0x620] sm:$0xff] }
 0xf80   : > { %v4486_v44 = vpop.f32.mrf.mxu0 }
 0xf81   : > { %v4487_v9 = vadd.f32 %v4486_v44, %v4316_v6 }
 0xf83   : > { %v4559_v58 = vadd.f32 %v4487_v9, %v4453_v52 }
 0xf86   : > { %v4418_v45 = vpop.f32.mrf.mxu2 }
 0xf88   : > { %v4488_v47 = vpop.f32.mrf.mxu0 }
 0xf89   : > { %v4489_v61 = vadd.f32 %v4488_v47, %v4318_v43  ;;  %v15084_v47 = vld [vmem:[%s19796_s2 + $0x650] sm:$0xff] }
 0xf8b   : > { %v4560_v8 = vadd.f32 %v4489_v61, %v4455_v18 }
 0xf8e   : > { %v4420_v11 = vpop.f32.mrf.mxu2 }
 0xf96   : > { %v4520_v51 = vpop.f32.mrf.mxu2 }
 0xf97   : > { %v4521_v57 = vadd.f32 %v4520_v51, %v4350_v42  ;;  %v15083_v51 = vld [vmem:[%s19796_s2 + $0x648] sm:$0xff] }
 0xf98   : > { %4862 = vmatpush.bf16.msra.mxu1 %v15083_v51 }
 0xf99   : > { %v4561_v59 = vadd.f32 %v4555_v55, %v4521_v57 }
 0xf9b   : > { %v4563_v60 = vadd.f32 %v4561_v59, %v4559_v58 }
 0xf9d   : > { %v4565_v62 = vadd.f32 %v4563_v60, %v4418_v45  ;;  %v15076_v60 = vld [vmem:[%s19796_s2 + $0x610] sm:$0xff] }
 0xf9e   : > { %v4522_v17 = vpop.f32.mrf.mxu2 }
 0xf9f   : > { %v4523_v63 = vadd.f32 %v4522_v17, %v4352_v1  ;;  %v4568_v12 = vadd.f32 %v4567_v3, %v4565_v62 }
 0xfa1   : > { %v4562_v5 = vadd.f32 %v4557_v19, %v4523_v63  ;;  %v4572_v16 = vmul.f32 0.2, %v4568_v12  ;;  %vm4570_vm4 = vcmp.ge.f32.partialorder %v4568_v12, 0.0 }
 0xfa3   : > { %v4564_v13 = vadd.f32 %v4562_v5, %v4560_v8  ;;  %v4574_v21 = vsel %vm4570_vm4, %v4568_v12, %v4572_v16 }
 0xfa5   : > { %v4566_v14 = vadd.f32 %v4564_v13, %v4420_v11 }
 0xfa7   : > { %v4569_v15 = vadd.f32 %v4567_v3, %v4566_v14  ;;  %v15080_v3 = vld [vmem:[%s19796_s2 + $0x630] sm:$0xff] }
 0xfa9   : > { %vm4571_vm3 = vcmp.ge.f32.partialorder %v4569_v15, 0.0  ;;  %v4573_v20 = vmul.f32 0.2, %v4569_v15 }
 0xfab   : > { %v4575_v22 = vsel %vm4571_vm3, %v4569_v15, %v4573_v20 }
 0xfac   : > { %v4594_v28 = vpack.c.bf16 %v4575_v22, %v4574_v21 }
 0xfae   : > { %4674 = vmatpush.bf16.msrb.mxu0 %v4594_v28 }
 0xfb1   : > { %13350 = vmatmul.msk.bf16.vlgmr.msrb.gmra.mxu0 %vm829_vm7, %v15067_v23  ;;  %v15086_v23 = vld [vmem:[%s19796_s2 + $0x660] sm:$0xff] }
 0xfc1   : > { %13351 = vmatmul.msk.bf16.gmra.mxu0 %vm829_vm7, %v15068_v24  ;;  %v15082_v24 = vld [vmem:[%s19796_s2 + $0x640] sm:$0xff] }
 0xfd1   : > { %13352 = vmatmul.msk.bf16.gmra.mxu0 %vm829_vm7, %v15069_v4 }
 0xfe1   : > { %13353 = vmatmul.msk.bf16.gmra.mxu0 %vm829_vm7, %v15070_v38 }
 0xff1   : > { %13354 = vmatmul.msk.bf16.gmra.mxu0 %vm829_vm7, %v15071_v25  ;;  %v15085_v25 = vld [vmem:[%s19796_s2 + $0x658] sm:$0xff] }
0x1001   : > { %13355 = vmatmul.msk.bf16.gmra.mxu0 %vm829_vm7, %v15072_v29 }
0x1011   : > { %13356 = vmatmul.msk.bf16.gmra.mxu0 %vm829_vm7, %v15073_v7 }
0x1021   : > { %13357 = vmatmul.msk.bf16.gmra.mxu0 %vm829_vm7, %v15074_v30 }
0x102e   : > { %v4676_v33 = vpop.f32.mrf.mxu0 }
0x102f   : > { %v4721_v13 = vpack.c.bf16 %v4676_v33, %v4676_v33 }
0x1031   : > { %13358 = vmatmul.msk.bf16.gmra.mxu0 %vm829_vm7, %v15075_v32  ;;  %v4899_v21 = vunpack.c.l.b16 %v4721_v13 }
0x1036   : > { %v4678_v27 = vpop.f32.mrf.mxu0 }
0x1037   : > { %v4722_v12 = vpack.c.bf16 %v4678_v27, %v4678_v27 }
0x1039   : > { %v4900_v16 = vunpack.c.l.b16 %v4722_v12 }
0x103b   : > { %v4901_v4 = vpack.c.b16 %v4900_v16, %v4899_v21 }
0x103e   : > { %v4681_v34 = vpop.f32.mrf.mxu0 }
0x103f   : > { %v4723_v35 = vpack.c.bf16 %v4681_v34, %v4681_v34 }
0x1041   : > { %v4759_v56 = vunpack.c.l.b16 %v4723_v35 }
0x1046   : > { %v4683_v26 = vpop.f32.mrf.mxu0 }
0x1047   : > { %v4724_v53 = vpack.c.bf16 %v4683_v26, %v4683_v26 }
0x1049   : > { %v4760_v40 = vunpack.c.l.b16 %v4724_v53 }
0x104b   : > { %v4761_v39 = vpack.c.b16 %v4760_v40, %v4759_v56 }
0x104d   : > { %13363 = vmatmul.msk.bf16.vlgmr.msra.gmra.mxu2 %vm829_vm7, %v4761_v39 }
0x104e   : > { %v16382_v41 = vpop.f32.mrf.mxu0  ;;  %4890 = vmatpush.bf16.msra.mxu2 %v15084_v47 }
0x104f   : > { %v4725_v30 = vpack.c.bf16 %v16382_v41, %v16382_v41 }
0x1051   : > { %v4927_v27 = vunpack.c.l.b16 %v4725_v30  ;;  %v15089_v30 = vld [vmem:[%s19796_s2 + $0x678] sm:$0xff] }
0x1056   : > { %v16384_v36 = vpop.f32.mrf.mxu0 }
0x1057   : > { %v4726_v29 = vpack.c.bf16 %v16384_v36, %v16384_v36 }
0x1059   : > { %v4928_v32 = vunpack.c.l.b16 %v4726_v29  ;;  %v15087_v29 = vld [vmem:[%s19796_s2 + $0x668] sm:$0xff] }
0x105b   : > { %v4929_v35 = vpack.c.b16 %v4928_v32, %v4927_v27  ;;  %v15091_v32 = vld [vmem:[%s19796_s2 + $0x688] sm:$0xff]  ;;  %v15093_v27 = vld [vmem:[%s19796_s2 + $0x698] sm:$0xff] }
0x105e   : > { %v4691_v42 = vpop.f32.mrf.mxu0 }
0x105f   : > { %v4727_v0 = vpack.c.bf16 %v4691_v42, %v4691_v42 }
0x1061   : > { %v4787_v43 = vunpack.c.l.b16 %v4727_v0 }
0x1066   : > { %v4693_v6 = vpop.f32.mrf.mxu0 }
0x1067   : > { %v4728_v1 = vpack.c.bf16 %v4693_v6, %v4693_v6 }
0x1069   : > { %v4788_v46 = vunpack.c.l.b16 %v4728_v1 }
0x106b   : > { %v4789_v10 = vpack.c.b16 %v4788_v46, %v4787_v43 }
0x106d   : > { %13368 = vmatmul.msk.bf16.vlgmr.msrb.gmra.mxu1 %vm829_vm7, %v4789_v10 }
0x106e   : > { %v4696_v45 = vpop.f32.mrf.mxu0  ;;  %4918 = vmatpush.bf16.msrb.mxu1 %v15076_v60  ;;  %v5047_v60 = vld [vmem:[%s19798_s4 + $0x100] ss:$0 sm:$0xff] }
0x106f   : > { %v4729_v31 = vpack.c.bf16 %v4696_v45, %v4696_v45 }
0x1071   : > { %v4955_v34 = vunpack.c.l.b16 %v4729_v31  ;;  %v15090_v31 = vld [vmem:[%s19796_s2 + $0x680] sm:$0xff] }
0x1076   : > { %v4698_v48 = vpop.f32.mrf.mxu0 }
0x1077   : > { %v4730_v7 = vpack.c.bf16 %v4698_v48, %v4698_v48 }
0x1079   : > { %v4956_v33 = vunpack.c.l.b16 %v4730_v7  ;;  %v15088_v7 = vld [vmem:[%s19796_s2 + $0x670] sm:$0xff] }
0x107b   : > { %v4957_v26 = vpack.c.b16 %v4956_v33, %v4955_v34  ;;  %v15092_v33 = vld [vmem:[%s19796_s2 + $0x690] sm:$0xff]  ;;  %v15094_v34 = vld [vmem:[%s19796_s2 + $0x6a0] sm:$0xff] }
0x107e   : > { %v4701_v11 = vpop.f32.mrf.mxu0 }
0x107f   : > { %v4731_v44 = vpack.c.bf16 %v4701_v11, %v4701_v11 }
0x1081   : > { %v4815_v52 = vunpack.c.l.b16 %v4731_v44 }
0x1086   : > { %v4703_v50 = vpop.f32.mrf.mxu0 }
0x1087   : > { %v4732_v9 = vpack.c.bf16 %v4703_v50, %v4703_v50 }
0x1089   : > { %v4816_v55 = vunpack.c.l.b16 %v4732_v9 }
0x108b   : > { %v4817_v57 = vpack.c.b16 %v4816_v55, %v4815_v52 }
0x108d   : > { %13373 = vmatmul.msk.bf16.vlgmr.msrb.gmra.mxu2 %vm829_vm7, %v4817_v57 }
0x108e   : > { %v4706_v58 = vpop.f32.mrf.mxu0  ;;  %4946 = vmatpush.bf16.msrb.mxu2 %v15078_v49 }
0x108f   : > { %v4733_v54 = vpack.c.bf16 %v4706_v58, %v4706_v58 }
0x1091   : > { %v4983_v40 = vunpack.c.l.b16 %v4733_v54 }
0x1096   : > { %v4708_v59 = vpop.f32.mrf.mxu0 }
0x1097   : > { %v4734_v53 = vpack.c.bf16 %v4708_v59, %v4708_v59 }
0x1099   : > { %v4984_v56 = vunpack.c.l.b16 %v4734_v53 }
0x109b   : > { %v4985_v39 = vpack.c.b16 %v4984_v56, %v4983_v40  ;;  %v15096_v40 = vld [vmem:[%s19796_s2 + $0x6b0] sm:$0xff] }
0x109e   : > { %v4711_v61 = vpop.f32.mrf.mxu0 }
0x109f   : > { %v4735_v17 = vpack.c.bf16 %v4711_v61, %v4711_v61 }
0x10a1   : > { %v4843_v62 = vunpack.c.l.b16 %v4735_v17 }
0x10a6   : > { %v4713_v18 = vpop.f32.mrf.mxu0 }
0x10a7   : > { %v4736_v19 = vpack.c.bf16 %v4713_v18, %v4713_v18 }
0x10a9   : > { %v4844_v63 = vunpack.c.l.b16 %v4736_v19 }
0x10ab   : > { %v4845_v8 = vpack.c.b16 %v4844_v63, %v4843_v62 }
0x10ad   : > { %13378 = vmatmul.msk.bf16.vlgmr.msra.gmra.mxu1 %vm829_vm7, %v4845_v8 }
0x10ae   : > { %v4716_v5 = vpop.f32.mrf.mxu0  ;;  %4974 = vmatpush.bf16.msra.mxu1 %v15080_v3 }
0x10af   : > { %v4737_v14 = vpack.c.bf16 %v4716_v5, %v4716_v5 }
0x10b1   : > { %v4871_v22 = vunpack.c.l.b16 %v4737_v14  ;;  %v5052_v14 = vld [vmem:[%s19798_s4 + $0x110] ss:$0 sm:$0xff] }
0x10b6   : > { %v4718_v15 = vpop.f32.mrf.mxu0 }
0x10b7   : > { %v4738_v20 = vpack.c.bf16 %v4718_v15, %v4718_v15 }
0x10b9   : > { %v4872_v28 = vunpack.c.l.b16 %v4738_v20 }
0x10bb   : > { %v4873_v38 = vpack.c.b16 %v4872_v28, %v4871_v22 }
0x10bd   : > { %13383 = vmatmul.msk.bf16.vlgmr.msra.gmra.mxu2 %vm829_vm7, %v4873_v38  ;;  %13388 = vmatmul.msk.bf16.vlgmr.msrb.gmra.mxu1 %vm829_vm7, %v4901_v4 }
0x10be   : > { %5039 = vmatpush.bf16.msrb.mxu1 %v15086_v23  ;;  %5002 = vmatpush.bf16.msra.mxu2 %v15082_v24 }
0x10c2   : > { %5040 = vmatpush.bf16.msrb.mxu1 %v15085_v25 }
0x10cd   : > { %13393 = vmatmul.msk.bf16.vlgmr.msrb.gmra.mxu2 %vm829_vm7, %v4929_v35  ;;  %13398 = vmatmul.msk.bf16.vlgmr.msra.gmra.mxu1 %vm829_vm7, %v4957_v26  ;;  %v15095_v35 = vld [vmem:[%s19796_s2 + $0x6a8] sm:$0xff] }
0x10d0   : > { %v4780_v36 = vpop.f32.mrf.mxu2 }
0x10d8   : > { %v4782_v0 = vpop.f32.mrf.mxu2 }
0x10dd   : > { %13403 = vmatmul.msk.bf16.vlgmr.msra.gmra.mxu2 %vm829_vm7, %v4985_v39  ;;  %13412 = vmatmul.msk.bf16.vlgmr.msrb.gmra.mxu1 %vm304_vm9, %v16332_v37 }
0x10ea   : > { %v4808_v41 = vpop.f32.mrf.mxu1 }
0x10f2   : > { %v4810_v42 = vpop.f32.mrf.mxu1 }
0x1110   : > { %v4836_v1 = vpop.f32.mrf.mxu2 }
0x1118   : > { %v4838_v43 = vpop.f32.mrf.mxu2 }
0x112a   : > { %v4864_v6 = vpop.f32.mrf.mxu1 }
0x1132   : > { %v4866_v2 = vpop.f32.mrf.mxu1 }
0x113a   : > { %v4920_v46 = vpop.f32.mrf.mxu1 }
0x113b   : > { %v4921_v55 = vadd.f32 %v4920_v46, %v4780_v36 }
0x1140   : > { %v4892_v10 = vpop.f32.mrf.mxu2 }
0x1142   : > { %v4922_v48 = vpop.f32.mrf.mxu1 }
0x1143   : > { %v4923_v19 = vadd.f32 %v4922_v48, %v4782_v0 }
0x1148   : > { %v4894_v45 = vpop.f32.mrf.mxu2 }
0x114a   : > { %v4976_v44 = vpop.f32.mrf.mxu1 }
0x114b   : > { %v4977_v37 = vadd.f32 %v4976_v44, %v4836_v1 }
0x1150   : > { %v4948_v11 = vpop.f32.mrf.mxu2 }
0x1151   : > { %v4949_v51 = vadd.f32 %v4948_v11, %v4808_v41 }
0x1152   : > { %v4978_v9 = vpop.f32.mrf.mxu1 }
0x1153   : > { %v5009_v58 = vadd.f32 %v4949_v51, %v4921_v55  ;;  %v4979_v62 = vadd.f32 %v4978_v9, %v4838_v43  ;;  %v15124_v9 = vld [vmem:[%s19796_s2 + $0x790] sm:$0xff] }
0x1154   : > { %5746 = vmatpush.bf16.msra.mxu1 %v15124_v9 }
0x1158   : > { %v4950_v50 = vpop.f32.mrf.mxu2 }
0x1159   : > { %v4951_v49 = vadd.f32 %v4950_v50, %v4810_v42  ;;  %v15098_v50 = vld [vmem:[%s19796_s2 + $0x6c0] sm:$0xff] }
0x115a   : > { %v5042_v17 = vpop.f32.mrf.mxu1 }
0x115b   : > { %v5010_v8 = vadd.f32 %v4951_v49, %v4923_v19 }
0x1160   : > { %v5004_v52 = vpop.f32.mrf.mxu2 }
0x1161   : > { %v5005_v57 = vadd.f32 %v5004_v52, %v4864_v6 }
0x1162   : > { %v5044_v21 = vpop.f32.mrf.mxu1 }
0x1163   : > { %v5011_v59 = vadd.f32 %v5005_v57, %v4977_v37 }
0x1165   : > { %v5013_v47 = vadd.f32 %v5011_v59, %v5009_v58 }
0x1167   : > { %v5015_v61 = vadd.f32 %v5013_v47, %v4892_v10  ;;  %v15099_v47 = vld [vmem:[%s19796_s2 + $0x6c8] sm:$0xff] }
0x1168   : > { %v5006_v18 = vpop.f32.mrf.mxu2 }
0x1169   : > { %v5048_v63 = vadd.f32 %v5047_v60, %v5015_v61  ;;  %v5007_v3 = vadd.f32 %v5006_v18, %v4866_v2  ;;  %v15097_v2 = vld [vmem:[%s19796_s2 + $0x6b8] sm:$0xff] }
0x116b   : > { %v5012_v5 = vadd.f32 %v5007_v3, %v4979_v62  ;;  %v5050_v12 = vadd.f32 %v5048_v63, %v5042_v17  ;;  %v15100_v63 = vld [vmem:[%s19796_s2 + $0x6d0] sm:$0xff] }
0x116d   : > { %v5014_v13 = vadd.f32 %v5012_v5, %v5010_v8  ;;  %v5053_v16 = vadd.f32 %v5052_v14, %v5050_v12 }
0x116f   : > { %v5016_v15 = vadd.f32 %v5014_v13, %v4894_v45  ;;  %v5057_v23 = vmul.f32 0.2, %v5053_v16  ;;  %vm5055_vm9 = vcmp.ge.f32.partialorder %v5053_v16, 0.0 }
0x1171   : > { %v5049_v20 = vadd.f32 %v5047_v60, %v5016_v15  ;;  %v5059_v4 = vsel %vm5055_vm9, %v5053_v16, %v5057_v23  ;;  %v15101_v16 = vld [vmem:[%s19796_s2 + $0x6d8] sm:$0xff] }
0x1173   : > { %v5051_v22 = vadd.f32 %v5049_v20, %v5044_v21 }
0x1175   : > { %v5054_v28 = vadd.f32 %v5052_v14, %v5051_v22 }
0x1177   : > { %vm5056_vm6 = vcmp.ge.f32.partialorder %v5054_v28, 0.0  ;;  %v5058_v24 = vmul.f32 0.2, %v5054_v28 }
0x1179   : > { %v5060_v38 = vsel %vm5056_vm6, %v5054_v28, %v5058_v24 }
0x117a   : > { %v5133_v25 = vpack.c.bf16 %v5060_v38, %v5059_v4  ;;  %v15102_v38 = vld [vmem:[%s19796_s2 + $0x6e0] sm:$0xff] }
0x117c   : > { %5429 = vmatpush.bf16.msrb.mxu2 %v5133_v25 }
0x117f   : > { %13557 = vmatmul.msk.bf16.vlgmr.msrb.gmra.mxu2 %vm829_vm7, %v15087_v29 }
0x118f   : > { %13558 = vmatmul.msk.bf16.gmra.mxu2 %vm829_vm7, %v15088_v7 }
0x119f   : > { %13559 = vmatmul.msk.bf16.gmra.mxu2 %vm829_vm7, %v15089_v30 }
0x11af   : > { %13560 = vmatmul.msk.bf16.gmra.mxu2 %vm829_vm7, %v15090_v31 }
0x11bf   : > { %13561 = vmatmul.msk.bf16.gmra.mxu2 %vm829_vm7, %v15091_v32 }
0x11cf   : > { %13562 = vmatmul.msk.bf16.gmra.mxu2 %vm829_vm7, %v15092_v33 }
0x11df   : > { %13563 = vmatmul.msk.bf16.gmra.mxu2 %vm829_vm7, %v15093_v27  ;;  %v15103_v27 = vld [vmem:[%s19796_s2 + $0x6e8] sm:$0xff] }
0x11ef   : > { %13564 = vmatmul.msk.bf16.gmra.mxu2 %vm829_vm7, %v15094_v34 }
0x11ff   : > { %13565 = vmatmul.msk.bf16.gmra.mxu2 %vm829_vm7, %v15095_v35 }
0x1202   : > { %v5431_v26 = vpop.f32.mrf.mxu2 }
0x1203   : > { %v5611_v53 = vpack.c.bf16 %v5431_v26, %v5431_v26 }
0x1205   : > { %v16472_v39 = vunpack.c.l.b16 %v5611_v53 }
0x120a   : > { %v5433_v54 = vpop.f32.mrf.mxu2 }
0x120b   : > { %v5612_v56 = vpack.c.bf16 %v5433_v54, %v5433_v54 }
0x120d   : > { %v16474_v41 = vunpack.c.l.b16 %v5612_v56 }
0x120f   : > { %v6052_v36 = vpack.c.b16 %v16474_v41, %v16472_v39  ;;  %13566 = vmatmul.msk.bf16.gmra.mxu2 %vm829_vm7, %v15096_v40  ;;  %v15122_v39 = vld [vmem:[%s19796_s2 + $0x780] sm:$0xff] }
0x1210   : > { %v15130_v41 = vld [vmem:[%s19796_s2 + $0x7c0] sm:$0xff] }
0x1211   : > { %5947 = vmatpush.bf16.msrb.mxu1 %v15130_v41 }
0x1212   : > { %v5436_v42 = vpop.f32.mrf.mxu2 }
0x1213   : > { %v5613_v0 = vpack.c.bf16 %v5436_v42, %v5436_v42  ;;  %v15104_v42 = vld [vmem:[%s19796_s2 + $0x6f0] sm:$0xff] }
0x1215   : > { %v16482_v43 = vunpack.c.l.b16 %v5613_v0 }
0x121a   : > { %v5438_v6 = vpop.f32.mrf.mxu2 }
0x121b   : > { %v5614_v1 = vpack.c.bf16 %v5438_v6, %v5438_v6 }
0x121d   : > { %v16484_v46 = vunpack.c.l.b16 %v5614_v1 }
0x121f   : > { %v6053_v10 = vpack.c.b16 %v16484_v46, %v16482_v43  ;;  %13567 = vmatmul.msk.bf16.gmra.mxu2 %vm829_vm7, %v15097_v2 }
0x1222   : > { %v5441_v45 = vpop.f32.mrf.mxu2 }
0x1223   : > { %v5615_v48 = vpack.c.bf16 %v5441_v45, %v5441_v45 }
0x1225   : > { %v16495_v51 = vunpack.c.l.b16 %v5615_v48 }
0x122a   : > { %v5443_v11 = vpop.f32.mrf.mxu2 }
0x122b   : > { %v5616_v44 = vpack.c.bf16 %v5443_v11, %v5443_v11 }
0x122d   : > { %v16497_v52 = vunpack.c.l.b16 %v5616_v44  ;;  %v15105_v44 = vld [vmem:[%s19796_s2 + $0x6f8] sm:$0xff] }
0x122f   : > { %v6054_v55 = vpack.c.b16 %v16497_v52, %v16495_v51  ;;  %13568 = vmatmul.msk.bf16.gmra.mxu2 %vm829_vm7, %v15098_v50 }
0x1232   : > { %v5446_v37 = vpop.f32.mrf.mxu2 }
0x1233   : > { %v5617_v57 = vpack.c.bf16 %v5446_v37, %v5446_v37 }
0x1235   : > { %v16505_v60 = vunpack.c.l.b16 %v5617_v57 }
0x123a   : > { %v5448_v58 = vpop.f32.mrf.mxu2 }
0x123b   : > { %v5618_v59 = vpack.c.bf16 %v5448_v58, %v5448_v58 }
0x123d   : > { %v16507_v49 = vunpack.c.l.b16 %v5618_v59 }
0x123f   : > { %v6055_v61 = vpack.c.b16 %v16507_v49, %v16505_v60  ;;  %13569 = vmatmul.msk.bf16.gmra.mxu2 %vm829_vm7, %v15099_v47 }
0x1242   : > { %v5451_v17 = vpop.f32.mrf.mxu2 }
0x1243   : > { %v5619_v18 = vpack.c.bf16 %v5451_v17, %v5451_v17  ;;  %v15106_v17 = vld [vmem:[%s19796_s2 + $0x700] sm:$0xff] }
0x1245   : > { %v5709_v3 = vunpack.c.l.b16 %v5619_v18  ;;  %v15126_v18 = vld [vmem:[%s19796_s2 + $0x7a0] sm:$0xff] }
0x1246   : > { %5813 = vmatpush.bf16.msrb.mxu3 %v15126_v18 }
0x124a   : > { %v5453_v19 = vpop.f32.mrf.mxu2 }
0x124b   : > { %v5620_v62 = vpack.c.bf16 %v5453_v19, %v5453_v19 }
0x124d   : > { %v5710_v8 = vunpack.c.l.b16 %v5620_v62 }
0x124f   : > { %v5717_v5 = vpack.c.b16 %v5710_v8, %v5709_v3  ;;  %13570 = vmatmul.msk.bf16.gmra.mxu2 %vm829_vm7, %v15100_v63 }
0x1251   : > { %13597 = vmatmul.msk.bf16.vlgmr.msra.gmra.mxu1 %vm829_vm7, %v5717_v5 }
0x1252   : > { %v5456_v12 = vpop.f32.mrf.mxu2 }
0x1253   : > { %v5621_v13 = vpack.c.bf16 %v5456_v12, %v5456_v12 }
0x1255   : > { %v5711_v20 = vunpack.c.l.b16 %v5621_v13  ;;  %v15107_v13 = vld [vmem:[%s19796_s2 + $0x708] sm:$0xff] }
0x125a   : > { %v5458_v14 = vpop.f32.mrf.mxu2 }
0x125b   : > { %v5622_v15 = vpack.c.bf16 %v5458_v14, %v5458_v14 }
0x125d   : > { %v5712_v21 = vunpack.c.l.b16 %v5622_v15 }
0x125f   : > { %v5718_v22 = vpack.c.b16 %v5712_v21, %v5711_v20  ;;  %13571 = vmatmul.msk.bf16.gmra.mxu2 %vm829_vm7, %v15101_v16 }
0x1261   : > { %13598 = vmatmul.msk.bf16.gmra.mxu1 %vm829_vm7, %v5718_v22 }
0x1262   : > { %v5461_v28 = vpop.f32.mrf.mxu2 }
0x1263   : > { %v5623_v23 = vpack.c.bf16 %v5461_v28, %v5461_v28 }
0x1265   : > { %v5713_v25 = vunpack.c.l.b16 %v5623_v23  ;;  %v15108_v23 = vld [vmem:[%s19796_s2 + $0x710] sm:$0xff] }
0x126a   : > { %v5463_v24 = vpop.f32.mrf.mxu2 }
0x126b   : > { %v5624_v4 = vpack.c.bf16 %v5463_v24, %v5463_v24 }
0x126d   : > { %v5714_v29 = vunpack.c.l.b16 %v5624_v4 }
0x126f   : > { %v5719_v7 = vpack.c.b16 %v5714_v29, %v5713_v25  ;;  %13572 = vmatmul.msk.bf16.gmra.mxu2 %vm829_vm7, %v15102_v38 }
0x1271   : > { %13599 = vmatmul.msk.bf16.gmra.mxu1 %vm829_vm7, %v5719_v7 }
0x1272   : > { %v5466_v30 = vpop.f32.mrf.mxu2 }
0x1273   : > { %v5625_v31 = vpack.c.bf16 %v5466_v30, %v5466_v30 }
0x1275   : > { %v5715_v34 = vunpack.c.l.b16 %v5625_v31  ;;  %v15109_v31 = vld [vmem:[%s19796_s2 + $0x718] sm:$0xff] }
0x127a   : > { %v5468_v32 = vpop.f32.mrf.mxu2 }
0x127b   : > { %v5626_v33 = vpack.c.bf16 %v5468_v32, %v5468_v32 }
0x127d   : > { %v5716_v35 = vunpack.c.l.b16 %v5626_v33 }
0x127f   : > { %v5720_v26 = vpack.c.b16 %v5716_v35, %v5715_v34  ;;  %13573 = vmatmul.msk.bf16.gmra.mxu2 %vm829_vm7, %v15103_v27 }
0x1281   : > { %13600 = vmatmul.msk.bf16.gmra.mxu1 %vm829_vm7, %v5720_v26 }
0x1282   : > { %v5471_v53 = vpop.f32.mrf.mxu2 }
0x1283   : > { %v5627_v54 = vpack.c.bf16 %v5471_v53, %v5471_v53 }
0x1285   : > { %v16535_v0 = vunpack.c.l.b16 %v5627_v54  ;;  %v15110_v54 = vld [vmem:[%s19796_s2 + $0x720] sm:$0xff] }
0x128a   : > { %v5473_v56 = vpop.f32.mrf.mxu2 }
0x128b   : > { %v5628_v40 = vpack.c.bf16 %v5473_v56, %v5473_v56 }
0x128d   : > { %v16537_v6 = vunpack.c.l.b16 %v5628_v40 }
0x128f   : > { %v6119_v1 = vpack.c.b16 %v16537_v6, %v16535_v0  ;;  %13574 = vmatmul.msk.bf16.gmra.mxu2 %vm829_vm7, %v15104_v42 }
0x1292   : > { %v5476_v2 = vpop.f32.mrf.mxu2 }
0x1293   : > { %v5629_v45 = vpack.c.bf16 %v5476_v2, %v5476_v2 }
0x1295   : > { %v16545_v50 = vunpack.c.l.b16 %v5629_v45 }
0x129a   : > { %v5478_v48 = vpop.f32.mrf.mxu2 }
0x129b   : > { %v5630_v11 = vpack.c.bf16 %v5478_v48, %v5478_v48 }
0x129d   : > { %v16547_v9 = vunpack.c.l.b16 %v5630_v11 }
0x129f   : > { %v6120_v37 = vpack.c.b16 %v16547_v9, %v16545_v50  ;;  %13575 = vmatmul.msk.bf16.gmra.mxu2 %vm829_vm7, %v15105_v44  ;;  %v15111_v44 = vld [vmem:[%s19796_s2 + $0x728] sm:$0xff] }
0x12a2   : > { %v5481_v57 = vpop.f32.mrf.mxu2 }
0x12a3   : > { %v5631_v58 = vpack.c.bf16 %v5481_v57, %v5481_v57 }
0x12a5   : > { %v16558_v19 = vunpack.c.l.b16 %v5631_v58 }
0x12aa   : > { %v5483_v59 = vpop.f32.mrf.mxu2 }
0x12ab   : > { %v5632_v47 = vpack.c.bf16 %v5483_v59, %v5483_v59 }
0x12ad   : > { %v16560_v62 = vunpack.c.l.b16 %v5632_v47 }
0x12af   : > { %v6121_v63 = vpack.c.b16 %v16560_v62, %v16558_v19  ;;  %13576 = vmatmul.msk.bf16.gmra.mxu2 %vm829_vm7, %v15106_v17 }
0x12b2   : > { %v5486_v3 = vpop.f32.mrf.mxu2 }
0x12b3   : > { %v5633_v8 = vpack.c.bf16 %v5486_v3, %v5486_v3 }
0x12b5   : > { %v16568_v14 = vunpack.c.l.b16 %v5633_v8  ;;  %v15112_v8 = vld [vmem:[%s19796_s2 + $0x730] sm:$0xff] }
0x12ba   : > { %v5488_v5 = vpop.f32.mrf.mxu2 }
0x12bb   : > { %v5634_v12 = vpack.c.bf16 %v5488_v5, %v5488_v5 }
0x12bd   : > { %v16570_v15 = vunpack.c.l.b16 %v5634_v12 }
0x12bf   : > { %v6122_v16 = vpack.c.b16 %v16570_v15, %v16568_v14  ;;  %13577 = vmatmul.msk.bf16.gmra.mxu2 %vm829_vm7, %v15107_v13 }
0x12c2   : > { %v5491_v20 = vpop.f32.mrf.mxu2 }
0x12c3   : > { %v5635_v21 = vpack.c.bf16 %v5491_v20, %v5491_v20 }
0x12c5   : > { %v5776_v24 = vunpack.c.l.b16 %v5635_v21 }
0x12ca   : > { %v5493_v22 = vpop.f32.mrf.mxu2 }
0x12cb   : > { %v5636_v28 = vpack.c.bf16 %v5493_v22, %v5493_v22 }
0x12cd   : > { %v5777_v4 = vunpack.c.l.b16 %v5636_v28 }
0x12cf   : > { %v5784_v38 = vpack.c.b16 %v5777_v4, %v5776_v24  ;;  %13578 = vmatmul.msk.bf16.gmra.mxu2 %vm829_vm7, %v15108_v23  ;;  %v15113_v23 = vld [vmem:[%s19796_s2 + $0x738] sm:$0xff] }
0x12d1   : > { %13605 = vmatmul.msk.bf16.vlgmr.msrb.gmra.mxu3 %vm829_vm7, %v5784_v38 }
0x12d2   : > { %v5496_v25 = vpop.f32.mrf.mxu2 }
0x12d3   : > { %v5637_v29 = vpack.c.bf16 %v5496_v25, %v5496_v25 }
0x12d5   : > { %v5778_v32 = vunpack.c.l.b16 %v5637_v29 }
0x12da   : > { %v5498_v7 = vpop.f32.mrf.mxu2 }
0x12db   : > { %v5638_v30 = vpack.c.bf16 %v5498_v7, %v5498_v7 }
0x12dd   : > { %v5779_v33 = vunpack.c.l.b16 %v5638_v30 }
0x12df   : > { %v5785_v27 = vpack.c.b16 %v5779_v33, %v5778_v32  ;;  %13579 = vmatmul.msk.bf16.gmra.mxu2 %vm829_vm7, %v15109_v31  ;;  %v15114_v31 = vld [vmem:[%s19796_s2 + $0x740] sm:$0xff]  ;;  %v15128_v32 = vld [vmem:[%s19796_s2 + $0x7b0] sm:$0xff] }
0x12e0   : > { %5880 = vmatpush.bf16.msra.mxu0 %v15128_v32 }
0x12e1   : > { %13606 = vmatmul.msk.bf16.gmra.mxu3 %vm829_vm7, %v5785_v27 }
0x12e2   : > { %v5501_v34 = vpop.f32.mrf.mxu2 }
0x12e3   : > { %v5639_v35 = vpack.c.bf16 %v5501_v34, %v5501_v34 }
0x12e5   : > { %v5780_v56 = vunpack.c.l.b16 %v5639_v35 }
0x12ea   : > { %v5503_v26 = vpop.f32.mrf.mxu2 }
0x12eb   : > { %v5640_v53 = vpack.c.bf16 %v5503_v26, %v5503_v26 }
0x12ed   : > { %v5781_v40 = vunpack.c.l.b16 %v5640_v53 }
0x12ef   : > { %v5786_v42 = vpack.c.b16 %v5781_v40, %v5780_v56  ;;  %13580 = vmatmul.msk.bf16.gmra.mxu2 %vm829_vm7, %v15110_v54  ;;  %v15115_v56 = vld [vmem:[%s19796_s2 + $0x748] sm:$0xff] }
0x12f1   : > { %13607 = vmatmul.msk.bf16.gmra.mxu3 %vm829_vm7, %v5786_v42 }
0x12f2   : > { %v5506_v2 = vpop.f32.mrf.mxu2 }
0x12f3   : > { %v5641_v45 = vpack.c.bf16 %v5506_v2, %v5506_v2 }
0x12f5   : > { %v5782_v57 = vunpack.c.l.b16 %v5641_v45 }
0x12fa   : > { %v5508_v48 = vpop.f32.mrf.mxu2 }
0x12fb   : > { %v5642_v11 = vpack.c.bf16 %v5508_v48, %v5508_v48 }
0x12fd   : > { %v5783_v58 = vunpack.c.l.b16 %v5642_v11 }
0x12ff   : > { %v5787_v59 = vpack.c.b16 %v5783_v58, %v5782_v57  ;;  %13581 = vmatmul.msk.bf16.gmra.mxu2 %vm829_vm7, %v15111_v44  ;;  %v15116_v57 = vld [vmem:[%s19796_s2 + $0x750] sm:$0xff] }
0x1301   : > { %13608 = vmatmul.msk.bf16.gmra.mxu3 %vm829_vm7, %v5787_v59 }
0x1302   : > { %v5511_v47 = vpop.f32.mrf.mxu2 }
0x1303   : > { %v5643_v17 = vpack.c.bf16 %v5511_v47, %v5511_v47 }
0x1305   : > { %v6178_v5 = vunpack.c.l.b16 %v5643_v17 }
0x130a   : > { %v5513_v18 = vpop.f32.mrf.mxu2 }
0x130b   : > { %v5644_v3 = vpack.c.bf16 %v5513_v18, %v5513_v18 }
0x130d   : > { %v6179_v12 = vunpack.c.l.b16 %v5644_v3 }
0x130f   : > { %v16598_v13 = vpack.c.b16 %v6179_v12, %v6178_v5  ;;  %13582 = vmatmul.msk.bf16.gmra.mxu2 %vm829_vm7, %v15112_v8  ;;  %v15117_v5 = vld [vmem:[%s19796_s2 + $0x758] sm:$0xff] }
0x1311   : > { %19939 = vst [vmem:[#allocation5_spill] sm:$0xff] %v16598_v13 }
0x1312   : > { %v5516_v20 = vpop.f32.mrf.mxu2 }
0x1313   : > { %v5645_v21 = vpack.c.bf16 %v5516_v20, %v5516_v20 }
0x1315   : > { %v6180_v24 = vunpack.c.l.b16 %v5645_v21 }
0x131a   : > { %v5518_v22 = vpop.f32.mrf.mxu2 }
0x131b   : > { %v5646_v28 = vpack.c.bf16 %v5518_v22, %v5518_v22 }
0x131d   : > { %v6181_v4 = vunpack.c.l.b16 %v5646_v28 }
0x131f   : > { %v16604_v38 = vpack.c.b16 %v6181_v4, %v6180_v24  ;;  %13583 = vmatmul.msk.bf16.gmra.mxu2 %vm829_vm7, %v15113_v23  ;;  %v15118_v4 = vld [vmem:[%s19796_s2 + $0x760] sm:$0xff] }
0x1321   : > { %19940 = vst [vmem:[#allocation6_spill] sm:$0xff] %v16604_v38 }
0x1322   : > { %v5521_v25 = vpop.f32.mrf.mxu2 }
0x1323   : > { %v5647_v29 = vpack.c.bf16 %v5521_v25, %v5521_v25  ;;  %v15123_v25 = vld [vmem:[%s19796_s2 + $0x788] sm:$0xff] }
0x1324   : > { %6081 = vmatpush.bf16.msrb.mxu0 %v15123_v25 }
0x1325   : > { %v6182_v33 = vunpack.c.l.b16 %v5647_v29 }
0x132a   : > { %v5523_v7 = vpop.f32.mrf.mxu2 }
0x132b   : > { %v5648_v30 = vpack.c.bf16 %v5523_v7, %v5523_v7 }
0x132d   : > { %v6183_v27 = vunpack.c.l.b16 %v5648_v30 }
0x132f   : > { %v16613_v34 = vpack.c.b16 %v6183_v27, %v6182_v33  ;;  %13584 = vmatmul.msk.bf16.gmra.mxu2 %vm829_vm7, %v15114_v31 }
0x1331   : > { %19941 = vst [vmem:[#allocation7_spill] sm:$0xff] %v16613_v34 }
0x1332   : > { %v5526_v35 = vpop.f32.mrf.mxu2 }
0x1333   : > { %v5649_v26 = vpack.c.bf16 %v5526_v35, %v5526_v35  ;;  %v15119_v35 = vld [vmem:[%s19796_s2 + $0x768] sm:$0xff] }
0x1335   : > { %v6184_v40 = vunpack.c.l.b16 %v5649_v26 }
0x133a   : > { %v5528_v53 = vpop.f32.mrf.mxu2 }
0x133b   : > { %v5650_v54 = vpack.c.bf16 %v5528_v53, %v5528_v53 }
0x133d   : > { %v6185_v42 = vunpack.c.l.b16 %v5650_v54 }
0x133f   : > { %v16619_v2 = vpack.c.b16 %v6185_v42, %v6184_v40  ;;  %13585 = vmatmul.msk.bf16.gmra.mxu2 %vm829_vm7, %v15115_v56  ;;  %v15120_v42 = vld [vmem:[%s19796_s2 + $0x770] sm:$0xff] }
0x1341   : > { %19942 = vst [vmem:[#allocation8_spill] sm:$0xff] %v16619_v2 }
0x1342   : > { %v5531_v45 = vpop.f32.mrf.mxu2 }
0x1343   : > { %v5651_v48 = vpack.c.bf16 %v5531_v45, %v5531_v45 }
0x1345   : > { %v5843_v58 = vunpack.c.l.b16 %v5651_v48 }
0x134a   : > { %v5533_v11 = vpop.f32.mrf.mxu2 }
0x134b   : > { %v5652_v44 = vpack.c.bf16 %v5533_v11, %v5533_v11  ;;  %v15121_v11 = vld [vmem:[%s19796_s2 + $0x778] sm:$0xff] }
0x134d   : > { %v5844_v59 = vunpack.c.l.b16 %v5652_v44 }
0x134f   : > { %v5851_v47 = vpack.c.b16 %v5844_v59, %v5843_v58  ;;  %13586 = vmatmul.msk.bf16.gmra.mxu2 %vm829_vm7, %v15116_v57 }
0x1351   : > { %13613 = vmatmul.msk.bf16.vlgmr.msra.gmra.mxu0 %vm829_vm7, %v5851_v47 }
0x1352   : > { %v5536_v17 = vpop.f32.mrf.mxu2 }
0x1353   : > { %v5653_v18 = vpack.c.bf16 %v5536_v17, %v5536_v17 }
0x1354   : > { %v5815_v62 = vpop.f32.mrf.mxu3 }
0x1355   : > { %v5845_v12 = vunpack.c.l.b16 %v5653_v18 }
0x135a   : > { %v5538_v3 = vpop.f32.mrf.mxu2 }
0x135b   : > { %v5654_v8 = vpack.c.bf16 %v5538_v3, %v5538_v3 }
0x135d   : > { %v5846_v20 = vunpack.c.l.b16 %v5654_v8 }
0x135f   : > { %v5852_v21 = vpack.c.b16 %v5846_v20, %v5845_v12  ;;  %13587 = vmatmul.msk.bf16.gmra.mxu2 %vm829_vm7, %v15117_v5 }
0x1361   : > { %13614 = vmatmul.msk.bf16.gmra.mxu0 %vm829_vm7, %v5852_v21 }
0x1362   : > { %v5541_v22 = vpop.f32.mrf.mxu2 }
0x1363   : > { %v5655_v28 = vpack.c.bf16 %v5541_v22, %v5541_v22 }
0x1365   : > { %v5847_v29 = vunpack.c.l.b16 %v5655_v28 }
0x136a   : > { %v5543_v23 = vpop.f32.mrf.mxu2 }
0x136b   : > { %v5656_v24 = vpack.c.bf16 %v5543_v23, %v5543_v23 }
0x136d   : > { %v5848_v7 = vunpack.c.l.b16 %v5656_v24 }
0x136f   : > { %v5853_v30 = vpack.c.b16 %v5848_v7, %v5847_v29  ;;  %13588 = vmatmul.msk.bf16.gmra.mxu2 %vm829_vm7, %v15118_v4 }
0x1371   : > { %13615 = vmatmul.msk.bf16.gmra.mxu0 %vm829_vm7, %v5853_v30 }
0x1372   : > { %v5546_v31 = vpop.f32.mrf.mxu2 }
0x1373   : > { %v5657_v32 = vpack.c.bf16 %v5546_v31, %v5546_v31 }
0x1375   : > { %v5849_v26 = vunpack.c.l.b16 %v5657_v32 }
0x137a   : > { %v5548_v33 = vpop.f32.mrf.mxu2 }
0x137b   : > { %v5658_v27 = vpack.c.bf16 %v5548_v33, %v5548_v33 }
0x137d   : > { %v5850_v53 = vunpack.c.l.b16 %v5658_v27 }
0x137f   : > { %v5854_v54 = vpack.c.b16 %v5850_v53, %v5849_v26  ;;  %13589 = vmatmul.msk.bf16.gmra.mxu2 %vm829_vm7, %v15119_v35 }
0x1381   : > { %13616 = vmatmul.msk.bf16.gmra.mxu0 %vm829_vm7, %v5854_v54 }
0x1382   : > { %v5551_v56 = vpop.f32.mrf.mxu2 }
0x1383   : > { %v5659_v59 = vpack.c.bf16 %v5551_v56, %v5551_v56  ;;  %v15131_v56 = vld [vmem:[%s19796_s2 + $0x7c8] sm:$0xff] }
0x1384   : > { %6014 = vmatpush.bf16.msra.mxu3 %v15131_v56 }
0x1385   : > { %v6245_v8 = vunpack.c.l.b16 %v5659_v59 }
0x138a   : > { %v5553_v40 = vpop.f32.mrf.mxu2 }
0x138b   : > { %v5660_v58 = vpack.c.bf16 %v5553_v40, %v5553_v40  ;;  %v15125_v40 = vld [vmem:[%s19796_s2 + $0x798] sm:$0xff] }
0x138c   : > { %6148 = vmatpush.bf16.msra.mxu1 %v15125_v40 }
0x138d   : > { %v6246_v18 = vunpack.c.l.b16 %v5660_v58 }
0x138f   : > { %13590 = vmatmul.msk.bf16.gmra.mxu2 %vm829_vm7, %v15120_v42  ;;  %v6253_v52 = vpack.c.b16 %v6246_v18, %v6245_v8 }
0x1391   : > { %13637 = vmatmul.msk.bf16.vlgmr.msrb.gmra.mxu0 %vm829_vm7, %v6052_v36  ;;  %v15129_v36 = vld [vmem:[%s19796_s2 + $0x7b8] sm:$0xff] }
0x1392   : > { %v5556_v45 = vpop.f32.mrf.mxu2  ;;  %6282 = vmatpush.bf16.msra.mxu0 %v15129_v36 }
0x1393   : > { %v5661_v20 = vpack.c.bf16 %v5556_v45, %v5556_v45 }
0x1395   : > { %v6247_v24 = vunpack.c.l.b16 %v5661_v20 }
0x139a   : > { %v5558_v48 = vpop.f32.mrf.mxu2 }
0x139f   : > { %13591 = vmatmul.msk.bf16.gmra.mxu2 %vm829_vm7, %v15121_v11 }
0x13a1   : > { %13638 = vmatmul.msk.bf16.gmra.mxu0 %vm829_vm7, %v6053_v10 }
0x13a2   : > { %v5561_v44 = vpop.f32.mrf.mxu2 }
0x13a3   : > { %v5663_v27 = vpack.c.bf16 %v5561_v44, %v5561_v44 }
0x13a5   : > { %v6249_v42 = vunpack.c.l.b16 %v5663_v27 }
0x13aa   : > { %v5563_v57 = vpop.f32.mrf.mxu2 }
0x13ab   : > { %v5664_v33 = vpack.c.bf16 %v5563_v57, %v5563_v57 }
0x13ad   : > { %v6250_v53 = vunpack.c.l.b16 %v5664_v33 }
0x13af   : > { %13592 = vmatmul.msk.bf16.gmra.mxu2 %vm829_vm7, %v15122_v39  ;;  %v6255_v44 = vpack.c.b16 %v6250_v53, %v6249_v42 }
0x13b1   : > { %13639 = vmatmul.msk.bf16.gmra.mxu0 %vm829_vm7, %v6054_v55 }
0x13b2   : > { %v5566_v43 = vpop.f32.mrf.mxu2 }
0x13ba   : > { %v5568_v46 = vpop.f32.mrf.mxu2 }
0x13bb   : > { %v5666_v36 = vpack.c.bf16 %v5568_v46, %v5568_v46 }
0x13c1   : > { %13640 = vmatmul.msk.bf16.gmra.mxu0 %vm829_vm7, %v6055_v61  ;;  %v5662_v61 = vpack.c.bf16 %v5558_v48, %v5558_v48 }
0x13c2   : > { %v5571_v10 = vpop.f32.mrf.mxu2 }
0x13c3   : > { %v5667_v47 = vpack.c.bf16 %v5571_v10, %v5571_v10  ;;  %v6248_v28 = vunpack.c.l.b16 %v5662_v61  ;;  %v5665_v10 = vpack.c.bf16 %v5566_v43, %v5566_v43 }
0x13c5   : > { %v5910_v5 = vunpack.c.l.b16 %v5667_v47  ;;  %v6254_v7 = vpack.c.b16 %v6248_v28, %v6247_v24  ;;  %v6252_v47 = vunpack.c.l.b16 %v5666_v36  ;;  %v6251_v18 = vunpack.c.l.b16 %v5665_v10 }
0x13ca   : > { %v5573_v17 = vpop.f32.mrf.mxu2 }
0x13cb   : > { %v5668_v3 = vpack.c.bf16 %v5573_v17, %v5573_v17 }
0x13cd   : > { %v5911_v12 = vunpack.c.l.b16 %v5668_v3 }
0x13ce   : > { %v16679_v51 = vpop.f32.mrf.mxu0 }
0x13cf   : > { %v5918_v55 = vpack.c.b16 %v5911_v12, %v5910_v5  ;;  %v16705_v12 = vpop.f32.mrf.mxu1 }
0x13d1   : > { %13621 = vmatmul.msk.bf16.vlgmr.msrb.gmra.mxu1 %vm829_vm7, %v5918_v55  ;;  %13661 = vmatmul.msk.bf16.vlgmr.msra.gmra.mxu0 %vm829_vm7, %v6253_v52  ;;  %v6256_v52 = vpack.c.b16 %v6252_v47, %v6251_v18 }
0x13d2   : > { %v5576_v60 = vpop.f32.mrf.mxu2 }
0x13d3   : > { %v5669_v21 = vpack.c.bf16 %v5576_v60, %v5576_v60 }
0x13d5   : > { %v5912_v4 = vunpack.c.l.b16 %v5669_v21 }
0x13d6   : > { %v16683_v49 = vpop.f32.mrf.mxu0 }
0x13d7   : > { %v16711_v43 = vpop.f32.mrf.mxu1 }
0x13da   : > { %v5578_v22 = vpop.f32.mrf.mxu2 }
0x13db   : > { %v5670_v23 = vpack.c.bf16 %v5578_v22, %v5578_v22 }
0x13dd   : > { %v5913_v25 = vunpack.c.l.b16 %v5670_v23 }
0x13de   : > { %v16685_v29 = vpop.f32.mrf.mxu0 }
0x13df   : > { %v5919_v30 = vpack.c.b16 %v5913_v25, %v5912_v4  ;;  %v16720_v25 = vpop.f32.mrf.mxu1 }
0x13e1   : > { %13622 = vmatmul.msk.bf16.gmra.mxu1 %vm829_vm7, %v5919_v30  ;;  %13662 = vmatmul.msk.bf16.gmra.mxu0 %vm829_vm7, %v6254_v7 }
0x13e2   : > { %v5581_v31 = vpop.f32.mrf.mxu2 }
0x13e3   : > { %v5671_v35 = vpack.c.bf16 %v5581_v31, %v5581_v31 }
0x13e5   : > { %v5914_v45 = vunpack.c.l.b16 %v5671_v35 }
0x13e6   : > { %v16689_v32 = vpop.f32.mrf.mxu0 }
0x13e7   : > { %v16724_v27 = vpop.f32.mrf.mxu1 }
0x13ea   : > { %v5583_v26 = vpop.f32.mrf.mxu2 }
0x13eb   : > { %v5672_v54 = vpack.c.bf16 %v5583_v26, %v5583_v26 }
0x13ed   : > { %v5915_v48 = vunpack.c.l.b16 %v5672_v54 }
0x13ee   : > { %v16697_v11 = vpop.f32.mrf.mxu0 }
0x13ef   : > { %v5920_v57 = vpack.c.b16 %v5915_v48, %v5914_v45  ;;  %v15127_v45 = vld [vmem:[%s19796_s2 + $0x7a8] sm:$0xff] }
0x13f0   : > { %6215 = vmatpush.bf16.msrb.mxu3 %v15127_v45 }
0x13f1   : > { %13623 = vmatmul.msk.bf16.gmra.mxu1 %vm829_vm7, %v5920_v57  ;;  %13663 = vmatmul.msk.bf16.gmra.mxu0 %vm829_vm7, %v6255_v44 }
0x13f2   : > { %v5586_v39 = vpop.f32.mrf.mxu2 }
0x13f3   : > { %v5673_v58 = vpack.c.bf16 %v5586_v39, %v5586_v39 }
0x13f5   : > { %v5916_v3 = vunpack.c.l.b16 %v5673_v58 }
0x13f6   : > { %v16701_v41 = vpop.f32.mrf.mxu0 }
0x13fa   : > { %v5588_v59 = vpop.f32.mrf.mxu2 }
0x13fb   : > { %v5674_v17 = vpack.c.bf16 %v5588_v59, %v5588_v59 }
0x13fd   : > { %v5917_v8 = vunpack.c.l.b16 %v5674_v17 }
0x13fe   : > { %v16703_v5 = vpop.f32.mrf.mxu0 }
0x13ff   : > { %v5921_v55 = vpack.c.b16 %v5917_v8, %v5916_v3 }
0x1401   : > { %13624 = vmatmul.msk.bf16.gmra.mxu1 %vm829_vm7, %v5921_v55  ;;  %13664 = vmatmul.msk.bf16.gmra.mxu0 %vm829_vm7, %v6256_v52 }
0x1402   : > { %v5591_v60 = vpop.f32.mrf.mxu2 }
0x1403   : > { %v5675_v61 = vpack.c.bf16 %v5591_v60, %v5591_v60  ;;  %v16764_v60 = vpop.f32.mrf.mxu3 }
0x1405   : > { %v5977_v22 = vunpack.c.l.b16 %v5675_v61 }
0x1406   : > { %v16709_v46 = vpop.f32.mrf.mxu0 }
0x140a   : > { %v5593_v20 = vpop.f32.mrf.mxu2 }
0x140b   : > { %v5676_v21 = vpack.c.bf16 %v5593_v20, %v5593_v20  ;;  %v5820_v20 = vpop.f32.mrf.mxu3 }
0x140d   : > { %v5978_v28 = vunpack.c.l.b16 %v5676_v21 }
0x140e   : > { %v16713_v23 = vpop.f32.mrf.mxu0 }
0x140f   : > { %v5985_v24 = vpack.c.b16 %v5978_v28, %v5977_v22 }
0x1411   : > { %13629 = vmatmul.msk.bf16.vlgmr.msra.gmra.mxu3 %vm829_vm7, %v5985_v24  ;;  %13645 = vmatmul.msk.bf16.vlgmr.msra.gmra.mxu1 %vm829_vm7, %v6119_v1  ;;  %v16735_v1 = vpop.f32.mrf.mxu1 }
0x1412   : > { %v5596_v4 = vpop.f32.mrf.mxu2 }
0x1413   : > { %v5677_v30 = vpack.c.bf16 %v5596_v4, %v5596_v4  ;;  %v16772_v14 = vpop.f32.mrf.mxu3 }
0x1415   : > { %v5979_v35 = vunpack.c.l.b16 %v5677_v30 }
0x1416   : > { %v16722_v7 = vpop.f32.mrf.mxu0 }
0x1419   : > { %v16742_v9 = vpop.f32.mrf.mxu1 }
0x141a   : > { %v5598_v31 = vpop.f32.mrf.mxu2 }
0x141b   : > { %v5678_v33 = vpack.c.bf16 %v5598_v31, %v5598_v31 }
0x141d   : > { %v5980_v26 = vunpack.c.l.b16 %v5678_v33 }
0x141e   : > { %v16726_v53 = vpop.f32.mrf.mxu0 }
0x141f   : > { %v5986_v54 = vpack.c.b16 %v5980_v26, %v5979_v35  ;;  %v6084_v26 = vadd.f32 %v16713_v23, %v16705_v12 }
0x1421   : > { %13630 = vmatmul.msk.bf16.gmra.mxu3 %vm829_vm7, %v5986_v54  ;;  %13646 = vmatmul.msk.bf16.gmra.mxu1 %vm829_vm7, %v6120_v37  ;;  %v16751_v58 = vpop.f32.mrf.mxu1 }
0x1422   : > { %v5601_v0 = vpop.f32.mrf.mxu2 }
0x1423   : > { %v5679_v56 = vpack.c.bf16 %v5601_v0, %v5601_v0 }
0x1425   : > { %v5981_v48 = vunpack.c.l.b16 %v5679_v56 }
0x1426   : > { %v16733_v6 = vpop.f32.mrf.mxu0 }
0x1429   : > { %v16760_v19 = vpop.f32.mrf.mxu1 }
0x142a   : > { %v5603_v40 = vpop.f32.mrf.mxu2 }
0x142b   : > { %v5680_v42 = vpack.c.bf16 %v5603_v40, %v5603_v40 }
0x142d   : > { %v5982_v44 = vunpack.c.l.b16 %v5680_v42 }
0x142e   : > { %v16740_v57 = vpop.f32.mrf.mxu0 }
0x142f   : > { %v5987_v50 = vpack.c.b16 %v5982_v44, %v5981_v48 }
0x1431   : > { %13631 = vmatmul.msk.bf16.gmra.mxu3 %vm829_vm7, %v5987_v50  ;;  %13647 = vmatmul.msk.bf16.gmra.mxu1 %vm829_vm7, %v6121_v63 }
0x1432   : > { %v5606_v37 = vpop.f32.mrf.mxu2 }
0x1433   : > { %v5681_v36 = vpack.c.bf16 %v5606_v37, %v5606_v37 }
0x1435   : > { %v5983_v47 = vunpack.c.l.b16 %v5681_v36 }
0x1436   : > { %v16749_v39 = vpop.f32.mrf.mxu0 }
0x143a   : > { %v5608_v10 = vpop.f32.mrf.mxu2 }
0x143b   : > { %v5682_v59 = vpack.c.bf16 %v5608_v10, %v5608_v10 }
0x143d   : > { %v5984_v17 = vunpack.c.l.b16 %v5682_v59 }
0x143e   : > { %v16753_v18 = vpop.f32.mrf.mxu0 }
0x143f   : > { %v5988_v3 = vpack.c.b16 %v5984_v17, %v5983_v47 }
0x1441   : > { %13632 = vmatmul.msk.bf16.gmra.mxu3 %vm829_vm7, %v5988_v3  ;;  %13648 = vmatmul.msk.bf16.gmra.mxu1 %vm829_vm7, %v6122_v16  ;;  %v5825_v16 = vpop.f32.mrf.mxu3 }
0x1446   : > { %v16762_v63 = vpop.f32.mrf.mxu0 }
0x1449   : > { %v5827_v24 = vpop.f32.mrf.mxu3 }
0x144e   : > { %v5949_v8 = vpop.f32.mrf.mxu1  ;;  %v6284_v52 = vpop.f32.mrf.mxu0 }
0x144f   : > { %v6285_v55 = vadd.f32 %v6284_v52, %v5949_v8 }
0x1451   : > { %13653 = vmatmul.msk.bf16.vlgmr.msrb.gmra.mxu3 %vm829_vm7, %v16598_v13  ;;  %v5830_v30 = vpop.f32.mrf.mxu3 }
0x1456   : > { %v16768_v61 = vpop.f32.mrf.mxu1  ;;  %v6286_v10 = vpop.f32.mrf.mxu0 }
0x1459   : > { %v16782_v33 = vpop.f32.mrf.mxu3 }
0x145e   : > { %v5954_v21 = vpop.f32.mrf.mxu1  ;;  %v6289_v17 = vpop.f32.mrf.mxu0 }
0x1461   : > { %13654 = vmatmul.msk.bf16.gmra.mxu3 %vm829_vm7, %v16604_v38 }
0x1466   : > { %v16774_v15 = vpop.f32.mrf.mxu1 }
0x146e   : > { %v5959_v22 = vpop.f32.mrf.mxu1 }
0x1471   : > { %13655 = vmatmul.msk.bf16.gmra.mxu3 %vm829_vm7, %v16613_v34  ;;  %v6290_v34 = vadd.f32 %v6289_v17, %v5954_v21 }
0x1476   : > { %v5961_v28 = vpop.f32.mrf.mxu1 }
0x147e   : > { %v5964_v4 = vpop.f32.mrf.mxu1 }
0x1481   : > { %13656 = vmatmul.msk.bf16.gmra.mxu3 %vm829_vm7, %v16619_v2  ;;  %v6089_v2 = vadd.f32 %v16726_v53, %v16720_v25 }
0x1486   : > { %v16780_v31 = vpop.f32.mrf.mxu1 }
0x148e   : > { %v6150_v35 = vpop.f32.mrf.mxu1 }
0x148f   : > { %v6151_v54 = vadd.f32 %v6150_v35, %v5815_v62  ;;  %v6291_v35 = vpop.f32.mrf.mxu0 }
0x1491   : > { %v6304_v0 = vadd.f32 %v6151_v54, %v6084_v26 }
0x1494   : > { %v6016_v56 = vpop.f32.mrf.mxu3 }
0x1496   : > { %v16794_v37 = vpop.f32.mrf.mxu1 }
0x149c   : > { %v16786_v40 = vpop.f32.mrf.mxu3 }
0x149d   : > { %19943 = vst [vmem:[#allocation9_spill] sm:$0xff] %v16786_v40 }
0x149e   : > { %v6155_v23 = vpop.f32.mrf.mxu1 }
0x149f   : > { %v6156_v26 = vadd.f32 %v6155_v23, %v5820_v20  ;;  %v6094_v20 = vadd.f32 %v16740_v57, %v16735_v1 }
0x14a1   : > { %v6306_v13 = vadd.f32 %v6156_v26, %v6089_v2 }
0x14a4   : > { %v6021_v42 = vpop.f32.mrf.mxu3 }
0x14a6   : > { %v6157_v52 = vpop.f32.mrf.mxu1 }
0x14ac   : > { %v16788_v45 = vpop.f32.mrf.mxu3 }
0x14b4   : > { %v6026_v48 = vpop.f32.mrf.mxu3 }
0x14bc   : > { %v16790_v44 = vpop.f32.mrf.mxu3 }
0x14c4   : > { %v16792_v50 = vpop.f32.mrf.mxu3 }
0x14cc   : > { %v16796_v36 = vpop.f32.mrf.mxu3 }
0x14d4   : > { %v6217_v59 = vpop.f32.mrf.mxu3 }
0x14d5   : > { %v6218_v12 = vadd.f32 %v6217_v59, %v16679_v51  ;;  %v6160_v59 = vpop.f32.mrf.mxu1 }
0x14d7   : > { %v6312_v47 = vadd.f32 %v6285_v55, %v6218_v12  ;;  %v6161_v12 = vadd.f32 %v6160_v59, %v5825_v16  ;;  %v6099_v16 = vadd.f32 %v16753_v18, %v16751_v58 }
0x14d9   : > { %v6320_v3 = vadd.f32 %v6312_v47, %v6304_v0  ;;  %v6294_v0 = vpop.f32.mrf.mxu0  ;;  %v6308_v21 = vadd.f32 %v6161_v12, %v6094_v20  ;;  %v6158_v12 = vadd.f32 %v6157_v52, %v16772_v14  ;;  %v6101_v52 = vadd.f32 %v16762_v63, %v16760_v19 }
0x14da   : > { %v6295_v23 = vadd.f32 %v6294_v0, %v5959_v22  ;;  %v6096_v22 = vadd.f32 %v16749_v39, %v16742_v9 }
0x14db   : > { %v16799_v62 = vadd.f32 %v6320_v3, %v6016_v56 }
0x14dc   : > { %v6219_v8 = vpop.f32.mrf.mxu3 }
0x14dd   : > { %v6162_v47 = vpop.f32.mrf.mxu1 }
0x14de   : > { %v6163_v57 = vadd.f32 %v6162_v47, %v5827_v24 }
0x14e0   : > { %v6309_v58 = vadd.f32 %v6163_v57, %v6096_v22 }
0x14e1   : > { %v6296_v53 = vpop.f32.mrf.mxu0 }
0x14e4   : > { %v6222_v54 = vpop.f32.mrf.mxu3 }
0x14e5   : > { %v6223_v38 = vadd.f32 %v6222_v54, %v16685_v29  ;;  %v6297_v54 = vadd.f32 %v6296_v53, %v5961_v28  ;;  %v6091_v28 = vadd.f32 %v16733_v6, %v16724_v27 }
0x14e7   : > { %v6314_v40 = vadd.f32 %v6290_v34, %v6223_v38  ;;  %v6165_v34 = vpop.f32.mrf.mxu1  ;;  %v6307_v6 = vadd.f32 %v6158_v12, %v6091_v28  ;;  %v15137_v12 = vld [vmem:[%s19796_s2 + $0x7f8] sm:$0xff]  ;;  %v15140_v28 = vld [vmem:[%s19796_s2 + $0x810] sm:$0xff] }
0x14e9   : > { %v6322_v51 = vadd.f32 %v6314_v40, %v6306_v13  ;;  %v6299_v40 = vpop.f32.mrf.mxu0 }
0x14ea   : > { %v6300_v1 = vadd.f32 %v6299_v40, %v5964_v4 }
0x14eb   : > { %v16804_v55 = vadd.f32 %v6322_v51, %v6021_v42  ;;  %v6166_v42 = vadd.f32 %v6165_v34, %v5830_v30 }
0x14ec   : > { %v6224_v56 = vpop.f32.mrf.mxu3 }
0x14ed   : > { %v6310_v51 = vadd.f32 %v6166_v42, %v6099_v16 }
0x14ef   : > { %v6167_v30 = vpop.f32.mrf.mxu1 }
0x14f0   : > { %v6168_v9 = vadd.f32 %v6167_v30, %v16782_v33  ;;  %v6086_v33 = vadd.f32 %v16722_v7, %v16711_v43  ;;  %v15135_v30 = vld [vmem:[%s19796_s2 + $0x7e8] sm:$0xff] }
0x14f1   : > { %v6301_v24 = vpop.f32.mrf.mxu0 }
0x14f2   : > { %v6302_v27 = vadd.f32 %v6301_v24, %v16780_v31 }
0x14f4   : > { %v6227_v3 = vpop.f32.mrf.mxu3 }
0x14f5   : > { %v6228_v25 = vadd.f32 %v6227_v3, %v16697_v11 }
0x14f7   : > { %v6316_v29 = vadd.f32 %v6295_v23, %v6228_v25  ;;  %v19944_v23 = vld [vmem:[#allocation9_spill] sm:$0xff] }
0x14f9   : > { %v6324_v2 = vadd.f32 %v6316_v29, %v6308_v21 }
0x14fb   : > { %v6332_v38 = vadd.f32 %v6324_v2, %v6026_v48  ;;  %v6225_v48 = vadd.f32 %v6224_v56, %v16689_v32  ;;  %v6287_v56 = vadd.f32 %v6286_v10, %v16768_v61 }
0x14fc   : > { %v6229_v13 = vpop.f32.mrf.mxu3 }
0x14fd   : > { %v6230_v17 = vadd.f32 %v6229_v13, %v16701_v41  ;;  %v6292_v41 = vadd.f32 %v6291_v35, %v16774_v15  ;;  %v6153_v15 = vadd.f32 %v16794_v37, %v16764_v60  ;;  %v6311_v35 = vadd.f32 %v6168_v9, %v6101_v52  ;;  %v6336_v60 = vld [vmem:[%s19798_s4 + $0x120] ss:$0 sm:$0xff] }
0x14fe   : > { %v6341_v43 = vadd.f32 %v6336_v60, %v6332_v38  ;;  %v6339_v29 = vadd.f32 %v6336_v60, %v16804_v55  ;;  %v6337_v42 = vadd.f32 %v6336_v60, %v16799_v62  ;;  %v15132_v62 = vld [vmem:[%s19796_s2 + $0x7d0] sm:$0xff] }
0x14ff   : > { %v6317_v59 = vadd.f32 %v6297_v54, %v6230_v17  ;;  %v6315_v39 = vadd.f32 %v6292_v41, %v6225_v48  ;;  %v6305_v47 = vadd.f32 %v6153_v15, %v6086_v33  ;;  %v15136_v41 = vld [vmem:[%s19796_s2 + $0x7f0] sm:$0xff]  ;;  %v15141_v15 = vld [vmem:[%s19796_s2 + $0x818] sm:$0xff] }
0x1500   : > { %v6357_v34 = vmul.f32 0.2, %v6341_v43  ;;  %vm6349_vm13 = vcmp.ge.f32.partialorder %v6341_v43, 0.0  ;;  %v6355_v16 = vmul.f32 0.2, %v6339_v29  ;;  %vm6347_vm15 = vcmp.ge.f32.partialorder %v6339_v29, 0.0 }
0x1501   : > { %v6325_v4 = vadd.f32 %v6317_v59, %v6309_v58  ;;  %v6353_v57 = vmul.f32 0.2, %v6337_v42  ;;  %vm6345_vm4 = vcmp.ge.f32.partialorder %v6337_v42, 0.0  ;;  %v15133_v59 = vld [vmem:[%s19796_s2 + $0x7d8] sm:$0xff]  ;;  %v15138_v58 = vld [vmem:[%s19796_s2 + $0x800] sm:$0xff] }
0x1502   : > { %v6365_v17 = vsel %vm6349_vm13, %v6341_v43, %v6357_v34  ;;  %v6363_v55 = vsel %vm6347_vm15, %v6339_v29, %v6355_v16 }
0x1503   : > { %v6333_v61 = vadd.f32 %v6325_v4, %v16790_v44 }
0x1504   : > { %v6232_v26 = vpop.f32.mrf.mxu3 }
0x1505   : > { %v6233_v11 = vadd.f32 %v6232_v26, %v16703_v5  ;;  %v6220_v5 = vadd.f32 %v6219_v8, %v16683_v49  ;;  %v6342_v3 = vadd.f32 %v6336_v60, %v6333_v61 }
0x1507   : > { %v6318_v0 = vadd.f32 %v6300_v1, %v6233_v11  ;;  %v6313_v8 = vadd.f32 %v6287_v56, %v6220_v5  ;;  %v6358_v53 = vmul.f32 0.2, %v6342_v3  ;;  %vm6350_vm12 = vcmp.ge.f32.partialorder %v6342_v3, 0.0 }
0x1509   : > { %v6326_v18 = vadd.f32 %v6318_v0, %v6310_v51  ;;  %v6321_v31 = vadd.f32 %v6313_v8, %v6305_v47  ;;  %v6361_v51 = vsel %vm6345_vm4, %v6337_v42, %v6353_v57  ;;  %v15134_v0 = vld [vmem:[%s19796_s2 + $0x7e0] sm:$0xff] }
0x150b   : > { %v6334_v32 = vadd.f32 %v6326_v18, %v16792_v50  ;;  %v6323_v50 = vadd.f32 %v6315_v39, %v6307_v6  ;;  %v6329_v25 = vadd.f32 %v6321_v31, %v19944_v23  ;;  %v15139_v18 = vld [vmem:[%s19796_s2 + $0x808] sm:$0xff] }
0x150c   : > { %v6234_v14 = vpop.f32.mrf.mxu3 }
0x150d   : > { %v6235_v49 = vadd.f32 %v6234_v14, %v16709_v46  ;;  %v6343_v19 = vadd.f32 %v6336_v60, %v6334_v32  ;;  %v6331_v37 = vadd.f32 %v6323_v50, %v16788_v45  ;;  %v6338_v38 = vadd.f32 %v6336_v60, %v6329_v25 }
0x150f   : > { %v6319_v10 = vadd.f32 %v6302_v27, %v6235_v49  ;;  %v6359_v20 = vmul.f32 0.2, %v6343_v19  ;;  %vm6351_vm8 = vcmp.ge.f32.partialorder %v6343_v19, 0.0  ;;  %v6340_v21 = vadd.f32 %v6336_v60, %v6331_v37 }
0x1510   : > { %v6354_v1 = vmul.f32 0.2, %v6338_v38  ;;  %vm6346_vm2 = vcmp.ge.f32.partialorder %v6338_v38, 0.0 }
0x1511   : > { %v6327_v63 = vadd.f32 %v6319_v10, %v6311_v35  ;;  %v6367_v2 = vsel %vm6351_vm8, %v6343_v19, %v6359_v20  ;;  %v6356_v40 = vmul.f32 0.2, %v6340_v21  ;;  %vm6348_vm14 = vcmp.ge.f32.partialorder %v6340_v21, 0.0  ;;  %v15142_v35 = vld [vmem:[%s19796_s2 + $0x820] sm:$0xff] }
0x1512   : > { %v6362_v22 = vsel %vm6346_vm2, %v6338_v38, %v6354_v1 }
0x1513   : > { %v6335_v46 = vadd.f32 %v6327_v63, %v16796_v36  ;;  %v6366_v36 = vsel %vm6350_vm12, %v6342_v3, %v6358_v53  ;;  %v6364_v54 = vsel %vm6348_vm14, %v6340_v21, %v6356_v40  ;;  %v6441_v48 = vpack.c.bf16 %v6362_v22, %v6361_v51  ;;  %v15144_v53 = vld [vmem:[%s19796_s2 + $0x830] sm:$0xff]  ;;  %v15145_v40 = vld [vmem:[%s19796_s2 + $0x838] sm:$0xff] }
0x1514   : > { %v6443_v26 = vpack.c.bf16 %v6366_v36, %v6365_v17  ;;  %v6442_v11 = vpack.c.bf16 %v6364_v54, %v6363_v55  ;;  %v15146_v55 = vld [vmem:[%s19796_s2 + $0x840] sm:$0xff] }
0x1515   : > { %v6344_v7 = vadd.f32 %v6336_v60, %v6335_v46  ;;  %v6995_v60 = vld [vmem:[%s19796_s2 + $0x8f8] sm:$0xf]  ;;  %v15143_v46 = vld [vmem:[%s19796_s2 + $0x828] sm:$0xff] }
0x1516   : > { %v7036_v31 = vsel %vm375_vm0, %v6995_v60, 0 }
0x1517   : > { %vm6352_vm10 = vcmp.ge.f32.partialorder %v6344_v7, 0.0  ;;  %v6360_v44 = vmul.f32 0.2, %v6344_v7  ;;  %7045 = vmatpush.bf16.msra.mxu3 %v7036_v31 }
0x1519   : > { %v6368_v13 = vsel %vm6352_vm10, %v6344_v7, %v6360_v44 }
0x151a   : > { %v6444_v45 = vpack.c.bf16 %v6368_v13, %v6367_v2 }
0x151c   : > { %6737 = vmatpush.bf16.msrb.mxu0 %v6444_v45 }
0x1520   : > { %6738 = vmatpush.bf16.msrb.mxu0 %v6443_v26 }
0x1524   : > { %6739 = vmatpush.bf16.msrb.mxu0 %v6442_v11 }
0x1528   : > { %6740 = vmatpush.bf16.msrb.mxu0 %v6441_v48 }
0x152b   : > { %13809 = vmatmul.msk.bf16.vlgmr.msrb.gmra.mxu0 %vm1262_vm5, %v15132_v62 }
0x153b   : > { %13810 = vmatmul.msk.bf16.gmra.mxu0 %vm1262_vm5, %v15133_v59 }
0x154b   : > { %13811 = vmatmul.msk.bf16.gmra.mxu0 %vm1262_vm5, %v15134_v0  ;;  %v15147_v0 = vld [vmem:[%s19796_s2 + $0x848] sm:$0xff] }
0x155b   : > { %13812 = vmatmul.msk.bf16.gmra.mxu0 %vm1262_vm5, %v15135_v30 }
0x156b   : > { %13813 = vmatmul.msk.bf16.gmra.mxu0 %vm1262_vm5, %v15136_v41 }
0x157b   : > { %13814 = vmatmul.msk.bf16.gmra.mxu0 %vm1262_vm5, %v15137_v12 }
0x158b   : > { %13815 = vmatmul.msk.bf16.gmra.mxu0 %vm1262_vm5, %v15138_v58 }
0x159b   : > { %13816 = vmatmul.msk.bf16.gmra.mxu0 %vm1262_vm5, %v15139_v18 }
0x15a8   : > { %v6742_v24 = vpop.f32.mrf.mxu0 }
0x15a9   : > { %v6922_v5 = vpack.c.bf16 %v6742_v24, %v6742_v24 }
0x15ab   : > { %13817 = vmatmul.msk.bf16.gmra.mxu0 %vm1262_vm5, %v15140_v28  ;;  %v16877_v4 = vunpack.c.l.b16 %v6922_v5  ;;  %v15148_v5 = vld [vmem:[%s19796_s2 + $0x850] sm:$0xff] }
0x15b0   : > { %v6744_v9 = vpop.f32.mrf.mxu0 }
0x15b1   : > { %v6923_v39 = vpack.c.bf16 %v6744_v9, %v6744_v9 }
0x15b3   : > { %v16879_v32 = vunpack.c.l.b16 %v6923_v39 }
0x15b5   : > { %v7339_v56 = vpack.c.b16 %v16879_v32, %v16877_v4 }
0x15b8   : > { %v6747_v14 = vpop.f32.mrf.mxu0 }
0x15b9   : > { %v6924_v52 = vpack.c.bf16 %v6747_v14, %v6747_v14 }
0x15bb   : > { %13818 = vmatmul.msk.bf16.gmra.mxu0 %vm1262_vm5, %v15141_v15  ;;  %v16887_v49 = vunpack.c.l.b16 %v6924_v52 }
0x15c0   : > { %v6749_v27 = vpop.f32.mrf.mxu0 }
0x15c1   : > { %v6925_v6 = vpack.c.bf16 %v6749_v27, %v6749_v27 }
0x15c3   : > { %v16889_v33 = vunpack.c.l.b16 %v6925_v6 }
0x15c5   : > { %v7340_v8 = vpack.c.b16 %v16889_v33, %v16887_v49 }
0x15c8   : > { %v6752_v50 = vpop.f32.mrf.mxu0 }
0x15c9   : > { %v6926_v61 = vpack.c.bf16 %v6752_v50, %v6752_v50 }
0x15cb   : > { %13819 = vmatmul.msk.bf16.gmra.mxu0 %vm1262_vm5, %v15142_v35  ;;  %v16900_v19 = vunpack.c.l.b16 %v6926_v61  ;;  %v15149_v35 = vld [vmem:[%s19796_s2 + $0x858] sm:$0xff] }
0x15d0   : > { %v6754_v10 = vpop.f32.mrf.mxu0 }
0x15d1   : > { %v6927_v47 = vpack.c.bf16 %v6754_v10, %v6754_v10 }
0x15d3   : > { %v16902_v63 = vunpack.c.l.b16 %v6927_v47 }
0x15d5   : > { %v7341_v37 = vpack.c.b16 %v16902_v63, %v16900_v19 }
0x15d8   : > { %v6757_v3 = vpop.f32.mrf.mxu0 }
0x15d9   : > { %v6928_v43 = vpack.c.bf16 %v6757_v3, %v6757_v3  ;;  %v15150_v3 = vld [vmem:[%s19796_s2 + $0x860] sm:$0xff] }
0x15db   : > { %13820 = vmatmul.msk.bf16.gmra.mxu0 %vm1262_vm5, %v15143_v46  ;;  %v16911_v23 = vunpack.c.l.b16 %v6928_v43 }
0x15e0   : > { %v6759_v7 = vpop.f32.mrf.mxu0 }
0x15e1   : > { %v6929_v20 = vpack.c.bf16 %v6759_v7, %v6759_v7 }
0x15e3   : > { %v16913_v25 = vunpack.c.l.b16 %v6929_v20 }
0x15e5   : > { %v19945_v19 = vpack.c.b16 %v16913_v25, %v16911_v23 }
0x15e8   : > { %v6762_v21 = vpop.f32.mrf.mxu0 }
0x15e9   : > { %v6930_v29 = vpack.c.bf16 %v6762_v21, %v6762_v21 }
0x15eb   : > { %13821 = vmatmul.msk.bf16.gmra.mxu0 %vm1262_vm5, %v15144_v53  ;;  %v7011_v34 = vunpack.c.l.b16 %v6930_v29 }
0x15f0   : > { %v6764_v2 = vpop.f32.mrf.mxu0 }
0x15f1   : > { %v6931_v13 = vpack.c.bf16 %v6764_v2, %v6764_v2 }
0x15f3   : > { %v7012_v45 = vunpack.c.l.b16 %v6931_v13  ;;  %v15151_v13 = vld [vmem:[%s19796_s2 + $0x868] sm:$0xff] }
0x15f5   : > { %v7019_v36 = vpack.c.b16 %v7012_v45, %v7011_v34 }
0x15f7   : > { %13845 = vmatmul.msk.bf16.vlgmr.msra.gmra.mxu3 %vm350_vm1, %v7019_v36 }
0x15f8   : > { %v6767_v38 = vpop.f32.mrf.mxu0 }
0x15f9   : > { %v6932_v42 = vpack.c.bf16 %v6767_v38, %v6767_v38 }
0x15fb   : > { %13822 = vmatmul.msk.bf16.gmra.mxu0 %vm1262_vm5, %v15145_v40  ;;  %v7013_v26 = vunpack.c.l.b16 %v6932_v42 }
0x1600   : > { %v6769_v17 = vpop.f32.mrf.mxu0 }
0x1601   : > { %v6933_v16 = vpack.c.bf16 %v6769_v17, %v6769_v17 }
0x1603   : > { %v7014_v54 = vunpack.c.l.b16 %v6933_v16  ;;  %v15152_v16 = vld [vmem:[%s19796_s2 + $0x870] sm:$0xff] }
0x1605   : > { %v7020_v1 = vpack.c.b16 %v7014_v54, %v7013_v26 }
0x1607   : > { %13846 = vmatmul.msk.bf16.gmra.mxu3 %vm350_vm1, %v7020_v1 }
0x1608   : > { %v6772_v57 = vpop.f32.mrf.mxu0 }
0x1609   : > { %v6934_v11 = vpack.c.bf16 %v6772_v57, %v6772_v57 }
0x160b   : > { %13823 = vmatmul.msk.bf16.gmra.mxu0 %vm1262_vm5, %v15146_v55  ;;  %v7015_v48 = vunpack.c.l.b16 %v6934_v11 }
0x1610   : > { %v6774_v22 = vpop.f32.mrf.mxu0 }
0x1611   : > { %v6935_v51 = vpack.c.bf16 %v6774_v22, %v6774_v22 }
0x1613   : > { %v7016_v62 = vunpack.c.l.b16 %v6935_v51  ;;  %v15153_v51 = vld [vmem:[%s19796_s2 + $0x878] sm:$0xff] }
0x1615   : > { %v7021_v59 = vpack.c.b16 %v7016_v62, %v7015_v48 }
0x1617   : > { %13847 = vmatmul.msk.bf16.gmra.mxu3 %vm350_vm1, %v7021_v59 }
0x1618   : > { %v6777_v30 = vpop.f32.mrf.mxu0 }
0x1619   : > { %v6936_v41 = vpack.c.bf16 %v6777_v30, %v6777_v30 }
0x161b   : > { %13824 = vmatmul.msk.bf16.gmra.mxu0 %vm1262_vm5, %v15147_v0  ;;  %v7017_v18 = vunpack.c.l.b16 %v6936_v41 }
0x1620   : > { %v6779_v12 = vpop.f32.mrf.mxu0 }
0x1621   : > { %v6937_v58 = vpack.c.bf16 %v6779_v12, %v6779_v12 }
0x1623   : > { %v7018_v28 = vunpack.c.l.b16 %v6937_v58  ;;  %v15154_v58 = vld [vmem:[%s19796_s2 + $0x880] sm:$0xff] }
0x1625   : > { %v7022_v24 = vpack.c.b16 %v7018_v28, %v7017_v18 }
0x1627   : > { %13848 = vmatmul.msk.bf16.gmra.mxu3 %vm350_vm1, %v7022_v24 }
0x1628   : > { %v6782_v9 = vpop.f32.mrf.mxu0 }
0x1629   : > { %v6938_v39 = vpack.c.bf16 %v6782_v9, %v6782_v9 }
0x162b   : > { %13825 = vmatmul.msk.bf16.gmra.mxu0 %vm1262_vm5, %v15148_v5  ;;  %v16941_v52 = vunpack.c.l.b16 %v6938_v39 }
0x1630   : > { %v6784_v15 = vpop.f32.mrf.mxu0 }
0x1631   : > { %v6939_v14 = vpack.c.bf16 %v6784_v15, %v6784_v15 }
0x1633   : > { %v16943_v27 = vunpack.c.l.b16 %v6939_v14  ;;  %v15155_v14 = vld [vmem:[%s19796_s2 + $0x888] sm:$0xff] }
0x1635   : > { %v7403_v6 = vpack.c.b16 %v16943_v27, %v16941_v52 }
0x1638   : > { %v6787_v50 = vpop.f32.mrf.mxu0 }
0x1639   : > { %v6940_v61 = vpack.c.bf16 %v6787_v50, %v6787_v50 }
0x163b   : > { %13826 = vmatmul.msk.bf16.gmra.mxu0 %vm1262_vm5, %v15149_v35  ;;  %v16951_v60 = vunpack.c.l.b16 %v6940_v61 }
0x1640   : > { %v6789_v10 = vpop.f32.mrf.mxu0 }
0x1641   : > { %v6941_v47 = vpack.c.bf16 %v6789_v10, %v6789_v10 }
0x1643   : > { %v16953_v31 = vunpack.c.l.b16 %v6941_v47 }
0x1645   : > { %v7404_v46 = vpack.c.b16 %v16953_v31, %v16951_v60 }
0x1648   : > { %v6792_v43 = vpop.f32.mrf.mxu0 }
0x1649   : > { %v6942_v7 = vpack.c.bf16 %v6792_v43, %v6792_v43 }
0x164b   : > { %13827 = vmatmul.msk.bf16.gmra.mxu0 %vm1262_vm5, %v15150_v3  ;;  %v16961_v21 = vunpack.c.l.b16 %v6942_v7  ;;  %v15156_v7 = vld [vmem:[%s19796_s2 + $0x890] sm:$0xff] }
0x1650   : > { %v6794_v20 = vpop.f32.mrf.mxu0 }
0x1651   : > { %v6943_v53 = vpack.c.bf16 %v6794_v20, %v6794_v20 }
0x1653   : > { %v16963_v29 = vunpack.c.l.b16 %v6943_v53 }
0x1655   : > { %v7405_v2 = vpack.c.b16 %v16963_v29, %v16961_v21 }
0x1658   : > { %v6797_v34 = vpop.f32.mrf.mxu0 }
0x1659   : > { %v6944_v45 = vpack.c.bf16 %v6797_v34, %v6797_v34 }
0x165b   : > { %13828 = vmatmul.msk.bf16.gmra.mxu0 %vm1262_vm5, %v15151_v13  ;;  %v16971_v38 = vunpack.c.l.b16 %v6944_v45 }
0x1660   : > { %v6799_v36 = vpop.f32.mrf.mxu0 }
0x1661   : > { %v6945_v40 = vpack.c.bf16 %v6799_v36, %v6799_v36 }
0x1663   : > { %v16973_v42 = vunpack.c.l.b16 %v6945_v40 }
0x1668   : > { %v6802_v26 = vpop.f32.mrf.mxu0 }
0x1669   : > { %v6946_v54 = vpack.c.bf16 %v6802_v26, %v6802_v26 }
0x166b   : > { %13829 = vmatmul.msk.bf16.gmra.mxu0 %vm1262_vm5, %v15152_v16  ;;  %v16981_v57 = vunpack.c.l.b16 %v6946_v54  ;;  %v15157_v16 = vld [vmem:[%s19796_s2 + $0x898] sm:$0xff] }
0x1670   : > { %v6804_v1 = vpop.f32.mrf.mxu0 }
0x1671   : > { %v6947_v55 = vpack.c.bf16 %v6804_v1, %v6804_v1 }
0x1673   : > { %v16983_v11 = vunpack.c.l.b16 %v6947_v55 }
0x1675   : > { %v7083_v22 = vpack.c.b16 %v16983_v11, %v16981_v57  ;;  %v7002_v11 = vld [vmem:[%s19796_s2 + $0x930] sm:$0xf] }
0x1678   : > { %v6807_v48 = vpop.f32.mrf.mxu0 }
0x1679   : > { %v6948_v62 = vpack.c.bf16 %v6807_v48, %v6807_v48 }
0x167b   : > { %13830 = vmatmul.msk.bf16.gmra.mxu0 %vm1262_vm5, %v15153_v51  ;;  %v16991_v30 = vunpack.c.l.b16 %v6948_v62 }
0x1680   : > { %v6809_v59 = vpop.f32.mrf.mxu0 }
0x1681   : > { %v6949_v0 = vpack.c.bf16 %v6809_v59, %v6809_v59  ;;  %v15158_v59 = vld [vmem:[%s19796_s2 + $0x8a0] sm:$0xff] }
0x1683   : > { %v16993_v41 = vunpack.c.l.b16 %v6949_v0 }
0x1685   : > { %v7084_v12 = vpack.c.b16 %v16993_v41, %v16991_v30  ;;  %v17149_v41 = vpop.f32.mrf.mxu3 }
0x1688   : > { %v6812_v18 = vpop.f32.mrf.mxu0 }
0x1689   : > { %v6950_v28 = vpack.c.bf16 %v6812_v18, %v6812_v18 }
0x168b   : > { %13831 = vmatmul.msk.bf16.gmra.mxu0 %vm1262_vm5, %v15154_v58  ;;  %v17001_v9 = vunpack.c.l.b16 %v6950_v28 }
0x1690   : > { %v6814_v24 = vpop.f32.mrf.mxu0 }
0x1691   : > { %v6951_v5 = vpack.c.bf16 %v6814_v24, %v6814_v24  ;;  %v6999_v24 = vld [vmem:[%s19796_s2 + $0x918] sm:$0xf] }
0x1693   : > { %v17003_v39 = vunpack.c.l.b16 %v6951_v5 }
0x1695   : > { %v7085_v15 = vpack.c.b16 %v17003_v39, %v17001_v9 }
0x1698   : > { %v6817_v35 = vpop.f32.mrf.mxu0 }
0x1699   : > { %v6952_v50 = vpack.c.bf16 %v6817_v35, %v6817_v35  ;;  %v7164_v35 = vsel %vm375_vm0, %v6999_v24, 0 }
0x169a   : > { %7173 = vmatpush.bf16.msrb.mxu3 %v7164_v35 }
0x169b   : > { %13832 = vmatmul.msk.bf16.gmra.mxu0 %vm1262_vm5, %v15155_v14  ;;  %v17011_v47 = vunpack.c.l.b16 %v6952_v50 }
0x16a0   : > { %v6819_v61 = vpop.f32.mrf.mxu0 }
0x16a1   : > { %v6953_v10 = vpack.c.bf16 %v6819_v61, %v6819_v61  ;;  %v15159_v61 = vld [vmem:[%s19796_s2 + $0x8a8] sm:$0xff] }
0x16a3   : > { %v17013_v3 = vunpack.c.l.b16 %v6953_v10 }
0x16a5   : > { %v7086_v43 = vpack.c.b16 %v17013_v3, %v17011_v47 }
0x16a8   : > { %v6822_v20 = vpop.f32.mrf.mxu0 }
0x16a9   : > { %v6954_v53 = vpack.c.bf16 %v6822_v20, %v6822_v20 }
0x16ab   : > { %13833 = vmatmul.msk.bf16.gmra.mxu0 %vm1262_vm5, %v15156_v7  ;;  %v17021_v45 = vunpack.c.l.b16 %v6954_v53 }
0x16b0   : > { %v6824_v13 = vpop.f32.mrf.mxu0 }
0x16b1   : > { %v6955_v34 = vpack.c.bf16 %v6824_v13, %v6824_v13 }
0x16b3   : > { %v17023_v36 = vunpack.c.l.b16 %v6955_v34 }
0x16b5   : > { %v19947_v29 = vpack.c.b16 %v17023_v36, %v17021_v45 }
0x16b8   : > { %v6827_v26 = vpop.f32.mrf.mxu0 }
0x16b9   : > { %v6956_v54 = vpack.c.bf16 %v6827_v26, %v6827_v26  ;;  %v15160_v26 = vld [vmem:[%s19796_s2 + $0x8b0] sm:$0xff] }
0x16bb   : > { %13834 = vmatmul.msk.bf16.gmra.mxu0 %vm1262_vm5, %v15157_v16  ;;  %v17031_v51 = vunpack.c.l.b16 %v6956_v54  ;;  %v15167_v16 = vld [vmem:[%s19796_s2 + $0x8e8] sm:$0xff] }
0x16c0   : > { %v6829_v1 = vpop.f32.mrf.mxu0 }
0x16c1   : > { %v6957_v55 = vpack.c.bf16 %v6829_v1, %v6829_v1 }
0x16c3   : > { %v17033_v48 = vunpack.c.l.b16 %v6957_v55 }
0x16c8   : > { %v6832_v0 = vpop.f32.mrf.mxu0 }
0x16c9   : > { %v6958_v58 = vpack.c.bf16 %v6832_v0, %v6832_v0 }
0x16cb   : > { %13835 = vmatmul.msk.bf16.gmra.mxu0 %vm1262_vm5, %v15158_v59  ;;  %v17044_v5 = vunpack.c.l.b16 %v6958_v58 }
0x16d0   : > { %v6834_v18 = vpop.f32.mrf.mxu0 }
0x16d1   : > { %v6959_v28 = vpack.c.bf16 %v6834_v18, %v6834_v18 }
0x16d3   : > { %v17046_v14 = vunpack.c.l.b16 %v6959_v28  ;;  %v15161_v28 = vld [vmem:[%s19796_s2 + $0x8b8] sm:$0xff] }
0x16d8   : > { %v6837_v10 = vpop.f32.mrf.mxu0 }
0x16d9   : > { %v6960_v7 = vpack.c.bf16 %v6837_v10, %v6837_v10 }
0x16db   : > { %13836 = vmatmul.msk.bf16.gmra.mxu0 %vm1262_vm5, %v15159_v61  ;;  %v17055_v13 = vunpack.c.l.b16 %v6960_v7 }
0x16e0   : > { %v6839_v20 = vpop.f32.mrf.mxu0 }
0x16e1   : > { %v6961_v53 = vpack.c.bf16 %v6839_v20, %v6839_v20 }
0x16e3   : > { %v17057_v34 = vunpack.c.l.b16 %v6961_v53 }
0x16e8   : > { %v6842_v54 = vpop.f32.mrf.mxu0 }
0x16e9   : > { %v6962_v1 = vpack.c.bf16 %v6842_v54, %v6842_v54 }
0x16eb   : > { %13837 = vmatmul.msk.bf16.gmra.mxu0 %vm1262_vm5, %v15160_v26  ;;  %v7139_v0 = vunpack.c.l.b16 %v6962_v1  ;;  %v15162_v26 = vld [vmem:[%s19796_s2 + $0x8c0] sm:$0xff] }
0x16f0   : > { %v6844_v55 = vpop.f32.mrf.mxu0 }
0x16f1   : > { %v6963_v59 = vpack.c.bf16 %v6844_v55, %v6844_v55 }
0x16f3   : > { %v7140_v58 = vunpack.c.l.b16 %v6963_v59 }
0x16f5   : > { %v7147_v18 = vpack.c.b16 %v7140_v58, %v7139_v0 }
0x16f7   : > { %13853 = vmatmul.msk.bf16.vlgmr.msrb.gmra.mxu3 %vm350_vm1, %v7147_v18 }
0x16f8   : > { %v6847_v24 = vpop.f32.mrf.mxu0 }
0x16f9   : > { %v6964_v35 = vpack.c.bf16 %v6847_v24, %v6847_v24 }
0x16fb   : > { %13838 = vmatmul.msk.bf16.gmra.mxu0 %vm1262_vm5, %v15161_v28  ;;  %v7141_v7 = vunpack.c.l.b16 %v6964_v35  ;;  %v15163_v28 = vld [vmem:[%s19796_s2 + $0x8c8] sm:$0xff] }
0x1700   : > { %v6849_v61 = vpop.f32.mrf.mxu0 }
0x1701   : > { %v6965_v10 = vpack.c.bf16 %v6849_v61, %v6849_v61 }
0x1703   : > { %v7142_v20 = vunpack.c.l.b16 %v6965_v10 }
0x1705   : > { %v7148_v53 = vpack.c.b16 %v7142_v20, %v7141_v7 }
0x1707   : > { %13854 = vmatmul.msk.bf16.gmra.mxu3 %vm350_vm1, %v7148_v53 }
0x1708   : > { %v6852_v54 = vpop.f32.mrf.mxu0 }
0x1709   : > { %v6966_v1 = vpack.c.bf16 %v6852_v54, %v6852_v54 }
0x170b   : > { %13839 = vmatmul.msk.bf16.gmra.mxu0 %vm1262_vm5, %v15162_v26  ;;  %v7143_v0 = vunpack.c.l.b16 %v6966_v1  ;;  %v15164_v26 = vld [vmem:[%s19796_s2 + $0x8d0] sm:$0xff] }
0x1710   : > { %v6854_v55 = vpop.f32.mrf.mxu0 }
0x1711   : > { %v6967_v59 = vpack.c.bf16 %v6854_v55, %v6854_v55 }
0x1713   : > { %v7144_v58 = vunpack.c.l.b16 %v6967_v59 }
0x1715   : > { %v7149_v18 = vpack.c.b16 %v7144_v58, %v7143_v0 }
0x1717   : > { %13855 = vmatmul.msk.bf16.gmra.mxu3 %vm350_vm1, %v7149_v18 }
0x1718   : > { %v6857_v24 = vpop.f32.mrf.mxu0 }
0x1719   : > { %v6968_v35 = vpack.c.bf16 %v6857_v24, %v6857_v24 }
0x171b   : > { %13840 = vmatmul.msk.bf16.gmra.mxu0 %vm1262_vm5, %v15163_v28  ;;  %v7145_v7 = vunpack.c.l.b16 %v6968_v35  ;;  %v15165_v28 = vld [vmem:[%s19796_s2 + $0x8d8] sm:$0xff] }
0x1720   : > { %v6859_v61 = vpop.f32.mrf.mxu0 }
0x1721   : > { %v6969_v10 = vpack.c.bf16 %v6859_v61, %v6859_v61 }
0x1723   : > { %v7146_v20 = vunpack.c.l.b16 %v6969_v10 }
0x1725   : > { %v7150_v53 = vpack.c.b16 %v7146_v20, %v7145_v7 }
0x1727   : > { %13856 = vmatmul.msk.bf16.gmra.mxu3 %vm350_vm1, %v7150_v53 }
0x1728   : > { %v6862_v54 = vpop.f32.mrf.mxu0 }
0x1729   : > { %v6970_v1 = vpack.c.bf16 %v6862_v54, %v6862_v54  ;;  %v15166_v54 = vld [vmem:[%s19796_s2 + $0x8e0] sm:$0xff] }
0x172b   : > { %13841 = vmatmul.msk.bf16.gmra.mxu0 %vm1262_vm5, %v15164_v26  ;;  %v17085_v0 = vunpack.c.l.b16 %v6970_v1  ;;  %v6997_v26 = vld [vmem:[%s19796_s2 + $0x908] sm:$0xf] }
0x172c   : > { %v7100_v1 = vsel %vm375_vm0, %v6997_v26, 0 }
0x172d   : > { %7109 = vmatpush.bf16.msra.mxu0 %v7100_v1 }
0x1730   : > { %v6864_v55 = vpop.f32.mrf.mxu0 }
0x1731   : > { %v6971_v59 = vpack.c.bf16 %v6864_v55, %v6864_v55 }
0x1733   : > { %v17087_v58 = vunpack.c.l.b16 %v6971_v59 }
0x1738   : > { %v6867_v24 = vpop.f32.mrf.mxu0 }
0x1739   : > { %v6972_v35 = vpack.c.bf16 %v6867_v24, %v6867_v24 }
0x173b   : > { %13842 = vmatmul.msk.bf16.gmra.mxu0 %vm1262_vm5, %v15165_v28  ;;  %v17095_v7 = vunpack.c.l.b16 %v6972_v35 }
0x1740   : > { %v6869_v61 = vpop.f32.mrf.mxu0 }
0x1741   : > { %v6973_v10 = vpack.c.bf16 %v6869_v61, %v6869_v61 }
0x1743   : > { %v17097_v20 = vunpack.c.l.b16 %v6973_v10 }
0x1748   : > { %v6872_v55 = vpop.f32.mrf.mxu0 }
0x1749   : > { %v6974_v59 = vpack.c.bf16 %v6872_v55, %v6872_v55 }
0x174b   : > { %13843 = vmatmul.msk.bf16.gmra.mxu0 %vm1262_vm5, %v15166_v54  ;;  %v17109_v35 = vunpack.c.l.b16 %v6974_v59 }
0x1750   : > { %v6874_v28 = vpop.f32.mrf.mxu0 }
0x1751   : > { %v6975_v24 = vpack.c.bf16 %v6874_v28, %v6874_v28 }
0x1753   : > { %v17111_v61 = vunpack.c.l.b16 %v6975_v24 }
0x1758   : > { %v6877_v50 = vpop.f32.mrf.mxu0 }
0x1759   : > { %v6976_v26 = vpack.c.bf16 %v6877_v50, %v6877_v50 }
0x175b   : > { %13844 = vmatmul.msk.bf16.gmra.mxu0 %vm1262_vm5, %v15167_v16  ;;  %v17119_v55 = vunpack.c.l.b16 %v6976_v26  ;;  %v7001_v16 = vld [vmem:[%s19796_s2 + $0x928] sm:$0xf] }
0x175c   : > { %v7228_v26 = vsel %vm375_vm0, %v7001_v16, 0  ;;  %v17151_v16 = vpop.f32.mrf.mxu3 }
0x175d   : > { %7237 = vmatpush.bf16.msrb.mxu0 %v7228_v26 }
0x1760   : > { %v6879_v1 = vpop.f32.mrf.mxu0 }
0x1761   : > { %v6977_v54 = vpack.c.bf16 %v6879_v1, %v6879_v1 }
0x1763   : > { %v17121_v28 = vunpack.c.l.b16 %v6977_v54 }
0x1764   : > { %v17154_v47 = vpop.f32.mrf.mxu3 }
0x1768   : > { %v6882_v24 = vpop.f32.mrf.mxu0 }
0x1769   : > { %v6978_v39 = vpack.c.bf16 %v6882_v24, %v6882_v24 }
0x176b   : > { %13849 = vmatmul.msk.bf16.vlgmr.msra.gmra.mxu0 %vm350_vm1, %v7083_v22  ;;  %v7292_v22 = vsel %vm375_vm0, %v7002_v11, 0  ;;  %v7203_v54 = vunpack.c.l.b16 %v6978_v39 }
0x176c   : > { %7301 = vmatpush.bf16.msra.mxu3 %v7292_v22 }
0x1770   : > { %v6884_v10 = vpop.f32.mrf.mxu0 }
0x1771   : > { %v6979_v9 = vpack.c.bf16 %v6884_v10, %v6884_v10 }
0x1778   : > { %v6887_v53 = vpop.f32.mrf.mxu0 }
0x1779   : > { %v6980_v3 = vpack.c.bf16 %v6887_v53, %v6887_v53 }
0x177b   : > { %13850 = vmatmul.msk.bf16.gmra.mxu0 %vm350_vm1, %v7084_v12  ;;  %v7205_v24 = vunpack.c.l.b16 %v6980_v3 }
0x1780   : > { %v6889_v50 = vpop.f32.mrf.mxu0 }
0x1781   : > { %v6981_v62 = vpack.c.bf16 %v6889_v50, %v6889_v50 }
0x1783   : > { %v7206_v17 = vunpack.c.l.b16 %v6981_v62 }
0x1785   : > { %v7212_v39 = vpack.c.b16 %v7206_v17, %v7205_v24  ;;  %v6996_v24 = vld [vmem:[%s19796_s2 + $0x900] sm:$0xf] }
0x1788   : > { %v6892_v1 = vpop.f32.mrf.mxu0 }
0x178b   : > { %13851 = vmatmul.msk.bf16.gmra.mxu0 %vm350_vm1, %v7085_v15  ;;  %v7204_v15 = vunpack.c.l.b16 %v6979_v9 }
0x178d   : > { %v7211_v59 = vpack.c.b16 %v7204_v15, %v7203_v54  ;;  %v17158_v15 = vpop.f32.mrf.mxu3 }
0x1790   : > { %v6894_v57 = vpop.f32.mrf.mxu0 }
0x1791   : > { %v6983_v50 = vpack.c.bf16 %v6894_v57, %v6894_v57 }
0x1795   : > { %v17160_v62 = vpop.f32.mrf.mxu3 }
0x1798   : > { %v6897_v30 = vpop.f32.mrf.mxu0 }
0x179b   : > { %13852 = vmatmul.msk.bf16.gmra.mxu0 %vm350_vm1, %v7086_v43 }
0x17a0   : > { %v6899_v12 = vpop.f32.mrf.mxu0 }
0x17a8   : > { %v6902_v26 = vpop.f32.mrf.mxu0 }
0x17a9   : > { %v6986_v11 = vpack.c.bf16 %v6902_v26, %v6902_v26 }
0x17ab   : > { %13857 = vmatmul.msk.bf16.vlgmr.msrb.gmra.mxu0 %vm350_vm1, %v7211_v59  ;;  %v7267_v43 = vunpack.c.l.b16 %v6986_v11  ;;  %v7208_v11 = vunpack.c.l.b16 %v6983_v50 }
0x17b0   : > { %v6904_v22 = vpop.f32.mrf.mxu0 }
0x17b1   : > { %v6987_v18 = vpack.c.bf16 %v6904_v22, %v6904_v22  ;;  %v6982_v22 = vpack.c.bf16 %v6892_v1, %v6892_v1 }
0x17b3   : > { %v7268_v40 = vunpack.c.l.b16 %v6987_v18  ;;  %v7207_v17 = vunpack.c.l.b16 %v6982_v22 }
0x17b5   : > { %v7275_v10 = vpack.c.b16 %v7268_v40, %v7267_v43  ;;  %v6994_v40 = vld [vmem:[%s19796_s2 + $0x8f0] sm:$0xf]  ;;  %v7213_v57 = vpack.c.b16 %v7208_v11, %v7207_v17 }
0x17b6   : > { %v7356_v3 = vsel %vm375_vm0, %v6994_v40, 0 }
0x17b7   : > { %13861 = vmatmul.msk.bf16.vlgmr.msra.gmra.mxu3 %vm350_vm1, %v7275_v10  ;;  %7365 = vmatpush.bf16.msra.mxu0 %v7356_v3  ;;  %v17168_v10 = vpop.f32.mrf.mxu3 }
0x17b8   : > { %v6907_v9 = vpop.f32.mrf.mxu0 }
0x17b9   : > { %v6988_v59 = vpack.c.bf16 %v6907_v9, %v6907_v9  ;;  %v6985_v9 = vpack.c.bf16 %v6899_v12, %v6899_v12 }
0x17bb   : > { %13858 = vmatmul.msk.bf16.gmra.mxu0 %vm350_vm1, %v7212_v39  ;;  %v7269_v44 = vunpack.c.l.b16 %v6988_v59  ;;  %v7420_v59 = vsel %vm375_vm0, %v6996_v24, 0  ;;  %v7210_v22 = vunpack.c.l.b16 %v6985_v9 }
0x17bc   : > { %7429 = vmatpush.bf16.msrb.mxu3 %v7420_v59 }
0x17bf   : > { %v17175_v17 = vpop.f32.mrf.mxu3 }
0x17c0   : > { %v6909_v54 = vpop.f32.mrf.mxu0 }
0x17c1   : > { %v6989_v26 = vpack.c.bf16 %v6909_v54, %v6909_v54  ;;  %v6984_v54 = vpack.c.bf16 %v6897_v30, %v6897_v30 }
0x17c3   : > { %v7270_v53 = vunpack.c.l.b16 %v6989_v26  ;;  %v7209_v11 = vunpack.c.l.b16 %v6984_v54 }
0x17c5   : > { %v7276_v18 = vpack.c.b16 %v7270_v53, %v7269_v44  ;;  %v7214_v40 = vpack.c.b16 %v7210_v22, %v7209_v11  ;;  %v15168_v22 = vld [vmem:[%s19796_s2 + $0x938] sm:$0xff] }
0x17c7   : > { %13862 = vmatmul.msk.bf16.gmra.mxu3 %vm350_vm1, %v7276_v18  ;;  %v17178_v24 = vpop.f32.mrf.mxu3 }
0x17c8   : > { %v6912_v43 = vpop.f32.mrf.mxu0 }
0x17c9   : > { %v6990_v1 = vpack.c.bf16 %v6912_v43, %v6912_v43 }
0x17cb   : > { %13859 = vmatmul.msk.bf16.gmra.mxu0 %vm350_vm1, %v7213_v57  ;;  %v7271_v50 = vunpack.c.l.b16 %v6990_v1 }
0x17cf   : > { %v17185_v9 = vpop.f32.mrf.mxu3 }
0x17d0   : > { %v6914_v44 = vpop.f32.mrf.mxu0 }
0x17d1   : > { %v6991_v39 = vpack.c.bf16 %v6914_v44, %v6914_v44 }
0x17d3   : > { %v7272_v26 = vunpack.c.l.b16 %v6991_v39 }
0x17d5   : > { %v7277_v53 = vpack.c.b16 %v7272_v26, %v7271_v50  ;;  %v19949_v26 = vpack.c.b16 %v17033_v48, %v17031_v51  ;;  %v19951_v51 = vpack.c.b16 %v17046_v14, %v17044_v5 }
0x17d7   : > { %13863 = vmatmul.msk.bf16.gmra.mxu3 %vm350_vm1, %v7277_v53  ;;  %v17189_v59 = vpop.f32.mrf.mxu3 }
0x17d8   : > { %v6917_v18 = vpop.f32.mrf.mxu0 }
0x17d9   : > { %v6992_v3 = vpack.c.bf16 %v6917_v18, %v6917_v18  ;;  %v19952_v18 = vpack.c.b16 %v17111_v61, %v17109_v35 }
0x17db   : > { %13860 = vmatmul.msk.bf16.gmra.mxu0 %vm350_vm1, %v7214_v40  ;;  %v7273_v57 = vunpack.c.l.b16 %v6992_v3  ;;  %v19953_v40 = vpack.c.b16 %v17057_v34, %v17055_v13  ;;  %v19954_v3 = vpack.c.b16 %v17121_v28, %v17119_v55 }
0x17df   : > { %v17201_v4 = vpop.f32.mrf.mxu3 }
0x17e0   : > { %v6919_v12 = vpop.f32.mrf.mxu0 }
0x17e1   : > { %v6993_v43 = vpack.c.bf16 %v6919_v12, %v6919_v12  ;;  %v19955_v12 = vld [vmem:[#allocation5_spill] sm:$0xff] }
0x17e3   : > { %v7274_v44 = vunpack.c.l.b16 %v6993_v43 }
0x17e5   : > { %v7278_v30 = vpack.c.b16 %v7274_v44, %v7273_v57 }
0x17e7   : > { %13864 = vmatmul.msk.bf16.gmra.mxu3 %vm350_vm1, %v7278_v30  ;;  %v17215_v49 = vpop.f32.mrf.mxu3 }
0x17e8   : > { %v7111_v1 = vpop.f32.mrf.mxu0 }
0x17eb   : > { %13865 = vmatmul.msk.bf16.vlgmr.msra.gmra.mxu0 %vm350_vm1, %v7339_v56  ;;  %v6998_v56 = vld [vmem:[%s19796_s2 + $0x910] sm:$0xf] }
0x17ec   : > { %v7484_v52 = vsel %vm375_vm0, %v6998_v56, 0  ;;  %v19956_v56 = vld [vmem:[#allocation6_spill] sm:$0xff] }
0x17ed   : > { %7493 = vmatpush.bf16.msrb.mxu0 %v7484_v52 }
0x17ef   : > { %v17227_v60 = vpop.f32.mrf.mxu3 }
0x17f0   : > { %v17187_v39 = vpop.f32.mrf.mxu0 }
0x17f1   : > { %7626 = vmatpush.bf16.msra.mxu0 %v15168_v22 }
0x17f7   : > { %13869 = vmatmul.msk.bf16.vlgmr.msrb.gmra.mxu3 %vm350_vm1, %v7403_v6  ;;  %v17239_v63 = vpop.f32.mrf.mxu3 }
0x17f8   : > { %v17195_v54 = vpop.f32.mrf.mxu0 }
0x17fb   : > { %13866 = vmatmul.msk.bf16.gmra.mxu0 %vm350_vm1, %v7340_v8  ;;  %v7000_v8 = vld [vmem:[%s19796_s2 + $0x920] sm:$0xf] }
0x17fc   : > { %v7548_v6 = vsel %vm375_vm0, %v7000_v8, 0 }
0x17fd   : > { %7557 = vmatpush.bf16.msra.mxu3 %v7548_v6 }
0x17ff   : > { %v17247_v50 = vpop.f32.mrf.mxu3 }
0x1800   : > { %v17203_v32 = vpop.f32.mrf.mxu0 }
0x1807   : > { %13870 = vmatmul.msk.bf16.gmra.mxu3 %vm350_vm1, %v7404_v46  ;;  %v19946_v46 = vpack.c.b16 %v16973_v42, %v16971_v38  ;;  %v17257_v25 = vpop.f32.mrf.mxu3 }
0x1808   : > { %v17213_v27 = vpop.f32.mrf.mxu0 }
0x180b   : > { %13867 = vmatmul.msk.bf16.gmra.mxu0 %vm350_vm1, %v7341_v37 }
0x1810   : > { %v17221_v33 = vpop.f32.mrf.mxu0 }
0x1817   : > { %13871 = vmatmul.msk.bf16.gmra.mxu3 %vm350_vm1, %v7405_v2  ;;  %v19948_v2 = vpack.c.b16 %v17087_v58, %v17085_v0  ;;  %v19950_v0 = vpack.c.b16 %v17097_v20, %v17095_v7 }
0x1818   : > { %v17233_v31 = vpop.f32.mrf.mxu0 }
0x181b   : > { %13868 = vmatmul.msk.bf16.gmra.mxu0 %vm350_vm1, %v19945_v19 }
0x1820   : > { %v17241_v37 = vpop.f32.mrf.mxu0 }
0x1827   : > { %13872 = vmatmul.msk.bf16.gmra.mxu3 %vm350_vm1, %v19946_v46 }
0x1828   : > { %v17249_v21 = vpop.f32.mrf.mxu0 }
0x182b   : > { %13873 = vmatmul.msk.bf16.vlgmr.msrb.gmra.mxu0 %vm350_vm1, %v19947_v29  ;;  %v19957_v29 = vld [vmem:[#allocation7_spill] sm:$0xff] }
0x1830   : > { %v17255_v23 = vpop.f32.mrf.mxu0 }
0x1837   : > { %13877 = vmatmul.msk.bf16.vlgmr.msra.gmra.mxu3 %vm350_vm1, %v19948_v2 }
0x1838   : > { %v17263_v38 = vpop.f32.mrf.mxu0 }
0x183a   : > { %v17265_v42 = vpop.f32.mrf.mxu3 }
0x183b   : > { %13874 = vmatmul.msk.bf16.gmra.mxu0 %vm350_vm1, %v19949_v26 }
0x1840   : > { %v17271_v45 = vpop.f32.mrf.mxu0 }
0x1842   : > { %v17273_v36 = vpop.f32.mrf.mxu3 }
0x1847   : > { %13878 = vmatmul.msk.bf16.gmra.mxu3 %vm350_vm1, %v19950_v0 }
0x1848   : > { %v17282_v58 = vpop.f32.mrf.mxu0 }
0x184a   : > { %v17284_v53 = vpop.f32.mrf.mxu3 }
0x184b   : > { %13875 = vmatmul.msk.bf16.gmra.mxu0 %vm350_vm1, %v19951_v51 }
0x1850   : > { %v17290_v48 = vpop.f32.mrf.mxu0 }
0x1852   : > { %v17292_v11 = vpop.f32.mrf.mxu3 }
0x1857   : > { %13879 = vmatmul.msk.bf16.gmra.mxu3 %vm350_vm1, %v19952_v18  ;;  %v19958_v18 = vld [vmem:[#allocation8_spill] sm:$0xff] }
0x1858   : > { %v17298_v7 = vpop.f32.mrf.mxu0 }
0x185a   : > { %v17300_v20 = vpop.f32.mrf.mxu3 }
0x185b   : > { %13876 = vmatmul.msk.bf16.gmra.mxu0 %vm350_vm1, %v19953_v40 }
0x1860   : > { %v17306_v5 = vpop.f32.mrf.mxu0 }
0x1862   : > { %v17308_v14 = vpop.f32.mrf.mxu3 }
0x1867   : > { %13880 = vmatmul.msk.bf16.gmra.mxu3 %vm350_vm1, %v19954_v3 }
0x1868   : > { %v7367_v35 = vpop.f32.mrf.mxu0 }
0x1869   : > { %v7368_v44 = vadd.f32 %v7367_v35, %v17149_v41 }
0x186a   : > { %v17314_v61 = vpop.f32.mrf.mxu3 }
0x186b   : > { %13885 = vmatmul.msk.bf16.vlgmr.msra.gmra.mxu0 %vm829_vm7, %v19955_v12 }
0x1870   : > { %v17318_v43 = vpop.f32.mrf.mxu0 }
0x1872   : > { %v17320_v13 = vpop.f32.mrf.mxu3 }
0x1878   : > { %v7372_v34 = vpop.f32.mrf.mxu0 }
0x1879   : > { %v7373_v19 = vadd.f32 %v7372_v34, %v17154_v47 }
0x187a   : > { %v7431_v57 = vpop.f32.mrf.mxu3 }
0x187b   : > { %v7432_v30 = vadd.f32 %v7431_v57, %v7111_v1  ;;  %13886 = vmatmul.msk.bf16.gmra.mxu0 %vm829_vm7, %v19956_v56 }
0x187d   : > { %v7579_v55 = vadd.f32 %v7432_v30, %v7368_v44 }
0x1880   : > { %v17325_v28 = vpop.f32.mrf.mxu0 }
0x1882   : > { %v17327_v52 = vpop.f32.mrf.mxu3 }
0x1888   : > { %v7377_v8 = vpop.f32.mrf.mxu0 }
0x1889   : > { %v7378_v0 = vadd.f32 %v7377_v8, %v17160_v62 }
0x188a   : > { %v7436_v6 = vpop.f32.mrf.mxu3 }
0x188b   : > { %v7437_v46 = vadd.f32 %v7436_v6, %v17195_v54  ;;  %13887 = vmatmul.msk.bf16.gmra.mxu0 %vm829_vm7, %v19957_v29 }
0x188d   : > { %v7581_v2 = vadd.f32 %v7437_v46, %v7373_v19 }
0x1890   : > { %v7379_v41 = vpop.f32.mrf.mxu0 }
0x1892   : > { %v7438_v1 = vpop.f32.mrf.mxu3 }
0x1898   : > { %v7382_v26 = vpop.f32.mrf.mxu0 }
0x1899   : > { %v7383_v12 = vadd.f32 %v7382_v26, %v17175_v17 }
0x189a   : > { %v7441_v22 = vpop.f32.mrf.mxu3 }
0x189b   : > { %v7442_v51 = vadd.f32 %v7441_v22, %v17213_v27  ;;  %13888 = vmatmul.msk.bf16.gmra.mxu0 %vm829_vm7, %v19958_v18 }
0x189d   : > { %v7583_v40 = vadd.f32 %v7442_v51, %v7378_v0 }
0x18a0   : > { %v17337_v3 = vpop.f32.mrf.mxu0 }
0x18a2   : > { %v7443_v47 = vpop.f32.mrf.mxu3 }
0x18a8   : > { %v7495_v54 = vpop.f32.mrf.mxu0 }
0x18a9   : > { %v7496_v27 = vadd.f32 %v7495_v54, %v17185_v9 }
0x18aa   : > { %v7446_v35 = vpop.f32.mrf.mxu3 }
0x18ab   : > { %v7447_v34 = vadd.f32 %v7446_v35, %v17233_v31 }
0x18ad   : > { %v7585_v57 = vadd.f32 %v7447_v34, %v7383_v12 }
0x18b0   : > { %v7497_v44 = vpop.f32.mrf.mxu0 }
0x18b2   : > { %v7448_v30 = vpop.f32.mrf.mxu3 }
0x18b8   : > { %v7500_v56 = vpop.f32.mrf.mxu0 }
0x18b9   : > { %v7501_v51 = vadd.f32 %v7500_v56, %v17201_v4  ;;  %v17353_v4 = vld [vmem:[%s19798_s4 + $0x130] ss:$0 sm:$0xff] }
0x18ba   : > { %v7559_v62 = vpop.f32.mrf.mxu3 }
0x18bb   : > { %v7560_v8 = vadd.f32 %v7559_v62, %v17249_v21 }
0x18bd   : > { %v7587_v6 = vadd.f32 %v7560_v8, %v7496_v27 }
0x18bf   : > { %v7595_v19 = vadd.f32 %v7587_v6, %v7579_v55 }
0x18c0   : > { %v7502_v46 = vpop.f32.mrf.mxu0 }
0x18c1   : > { %v7603_v27 = vadd.f32 %v7595_v19, %v17265_v42 }
0x18c2   : > { %v7561_v29 = vpop.f32.mrf.mxu3 }
0x18c8   : > { %v7505_v22 = vpop.f32.mrf.mxu0 }
0x18c9   : > { %v7506_v9 = vadd.f32 %v7505_v22, %v17227_v60 }
0x18ca   : > { %v7564_v0 = vpop.f32.mrf.mxu3 }
0x18cb   : > { %v7565_v17 = vadd.f32 %v7564_v0, %v17263_v38  ;;  %v7649_v38 = vadd.f32 %v17353_v4, %v7603_v27 }
0x18cd   : > { %v7589_v31 = vadd.f32 %v7565_v17, %v7501_v51  ;;  %v7444_v51 = vadd.f32 %v7443_v47, %v17221_v33 }
0x18cf   : > { %v17345_v26 = vadd.f32 %v7589_v31, %v7581_v2 }
0x18d0   : > { %v7507_v18 = vpop.f32.mrf.mxu0 }
0x18d1   : > { %v7508_v31 = vadd.f32 %v7507_v18, %v17239_v63  ;;  %v7375_v63 = vadd.f32 %v17325_v28, %v17158_v15  ;;  %v7370_v15 = vadd.f32 %v17318_v43, %v17151_v16  ;;  %v7605_v16 = vadd.f32 %v17345_v26, %v17284_v53 }
0x18d2   : > { %v7566_v35 = vpop.f32.mrf.mxu3 }
0x18d8   : > { %v7510_v12 = vpop.f32.mrf.mxu0 }
0x18d9   : > { %v7511_v42 = vadd.f32 %v7510_v12, %v17247_v50  ;;  %v7449_v50 = vadd.f32 %v7448_v30, %v17241_v37  ;;  %v7498_v37 = vadd.f32 %v7497_v44, %v17189_v59 }
0x18da   : > { %v7569_v34 = vpop.f32.mrf.mxu3 }
0x18db   : > { %v7570_v21 = vadd.f32 %v7569_v34, %v17282_v58 }
0x18dd   : > { %v7591_v55 = vadd.f32 %v7570_v21, %v7506_v9  ;;  %v7380_v9 = vadd.f32 %v7379_v41, %v17168_v10  ;;  %v7567_v21 = vadd.f32 %v7566_v35, %v17271_v45  ;;  %v7562_v10 = vadd.f32 %v7561_v29, %v17255_v23 }
0x18de   : > { %v7385_v45 = vadd.f32 %v17337_v3, %v17178_v24 }
0x18df   : > { %v7599_v54 = vadd.f32 %v7591_v55, %v7583_v40  ;;  %v7588_v28 = vadd.f32 %v7562_v10, %v7498_v37  ;;  %v15252_v37 = vld [vmem:[%s19796_s2 + $0xbd8] sm:$0xff] }
0x18e0   : > { %v7512_v62 = vpop.f32.mrf.mxu0  ;;  %v7586_v30 = vadd.f32 %v7449_v50, %v7385_v45 }
0x18e1   : > { %v7513_v33 = vadd.f32 %v7512_v62, %v17257_v25  ;;  %v7607_v29 = vadd.f32 %v7599_v54, %v17300_v20  ;;  %v7665_v20 = vld [vmem:[%s19798_s4 + $0x140] ss:$0 sm:$0xff] }
0x18e2   : > { %v7571_v60 = vpop.f32.mrf.mxu3 }
0x18e3   : > { %v7572_v19 = vadd.f32 %v7571_v60, %v17290_v48  ;;  %v7503_v48 = vadd.f32 %v7502_v46, %v17215_v49  ;;  %v7653_v43 = vadd.f32 %v17353_v4, %v7607_v29  ;;  %v15176_v29 = vld [vmem:[%s19796_s2 + $0x978] sm:$0xff] }
0x18e5   : > { %v7592_v55 = vadd.f32 %v7572_v19, %v7508_v31 }
0x18e8   : > { %v7628_v2 = vpop.f32.mrf.mxu0 }
0x18e9   : > { %v17356_v56 = vadd.f32 %v7649_v38, %v7628_v2  ;;  %v7439_v38 = vadd.f32 %v7438_v1, %v17203_v32  ;;  %v7434_v1 = vadd.f32 %v17327_v52, %v17187_v39 }
0x18ea   : > { %v7574_v22 = vpop.f32.mrf.mxu3 }
0x18eb   : > { %v7575_v0 = vadd.f32 %v7574_v22, %v17298_v7  ;;  %v7584_v7 = vadd.f32 %v7444_v51, %v7380_v9  ;;  %v7582_v49 = vadd.f32 %v7439_v38, %v7375_v63  ;;  %v7580_v3 = vadd.f32 %v7434_v1, %v7370_v15  ;;  %v15170_v1 = vld [vmem:[%s19796_s2 + $0x948] sm:$0xff] }
0x18ec   : > { %v15254_v15 = vld [vmem:[%s19796_s2 + $0xbe8] sm:$0xff] }
0x18ed   : > { %v7593_v34 = vadd.f32 %v7575_v0, %v7511_v42  ;;  %v7600_v41 = vadd.f32 %v7592_v55, %v7584_v7  ;;  %v7596_v52 = vadd.f32 %v7588_v28, %v7580_v3  ;;  %v15173_v28 = vld [vmem:[%s19796_s2 + $0x960] sm:$0xff]  ;;  %v15175_v3 = vld [vmem:[%s19796_s2 + $0x970] sm:$0xff] }
0x18ef   : > { %v7601_v47 = vadd.f32 %v7593_v34, %v7585_v57  ;;  %v7608_v24 = vadd.f32 %v7600_v41, %v17308_v14  ;;  %v7604_v35 = vadd.f32 %v7596_v52, %v17273_v36  ;;  %v15169_v41 = vld [vmem:[%s19796_s2 + $0x940] sm:$0xff] }
0x18f0   : > { %v17358_v8 = vpop.f32.mrf.mxu0  ;;  %v15177_v52 = vld [vmem:[%s19796_s2 + $0x980] sm:$0xff] }
0x18f1   : > { %v7609_v25 = vadd.f32 %v7601_v47, %v17314_v61  ;;  %v7654_v44 = vadd.f32 %v17353_v4, %v7608_v24  ;;  %v7650_v0 = vadd.f32 %v17353_v4, %v7604_v35  ;;  %v15256_v24 = vld [vmem:[%s19796_s2 + $0xbf8] sm:$0xff] }
0x18f2   : > { %v7576_v17 = vpop.f32.mrf.mxu3 }
0x18f3   : > { %v7577_v27 = vadd.f32 %v7576_v17, %v17306_v5  ;;  %v7590_v5 = vadd.f32 %v7567_v21, %v7503_v48  ;;  %v7655_v39 = vadd.f32 %v17353_v4, %v7609_v25  ;;  %v7658_v36 = vadd.f32 %v7650_v0, %v17358_v8  ;;  %v15172_v25 = vld [vmem:[%s19796_s2 + $0x958] sm:$0xff] }
0x18f4   : > { %v7666_v8 = vadd.f32 %v7665_v20, %v17356_v56 }
0x18f5   : > { %v7594_v32 = vadd.f32 %v7577_v27, %v7513_v33  ;;  %v7598_v23 = vadd.f32 %v7590_v5, %v7582_v49  ;;  %v7667_v38 = vadd.f32 %v7665_v20, %v7658_v36  ;;  %v15171_v49 = vld [vmem:[%s19796_s2 + $0x950] sm:$0xff]  ;;  %v15261_v36 = vld [vmem:[%s19796_s2 + $0xc20] sm:$0xff] }
0x18f6   : > { %v7682_v47 = vmul.f32 0.2, %v7666_v8  ;;  %vm7674_vm12 = vcmp.ge.f32.partialorder %v7666_v8, 0.0 }
0x18f7   : > { %v7602_v57 = vadd.f32 %v7594_v32, %v7586_v30  ;;  %v7606_v59 = vadd.f32 %v7598_v23, %v17292_v11  ;;  %v7683_v48 = vmul.f32 0.2, %v7667_v38  ;;  %vm7675_vm10 = vcmp.ge.f32.partialorder %v7667_v38, 0.0  ;;  %v15251_v32 = vld [vmem:[%s19796_s2 + $0xbd0] sm:$0xff]  ;;  %v15253_v30 = vld [vmem:[%s19796_s2 + $0xbe0] sm:$0xff] }
0x18f8   : > { %v7633_v6 = vpop.f32.mrf.mxu0  ;;  %v7690_v56 = vsel %vm7674_vm12, %v7666_v8, %v7682_v47  ;;  %v15255_v23 = vld [vmem:[%s19796_s2 + $0xbf0] sm:$0xff] }
0x18f9   : > { %v7610_v18 = vadd.f32 %v7602_v57, %v17320_v13  ;;  %v7652_v12 = vadd.f32 %v17353_v4, %v7606_v59  ;;  %v7651_v13 = vadd.f32 %v17353_v4, %v7605_v16  ;;  %v7691_v45 = vsel %vm7675_vm10, %v7667_v38, %v7683_v48  ;;  %v15174_v57 = vld [vmem:[%s19796_s2 + $0x968] sm:$0xff]  ;;  %v15180_v38 = vld [vmem:[%s19796_s2 + $0x998] sm:$0xff] }
0x18fa   : > { %v7986_v5 = vpack.c.bf16 %v7691_v45, %v7690_v56  ;;  %v15263_v56 = vld [vmem:[%s19796_s2 + $0xc30] sm:$0xff] }
0x18fb   : > { %v7656_v62 = vadd.f32 %v17353_v4, %v7610_v18  ;;  %v7659_v42 = vadd.f32 %v7651_v13, %v7633_v6 }
0x18fd   : > { %v7668_v9 = vadd.f32 %v7665_v20, %v7659_v42 }
0x18ff   : > { %v7684_v7 = vmul.f32 0.2, %v7668_v9  ;;  %vm7676_vm8 = vcmp.ge.f32.partialorder %v7668_v9, 0.0 }
0x1900   : > { %v7635_v58 = vpop.f32.mrf.mxu0 }
0x1901   : > { %v7660_v22 = vadd.f32 %v7652_v12, %v7635_v58  ;;  %v7692_v63 = vsel %vm7676_vm8, %v7668_v9, %v7684_v7 }
0x1903   : > { %v7669_v31 = vadd.f32 %v7665_v20, %v7660_v22 }
0x1905   : > { %v7685_v4 = vmul.f32 0.2, %v7669_v31  ;;  %vm7677_vm6 = vcmp.ge.f32.partialorder %v7669_v31, 0.0 }
0x1907   : > { %v7693_v33 = vsel %vm7677_vm6, %v7669_v31, %v7685_v4 }
0x1908   : > { %v7638_v40 = vpop.f32.mrf.mxu0  ;;  %v7987_v10 = vpack.c.bf16 %v7693_v33, %v7692_v63 }
0x1909   : > { %v7661_v11 = vadd.f32 %v7653_v43, %v7638_v40 }
0x190b   : > { %v7670_v19 = vadd.f32 %v7665_v20, %v7661_v11  ;;  %v15178_v11 = vld [vmem:[%s19796_s2 + $0x988] sm:$0xff] }
0x190d   : > { %v7686_v21 = vmul.f32 0.2, %v7670_v19  ;;  %vm7678_vm9 = vcmp.ge.f32.partialorder %v7670_v19, 0.0 }
0x1910   : > { %v7640_v2 = vpop.f32.mrf.mxu0 }
0x1911   : > { %v7662_v14 = vadd.f32 %v7654_v44, %v7640_v2  ;;  %v7694_v2 = vsel %vm7678_vm9, %v7670_v19, %v7686_v21  ;;  %v15259_v44 = vld [vmem:[%s19796_s2 + $0xc10] sm:$0xff] }
0x1913   : > { %v7671_v53 = vadd.f32 %v7665_v20, %v7662_v14 }
0x1915   : > { %v7687_v40 = vmul.f32 0.2, %v7671_v53  ;;  %vm7679_vm3 = vcmp.ge.f32.partialorder %v7671_v53, 0.0 }
0x1917   : > { %v7695_v6 = vsel %vm7679_vm3, %v7671_v53, %v7687_v40 }
0x1918   : > { %v7643_v46 = vpop.f32.mrf.mxu0  ;;  %v7988_v50 = vpack.c.bf16 %v7695_v6, %v7694_v2  ;;  %v15262_v6 = vld [vmem:[%s19796_s2 + $0xc28] sm:$0xff] }
0x1919   : > { %v7663_v61 = vadd.f32 %v7655_v39, %v7643_v46  ;;  %v15257_v46 = vld [vmem:[%s19796_s2 + $0xc00] sm:$0xff]  ;;  %v15258_v39 = vld [vmem:[%s19796_s2 + $0xc08] sm:$0xff] }
0x191b   : > { %v7672_v54 = vadd.f32 %v7665_v20, %v7663_v61 }
0x191d   : > { %v7688_v51 = vmul.f32 0.2, %v7672_v54  ;;  %vm7680_vm0 = vcmp.ge.f32.partialorder %v7672_v54, 0.0 }
0x191f   : > { %v7696_v55 = vsel %vm7680_vm0, %v7672_v54, %v7688_v51  ;;  %v15179_v51 = vld [vmem:[%s19796_s2 + $0x990] sm:$0xff] }
0x1920   : > { %v7645_v60 = vpop.f32.mrf.mxu0 }
0x1921   : > { %v7664_v26 = vadd.f32 %v7656_v62, %v7645_v60  ;;  %v15260_v62 = vld [vmem:[%s19796_s2 + $0xc18] sm:$0xff] }
0x1923   : > { %v7673_v17 = vadd.f32 %v7665_v20, %v7664_v26 }
0x1925   : > { %vm7681_vm7 = vcmp.ge.f32.partialorder %v7673_v17, 0.0  ;;  %v7689_v34 = vmul.f32 0.2, %v7673_v17 }
0x1927   : > { %v7697_v58 = vsel %vm7681_vm7, %v7673_v17, %v7689_v34 }
0x1928   : > { %v7989_v27 = vpack.c.bf16 %v7697_v58, %v7696_v55 }
0x192a   : > { %9146 = vmatpush.bf16.msrb.mxu1 %v7989_v27  ;;  %15345 = vmatpush.bf16.msra.mxu2 %v7989_v27 }
0x192b   : > { %15346 = vmatpush.bf16.msrb.mxu3 %v7989_v27 }
0x192e   : > { %9147 = vmatpush.bf16.msrb.mxu1 %v7988_v50  ;;  %15347 = vmatpush.bf16.msra.mxu2 %v7988_v50 }
0x192f   : > { %15348 = vmatpush.bf16.msrb.mxu3 %v7988_v50 }
0x1932   : > { %9148 = vmatpush.bf16.msrb.mxu1 %v7987_v10  ;;  %15349 = vmatpush.bf16.msra.mxu2 %v7987_v10 }
0x1933   : > { %15350 = vmatpush.bf16.msrb.mxu3 %v7987_v10  ;;  %v15181_v10 = vld [vmem:[%s19796_s2 + $0x9a0] sm:$0xff] }
0x1936   : > { %9149 = vmatpush.bf16.msrb.mxu1 %v7986_v5  ;;  %15351 = vmatpush.bf16.msra.mxu2 %v7986_v5 }
0x1937   : > { %15352 = vmatpush.bf16.msrb.mxu3 %v7986_v5 }
0x1939   : > { %14465 = vmatmul.msk.bf16.vlgmr.msrb.gmra.mxu1 %vm1262_vm5, %v15169_v41 }
0x193a   : > { %14547 = vmatmul.msk.bf16.vlgmr.msrb.gmra.mxu3 %vm1262_vm5, %v15251_v32 }
0x1949   : > { %14466 = vmatmul.msk.bf16.gmra.mxu1 %vm1262_vm5, %v15170_v1 }
0x194a   : > { %14548 = vmatmul.msk.bf16.gmra.mxu3 %vm1262_vm5, %v15252_v37 }
0x1959   : > { %14467 = vmatmul.msk.bf16.gmra.mxu1 %vm1262_vm5, %v15171_v49 }
0x195a   : > { %14549 = vmatmul.msk.bf16.gmra.mxu3 %vm1262_vm5, %v15253_v30 }
0x1969   : > { %14468 = vmatmul.msk.bf16.gmra.mxu1 %vm1262_vm5, %v15172_v25 }
0x196a   : > { %14550 = vmatmul.msk.bf16.gmra.mxu3 %vm1262_vm5, %v15254_v15  ;;  %v15182_v15 = vld [vmem:[%s19796_s2 + $0x9a8] sm:$0xff] }
0x1979   : > { %14469 = vmatmul.msk.bf16.gmra.mxu1 %vm1262_vm5, %v15173_v28 }
0x197a   : > { %14551 = vmatmul.msk.bf16.gmra.mxu3 %vm1262_vm5, %v15255_v23  ;;  %v15264_v23 = vld [vmem:[%s19796_s2 + $0xc38] sm:$0xff] }
0x1989   : > { %14470 = vmatmul.msk.bf16.gmra.mxu1 %vm1262_vm5, %v15174_v57 }
0x198a   : > { %14552 = vmatmul.msk.bf16.gmra.mxu3 %vm1262_vm5, %v15256_v24 }
0x1999   : > { %14471 = vmatmul.msk.bf16.gmra.mxu1 %vm1262_vm5, %v15175_v3 }
0x199a   : > { %14553 = vmatmul.msk.bf16.gmra.mxu3 %vm1262_vm5, %v15257_v46 }
0x19a9   : > { %14472 = vmatmul.msk.bf16.gmra.mxu1 %vm1262_vm5, %v15176_v29 }
0x19aa   : > { %14554 = vmatmul.msk.bf16.gmra.mxu3 %vm1262_vm5, %v15258_v39 }
0x19b6   : > { %v9151_v59 = vpop.f32.mrf.mxu1 }
0x19b7   : > { %v9871_v61 = vpack.c.bf16 %v9151_v59, %v9151_v59 }
0x19b9   : > { %14473 = vmatmul.msk.bf16.gmra.mxu1 %vm1262_vm5, %v15177_v52  ;;  %v17476_v14 = vunpack.c.l.b16 %v9871_v61  ;;  %v15183_v61 = vld [vmem:[%s19796_s2 + $0x9b0] sm:$0xff] }
0x19ba   : > { %14555 = vmatmul.msk.bf16.gmra.mxu3 %vm1262_vm5, %v15259_v44 }
0x19bb   : > { %19959 = vst [vmem:[#allocation9_spill] sm:$0xff] %v17476_v14 }
0x19bd   : > { %v17474_v18 = vpop.f32.mrf.mxu3 }
0x19be   : > { %v9153_v16 = vpop.f32.mrf.mxu1 }
0x19bf   : > { %v9872_v43 = vpack.c.bf16 %v9153_v16, %v9153_v16 }
0x19c1   : > { %v17478_v20 = vunpack.c.l.b16 %v9872_v43 }
0x19c3   : > { %19960 = vst [vmem:[#allocation5_spill] sm:$0xff] %v17478_v20 }
0x19c5   : > { %v17482_v12 = vpop.f32.mrf.mxu3 }
0x19c6   : > { %v9156_v54 = vpop.f32.mrf.mxu1 }
0x19c7   : > { %v9873_v60 = vpack.c.bf16 %v9156_v54, %v9156_v54  ;;  %v15265_v54 = vld [vmem:[%s19796_s2 + $0xc40] sm:$0xff] }
0x19c9   : > { %14474 = vmatmul.msk.bf16.gmra.mxu1 %vm1262_vm5, %v15178_v11  ;;  %v17494_v26 = vunpack.c.l.b16 %v9873_v60 }
0x19ca   : > { %14556 = vmatmul.msk.bf16.gmra.mxu3 %vm1262_vm5, %v15260_v62 }
0x19cb   : > { %19961 = vst [vmem:[#allocation6_spill] sm:$0xff] %v17494_v26 }
0x19cd   : > { %v17492_v13 = vpop.f32.mrf.mxu3 }
0x19ce   : > { %v9158_v22 = vpop.f32.mrf.mxu1 }
0x19cf   : > { %v9874_v53 = vpack.c.bf16 %v9158_v22, %v9158_v22 }
0x19d1   : > { %v17496_v0 = vunpack.c.l.b16 %v9874_v53 }
0x19d3   : > { %19962 = vst [vmem:[#allocation7_spill] sm:$0xff] %v17496_v0 }
0x19d5   : > { %v17500_v19 = vpop.f32.mrf.mxu3 }
0x19d6   : > { %v9161_v17 = vpop.f32.mrf.mxu1 }
0x19d7   : > { %v9875_v31 = vpack.c.bf16 %v9161_v17, %v9161_v17 }
0x19d9   : > { %14475 = vmatmul.msk.bf16.gmra.mxu1 %vm1262_vm5, %v15179_v51  ;;  %v17512_v21 = vunpack.c.l.b16 %v9875_v31 }
0x19da   : > { %14557 = vmatmul.msk.bf16.gmra.mxu3 %vm1262_vm5, %v15261_v36 }
0x19db   : > { %19963 = vst [vmem:[#allocation8_spill] sm:$0xff] %v17512_v21 }
0x19dd   : > { %v17510_v40 = vpop.f32.mrf.mxu3 }
0x19de   : > { %v9163_v34 = vpop.f32.mrf.mxu1 }
0x19df   : > { %v9876_v9 = vpack.c.bf16 %v9163_v34, %v9163_v34 }
0x19e1   : > { %v17514_v55 = vunpack.c.l.b16 %v9876_v9 }
0x19e3   : > { %19964 = vst [vmem:[#allocation10_spill] sm:$0xff] %v17514_v55 }
0x19e5   : > { %v17518_v27 = vpop.f32.mrf.mxu3 }
0x19e6   : > { %v9166_v4 = vpop.f32.mrf.mxu1 }
0x19e7   : > { %v9877_v8 = vpack.c.bf16 %v9166_v4, %v9166_v4 }
0x19e9   : > { %14476 = vmatmul.msk.bf16.gmra.mxu1 %vm1262_vm5, %v15180_v38  ;;  %v17530_v48 = vunpack.c.l.b16 %v9877_v8  ;;  %v15184_v38 = vld [vmem:[%s19796_s2 + $0x9b8] sm:$0xff] }
0x19ea   : > { %14558 = vmatmul.msk.bf16.gmra.mxu3 %vm1262_vm5, %v15262_v6  ;;  %v15266_v6 = vld [vmem:[%s19796_s2 + $0xc48] sm:$0xff] }
0x19eb   : > { %19965 = vst [vmem:[#allocation11_spill] sm:$0xff] %v17530_v48 }
0x19ed   : > { %v17528_v7 = vpop.f32.mrf.mxu3 }
0x19ee   : > { %v9168_v2 = vpop.f32.mrf.mxu1 }
0x19ef   : > { %v9878_v50 = vpack.c.bf16 %v9168_v2, %v9168_v2 }
0x19f1   : > { %v17532_v33 = vunpack.c.l.b16 %v9878_v50 }
0x19f3   : > { %19966 = vst [vmem:[#allocation12_spill] sm:$0xff] %v17532_v33 }
0x19f5   : > { %v17536_v63 = vpop.f32.mrf.mxu3 }
0x19f6   : > { %v9171_v45 = vpop.f32.mrf.mxu1 }
0x19f7   : > { %v9879_v5 = vpack.c.bf16 %v9171_v45, %v9171_v45 }
0x19f9   : > { %14477 = vmatmul.msk.bf16.gmra.mxu1 %vm1262_vm5, %v15181_v10  ;;  %v17548_v37 = vunpack.c.l.b16 %v9879_v5 }
0x19fa   : > { %14559 = vmatmul.msk.bf16.gmra.mxu3 %vm1262_vm5, %v15263_v56 }
0x19fb   : > { %19967 = vst [vmem:[#allocation13_spill] sm:$0xff] %v17548_v37 }
0x19fd   : > { %v17546_v41 = vpop.f32.mrf.mxu3 }
0x19fe   : > { %v9173_v32 = vpop.f32.mrf.mxu1 }
0x19ff   : > { %v9880_v1 = vpack.c.bf16 %v9173_v32, %v9173_v32 }
0x1a01   : > { %v17550_v49 = vunpack.c.l.b16 %v9880_v1  ;;  %v15185_v1 = vld [vmem:[%s19796_s2 + $0x9c0] sm:$0xff] }
0x1a03   : > { %19968 = vst [vmem:[#allocation14_spill] sm:$0xff] %v17550_v49 }
0x1a05   : > { %v17554_v25 = vpop.f32.mrf.mxu3 }
0x1a06   : > { %v9176_v28 = vpop.f32.mrf.mxu1 }
0x1a07   : > { %v9881_v57 = vpack.c.bf16 %v9176_v28, %v9176_v28  ;;  %v15267_v28 = vld [vmem:[%s19796_s2 + $0xc50] sm:$0xff] }
0x1a09   : > { %14478 = vmatmul.msk.bf16.gmra.mxu1 %vm1262_vm5, %v15182_v15  ;;  %v17564_v29 = vunpack.c.l.b16 %v9881_v57 }
0x1a0a   : > { %14560 = vmatmul.msk.bf16.gmra.mxu3 %vm1262_vm5, %v15264_v23 }
0x1a0b   : > { %19969 = vst [vmem:[#allocation15_spill] sm:$0xff] %v17564_v29 }
0x1a0d   : > { %v9586_v24 = vpop.f32.mrf.mxu3 }
0x1a0e   : > { %v9178_v3 = vpop.f32.mrf.mxu1  ;;  %v10045_v52 = vpack.c.bf16 %v9586_v24, %v9586_v24 }
0x1a0f   : > { %v9882_v46 = vpack.c.bf16 %v9178_v3, %v9178_v3 }
0x1a10   : > { %v17573_v16 = vunpack.c.l.b16 %v10045_v52 }
0x1a11   : > { %v17566_v39 = vunpack.c.l.b16 %v9882_v46 }
0x1a13   : > { %19970 = vst [vmem:[#allocation16_spill] sm:$0xff] %v17566_v39 }
0x1a15   : > { %v9588_v44 = vpop.f32.mrf.mxu3 }
0x1a16   : > { %v10046_v43 = vpack.c.bf16 %v9588_v44, %v9588_v44  ;;  %v9181_v11 = vpop.f32.mrf.mxu1 }
0x1a17   : > { %v9883_v22 = vpack.c.bf16 %v9181_v11, %v9181_v11 }
0x1a18   : > { %v17578_v62 = vunpack.c.l.b16 %v10046_v43  ;;  %v15186_v43 = vld [vmem:[%s19796_s2 + $0x9c8] sm:$0xff] }
0x1a19   : > { %14479 = vmatmul.msk.bf16.gmra.mxu1 %vm1262_vm5, %v15183_v61  ;;  %v17586_v36 = vunpack.c.l.b16 %v9883_v22 }
0x1a1a   : > { %14561 = vmatmul.msk.bf16.gmra.mxu3 %vm1262_vm5, %v15265_v54  ;;  %v15268_v54 = vld [vmem:[%s19796_s2 + $0xc58] sm:$0xff] }
0x1a1b   : > { %19971 = vst [vmem:[#allocation17_spill] sm:$0xff] %v17586_v36 }
0x1a1d   : > { %v17584_v53 = vpop.f32.mrf.mxu3 }
0x1a1e   : > { %v9183_v51 = vpop.f32.mrf.mxu1 }
0x1a1f   : > { %v9884_v17 = vpack.c.bf16 %v9183_v51, %v9183_v51 }
0x1a21   : > { %v17588_v31 = vunpack.c.l.b16 %v9884_v17 }
0x1a23   : > { %19972 = vst [vmem:[#allocation18_spill] sm:$0xff] %v17588_v31 }
0x1a25   : > { %v17592_v9 = vpop.f32.mrf.mxu3 }
0x1a26   : > { %v9186_v4 = vpop.f32.mrf.mxu1 }
0x1a27   : > { %v9885_v8 = vpack.c.bf16 %v9186_v4, %v9186_v4 }
0x1a29   : > { %14480 = vmatmul.msk.bf16.gmra.mxu1 %vm1262_vm5, %v15184_v38  ;;  %v17604_v45 = vunpack.c.l.b16 %v9885_v8 }
0x1a2a   : > { %14562 = vmatmul.msk.bf16.gmra.mxu3 %vm1262_vm5, %v15266_v6 }
0x1a2b   : > { %19973 = vst [vmem:[#allocation19_spill] sm:$0xff] %v17604_v45 }
0x1a2d   : > { %v17602_v2 = vpop.f32.mrf.mxu3 }
0x1a2e   : > { %v9188_v50 = vpop.f32.mrf.mxu1 }
0x1a2f   : > { %v9886_v10 = vpack.c.bf16 %v9188_v50, %v9188_v50 }
0x1a31   : > { %v17606_v56 = vunpack.c.l.b16 %v9886_v10  ;;  %v15187_v10 = vld [vmem:[%s19796_s2 + $0x9d0] sm:$0xff] }
0x1a33   : > { %19974 = vst [vmem:[#allocation20_spill] sm:$0xff] %v17606_v56 }
0x1a35   : > { %v17610_v32 = vpop.f32.mrf.mxu3 }
0x1a36   : > { %v9191_v15 = vpop.f32.mrf.mxu1 }
0x1a37   : > { %v9887_v23 = vpack.c.bf16 %v9191_v15, %v9191_v15  ;;  %v15269_v15 = vld [vmem:[%s19796_s2 + $0xc60] sm:$0xff] }
0x1a39   : > { %14481 = vmatmul.msk.bf16.gmra.mxu1 %vm1262_vm5, %v15185_v1  ;;  %v17622_v46 = vunpack.c.l.b16 %v9887_v23 }
0x1a3a   : > { %14563 = vmatmul.msk.bf16.gmra.mxu3 %vm1262_vm5, %v15267_v28 }
0x1a3b   : > { %19975 = vst [vmem:[#allocation21_spill] sm:$0xff] %v17622_v46 }
0x1a3d   : > { %v17620_v57 = vpop.f32.mrf.mxu3 }
0x1a3e   : > { %v9193_v24 = vpop.f32.mrf.mxu1 }
0x1a3f   : > { %v9888_v3 = vpack.c.bf16 %v9193_v24, %v9193_v24 }
0x1a41   : > { %v17624_v52 = vunpack.c.l.b16 %v9888_v3 }
0x1a43   : > { %19976 = vst [vmem:[#allocation22_spill] sm:$0xff] %v17624_v52 }
0x1a45   : > { %v17628_v61 = vpop.f32.mrf.mxu3 }
0x1a46   : > { %v9196_v11 = vpop.f32.mrf.mxu1 }
0x1a47   : > { %v9889_v22 = vpack.c.bf16 %v9196_v11, %v9196_v11 }
0x1a49   : > { %14482 = vmatmul.msk.bf16.gmra.mxu1 %vm1262_vm5, %v15186_v43  ;;  %v17640_v4 = vunpack.c.l.b16 %v9889_v22 }
0x1a4a   : > { %14564 = vmatmul.msk.bf16.gmra.mxu3 %vm1262_vm5, %v15268_v54 }
0x1a4b   : > { %19977 = vst [vmem:[#allocation23_spill] sm:$0xff] %v17640_v4 }
0x1a4d   : > { %v17638_v51 = vpop.f32.mrf.mxu3 }
0x1a4e   : > { %v9198_v17 = vpop.f32.mrf.mxu1 }
0x1a4f   : > { %v9890_v38 = vpack.c.bf16 %v9198_v17, %v9198_v17  ;;  %v15188_v17 = vld [vmem:[%s19796_s2 + $0x9d8] sm:$0xff] }
0x1a51   : > { %v17642_v6 = vunpack.c.l.b16 %v9890_v38 }
0x1a53   : > { %19978 = vst [vmem:[#allocation24_spill] sm:$0xff] %v17642_v6 }
0x1a55   : > { %v17646_v50 = vpop.f32.mrf.mxu3 }
0x1a56   : > { %v9201_v1 = vpop.f32.mrf.mxu1 }
0x1a57   : > { %v9891_v28 = vpack.c.bf16 %v9201_v1, %v9201_v1  ;;  %v10035_v1 = vpack.c.bf16 %v17474_v18, %v17474_v18 }
0x1a59   : > { %14483 = vmatmul.msk.bf16.gmra.mxu1 %vm1262_vm5, %v15187_v10  ;;  %v17658_v43 = vunpack.c.l.b16 %v9891_v28  ;;  %v15270_v10 = vld [vmem:[%s19796_s2 + $0xc68] sm:$0xff]  ;;  %v17680_v42 = vunpack.c.l.b16 %v10035_v1 }
0x1a5a   : > { %14565 = vmatmul.msk.bf16.gmra.mxu3 %vm1262_vm5, %v15269_v15  ;;  %v10036_v15 = vpack.c.bf16 %v17482_v12, %v17482_v12  ;;  %v15189_v12 = vld [vmem:[%s19796_s2 + $0x9e0] sm:$0xff] }
0x1a5b   : > { %19979 = vst [vmem:[#allocation25_spill] sm:$0xff] %v17680_v42 }
0x1a5c   : > { %v17682_v58 = vunpack.c.l.b16 %v10036_v15  ;;  %v15271_v15 = vld [vmem:[%s19796_s2 + $0xc70] sm:$0xff] }
0x1a5d   : > { %v17656_v23 = vpop.f32.mrf.mxu3 }
0x1a5e   : > { %v9203_v24 = vpop.f32.mrf.mxu1  ;;  %19980 = vst [vmem:[#allocation26_spill] sm:$0xff] %v17682_v58 }
0x1a5f   : > { %v9892_v3 = vpack.c.bf16 %v9203_v24, %v9203_v24 }
0x1a61   : > { %v17660_v11 = vunpack.c.l.b16 %v9892_v3 }
0x1a65   : > { %v17664_v22 = vpop.f32.mrf.mxu3 }
0x1a66   : > { %v9206_v38 = vpop.f32.mrf.mxu1 }
0x1a67   : > { %v9893_v28 = vpack.c.bf16 %v9206_v38, %v9206_v38 }
0x1a69   : > { %14484 = vmatmul.msk.bf16.gmra.mxu1 %vm1262_vm5, %v15188_v17  ;;  %v17684_v47 = vunpack.c.l.b16 %v9893_v28  ;;  %v10038_v28 = vpack.c.bf16 %v17500_v19, %v17500_v19  ;;  %v15190_v19 = vld [vmem:[%s19796_s2 + $0x9e8] sm:$0xff] }
0x1a6a   : > { %14566 = vmatmul.msk.bf16.gmra.mxu3 %vm1262_vm5, %v15270_v10 }
0x1a6b   : > { %v17710_v38 = vunpack.c.l.b16 %v10038_v28  ;;  %v10040_v28 = vpack.c.bf16 %v17518_v27, %v17518_v27  ;;  %v15191_v27 = vld [vmem:[%s19796_s2 + $0x9f0] sm:$0xff] }
0x1a6d   : > { %v17678_v24 = vpop.f32.mrf.mxu3  ;;  %19982 = vst [vmem:[#allocation28_spill] sm:$0xff] %v17710_v38  ;;  %v17736_v60 = vunpack.c.l.b16 %v10040_v28 }
0x1a6e   : > { %v9208_v3 = vpop.f32.mrf.mxu1 }
0x1a6f   : > { %v9894_v35 = vpack.c.bf16 %v9208_v3, %v9208_v3  ;;  %19984 = vst [vmem:[#allocation30_spill] sm:$0xff] %v17736_v60 }
0x1a71   : > { %v17686_v17 = vunpack.c.l.b16 %v9894_v35  ;;  %v10037_v35 = vpack.c.bf16 %v17492_v13, %v17492_v13 }
0x1a73   : > { %v17708_v5 = vunpack.c.l.b16 %v10037_v35  ;;  %v15272_v35 = vld [vmem:[%s19796_s2 + $0xc78] sm:$0xff] }
0x1a75   : > { %v17690_v18 = vpop.f32.mrf.mxu3  ;;  %19981 = vst [vmem:[#allocation27_spill] sm:$0xff] %v17708_v5 }
0x1a76   : > { %v9211_v1 = vpop.f32.mrf.mxu1 }
0x1a77   : > { %v9895_v3 = vpack.c.bf16 %v9211_v1, %v9211_v1 }
0x1a79   : > { %14485 = vmatmul.msk.bf16.gmra.mxu1 %vm1262_vm5, %v15189_v12  ;;  %v17712_v44 = vunpack.c.l.b16 %v9895_v3 }
0x1a7a   : > { %14567 = vmatmul.msk.bf16.gmra.mxu3 %vm1262_vm5, %v15271_v15 }
0x1a7d   : > { %v17706_v30 = vpop.f32.mrf.mxu3 }
0x1a7e   : > { %v9213_v59 = vpop.f32.mrf.mxu1 }
0x1a7f   : > { %v9896_v34 = vpack.c.bf16 %v9213_v59, %v9213_v59 }
0x1a81   : > { %v17714_v12 = vunpack.c.l.b16 %v9896_v34  ;;  %v10039_v34 = vpack.c.bf16 %v17510_v40, %v17510_v40 }
0x1a83   : > { %v17734_v59 = vunpack.c.l.b16 %v10039_v34 }
0x1a85   : > { %v17718_v13 = vpop.f32.mrf.mxu3  ;;  %19983 = vst [vmem:[#allocation29_spill] sm:$0xff] %v17734_v59 }
0x1a86   : > { %v9216_v1 = vpop.f32.mrf.mxu1 }
0x1a87   : > { %v9897_v3 = vpack.c.bf16 %v9216_v1, %v9216_v1 }
0x1a89   : > { %14486 = vmatmul.msk.bf16.gmra.mxu1 %vm1262_vm5, %v15190_v19  ;;  %v17738_v15 = vunpack.c.l.b16 %v9897_v3 }
0x1a8a   : > { %14568 = vmatmul.msk.bf16.gmra.mxu3 %vm1262_vm5, %v15272_v35 }
0x1a8d   : > { %v9626_v8 = vpop.f32.mrf.mxu3 }
0x1a8e   : > { %v9218_v54 = vpop.f32.mrf.mxu1  ;;  %v10061_v19 = vpack.c.bf16 %v9626_v8, %v9626_v8 }
0x1a8f   : > { %v9898_v10 = vpack.c.bf16 %v9218_v54, %v9218_v54  ;;  %v10041_v54 = vpack.c.bf16 %v17528_v7, %v17528_v7 }
0x1a90   : > { %v17749_v1 = vunpack.c.l.b16 %v10061_v19  ;;  %v10042_v19 = vpack.c.bf16 %v17536_v63, %v17536_v63  ;;  %v15192_v63 = vld [vmem:[%s19796_s2 + $0x9f8] sm:$0xff] }
0x1a91   : > { %v17740_v14 = vunpack.c.l.b16 %v9898_v10  ;;  %v15273_v10 = vld [vmem:[%s19796_s2 + $0xc80] sm:$0xff] }
0x1a92   : > { %19985 = vst [vmem:[#allocation31_spill] sm:$0xff] %v17749_v1  ;;  %v17768_v0 = vunpack.c.l.b16 %v10042_v19  ;;  %v10044_v19 = vpack.c.bf16 %v17554_v25, %v17554_v25  ;;  %v15193_v25 = vld [vmem:[%s19796_s2 + $0xa00] sm:$0xff] }
0x1a94   : > { %19988 = vst [vmem:[#allocation34_spill] sm:$0xff] %v17768_v0  ;;  %v17796_v48 = vunpack.c.l.b16 %v10044_v19 }
0x1a95   : > { %v9628_v40 = vpop.f32.mrf.mxu3 }
0x1a96   : > { %v10062_v34 = vpack.c.bf16 %v9628_v40, %v9628_v40  ;;  %v9221_v28 = vpop.f32.mrf.mxu1 }
0x1a97   : > { %v9899_v40 = vpack.c.bf16 %v9221_v28, %v9221_v28  ;;  %v15274_v28 = vld [vmem:[%s19796_s2 + $0xc88] sm:$0xff] }
0x1a98   : > { %v17754_v8 = vunpack.c.l.b16 %v10062_v34  ;;  %v17766_v34 = vunpack.c.l.b16 %v10041_v54 }
0x1a99   : > { %14487 = vmatmul.msk.bf16.gmra.mxu1 %vm1262_vm5, %v15191_v27  ;;  %v17770_v27 = vunpack.c.l.b16 %v9899_v40 }
0x1a9a   : > { %19986 = vst [vmem:[#allocation32_spill] sm:$0xff] %v17754_v8  ;;  %14569 = vmatmul.msk.bf16.gmra.mxu3 %vm1262_vm5, %v15273_v10 }
0x1a9b   : > { %19987 = vst [vmem:[#allocation33_spill] sm:$0xff] %v17766_v34 }
0x1a9d   : > { %v17764_v35 = vpop.f32.mrf.mxu3 }
0x1a9e   : > { %v9223_v20 = vpop.f32.mrf.mxu1 }
0x1a9f   : > { %v9900_v26 = vpack.c.bf16 %v9223_v20, %v9223_v20 }
0x1aa1   : > { %v17772_v3 = vunpack.c.l.b16 %v9900_v26  ;;  %v10043_v26 = vpack.c.bf16 %v17546_v41, %v17546_v41 }
0x1aa3   : > { %v17794_v55 = vunpack.c.l.b16 %v10043_v26  ;;  %v15275_v26 = vld [vmem:[%s19796_s2 + $0xc90] sm:$0xff] }
0x1aa5   : > { %v17776_v7 = vpop.f32.mrf.mxu3 }
0x1aa6   : > { %v9226_v54 = vpop.f32.mrf.mxu1 }
0x1aa7   : > { %v9901_v40 = vpack.c.bf16 %v9226_v54, %v9226_v54 }
0x1aa9   : > { %14488 = vmatmul.msk.bf16.gmra.mxu1 %vm1262_vm5, %v15192_v63  ;;  %v17798_v33 = vunpack.c.l.b16 %v9901_v40 }
0x1aaa   : > { %14570 = vmatmul.msk.bf16.gmra.mxu3 %vm1262_vm5, %v15274_v28 }
0x1aad   : > { %v17792_v10 = vpop.f32.mrf.mxu3 }
0x1aae   : > { %v9228_v21 = vpop.f32.mrf.mxu1 }
0x1aaf   : > { %v9902_v20 = vpack.c.bf16 %v9228_v21, %v9228_v21 }
0x1ab1   : > { %v17800_v63 = vunpack.c.l.b16 %v9902_v20 }
0x1ab5   : > { %v17804_v41 = vpop.f32.mrf.mxu3 }
0x1ab6   : > { %v9231_v54 = vpop.f32.mrf.mxu1 }
0x1ab7   : > { %v9903_v20 = vpack.c.bf16 %v9231_v54, %v9231_v54  ;;  %v15276_v54 = vld [vmem:[%s19796_s2 + $0xc98] sm:$0xff] }
0x1ab9   : > { %14489 = vmatmul.msk.bf16.gmra.mxu1 %vm1262_vm5, %v15193_v25  ;;  %v17818_v37 = vunpack.c.l.b16 %v9903_v20  ;;  %v15194_v25 = vld [vmem:[%s19796_s2 + $0xa08] sm:$0xff] }
0x1aba   : > { %14571 = vmatmul.msk.bf16.gmra.mxu3 %vm1262_vm5, %v15275_v26  ;;  %v10048_v26 = vpack.c.bf16 %v17592_v9, %v17592_v9 }
0x1abc   : > { %v17842_v45 = vunpack.c.l.b16 %v10048_v26  ;;  %v10050_v26 = vpack.c.bf16 %v17610_v32, %v17610_v32  ;;  %v15196_v32 = vld [vmem:[%s19796_s2 + $0xa18] sm:$0xff] }
0x1abd   : > { %v17816_v19 = vpop.f32.mrf.mxu3 }
0x1abe   : > { %v9233_v40 = vpop.f32.mrf.mxu1  ;;  %19990 = vst [vmem:[#allocation36_spill] sm:$0xff] %v17842_v45  ;;  %v17870_v45 = vunpack.c.l.b16 %v10050_v26  ;;  %v10052_v26 = vpack.c.bf16 %v17628_v61, %v17628_v61  ;;  %v15197_v61 = vld [vmem:[%s19796_s2 + $0xa20] sm:$0xff] }
0x1abf   : > { %v9904_v28 = vpack.c.bf16 %v9233_v40, %v9233_v40 }
0x1ac0   : > { %19992 = vst [vmem:[#allocation38_spill] sm:$0xff] %v17870_v45  ;;  %v17898_v45 = vunpack.c.l.b16 %v10052_v26  ;;  %v10054_v26 = vpack.c.bf16 %v17646_v50, %v17646_v50  ;;  %v15198_v50 = vld [vmem:[%s19796_s2 + $0xa28] sm:$0xff] }
0x1ac1   : > { %v17820_v49 = vunpack.c.l.b16 %v9904_v28  ;;  %v10047_v28 = vpack.c.bf16 %v17584_v53, %v17584_v53 }
0x1ac2   : > { %19994 = vst [vmem:[#allocation40_spill] sm:$0xff] %v17898_v45  ;;  %v17926_v45 = vunpack.c.l.b16 %v10054_v26  ;;  %v10056_v26 = vpack.c.bf16 %v17664_v22, %v17664_v22  ;;  %v15281_v22 = vld [vmem:[%s19796_s2 + $0xcc0] sm:$0xff] }
0x1ac3   : > { %v17840_v31 = vunpack.c.l.b16 %v10047_v28  ;;  %v15277_v28 = vld [vmem:[%s19796_s2 + $0xca0] sm:$0xff] }
0x1ac4   : > { %19996 = vst [vmem:[#allocation42_spill] sm:$0xff] %v17926_v45 }
0x1ac5   : > { %v17824_v29 = vpop.f32.mrf.mxu3  ;;  %19989 = vst [vmem:[#allocation35_spill] sm:$0xff] %v17840_v31 }
0x1ac6   : > { %v9236_v39 = vpop.f32.mrf.mxu1 }
0x1ac7   : > { %v9905_v20 = vpack.c.bf16 %v9236_v39, %v9236_v39  ;;  %v15195_v39 = vld [vmem:[%s19796_s2 + $0xa10] sm:$0xff] }
0x1ac9   : > { %14490 = vmatmul.msk.bf16.gmra.mxu1 %vm1262_vm5, %v15194_v25  ;;  %v17844_v56 = vunpack.c.l.b16 %v9905_v20 }
0x1aca   : > { %14572 = vmatmul.msk.bf16.gmra.mxu3 %vm1262_vm5, %v15276_v54 }
0x1acd   : > { %v17838_v40 = vpop.f32.mrf.mxu3 }
0x1ace   : > { %v9238_v21 = vpop.f32.mrf.mxu1 }
0x1acf   : > { %v9906_v36 = vpack.c.bf16 %v9238_v21, %v9238_v21 }
0x1ad1   : > { %v17846_v25 = vunpack.c.l.b16 %v9906_v36  ;;  %v10049_v36 = vpack.c.bf16 %v17602_v2, %v17602_v2 }
0x1ad3   : > { %v17868_v31 = vunpack.c.l.b16 %v10049_v36  ;;  %v15278_v36 = vld [vmem:[%s19796_s2 + $0xca8] sm:$0xff] }
0x1ad5   : > { %v17850_v53 = vpop.f32.mrf.mxu3  ;;  %19991 = vst [vmem:[#allocation37_spill] sm:$0xff] %v17868_v31 }
0x1ad6   : > { %v9241_v21 = vpop.f32.mrf.mxu1 }
0x1ad7   : > { %v9907_v20 = vpack.c.bf16 %v9241_v21, %v9241_v21 }
0x1ad9   : > { %14491 = vmatmul.msk.bf16.gmra.mxu1 %vm1262_vm5, %v15195_v39  ;;  %v17872_v8 = vunpack.c.l.b16 %v9907_v20 }
0x1ada   : > { %14573 = vmatmul.msk.bf16.gmra.mxu3 %vm1262_vm5, %v15277_v28 }
0x1add   : > { %v17866_v54 = vpop.f32.mrf.mxu3 }
0x1ade   : > { %v9243_v1 = vpop.f32.mrf.mxu1 }
0x1adf   : > { %v9908_v9 = vpack.c.bf16 %v9243_v1, %v9243_v1 }
0x1ae1   : > { %v17874_v39 = vunpack.c.l.b16 %v9908_v9  ;;  %v10051_v9 = vpack.c.bf16 %v17620_v57, %v17620_v57 }
0x1ae3   : > { %v17896_v31 = vunpack.c.l.b16 %v10051_v9  ;;  %v15279_v9 = vld [vmem:[%s19796_s2 + $0xcb0] sm:$0xff] }
0x1ae5   : > { %v17878_v2 = vpop.f32.mrf.mxu3  ;;  %19993 = vst [vmem:[#allocation39_spill] sm:$0xff] %v17896_v31 }
0x1ae6   : > { %v9246_v21 = vpop.f32.mrf.mxu1 }
0x1ae7   : > { %v9909_v20 = vpack.c.bf16 %v9246_v21, %v9246_v21 }
0x1ae9   : > { %14492 = vmatmul.msk.bf16.gmra.mxu1 %vm1262_vm5, %v15196_v32  ;;  %v17900_v58 = vunpack.c.l.b16 %v9909_v20 }
0x1aea   : > { %14574 = vmatmul.msk.bf16.gmra.mxu3 %vm1262_vm5, %v15278_v36 }
0x1aed   : > { %v17894_v28 = vpop.f32.mrf.mxu3 }
0x1aee   : > { %v9248_v42 = vpop.f32.mrf.mxu1 }
0x1aef   : > { %v9910_v1 = vpack.c.bf16 %v9248_v42, %v9248_v42 }
0x1af1   : > { %v17902_v32 = vunpack.c.l.b16 %v9910_v1  ;;  %v10053_v1 = vpack.c.bf16 %v17638_v51, %v17638_v51 }
0x1af3   : > { %v17924_v31 = vunpack.c.l.b16 %v10053_v1  ;;  %v15280_v1 = vld [vmem:[%s19796_s2 + $0xcb8] sm:$0xff] }
0x1af5   : > { %v17906_v57 = vpop.f32.mrf.mxu3  ;;  %19995 = vst [vmem:[#allocation41_spill] sm:$0xff] %v17924_v31 }
0x1af6   : > { %v9251_v21 = vpop.f32.mrf.mxu1 }
0x1af7   : > { %v9911_v20 = vpack.c.bf16 %v9251_v21, %v9251_v21 }
0x1af9   : > { %14493 = vmatmul.msk.bf16.gmra.mxu1 %vm1262_vm5, %v15197_v61  ;;  %v17928_v38 = vunpack.c.l.b16 %v9911_v20 }
0x1afa   : > { %14575 = vmatmul.msk.bf16.gmra.mxu3 %vm1262_vm5, %v15279_v9 }
0x1afd   : > { %v17922_v36 = vpop.f32.mrf.mxu3 }
0x1afe   : > { %v9253_v5 = vpop.f32.mrf.mxu1 }
0x1aff   : > { %v9912_v42 = vpack.c.bf16 %v9253_v5, %v9253_v5  ;;  %v17954_v5 = vunpack.c.l.b16 %v10056_v26 }
0x1b01   : > { %v17930_v61 = vunpack.c.l.b16 %v9912_v42  ;;  %v10055_v42 = vpack.c.bf16 %v17656_v23, %v17656_v23  ;;  %19998 = vst [vmem:[#allocation44_spill] sm:$0xff] %v17954_v5 }
0x1b03   : > { %v17952_v46 = vunpack.c.l.b16 %v10055_v42 }
0x1b05   : > { %v17934_v51 = vpop.f32.mrf.mxu3  ;;  %19997 = vst [vmem:[#allocation43_spill] sm:$0xff] %v17952_v46 }
0x1b06   : > { %v17941_v21 = vpop.f32.mrf.mxu1 }
0x1b09   : > { %14494 = vmatmul.msk.bf16.gmra.mxu1 %vm1262_vm5, %v15198_v50  ;;  %v15199_v50 = vld [vmem:[%s19796_s2 + $0xa30] sm:$0xff] }
0x1b0a   : > { %14576 = vmatmul.msk.bf16.gmra.mxu3 %vm1262_vm5, %v15280_v1 }
0x1b0d   : > { %v9666_v20 = vpop.f32.mrf.mxu3 }
0x1b0e   : > { %v9258_v9 = vpop.f32.mrf.mxu1  ;;  %v10077_v31 = vpack.c.bf16 %v9666_v20, %v9666_v20  ;;  %v10057_v20 = vpack.c.bf16 %v17678_v24, %v17678_v24 }
0x1b10   : > { %v17961_v52 = vunpack.c.l.b16 %v10077_v31  ;;  %v10058_v31 = vpack.c.bf16 %v17690_v18, %v17690_v18  ;;  %v17978_v46 = vunpack.c.l.b16 %v10057_v20  ;;  %v15282_v18 = vld [vmem:[%s19796_s2 + $0xcc8] sm:$0xff]  ;;  %v10059_v20 = vpack.c.bf16 %v17706_v30, %v17706_v30  ;;  %v15201_v30 = vld [vmem:[%s19796_s2 + $0xa40] sm:$0xff] }
0x1b12   : > { %19999 = vst [vmem:[#allocation45_spill] sm:$0xff] %v17961_v52 }
0x1b13   : > { %20001 = vst [vmem:[#allocation47_spill] sm:$0xff] %v17978_v46  ;;  %v18000_v46 = vunpack.c.l.b16 %v10059_v20 }
0x1b15   : > { %v9668_v45 = vpop.f32.mrf.mxu3  ;;  %20003 = vst [vmem:[#allocation49_spill] sm:$0xff] %v18000_v46 }
0x1b16   : > { %v10078_v23 = vpack.c.bf16 %v9668_v45, %v9668_v45  ;;  %v9261_v59 = vpop.f32.mrf.mxu1 }
0x1b17   : > { %v9915_v6 = vpack.c.bf16 %v9261_v59, %v9261_v59 }
0x1b18   : > { %v17966_v42 = vunpack.c.l.b16 %v10078_v23  ;;  %v17980_v23 = vunpack.c.l.b16 %v10058_v31  ;;  %v10060_v31 = vpack.c.bf16 %v17718_v13, %v17718_v13 }
0x1b19   : > { %14495 = vmatmul.msk.bf16.gmra.mxu1 %vm1262_vm5, %v15199_v50  ;;  %v15200_v50 = vld [vmem:[%s19796_s2 + $0xa38] sm:$0xff]  ;;  %v10212_v59 = vunpack.c.l.b16 %v9915_v6 }
0x1b1a   : > { %20000 = vst [vmem:[#allocation46_spill] sm:$0xff] %v17966_v42  ;;  %14577 = vmatmul.msk.bf16.gmra.mxu3 %vm1262_vm5, %v15281_v22 }
0x1b1b   : > { %20002 = vst [vmem:[#allocation48_spill] sm:$0xff] %v17980_v23  ;;  %v18002_v23 = vunpack.c.l.b16 %v10060_v31 }
0x1b1d   : > { %v17976_v45 = vpop.f32.mrf.mxu3  ;;  %20004 = vst [vmem:[#allocation50_spill] sm:$0xff] %v18002_v23 }
0x1b1e   : > { %v9263_v1 = vpop.f32.mrf.mxu1 }
0x1b1f   : > { %v9916_v60 = vpack.c.bf16 %v9263_v1, %v9263_v1  ;;  %v15283_v1 = vld [vmem:[%s19796_s2 + $0xcd0] sm:$0xff] }
0x1b21   : > { %v10213_v34 = vunpack.c.l.b16 %v9916_v60 }
0x1b23   : > { %v10238_v60 = vpack.c.b16 %v10213_v34, %v10212_v59 }
0x1b25   : > { %v17982_v5 = vpop.f32.mrf.mxu3 }
0x1b26   : > { %v9266_v24 = vpop.f32.mrf.mxu1 }
0x1b27   : > { %v9917_v26 = vpack.c.bf16 %v9266_v24, %v9266_v24 }
0x1b29   : > { %14496 = vmatmul.msk.bf16.gmra.mxu1 %vm1262_vm5, %v15200_v50  ;;  %v10214_v4 = vunpack.c.l.b16 %v9917_v26  ;;  %v9913_v26 = vpack.c.bf16 %v17941_v21, %v17941_v21  ;;  %v15202_v21 = vld [vmem:[%s19796_s2 + $0xa48] sm:$0xff] }
0x1b2a   : > { %14578 = vmatmul.msk.bf16.gmra.mxu3 %vm1262_vm5, %v15282_v18 }
0x1b2d   : > { %v17998_v52 = vpop.f32.mrf.mxu3 }
0x1b2e   : > { %v9268_v42 = vpop.f32.mrf.mxu1 }
0x1b2f   : > { %v9918_v22 = vpack.c.bf16 %v9268_v42, %v9268_v42  ;;  %v10210_v42 = vunpack.c.l.b16 %v9913_v26 }
0x1b31   : > { %v10215_v50 = vunpack.c.l.b16 %v9918_v22 }
0x1b33   : > { %v10239_v18 = vpack.c.b16 %v10215_v50, %v10214_v4  ;;  %v9914_v4 = vpack.c.bf16 %v9258_v9, %v9258_v9  ;;  %v10270_v50 = vsel %vm350_vm1, %v10238_v60, 0  ;;  %v10064_v60 = vpack.c.bf16 %v17776_v7, %v17776_v7 }
0x1b35   : > { %v18004_v0 = vpop.f32.mrf.mxu3  ;;  %v10273_v13 = vsel %vm350_vm1, %v10239_v18, 0  ;;  %v10211_v22 = vunpack.c.l.b16 %v9914_v4  ;;  %v15284_v4 = vld [vmem:[%s19796_s2 + $0xcd8] sm:$0xff] }
0x1b36   : > { %v9271_v24 = vpop.f32.mrf.mxu1  ;;  %10299 = vmatpush.bf16.xpose.msrb.mxu0 %v10273_v13 }
0x1b37   : > { %v9919_v20 = vpack.c.bf16 %v9271_v24, %v9271_v24  ;;  %v10237_v34 = vpack.c.b16 %v10211_v22, %v10210_v42  ;;  %v10063_v42 = vpack.c.bf16 %v17764_v35, %v17764_v35 }
0x1b39   : > { %14497 = vmatmul.msk.bf16.gmra.mxu1 %vm1262_vm5, %v15201_v30  ;;  %v18022_v6 = vunpack.c.l.b16 %v9919_v20  ;;  %v10267_v24 = vsel %vm350_vm1, %v10237_v34, 0  ;;  %v20005_v20 = vpack.c.b16 %v17930_v61, %v17928_v38  ;;  %v18049_v34 = vunpack.c.l.b16 %v10063_v42  ;;  %v15203_v38 = vld [vmem:[%s19796_s2 + $0xa50] sm:$0xff] }
0x1b3a   : > { %14579 = vmatmul.msk.bf16.gmra.mxu3 %vm1262_vm5, %v15283_v1  ;;  %v20008_v61 = vpack.c.b16 %v17902_v32, %v17900_v58  ;;  %v10066_v58 = vpack.c.bf16 %v17804_v41, %v17804_v41 }
0x1b3b   : > { %20006 = vst [vmem:[#allocation51_spill] sm:$0xff] %v18049_v34 }
0x1b3d   : > { %v18019_v31 = vpop.f32.mrf.mxu3 }
0x1b3e   : > { %v9273_v18 = vpop.f32.mrf.mxu1  ;;  %10300 = vmatpush.bf16.xpose.msrb.mxu0 %v10270_v50  ;;  %v10264_v50 = vsel %vm350_vm1, %v20005_v20, 0  ;;  %v10065_v20 = vpack.c.bf16 %v17792_v10, %v17792_v10 }
0x1b3f   : > { %v9920_v13 = vpack.c.bf16 %v9273_v18, %v9273_v18 }
0x1b41   : > { %v18024_v9 = vunpack.c.l.b16 %v9920_v13 }
0x1b45   : > { %v18028_v1 = vpop.f32.mrf.mxu3 }
0x1b46   : > { %v9276_v59 = vpop.f32.mrf.mxu1  ;;  %10301 = vmatpush.bf16.xpose.msrb.mxu0 %v10267_v24 }
0x1b47   : > { %v9921_v26 = vpack.c.bf16 %v9276_v59, %v9276_v59 }
0x1b49   : > { %14498 = vmatmul.msk.bf16.gmra.mxu1 %vm1262_vm5, %v15202_v21  ;;  %v18051_v21 = vunpack.c.l.b16 %v10064_v60  ;;  %v18053_v24 = vunpack.c.l.b16 %v9921_v26  ;;  %v15285_v26 = vld [vmem:[%s19796_s2 + $0xce0] sm:$0xff] }
0x1b4a   : > { %14580 = vmatmul.msk.bf16.gmra.mxu3 %vm1262_vm5, %v15284_v4  ;;  %v10261_v4 = vsel %vm350_vm1, %v20008_v61, 0 }
0x1b4b   : > { %20007 = vst [vmem:[#allocation52_spill] sm:$0xff] %v18051_v21 }
0x1b4d   : > { %v18043_v22 = vpop.f32.mrf.mxu3 }
0x1b4e   : > { %v9278_v18 = vpop.f32.mrf.mxu1  ;;  %10302 = vmatpush.bf16.xpose.msrb.mxu0 %v10264_v50 }
0x1b4f   : > { %v9922_v13 = vpack.c.bf16 %v9278_v18, %v9278_v18  ;;  %v20009_v18 = vpack.c.b16 %v17874_v39, %v17872_v8  ;;  %v15204_v8 = vld [vmem:[%s19796_s2 + $0xa58] sm:$0xff]  ;;  %v20012_v39 = vpack.c.b16 %v17846_v25, %v17844_v56  ;;  %v10068_v56 = vpack.c.bf16 %v17824_v29, %v17824_v29 }
0x1b51   : > { %v18055_v35 = vunpack.c.l.b16 %v9922_v13  ;;  %v10258_v13 = vsel %vm350_vm1, %v20009_v18, 0  ;;  %v15286_v18 = vld [vmem:[%s19796_s2 + $0xce8] sm:$0xff] }
0x1b55   : > { %v18059_v59 = vpop.f32.mrf.mxu3 }
0x1b56   : > { %v9281_v60 = vpop.f32.mrf.mxu1  ;;  %10303 = vmatpush.bf16.xpose.msrb.mxu0 %v10261_v4 }
0x1b57   : > { %v9923_v32 = vpack.c.bf16 %v9281_v60, %v9281_v60 }
0x1b59   : > { %14499 = vmatmul.msk.bf16.gmra.mxu1 %vm1262_vm5, %v15203_v38  ;;  %v18085_v38 = vunpack.c.l.b16 %v10065_v20  ;;  %v18089_v42 = vunpack.c.l.b16 %v9923_v32  ;;  %v10255_v20 = vsel %vm350_vm1, %v20012_v39, 0 }
0x1b5a   : > { %14581 = vmatmul.msk.bf16.gmra.mxu3 %vm1262_vm5, %v15285_v26  ;;  %v18087_v26 = vunpack.c.l.b16 %v10066_v58 }
0x1b5b   : > { %20010 = vst [vmem:[#allocation53_spill] sm:$0xff] %v18085_v38 }
0x1b5c   : > { %20011 = vst [vmem:[#allocation54_spill] sm:$0xff] %v18087_v26 }
0x1b5d   : > { %v18079_v50 = vpop.f32.mrf.mxu3 }
0x1b5e   : > { %v9283_v61 = vpop.f32.mrf.mxu1  ;;  %10304 = vmatpush.bf16.xpose.msrb.mxu0 %v10258_v13  ;;  %v10067_v13 = vpack.c.bf16 %v17816_v19, %v17816_v19 }
0x1b5f   : > { %v9924_v4 = vpack.c.bf16 %v9283_v61, %v9283_v61 }
0x1b61   : > { %v18091_v10 = vunpack.c.l.b16 %v9924_v4  ;;  %v20013_v4 = vpack.c.b16 %v17820_v49, %v17818_v37  ;;  %v15205_v37 = vld [vmem:[%s19796_s2 + $0xa60] sm:$0xff] }
0x1b63   : > { %v10252_v39 = vsel %vm350_vm1, %v20013_v4, 0 }
0x1b65   : > { %v18095_v60 = vpop.f32.mrf.mxu3 }
0x1b66   : > { %v9286_v32 = vpop.f32.mrf.mxu1  ;;  %10305 = vmatpush.bf16.xpose.msrb.mxu0 %v10255_v20 }
0x1b67   : > { %v9925_v25 = vpack.c.bf16 %v9286_v32, %v9286_v32 }
0x1b69   : > { %14500 = vmatmul.msk.bf16.gmra.mxu1 %vm1262_vm5, %v15204_v8  ;;  %v18121_v8 = vunpack.c.l.b16 %v10067_v13  ;;  %v18125_v30 = vunpack.c.l.b16 %v9925_v25  ;;  %v15287_v13 = vld [vmem:[%s19796_s2 + $0xcf0] sm:$0xff]  ;;  %v10070_v25 = vpack.c.bf16 %v17850_v53, %v17850_v53  ;;  %v15206_v53 = vld [vmem:[%s19796_s2 + $0xa68] sm:$0xff] }
0x1b6a   : > { %14582 = vmatmul.msk.bf16.gmra.mxu3 %vm1262_vm5, %v15286_v18  ;;  %v18123_v18 = vunpack.c.l.b16 %v10068_v56  ;;  %v10069_v56 = vpack.c.bf16 %v17838_v40, %v17838_v40 }
0x1b6b   : > { %20014 = vst [vmem:[#allocation55_spill] sm:$0xff] %v18121_v8  ;;  %v18151_v41 = vunpack.c.l.b16 %v10070_v25  ;;  %v15288_v25 = vld [vmem:[%s19796_s2 + $0xcf8] sm:$0xff] }
0x1b6c   : > { %20015 = vst [vmem:[#allocation56_spill] sm:$0xff] %v18123_v18  ;;  %v18149_v7 = vunpack.c.l.b16 %v10069_v56 }
0x1b6d   : > { %v18115_v61 = vpop.f32.mrf.mxu3  ;;  %20017 = vst [vmem:[#allocation58_spill] sm:$0xff] %v18151_v41 }
0x1b6e   : > { %v9288_v58 = vpop.f32.mrf.mxu1  ;;  %10306 = vmatpush.bf16.xpose.msrb.mxu0 %v10252_v39  ;;  %20016 = vst [vmem:[#allocation57_spill] sm:$0xff] %v18149_v7 }
0x1b6f   : > { %v9926_v20 = vpack.c.bf16 %v9288_v58, %v9288_v58 }
0x1b71   : > { %v18127_v19 = vunpack.c.l.b16 %v9926_v20 }
0x1b75   : > { %v18131_v32 = vpop.f32.mrf.mxu3 }
0x1b76   : > { %v9291_v58 = vpop.f32.mrf.mxu1 }
0x1b77   : > { %v9927_v4 = vpack.c.bf16 %v9291_v58, %v9291_v58 }
0x1b79   : > { %14501 = vmatmul.msk.bf16.gmra.mxu1 %vm1262_vm5, %v15205_v37  ;;  %v18153_v29 = vunpack.c.l.b16 %v9927_v4  ;;  %v10072_v4 = vpack.c.bf16 %v17878_v2, %v17878_v2  ;;  %v15289_v2 = vld [vmem:[%s19796_s2 + $0xd00] sm:$0xff] }
0x1b7a   : > { %14583 = vmatmul.msk.bf16.gmra.mxu3 %vm1262_vm5, %v15287_v13 }
0x1b7b   : > { %v18179_v58 = vunpack.c.l.b16 %v10072_v4 }
0x1b7d   : > { %v18147_v39 = vpop.f32.mrf.mxu3  ;;  %20019 = vst [vmem:[#allocation60_spill] sm:$0xff] %v18179_v58 }
0x1b7e   : > { %v9293_v20 = vpop.f32.mrf.mxu1 }
0x1b7f   : > { %v9928_v49 = vpack.c.bf16 %v9293_v20, %v9293_v20 }
0x1b81   : > { %v18155_v37 = vunpack.c.l.b16 %v9928_v49  ;;  %v10071_v49 = vpack.c.bf16 %v17866_v54, %v17866_v54 }
0x1b83   : > { %v18177_v34 = vunpack.c.l.b16 %v10071_v49 }
0x1b85   : > { %v18159_v40 = vpop.f32.mrf.mxu3  ;;  %20018 = vst [vmem:[#allocation59_spill] sm:$0xff] %v18177_v34 }
0x1b86   : > { %v18166_v56 = vpop.f32.mrf.mxu1 }
0x1b89   : > { %14502 = vmatmul.msk.bf16.gmra.mxu1 %vm1262_vm5, %v15206_v53  ;;  %v15207_v53 = vld [vmem:[%s19796_s2 + $0xa70] sm:$0xff] }
0x1b8a   : > { %14584 = vmatmul.msk.bf16.gmra.mxu3 %vm1262_vm5, %v15288_v25 }
0x1b8d   : > { %v9706_v20 = vpop.f32.mrf.mxu3 }
0x1b8e   : > { %v9298_v13 = vpop.f32.mrf.mxu1  ;;  %v10093_v21 = vpack.c.bf16 %v9706_v20, %v9706_v20  ;;  %v10073_v20 = vpack.c.bf16 %v17894_v28, %v17894_v28 }
0x1b90   : > { %v18186_v26 = vunpack.c.l.b16 %v10093_v21  ;;  %v10074_v21 = vpack.c.bf16 %v17906_v57, %v17906_v57  ;;  %v18203_v18 = vunpack.c.l.b16 %v10073_v20  ;;  %v15290_v57 = vld [vmem:[%s19796_s2 + $0xd08] sm:$0xff]  ;;  %v10075_v20 = vpack.c.bf16 %v17922_v36, %v17922_v36  ;;  %v15209_v36 = vld [vmem:[%s19796_s2 + $0xa80] sm:$0xff] }
0x1b92   : > { %20020 = vst [vmem:[#allocation61_spill] sm:$0xff] %v18186_v26  ;;  %v18225_v58 = vunpack.c.l.b16 %v10075_v20 }
0x1b93   : > { %20022 = vst [vmem:[#allocation63_spill] sm:$0xff] %v18203_v18 }
0x1b94   : > { %20024 = vst [vmem:[#allocation65_spill] sm:$0xff] %v18225_v58 }
0x1b95   : > { %v9708_v38 = vpop.f32.mrf.mxu3 }
0x1b96   : > { %v10094_v54 = vpack.c.bf16 %v9708_v38, %v9708_v38  ;;  %v9301_v8 = vpop.f32.mrf.mxu1 }
0x1b97   : > { %v9931_v23 = vpack.c.bf16 %v9301_v8, %v9301_v8 }
0x1b98   : > { %v18191_v49 = vunpack.c.l.b16 %v10094_v54  ;;  %v18205_v54 = vunpack.c.l.b16 %v10074_v21  ;;  %v10076_v21 = vpack.c.bf16 %v17934_v51, %v17934_v51 }
0x1b99   : > { %14503 = vmatmul.msk.bf16.gmra.mxu1 %vm1262_vm5, %v15207_v53  ;;  %v15208_v53 = vld [vmem:[%s19796_s2 + $0xa78] sm:$0xff]  ;;  %v10228_v8 = vunpack.c.l.b16 %v9931_v23 }
0x1b9a   : > { %20021 = vst [vmem:[#allocation62_spill] sm:$0xff] %v18191_v49  ;;  %14585 = vmatmul.msk.bf16.gmra.mxu3 %vm1262_vm5, %v15289_v2  ;;  %v18227_v18 = vunpack.c.l.b16 %v10076_v21 }
0x1b9b   : > { %20023 = vst [vmem:[#allocation64_spill] sm:$0xff] %v18205_v54 }
0x1b9c   : > { %20025 = vst [vmem:[#allocation66_spill] sm:$0xff] %v18227_v18 }
0x1b9d   : > { %v18201_v38 = vpop.f32.mrf.mxu3 }
0x1b9e   : > { %v9303_v25 = vpop.f32.mrf.mxu1 }
0x1b9f   : > { %v9932_v54 = vpack.c.bf16 %v9303_v25, %v9303_v25  ;;  %v15291_v25 = vld [vmem:[%s19796_s2 + $0xd10] sm:$0xff] }
0x1ba1   : > { %v10229_v26 = vunpack.c.l.b16 %v9932_v54  ;;  %v9929_v54 = vpack.c.bf16 %v18166_v56, %v18166_v56  ;;  %v15210_v56 = vld [vmem:[%s19796_s2 + $0xa88] sm:$0xff] }
0x1ba5   : > { %v18207_v7 = vpop.f32.mrf.mxu3 }
0x1ba6   : > { %v9306_v28 = vpop.f32.mrf.mxu1 }
0x1ba7   : > { %v9933_v4 = vpack.c.bf16 %v9306_v28, %v9306_v28 }
0x1ba9   : > { %14504 = vmatmul.msk.bf16.gmra.mxu1 %vm1262_vm5, %v15208_v53  ;;  %v10230_v46 = vunpack.c.l.b16 %v9933_v4  ;;  %v10246_v4 = vpack.c.b16 %v10229_v26, %v10228_v8 }
0x1baa   : > { %14586 = vmatmul.msk.bf16.gmra.mxu3 %vm1262_vm5, %v15290_v57 }
0x1bad   : > { %v18223_v41 = vpop.f32.mrf.mxu3 }
0x1bae   : > { %v9308_v34 = vpop.f32.mrf.mxu1 }
0x1baf   : > { %v9934_v2 = vpack.c.bf16 %v9308_v34, %v9308_v34  ;;  %v10226_v34 = vunpack.c.l.b16 %v9929_v54 }
0x1bb1   : > { %v10231_v53 = vunpack.c.l.b16 %v9934_v2 }
0x1bb3   : > { %v10247_v57 = vpack.c.b16 %v10231_v53, %v10230_v46  ;;  %v9930_v46 = vpack.c.bf16 %v9298_v13, %v9298_v13  ;;  %v10294_v53 = vsel %vm350_vm1, %v10246_v4, 0  ;;  %v10080_v4 = vpack.c.bf16 %v17982_v5, %v17982_v5 }
0x1bb5   : > { %v18229_v49 = vpop.f32.mrf.mxu3  ;;  %v10297_v51 = vsel %vm350_vm1, %v10247_v57, 0  ;;  %v10227_v2 = vunpack.c.l.b16 %v9930_v46  ;;  %v15292_v46 = vld [vmem:[%s19796_s2 + $0xd18] sm:$0xff] }
0x1bb6   : > { %v9311_v28 = vpop.f32.mrf.mxu1  ;;  %10312 = vmatpush.bf16.xpose.msrb.mxu2 %v10297_v51 }
0x1bb7   : > { %v9935_v20 = vpack.c.bf16 %v9311_v28, %v9311_v28  ;;  %v10245_v26 = vpack.c.b16 %v10227_v2, %v10226_v34  ;;  %v10079_v34 = vpack.c.bf16 %v17976_v45, %v17976_v45 }
0x1bb9   : > { %14505 = vmatmul.msk.bf16.gmra.mxu1 %vm1262_vm5, %v15209_v36  ;;  %v18247_v23 = vunpack.c.l.b16 %v9935_v20  ;;  %v10291_v28 = vsel %vm350_vm1, %v10245_v26, 0  ;;  %v20028_v20 = vpack.c.b16 %v18155_v37, %v18153_v29  ;;  %v18274_v26 = vunpack.c.l.b16 %v10079_v34  ;;  %v15211_v29 = vld [vmem:[%s19796_s2 + $0xa90] sm:$0xff] }
0x1bba   : > { %14587 = vmatmul.msk.bf16.gmra.mxu3 %vm1262_vm5, %v15291_v25  ;;  %v20033_v37 = vpack.c.b16 %v18127_v19, %v18125_v30  ;;  %v10082_v30 = vpack.c.bf16 %v18004_v0, %v18004_v0 }
0x1bbb   : > { %20026 = vst [vmem:[#allocation67_spill] sm:$0xff] %v18247_v23 }
0x1bbc   : > { %20029 = vst [vmem:[#allocation69_spill] sm:$0xff] %v18274_v26 }
0x1bbd   : > { %v18244_v21 = vpop.f32.mrf.mxu3 }
0x1bbe   : > { %v9313_v57 = vpop.f32.mrf.mxu1  ;;  %10313 = vmatpush.bf16.xpose.msrb.mxu2 %v10294_v53  ;;  %v10288_v53 = vsel %vm350_vm1, %v20028_v20, 0  ;;  %v10081_v20 = vpack.c.bf16 %v17998_v52, %v17998_v52 }
0x1bbf   : > { %v9936_v51 = vpack.c.bf16 %v9313_v57, %v9313_v57 }
0x1bc1   : > { %v18249_v13 = vunpack.c.l.b16 %v9936_v51 }
0x1bc3   : > { %20027 = vst [vmem:[#allocation68_spill] sm:$0xff] %v18249_v13 }
0x1bc5   : > { %v18253_v25 = vpop.f32.mrf.mxu3 }
0x1bc6   : > { %v9316_v8 = vpop.f32.mrf.mxu1  ;;  %10314 = vmatpush.bf16.xpose.msrb.mxu2 %v10291_v28 }
0x1bc7   : > { %v9937_v54 = vpack.c.bf16 %v9316_v8, %v9316_v8 }
0x1bc9   : > { %14506 = vmatmul.msk.bf16.gmra.mxu1 %vm1262_vm5, %v15210_v56  ;;  %v18276_v56 = vunpack.c.l.b16 %v10080_v4  ;;  %v18278_v28 = vunpack.c.l.b16 %v9937_v54  ;;  %v15293_v54 = vld [vmem:[%s19796_s2 + $0xd20] sm:$0xff] }
0x1bca   : > { %14588 = vmatmul.msk.bf16.gmra.mxu3 %vm1262_vm5, %v15292_v46  ;;  %v10285_v46 = vsel %vm350_vm1, %v20033_v37, 0 }
0x1bcb   : > { %20030 = vst [vmem:[#allocation70_spill] sm:$0xff] %v18276_v56 }
0x1bcc   : > { %20031 = vst [vmem:[#allocation71_spill] sm:$0xff] %v18278_v28 }
0x1bcd   : > { %v18268_v2 = vpop.f32.mrf.mxu3 }
0x1bce   : > { %v9318_v57 = vpop.f32.mrf.mxu1  ;;  %10315 = vmatpush.bf16.xpose.msrb.mxu2 %v10288_v53 }
0x1bcf   : > { %v9938_v51 = vpack.c.bf16 %v9318_v57, %v9318_v57  ;;  %v20034_v57 = vpack.c.b16 %v18091_v10, %v18089_v42  ;;  %v15212_v42 = vld [vmem:[%s19796_s2 + $0xa98] sm:$0xff]  ;;  %v20039_v10 = vpack.c.b16 %v18055_v35, %v18053_v24  ;;  %v10083_v24 = vpack.c.bf16 %v18019_v31, %v18019_v31 }
0x1bd0   : > { %v10084_v35 = vpack.c.bf16 %v18028_v1, %v18028_v1 }
0x1bd1   : > { %v18280_v45 = vunpack.c.l.b16 %v9938_v51  ;;  %v10282_v51 = vsel %vm350_vm1, %v20034_v57, 0  ;;  %v15294_v57 = vld [vmem:[%s19796_s2 + $0xd28] sm:$0xff]  ;;  %v18350_v5 = vunpack.c.l.b16 %v10083_v24 }
0x1bd3   : > { %20032 = vst [vmem:[#allocation72_spill] sm:$0xff] %v18280_v45 }
0x1bd4   : > { %20041 = vst [vmem:[#allocation77_spill] sm:$0xff] %v18350_v5 }
0x1bd5   : > { %v18284_v8 = vpop.f32.mrf.mxu3 }
0x1bd6   : > { %v9321_v4 = vpop.f32.mrf.mxu1  ;;  %10316 = vmatpush.bf16.xpose.msrb.mxu2 %v10285_v46 }
0x1bd7   : > { %v9939_v19 = vpack.c.bf16 %v9321_v4, %v9321_v4 }
0x1bd9   : > { %14507 = vmatmul.msk.bf16.gmra.mxu1 %vm1262_vm5, %v15211_v29  ;;  %v18310_v29 = vunpack.c.l.b16 %v10081_v20  ;;  %v18314_v36 = vunpack.c.l.b16 %v9939_v19  ;;  %v10279_v20 = vsel %vm350_vm1, %v20039_v10, 0 }
0x1bda   : > { %14589 = vmatmul.msk.bf16.gmra.mxu3 %vm1262_vm5, %v15293_v54  ;;  %v18312_v54 = vunpack.c.l.b16 %v10082_v30 }
0x1bdb   : > { %20035 = vst [vmem:[#allocation73_spill] sm:$0xff] %v18310_v29 }
0x1bdc   : > { %20036 = vst [vmem:[#allocation74_spill] sm:$0xff] %v18312_v54 }
0x1bdd   : > { %v18304_v53 = vpop.f32.mrf.mxu3  ;;  %20037 = vst [vmem:[#allocation75_spill] sm:$0xff] %v18314_v36 }
0x1bde   : > { %v9323_v37 = vpop.f32.mrf.mxu1  ;;  %10317 = vmatpush.bf16.xpose.msrb.mxu2 %v10282_v51  ;;  %v15234_v51 = vld [vmem:[%s19796_s2 + $0xb48] sm:$0xff] }
0x1bdf   : > { %v9940_v46 = vpack.c.bf16 %v9323_v37, %v9323_v37  ;;  %14530 = vmatmul.msk.bf16.vlgmr.msra.gmra.mxu2 %vm1262_vm5, %v15234_v51  ;;  %v18352_v51 = vunpack.c.l.b16 %v10084_v35  ;;  %v15295_v35 = vld [vmem:[%s19796_s2 + $0xd30] sm:$0xff] }
0x1be1   : > { %v18316_v52 = vunpack.c.l.b16 %v9940_v46  ;;  %20042 = vst [vmem:[#allocation78_spill] sm:$0xff] %v18352_v51 }
0x1be3   : > { %20038 = vst [vmem:[#allocation76_spill] sm:$0xff] %v18316_v52 }
0x1be5   : > { %v18320_v4 = vpop.f32.mrf.mxu3 }
0x1be6   : > { %v9326_v19 = vpop.f32.mrf.mxu1  ;;  %10318 = vmatpush.bf16.xpose.msrb.mxu2 %v10279_v20 }
0x1be7   : > { %v9941_v37 = vpack.c.bf16 %v9326_v19, %v9326_v19 }
0x1be9   : > { %14508 = vmatmul.msk.bf16.gmra.mxu1 %vm1262_vm5, %v15212_v42  ;;  %v20040_v42 = vpack.c.b16 %v18024_v9, %v18022_v6  ;;  %v18354_v0 = vunpack.c.l.b16 %v9941_v37  ;;  %v15213_v6 = vld [vmem:[%s19796_s2 + $0xaa0] sm:$0xff]  ;;  %v15235_v37 = vld [vmem:[%s19796_s2 + $0xb50] sm:$0xff] }
0x1bea   : > { %14590 = vmatmul.msk.bf16.gmra.mxu3 %vm1262_vm5, %v15294_v57 }
0x1beb   : > { %v10276_v10 = vsel %vm350_vm1, %v20040_v42, 0  ;;  %20043 = vst [vmem:[#allocation79_spill] sm:$0xff] %v18354_v0  ;;  %v10085_v42 = vpack.c.bf16 %v18043_v22, %v18043_v22 }
0x1bed   : > { %v18344_v46 = vpop.f32.mrf.mxu3 }
0x1bee   : > { %v9328_v20 = vpop.f32.mrf.mxu1  ;;  %10319 = vmatpush.bf16.xpose.msrb.mxu2 %v10276_v10  ;;  %v10086_v10 = vpack.c.bf16 %v18059_v59, %v18059_v59  ;;  %v15214_v59 = vld [vmem:[%s19796_s2 + $0xaa8] sm:$0xff] }
0x1bef   : > { %v9942_v57 = vpack.c.bf16 %v9328_v20, %v9328_v20  ;;  %14531 = vmatmul.msk.bf16.gmra.mxu2 %vm1262_vm5, %v15235_v37 }
0x1bf1   : > { %v18356_v31 = vunpack.c.l.b16 %v9942_v57 }
0x1bf3   : > { %20044 = vst [vmem:[#allocation80_spill] sm:$0xff] %v18356_v31 }
0x1bf5   : > { %v18360_v19 = vpop.f32.mrf.mxu3 }
0x1bf6   : > { %v9331_v24 = vpop.f32.mrf.mxu1 }
0x1bf7   : > { %v9943_v20 = vpack.c.bf16 %v9331_v24, %v9331_v24 }
0x1bf9   : > { %14509 = vmatmul.msk.bf16.gmra.mxu1 %vm1262_vm5, %v15213_v6  ;;  %v18382_v6 = vunpack.c.l.b16 %v10085_v42  ;;  %v18386_v30 = vunpack.c.l.b16 %v9943_v20  ;;  %v15296_v42 = vld [vmem:[%s19796_s2 + $0xd38] sm:$0xff]  ;;  %v10088_v20 = vpack.c.bf16 %v18095_v60, %v18095_v60  ;;  %v15215_v60 = vld [vmem:[%s19796_s2 + $0xab0] sm:$0xff] }
0x1bfa   : > { %14591 = vmatmul.msk.bf16.gmra.mxu3 %vm1262_vm5, %v15295_v35  ;;  %v18384_v35 = vunpack.c.l.b16 %v10086_v10  ;;  %v10087_v10 = vpack.c.bf16 %v18079_v50, %v18079_v50 }
0x1bfb   : > { %20045 = vst [vmem:[#allocation81_spill] sm:$0xff] %v18382_v6 }
0x1bfc   : > { %20046 = vst [vmem:[#allocation82_spill] sm:$0xff] %v18384_v35  ;;  %v18412_v23 = vunpack.c.l.b16 %v10087_v10 }
0x1bfd   : > { %v18380_v57 = vpop.f32.mrf.mxu3  ;;  %20047 = vst [vmem:[#allocation83_spill] sm:$0xff] %v18386_v30 }
0x1bfe   : > { %v9333_v1 = vpop.f32.mrf.mxu1  ;;  %20049 = vst [vmem:[#allocation85_spill] sm:$0xff] %v18412_v23 }
0x1bff   : > { %v9944_v34 = vpack.c.bf16 %v9333_v1, %v9333_v1 }
0x1c01   : > { %v18388_v9 = vunpack.c.l.b16 %v9944_v34  ;;  %v15236_v34 = vld [vmem:[%s19796_s2 + $0xb58] sm:$0xff] }
0x1c02   : > { %14532 = vmatmul.msk.bf16.gmra.mxu2 %vm1262_vm5, %v15236_v34 }
0x1c03   : > { %20048 = vst [vmem:[#allocation84_spill] sm:$0xff] %v18388_v9 }
0x1c05   : > { %v18392_v22 = vpop.f32.mrf.mxu3 }
0x1c06   : > { %v9336_v24 = vpop.f32.mrf.mxu1 }
0x1c07   : > { %v9945_v37 = vpack.c.bf16 %v9336_v24, %v9336_v24 }
0x1c09   : > { %14510 = vmatmul.msk.bf16.gmra.mxu1 %vm1262_vm5, %v15214_v59  ;;  %v18414_v59 = vunpack.c.l.b16 %v10088_v20 }
0x1c0a   : > { %14592 = vmatmul.msk.bf16.gmra.mxu3 %vm1262_vm5, %v15296_v42  ;;  %v18416_v42 = vunpack.c.l.b16 %v9945_v37 }
0x1c0b   : > { %20050 = vst [vmem:[#allocation86_spill] sm:$0xff] %v18414_v59 }
0x1c0c   : > { %20051 = vst [vmem:[#allocation87_spill] sm:$0xff] %v18416_v42 }
0x1c0d   : > { %v9746_v1 = vpop.f32.mrf.mxu3 }
0x1c0e   : > { %v9338_v58 = vpop.f32.mrf.mxu1  ;;  %v10109_v28 = vpack.c.bf16 %v9746_v1, %v9746_v1 }
0x1c0f   : > { %v9946_v18 = vpack.c.bf16 %v9338_v58, %v9338_v58 }
0x1c10   : > { %v18427_v24 = vunpack.c.l.b16 %v10109_v28  ;;  %v15237_v28 = vld [vmem:[%s19796_s2 + $0xb60] sm:$0xff] }
0x1c11   : > { %v18418_v13 = vunpack.c.l.b16 %v9946_v18  ;;  %v15297_v18 = vld [vmem:[%s19796_s2 + $0xd40] sm:$0xff] }
0x1c12   : > { %20053 = vst [vmem:[#allocation89_spill] sm:$0xff] %v18427_v24  ;;  %14533 = vmatmul.msk.bf16.gmra.mxu2 %vm1262_vm5, %v15237_v28 }
0x1c13   : > { %20052 = vst [vmem:[#allocation88_spill] sm:$0xff] %v18418_v13 }
0x1c15   : > { %v9748_v50 = vpop.f32.mrf.mxu3 }
0x1c16   : > { %v10110_v10 = vpack.c.bf16 %v9748_v50, %v9748_v50  ;;  %v9341_v20 = vpop.f32.mrf.mxu1  ;;  %v10089_v50 = vpack.c.bf16 %v18115_v61, %v18115_v61 }
0x1c17   : > { %v9947_v34 = vpack.c.bf16 %v9341_v20, %v9341_v20 }
0x1c18   : > { %v18432_v37 = vunpack.c.l.b16 %v10110_v10  ;;  %v10090_v10 = vpack.c.bf16 %v18131_v32, %v18131_v32  ;;  %v18448_v1 = vunpack.c.l.b16 %v10089_v50  ;;  %v15216_v32 = vld [vmem:[%s19796_s2 + $0xab8] sm:$0xff] }
0x1c19   : > { %14511 = vmatmul.msk.bf16.gmra.mxu1 %vm1262_vm5, %v15215_v60  ;;  %v18452_v36 = vunpack.c.l.b16 %v9947_v34  ;;  %v15298_v34 = vld [vmem:[%s19796_s2 + $0xd48] sm:$0xff] }
0x1c1a   : > { %20054 = vst [vmem:[#allocation90_spill] sm:$0xff] %v18432_v37  ;;  %14593 = vmatmul.msk.bf16.gmra.mxu3 %vm1262_vm5, %v15297_v18  ;;  %v18450_v18 = vunpack.c.l.b16 %v10090_v10  ;;  %v10091_v10 = vpack.c.bf16 %v18147_v39, %v18147_v39 }
0x1c1b   : > { %20055 = vst [vmem:[#allocation91_spill] sm:$0xff] %v18448_v1  ;;  %v15226_v1 = vld [vmem:[%s19796_s2 + $0xb08] sm:$0xff] }
0x1c1c   : > { %20056 = vst [vmem:[#allocation92_spill] sm:$0xff] %v18450_v18 }
0x1c1d   : > { %v18446_v58 = vpop.f32.mrf.mxu3  ;;  %20057 = vst [vmem:[#allocation93_spill] sm:$0xff] %v18452_v36 }
0x1c1e   : > { %v9343_v60 = vpop.f32.mrf.mxu1 }
0x1c1f   : > { %v9948_v45 = vpack.c.bf16 %v9343_v60, %v9343_v60  ;;  %v10092_v60 = vpack.c.bf16 %v18159_v40, %v18159_v40  ;;  %v15217_v40 = vld [vmem:[%s19796_s2 + $0xac0] sm:$0xff] }
0x1c21   : > { %v18454_v52 = vunpack.c.l.b16 %v9948_v45  ;;  %v15238_v45 = vld [vmem:[%s19796_s2 + $0xb68] sm:$0xff] }
0x1c22   : > { %14534 = vmatmul.msk.bf16.gmra.mxu2 %vm1262_vm5, %v15238_v45 }
0x1c23   : > { %20058 = vst [vmem:[#allocation94_spill] sm:$0xff] %v18454_v52 }
0x1c25   : > { %v18458_v61 = vpop.f32.mrf.mxu3 }
0x1c26   : > { %v9346_v50 = vpop.f32.mrf.mxu1 }
0x1c27   : > { %v9949_v28 = vpack.c.bf16 %v9346_v50, %v9346_v50 }
0x1c29   : > { %14512 = vmatmul.msk.bf16.gmra.mxu1 %vm1262_vm5, %v15216_v32  ;;  %v18480_v32 = vunpack.c.l.b16 %v10091_v10  ;;  %v18484_v30 = vunpack.c.l.b16 %v9949_v28  ;;  %v15299_v28 = vld [vmem:[%s19796_s2 + $0xd50] sm:$0xff] }
0x1c2a   : > { %14594 = vmatmul.msk.bf16.gmra.mxu3 %vm1262_vm5, %v15298_v34  ;;  %v18482_v34 = vunpack.c.l.b16 %v10092_v60 }
0x1c2b   : > { %20059 = vst [vmem:[#allocation95_spill] sm:$0xff] %v18480_v32 }
0x1c2c   : > { %20060 = vst [vmem:[#allocation96_spill] sm:$0xff] %v18482_v34 }
0x1c2d   : > { %v18478_v20 = vpop.f32.mrf.mxu3  ;;  %20061 = vst [vmem:[#allocation97_spill] sm:$0xff] %v18484_v30 }
0x1c2e   : > { %v9348_v0 = vpop.f32.mrf.mxu1 }
0x1c2f   : > { %v9950_v31 = vpack.c.bf16 %v9348_v0, %v9348_v0 }
0x1c31   : > { %v18486_v9 = vunpack.c.l.b16 %v9950_v31  ;;  %v15239_v31 = vld [vmem:[%s19796_s2 + $0xb70] sm:$0xff] }
0x1c32   : > { %14535 = vmatmul.msk.bf16.gmra.mxu2 %vm1262_vm5, %v15239_v31  ;;  %v10096_v31 = vpack.c.bf16 %v18207_v7, %v18207_v7  ;;  %v15219_v7 = vld [vmem:[%s19796_s2 + $0xad0] sm:$0xff] }
0x1c33   : > { %20062 = vst [vmem:[#allocation98_spill] sm:$0xff] %v18486_v9 }
0x1c35   : > { %v18490_v39 = vpop.f32.mrf.mxu3 }
0x1c36   : > { %v9351_v50 = vpop.f32.mrf.mxu1 }
0x1c37   : > { %v9951_v10 = vpack.c.bf16 %v9351_v50, %v9351_v50  ;;  %v15300_v50 = vld [vmem:[%s19796_s2 + $0xd58] sm:$0xff] }
0x1c39   : > { %14513 = vmatmul.msk.bf16.gmra.mxu1 %vm1262_vm5, %v15217_v40  ;;  %v18508_v42 = vunpack.c.l.b16 %v9951_v10 }
0x1c3a   : > { %14595 = vmatmul.msk.bf16.gmra.mxu3 %vm1262_vm5, %v15299_v28  ;;  %v15218_v28 = vld [vmem:[%s19796_s2 + $0xac8] sm:$0xff] }
0x1c3b   : > { %20063 = vst [vmem:[#allocation99_spill] sm:$0xff] %v18508_v42 }
0x1c3d   : > { %v18506_v60 = vpop.f32.mrf.mxu3 }
0x1c3e   : > { %v9353_v45 = vpop.f32.mrf.mxu1 }
0x1c3f   : > { %v9952_v0 = vpack.c.bf16 %v9353_v45, %v9353_v45  ;;  %v15240_v45 = vld [vmem:[%s19796_s2 + $0xb78] sm:$0xff] }
0x1c41   : > { %v18510_v13 = vunpack.c.l.b16 %v9952_v0  ;;  %v10095_v0 = vpack.c.bf16 %v18201_v38, %v18201_v38 }
0x1c42   : > { %14536 = vmatmul.msk.bf16.gmra.mxu2 %vm1262_vm5, %v15240_v45 }
0x1c43   : > { %20064 = vst [vmem:[#allocation100_spill] sm:$0xff] %v18510_v13 }
0x1c45   : > { %v18514_v36 = vpop.f32.mrf.mxu3 }
0x1c46   : > { %v9356_v52 = vpop.f32.mrf.mxu1 }
0x1c47   : > { %v9953_v10 = vpack.c.bf16 %v9356_v52, %v9356_v52 }
0x1c49   : > { %14514 = vmatmul.msk.bf16.gmra.mxu1 %vm1262_vm5, %v15218_v28  ;;  %v18534_v28 = vunpack.c.l.b16 %v10095_v0  ;;  %v18538_v30 = vunpack.c.l.b16 %v9953_v10  ;;  %v15301_v0 = vld [vmem:[%s19796_s2 + $0xd60] sm:$0xff]  ;;  %v10098_v10 = vpack.c.bf16 %v18229_v49, %v18229_v49  ;;  %v15220_v49 = vld [vmem:[%s19796_s2 + $0xad8] sm:$0xff] }
0x1c4a   : > { %14596 = vmatmul.msk.bf16.gmra.mxu3 %vm1262_vm5, %v15300_v50  ;;  %v18536_v50 = vunpack.c.l.b16 %v10096_v31  ;;  %v10097_v31 = vpack.c.bf16 %v18223_v41, %v18223_v41 }
0x1c4b   : > { %20065 = vst [vmem:[#allocation101_spill] sm:$0xff] %v18534_v28 }
0x1c4c   : > { %20066 = vst [vmem:[#allocation102_spill] sm:$0xff] %v18536_v50 }
0x1c4d   : > { %v18532_v40 = vpop.f32.mrf.mxu3  ;;  %20067 = vst [vmem:[#allocation103_spill] sm:$0xff] %v18538_v30 }
0x1c4e   : > { %v9358_v42 = vpop.f32.mrf.mxu1 }
0x1c4f   : > { %v9954_v13 = vpack.c.bf16 %v9358_v42, %v9358_v42 }
0x1c51   : > { %v18540_v9 = vunpack.c.l.b16 %v9954_v13  ;;  %v15241_v13 = vld [vmem:[%s19796_s2 + $0xb80] sm:$0xff] }
0x1c52   : > { %14537 = vmatmul.msk.bf16.gmra.mxu2 %vm1262_vm5, %v15241_v13 }
0x1c53   : > { %20068 = vst [vmem:[#allocation104_spill] sm:$0xff] %v18540_v9 }
0x1c55   : > { %v18544_v38 = vpop.f32.mrf.mxu3 }
0x1c56   : > { %v9361_v42 = vpop.f32.mrf.mxu1 }
0x1c57   : > { %v9955_v45 = vpack.c.bf16 %v9361_v42, %v9361_v42 }
0x1c59   : > { %14515 = vmatmul.msk.bf16.gmra.mxu1 %vm1262_vm5, %v15219_v7  ;;  %v18566_v7 = vunpack.c.l.b16 %v10097_v31  ;;  %v18570_v26 = vunpack.c.l.b16 %v9955_v45  ;;  %v15302_v45 = vld [vmem:[%s19796_s2 + $0xd68] sm:$0xff]  ;;  %v10099_v31 = vpack.c.bf16 %v18244_v21, %v18244_v21  ;;  %v10102_v21 = vpack.c.bf16 %v18284_v8, %v18284_v8 }
0x1c5a   : > { %14597 = vmatmul.msk.bf16.gmra.mxu3 %vm1262_vm5, %v15301_v0  ;;  %v18568_v0 = vunpack.c.l.b16 %v10098_v10  ;;  %v10100_v10 = vpack.c.bf16 %v18253_v25, %v18253_v25  ;;  %v15221_v25 = vld [vmem:[%s19796_s2 + $0xae0] sm:$0xff]  ;;  %v15222_v8 = vld [vmem:[%s19796_s2 + $0xae8] sm:$0xff] }
0x1c5b   : > { %20070 = vst [vmem:[#allocation106_spill] sm:$0xff] %v18566_v7 }
0x1c5c   : > { %20071 = vst [vmem:[#allocation107_spill] sm:$0xff] %v18568_v0 }
0x1c5d   : > { %v18564_v52 = vpop.f32.mrf.mxu3  ;;  %20072 = vst [vmem:[#allocation108_spill] sm:$0xff] %v18570_v26 }
0x1c5e   : > { %20069 = vst [vmem:[#allocation105_spill] sm:$0xff] %v18564_v52  ;;  %v9363_v30 = vpop.f32.mrf.mxu1 }
0x1c5f   : > { %v9956_v9 = vpack.c.bf16 %v9363_v30, %v9363_v30 }
0x1c61   : > { %v18572_v56 = vunpack.c.l.b16 %v9956_v9  ;;  %v15242_v9 = vld [vmem:[%s19796_s2 + $0xb88] sm:$0xff] }
0x1c62   : > { %14538 = vmatmul.msk.bf16.gmra.mxu2 %vm1262_vm5, %v15242_v9 }
0x1c63   : > { %20073 = vst [vmem:[#allocation109_spill] sm:$0xff] %v18572_v56 }
0x1c65   : > { %v18576_v41 = vpop.f32.mrf.mxu3 }
0x1c66   : > { %20074 = vst [vmem:[#allocation110_spill] sm:$0xff] %v18576_v41  ;;  %v9366_v42 = vpop.f32.mrf.mxu1  ;;  %v18602_v41 = vunpack.c.l.b16 %v10100_v10  ;;  %v10101_v10 = vpack.c.bf16 %v18268_v2, %v18268_v2  ;;  %v10104_v2 = vpack.c.bf16 %v18320_v4, %v18320_v4  ;;  %v15223_v4 = vld [vmem:[%s19796_s2 + $0xaf0] sm:$0xff] }
0x1c67   : > { %v9957_v13 = vpack.c.bf16 %v9366_v42, %v9366_v42 }
0x1c68   : > { %20077 = vst [vmem:[#allocation113_spill] sm:$0xff] %v18602_v41  ;;  %v18674_v51 = vunpack.c.l.b16 %v10104_v2  ;;  %v10105_v2 = vpack.c.bf16 %v18344_v46, %v18344_v46  ;;  %v15306_v41 = vld [vmem:[%s19796_s2 + $0xd88] sm:$0xff] }
0x1c69   : > { %14516 = vmatmul.msk.bf16.gmra.mxu1 %vm1262_vm5, %v15220_v49  ;;  %v18598_v49 = vpop.f32.mrf.mxu2  ;;  %v18604_v52 = vunpack.c.l.b16 %v9957_v13  ;;  %v15303_v13 = vld [vmem:[%s19796_s2 + $0xd70] sm:$0xff] }
0x1c6a   : > { %14598 = vmatmul.msk.bf16.gmra.mxu3 %vm1262_vm5, %v15302_v45  ;;  %v18600_v45 = vunpack.c.l.b16 %v10099_v31  ;;  %20089 = vst [vmem:[#allocation125_spill] sm:$0xff] %v18674_v51 }
0x1c6b   : > { %20078 = vst [vmem:[#allocation114_spill] sm:$0xff] %v18604_v52 }
0x1c6c   : > { %20076 = vst [vmem:[#allocation112_spill] sm:$0xff] %v18600_v45 }
0x1c6d   : > { %v18596_v30 = vpop.f32.mrf.mxu3 }
0x1c6e   : > { %20075 = vst [vmem:[#allocation111_spill] sm:$0xff] %v18596_v30  ;;  %v9368_v26 = vpop.f32.mrf.mxu1  ;;  %v18638_v30 = vunpack.c.l.b16 %v10102_v21  ;;  %v15304_v21 = vld [vmem:[%s19796_s2 + $0xd78] sm:$0xff] }
0x1c6f   : > { %v9958_v56 = vpack.c.bf16 %v9368_v26, %v9368_v26 }
0x1c70   : > { %20083 = vst [vmem:[#allocation119_spill] sm:$0xff] %v18638_v30 }
0x1c71   : > { %v18606_v9 = vunpack.c.l.b16 %v9958_v56  ;;  %v18620_v31 = vpop.f32.mrf.mxu2  ;;  %v15243_v56 = vld [vmem:[%s19796_s2 + $0xb90] sm:$0xff] }
0x1c72   : > { %14539 = vmatmul.msk.bf16.gmra.mxu2 %vm1262_vm5, %v15243_v56 }
0x1c73   : > { %20079 = vst [vmem:[#allocation115_spill] sm:$0xff] %v18606_v9 }
0x1c75   : > { %v18610_v29 = vpop.f32.mrf.mxu3 }
0x1c76   : > { %20080 = vst [vmem:[#allocation116_spill] sm:$0xff] %v18610_v29  ;;  %v9371_v42 = vpop.f32.mrf.mxu1 }
0x1c77   : > { %v9959_v26 = vpack.c.bf16 %v9371_v42, %v9371_v42 }
0x1c79   : > { %14517 = vmatmul.msk.bf16.gmra.mxu1 %vm1262_vm5, %v15221_v25  ;;  %v18634_v25 = vpop.f32.mrf.mxu2  ;;  %v18640_v54 = vunpack.c.l.b16 %v9959_v26 }
0x1c7a   : > { %14599 = vmatmul.msk.bf16.gmra.mxu3 %vm1262_vm5, %v15303_v13  ;;  %v18636_v13 = vunpack.c.l.b16 %v10101_v10  ;;  %v10103_v10 = vpack.c.bf16 %v18304_v53, %v18304_v53 }
0x1c7b   : > { %20084 = vst [vmem:[#allocation120_spill] sm:$0xff] %v18640_v54 }
0x1c7c   : > { %20082 = vst [vmem:[#allocation118_spill] sm:$0xff] %v18636_v13 }
0x1c7d   : > { %v18632_v52 = vpop.f32.mrf.mxu3 }
0x1c7e   : > { %20081 = vst [vmem:[#allocation117_spill] sm:$0xff] %v18632_v52  ;;  %v9373_v9 = vpop.f32.mrf.mxu1  ;;  %v18672_v52 = vunpack.c.l.b16 %v10103_v10 }
0x1c7f   : > { %v9960_v29 = vpack.c.bf16 %v9373_v9, %v9373_v9 }
0x1c80   : > { %20088 = vst [vmem:[#allocation124_spill] sm:$0xff] %v18672_v52 }
0x1c81   : > { %v18642_v56 = vunpack.c.l.b16 %v9960_v29  ;;  %v18656_v26 = vpop.f32.mrf.mxu2  ;;  %v15244_v29 = vld [vmem:[%s19796_s2 + $0xb98] sm:$0xff] }
0x1c82   : > { %14540 = vmatmul.msk.bf16.gmra.mxu2 %vm1262_vm5, %v15244_v29 }
0x1c83   : > { %20085 = vst [vmem:[#allocation121_spill] sm:$0xff] %v18642_v56 }
0x1c85   : > { %v18646_v5 = vpop.f32.mrf.mxu3 }
0x1c86   : > { %20086 = vst [vmem:[#allocation122_spill] sm:$0xff] %v18646_v5  ;;  %v9376_v42 = vpop.f32.mrf.mxu1 }
0x1c87   : > { %v9961_v9 = vpack.c.bf16 %v9376_v42, %v9376_v42 }
0x1c89   : > { %14518 = vmatmul.msk.bf16.gmra.mxu1 %vm1262_vm5, %v15222_v8  ;;  %v18670_v8 = vpop.f32.mrf.mxu2 }
0x1c8a   : > { %14600 = vmatmul.msk.bf16.gmra.mxu3 %vm1262_vm5, %v15304_v21  ;;  %v18676_v21 = vunpack.c.l.b16 %v9961_v9  ;;  %v10106_v9 = vpack.c.bf16 %v18360_v19, %v18360_v19  ;;  %v15224_v19 = vld [vmem:[%s19796_s2 + $0xaf8] sm:$0xff] }
0x1c8c   : > { %20090 = vst [vmem:[#allocation126_spill] sm:$0xff] %v18676_v21 }
0x1c8d   : > { %v18668_v54 = vpop.f32.mrf.mxu3 }
0x1c8e   : > { %20087 = vst [vmem:[#allocation123_spill] sm:$0xff] %v18668_v54  ;;  %v9378_v56 = vpop.f32.mrf.mxu1  ;;  %v18706_v54 = vunpack.c.l.b16 %v10106_v9  ;;  %v10108_v9 = vpack.c.bf16 %v18392_v22, %v18392_v22  ;;  %v15225_v22 = vld [vmem:[%s19796_s2 + $0xb00] sm:$0xff] }
0x1c8f   : > { %v9962_v5 = vpack.c.bf16 %v9378_v56, %v9378_v56 }
0x1c90   : > { %20094 = vst [vmem:[#allocation130_spill] sm:$0xff] %v18706_v54  ;;  %v18738_v23 = vunpack.c.l.b16 %v10108_v9 }
0x1c91   : > { %v18678_v29 = vunpack.c.l.b16 %v9962_v5  ;;  %v18689_v10 = vpop.f32.mrf.mxu2  ;;  %v15245_v5 = vld [vmem:[%s19796_s2 + $0xba0] sm:$0xff] }
0x1c92   : > { %14541 = vmatmul.msk.bf16.gmra.mxu2 %vm1262_vm5, %v15245_v5  ;;  %20098 = vst [vmem:[#allocation134_spill] sm:$0xff] %v18738_v23 }
0x1c93   : > { %20091 = vst [vmem:[#allocation127_spill] sm:$0xff] %v18678_v29 }
0x1c95   : > { %v18682_v6 = vpop.f32.mrf.mxu3 }
0x1c96   : > { %20092 = vst [vmem:[#allocation128_spill] sm:$0xff] %v18682_v6  ;;  %v9381_v42 = vpop.f32.mrf.mxu1 }
0x1c97   : > { %v9963_v53 = vpack.c.bf16 %v9381_v42, %v9381_v42 }
0x1c99   : > { %14519 = vmatmul.msk.bf16.gmra.mxu1 %vm1262_vm5, %v15223_v4  ;;  %v18702_v6 = vpop.f32.mrf.mxu2  ;;  %v18704_v4 = vunpack.c.l.b16 %v10105_v2  ;;  %v18708_v35 = vunpack.c.l.b16 %v9963_v53  ;;  %v10107_v53 = vpack.c.bf16 %v18380_v57, %v18380_v57  ;;  %v15305_v57 = vld [vmem:[%s19796_s2 + $0xd80] sm:$0xff] }
0x1c9a   : > { %14601 = vmatmul.msk.bf16.gmra.mxu3 %vm1262_vm5, %v15305_v57  ;;  %v10111_v57 = vpack.c.bf16 %v18446_v58, %v18446_v58 }
0x1c9b   : > { %20093 = vst [vmem:[#allocation129_spill] sm:$0xff] %v18704_v4 }
0x1c9c   : > { %20095 = vst [vmem:[#allocation131_spill] sm:$0xff] %v18708_v35 }
0x1c9d   : > { %v18700_v21 = vpop.f32.mrf.mxu3 }
0x1c9e   : > { %v9383_v56 = vpop.f32.mrf.mxu1 }
0x1c9f   : > { %v9964_v29 = vpack.c.bf16 %v9383_v56, %v9383_v56 }
0x1ca1   : > { %v18710_v5 = vunpack.c.l.b16 %v9964_v29  ;;  %v18721_v2 = vpop.f32.mrf.mxu2  ;;  %v15246_v29 = vld [vmem:[%s19796_s2 + $0xba8] sm:$0xff] }
0x1ca2   : > { %14542 = vmatmul.msk.bf16.gmra.mxu2 %vm1262_vm5, %v15246_v29 }
0x1ca3   : > { %20096 = vst [vmem:[#allocation132_spill] sm:$0xff] %v18710_v5 }
0x1ca5   : > { %v18714_v28 = vpop.f32.mrf.mxu3 }
0x1ca6   : > { %v9386_v42 = vpop.f32.mrf.mxu1 }
0x1ca7   : > { %v9965_v46 = vpack.c.bf16 %v9386_v42, %v9386_v42 }
0x1ca9   : > { %14520 = vmatmul.msk.bf16.gmra.mxu1 %vm1262_vm5, %v15224_v19  ;;  %v18734_v50 = vpop.f32.mrf.mxu2  ;;  %v18736_v19 = vunpack.c.l.b16 %v10107_v53  ;;  %v18740_v59 = vunpack.c.l.b16 %v9965_v46 }
0x1caa   : > { %14602 = vmatmul.msk.bf16.gmra.mxu3 %vm1262_vm5, %v15306_v41  ;;  %v15307_v41 = vld [vmem:[%s19796_s2 + $0xd90] sm:$0xff] }
0x1cab   : > { %20097 = vst [vmem:[#allocation133_spill] sm:$0xff] %v18736_v19 }
0x1cac   : > { %20099 = vst [vmem:[#allocation135_spill] sm:$0xff] %v18740_v59 }
0x1cad   : > { %v18732_v35 = vpop.f32.mrf.mxu3 }
0x1cae   : > { %v9388_v56 = vpop.f32.mrf.mxu1 }
0x1caf   : > { %v9966_v5 = vpack.c.bf16 %v9388_v56, %v9388_v56 }
0x1cb1   : > { %v18742_v29 = vunpack.c.l.b16 %v9966_v5  ;;  %v18753_v53 = vpop.f32.mrf.mxu2  ;;  %v15247_v5 = vld [vmem:[%s19796_s2 + $0xbb0] sm:$0xff] }
0x1cb2   : > { %14543 = vmatmul.msk.bf16.gmra.mxu2 %vm1262_vm5, %v15247_v5 }
0x1cb3   : > { %20100 = vst [vmem:[#allocation136_spill] sm:$0xff] %v18742_v29 }
0x1cb5   : > { %v18746_v7 = vpop.f32.mrf.mxu3 }
0x1cb6   : > { %v9391_v42 = vpop.f32.mrf.mxu1 }
0x1cb7   : > { %v9967_v46 = vpack.c.bf16 %v9391_v42, %v9391_v42 }
0x1cb9   : > { %14521 = vmatmul.msk.bf16.gmra.mxu1 %vm1262_vm5, %v15225_v22  ;;  %v18766_v29 = vpop.f32.mrf.mxu2  ;;  %v18768_v22 = vunpack.c.l.b16 %v9967_v46 }
0x1cba   : > { %20101 = vst [vmem:[#allocation137_spill] sm:$0xff] %v18766_v29  ;;  %14603 = vmatmul.msk.bf16.gmra.mxu3 %vm1262_vm5, %v15307_v41 }
0x1cbd   : > { %v18760_v9 = vpop.f32.mrf.mxu3 }
0x1cbe   : > { %v9393_v59 = vpop.f32.mrf.mxu1 }
0x1cbf   : > { %v9968_v56 = vpack.c.bf16 %v9393_v59, %v9393_v59  ;;  %v15248_v59 = vld [vmem:[%s19796_s2 + $0xbb8] sm:$0xff] }
0x1cc1   : > { %v18770_v0 = vunpack.c.l.b16 %v9968_v56  ;;  %v18779_v45 = vpop.f32.mrf.mxu2  ;;  %v10112_v56 = vpack.c.bf16 %v18458_v61, %v18458_v61 }
0x1cc2   : > { %20102 = vst [vmem:[#allocation138_spill] sm:$0xff] %v18779_v45  ;;  %14544 = vmatmul.msk.bf16.gmra.mxu2 %vm1262_vm5, %v15248_v59  ;;  %v18798_v59 = vunpack.c.l.b16 %v10111_v57  ;;  %v15310_v45 = vld [vmem:[%s19796_s2 + $0xda8] sm:$0xff] }
0x1cc3   : > { %v18800_v13 = vunpack.c.l.b16 %v10112_v56  ;;  %v10113_v56 = vpack.c.bf16 %v18478_v20, %v18478_v20 }
0x1cc4   : > { %20104 = vst [vmem:[#allocation140_spill] sm:$0xff] %v18798_v59 }
0x1cc5   : > { %v18774_v42 = vpop.f32.mrf.mxu3  ;;  %20105 = vst [vmem:[#allocation141_spill] sm:$0xff] %v18800_v13  ;;  %v18832_v4 = vunpack.c.l.b16 %v10113_v56 }
0x1cc6   : > { %v9396_v18 = vpop.f32.mrf.mxu1 }
0x1cc7   : > { %v9969_v46 = vpack.c.bf16 %v9396_v18, %v9396_v18  ;;  %20108 = vst [vmem:[#allocation144_spill] sm:$0xff] %v18832_v4 }
0x1cc9   : > { %14522 = vmatmul.msk.bf16.gmra.mxu1 %vm1262_vm5, %v15226_v1  ;;  %v18796_v34 = vpop.f32.mrf.mxu2  ;;  %v18802_v58 = vunpack.c.l.b16 %v9969_v46  ;;  %v10114_v46 = vpack.c.bf16 %v18490_v39, %v18490_v39 }
0x1cca   : > { %20103 = vst [vmem:[#allocation139_spill] sm:$0xff] %v18796_v34 }
0x1ccd   : > { %v18790_v5 = vpop.f32.mrf.mxu3 }
0x1cce   : > { %v9398_v1 = vpop.f32.mrf.mxu1 }
0x1ccf   : > { %v9970_v32 = vpack.c.bf16 %v9398_v1, %v9398_v1  ;;  %v15227_v1 = vld [vmem:[%s19796_s2 + $0xb10] sm:$0xff] }
0x1cd1   : > { %v18804_v61 = vunpack.c.l.b16 %v9970_v32  ;;  %v18815_v52 = vpop.f32.mrf.mxu2  ;;  %v15249_v32 = vld [vmem:[%s19796_s2 + $0xbc0] sm:$0xff] }
0x1cd2   : > { %20106 = vst [vmem:[#allocation142_spill] sm:$0xff] %v18815_v52  ;;  %14545 = vmatmul.msk.bf16.gmra.mxu2 %vm1262_vm5, %v15249_v32  ;;  %v18834_v32 = vunpack.c.l.b16 %v10114_v46 }
0x1cd4   : > { %20109 = vst [vmem:[#allocation145_spill] sm:$0xff] %v18834_v32 }
0x1cd5   : > { %v18808_v30 = vpop.f32.mrf.mxu3 }
0x1cd6   : > { %v9401_v57 = vpop.f32.mrf.mxu1 }
0x1cd7   : > { %v9971_v18 = vpack.c.bf16 %v9401_v57, %v9401_v57  ;;  %v15250_v57 = vld [vmem:[%s19796_s2 + $0xbc8] sm:$0xff] }
0x1cd9   : > { %14523 = vmatmul.msk.bf16.gmra.mxu1 %vm1262_vm5, %v15227_v1  ;;  %v18830_v13 = vpop.f32.mrf.mxu2  ;;  %v18836_v20 = vunpack.c.l.b16 %v9971_v18 }
0x1cda   : > { %20107 = vst [vmem:[#allocation143_spill] sm:$0xff] %v18830_v13 }
0x1cdd   : > { %v9811_v51 = vpop.f32.mrf.mxu3 }
0x1cde   : > { %v9403_v59 = vpop.f32.mrf.mxu1  ;;  %v10135_v39 = vpack.c.bf16 %v9811_v51, %v9811_v51 }
0x1cdf   : > { %v9972_v1 = vpack.c.bf16 %v9403_v59, %v9403_v59  ;;  %v15228_v59 = vld [vmem:[%s19796_s2 + $0xb18] sm:$0xff] }
0x1ce0   : > { %v18847_v56 = vunpack.c.l.b16 %v10135_v39  ;;  %v10115_v39 = vpack.c.bf16 %v18506_v60, %v18506_v60 }
0x1ce1   : > { %v18838_v54 = vunpack.c.l.b16 %v9972_v1  ;;  %v18851_v1 = vpop.f32.mrf.mxu2 }
0x1ce2   : > { %20110 = vst [vmem:[#allocation146_spill] sm:$0xff] %v18851_v1  ;;  %14546 = vmatmul.msk.bf16.gmra.mxu2 %vm1262_vm5, %v15250_v57  ;;  %v18872_v57 = vunpack.c.l.b16 %v10115_v39 }
0x1ce4   : > { %20112 = vst [vmem:[#allocation148_spill] sm:$0xff] %v18872_v57 }
0x1ce5   : > { %v9813_v19 = vpop.f32.mrf.mxu3 }
0x1ce6   : > { %v10136_v46 = vpack.c.bf16 %v9813_v19, %v9813_v19  ;;  %v9406_v13 = vpop.f32.mrf.mxu1  ;;  %v10116_v19 = vpack.c.bf16 %v18514_v36, %v18514_v36 }
0x1ce8   : > { %v18849_v18 = vunpack.c.l.b16 %v10136_v46  ;;  %v9973_v46 = vpack.c.bf16 %v9406_v13, %v9406_v13  ;;  %v18874_v32 = vunpack.c.l.b16 %v10116_v19  ;;  %v10002_v19 = vpack.c.bf16 %v18620_v31, %v18620_v31 }
0x1ce9   : > { %14524 = vmatmul.msk.bf16.gmra.mxu1 %vm1262_vm5, %v15228_v59  ;;  %v15308_v59 = vld [vmem:[%s19796_s2 + $0xd98] sm:$0xff]  ;;  %v18870_v4 = vpop.f32.mrf.mxu2  ;;  %v10118_v13 = vpack.c.bf16 %v18544_v38, %v18544_v38 }
0x1cea   : > { %14604 = vmatmul.msk.bf16.gmra.mxu3 %vm1262_vm5, %v15308_v59  ;;  %20111 = vst [vmem:[#allocation147_spill] sm:$0xff] %v18870_v4  ;;  %v18876_v60 = vunpack.c.l.b16 %v9973_v46  ;;  %v10117_v46 = vpack.c.bf16 %v18532_v40, %v18532_v40  ;;  %v15309_v59 = vld [vmem:[%s19796_s2 + $0xda0] sm:$0xff]  ;;  %v18905_v57 = vunpack.c.l.b16 %v10002_v19 }
0x1ceb   : > { %20113 = vst [vmem:[#allocation149_spill] sm:$0xff] %v18874_v32  ;;  %v18912_v32 = vunpack.c.l.b16 %v10118_v13 }
0x1cec   : > { %20116 = vst [vmem:[#allocation152_spill] sm:$0xff] %v18905_v57  ;;  %v18910_v40 = vunpack.c.l.b16 %v10117_v46  ;;  %v10003_v46 = vpack.c.bf16 %v18634_v25, %v18634_v25  ;;  %v10005_v25 = vpack.c.bf16 %v18670_v8, %v18670_v8 }
0x1ced   : > { %v18864_v41 = vpop.f32.mrf.mxu3  ;;  %20119 = vst [vmem:[#allocation155_spill] sm:$0xff] %v18912_v32  ;;  %v15231_v32 = vld [vmem:[%s19796_s2 + $0xb30] sm:$0xff] }
0x1cee   : > { %v9408_v51 = vpop.f32.mrf.mxu1  ;;  %20118 = vst [vmem:[#allocation154_spill] sm:$0xff] %v18910_v40 }
0x1cef   : > { %v9974_v1 = vpack.c.bf16 %v9408_v51, %v9408_v51  ;;  %v15229_v51 = vld [vmem:[%s19796_s2 + $0xb20] sm:$0xff] }
0x1cf1   : > { %v18878_v36 = vunpack.c.l.b16 %v9974_v1  ;;  %v18889_v4 = vpop.f32.mrf.mxu2  ;;  %v10001_v1 = vpack.c.bf16 %v18598_v49, %v18598_v49 }
0x1cf2   : > { %20114 = vst [vmem:[#allocation150_spill] sm:$0xff] %v18889_v4 }
0x1cf5   : > { %v18882_v23 = vpop.f32.mrf.mxu3 }
0x1cf6   : > { %v9411_v39 = vpop.f32.mrf.mxu1 }
0x1cf7   : > { %v9975_v24 = vpack.c.bf16 %v9411_v39, %v9411_v39 }
0x1cf9   : > { %14525 = vmatmul.msk.bf16.gmra.mxu1 %vm1262_vm5, %v15229_v51  ;;  %v18903_v51 = vunpack.c.l.b16 %v10001_v1  ;;  %v18908_v31 = vpop.f32.mrf.mxu2  ;;  %v18914_v38 = vunpack.c.l.b16 %v9975_v24 }
0x1cfa   : > { %14605 = vmatmul.msk.bf16.gmra.mxu3 %vm1262_vm5, %v15309_v59  ;;  %20117 = vst [vmem:[#allocation153_spill] sm:$0xff] %v18908_v31  ;;  %v18941_v59 = vunpack.c.l.b16 %v10003_v46 }
0x1cfb   : > { %20115 = vst [vmem:[#allocation151_spill] sm:$0xff] %v18903_v51 }
0x1cfc   : > { %20121 = vst [vmem:[#allocation157_spill] sm:$0xff] %v18941_v59  ;;  %v10006_v59 = vpack.c.bf16 %v18689_v10, %v18689_v10 }
0x1cfd   : > { %v9821_v37 = vpop.f32.mrf.mxu3 }
0x1cfe   : > { %v9413_v4 = vpop.f32.mrf.mxu1  ;;  %v10139_v51 = vpack.c.bf16 %v9821_v37, %v9821_v37  ;;  %v18970_v8 = vunpack.c.l.b16 %v10006_v59 }
0x1cff   : > { %v9976_v49 = vpack.c.bf16 %v9413_v4, %v9413_v4  ;;  %v15230_v4 = vld [vmem:[%s19796_s2 + $0xb28] sm:$0xff] }
0x1d01   : > { %v18916_v39 = vunpack.c.l.b16 %v9976_v49  ;;  %v18929_v24 = vpop.f32.mrf.mxu2  ;;  %v10004_v49 = vpack.c.bf16 %v18656_v26, %v18656_v26 }
0x1d02   : > { %20120 = vst [vmem:[#allocation156_spill] sm:$0xff] %v18929_v24 }
0x1d03   : > { %v18943_v40 = vunpack.c.l.b16 %v10004_v49 }
0x1d05   : > { %v9823_v19 = vpop.f32.mrf.mxu3 }
0x1d06   : > { %v18927_v13 = vpop.f32.mrf.mxu1  ;;  %v10140_v57 = vpack.c.bf16 %v9823_v19, %v9823_v19  ;;  %v15311_v19 = vld [vmem:[%s19796_s2 + $0xdb0] sm:$0xff] }
0x1d09   : > { %14526 = vmatmul.msk.bf16.gmra.mxu1 %vm1262_vm5, %v15230_v4  ;;  %v18946_v4 = vpop.f32.mrf.mxu2 }
0x1d0a   : > { %14606 = vmatmul.msk.bf16.gmra.mxu3 %vm1262_vm5, %v15310_v45  ;;  %20122 = vst [vmem:[#allocation158_spill] sm:$0xff] %v18946_v4  ;;  %v10840_v45 = vunpack.c.l.b16 %v10139_v51  ;;  %v18968_v51 = vunpack.c.l.b16 %v10005_v25 }
0x1d0d   : > { %v9826_v1 = vpop.f32.mrf.mxu3 }
0x1d0e   : > { %v18939_v31 = vpop.f32.mrf.mxu1  ;;  %v10141_v24 = vpack.c.bf16 %v9826_v1, %v9826_v1  ;;  %v10841_v1 = vunpack.c.l.b16 %v10140_v57 }
0x1d10   : > { %v10842_v29 = vunpack.c.l.b16 %v10141_v24  ;;  %v10137_v24 = vpack.c.bf16 %v18864_v41, %v18864_v41 }
0x1d11   : > { %v18953_v34 = vpop.f32.mrf.mxu2 }
0x1d12   : > { %20123 = vst [vmem:[#allocation159_spill] sm:$0xff] %v18953_v34 }
0x1d15   : > { %v9828_v26 = vpop.f32.mrf.mxu3 }
0x1d16   : > { %v10142_v46 = vpack.c.bf16 %v9828_v26, %v9828_v26  ;;  %v9421_v52 = vpop.f32.mrf.mxu1 }
0x1d17   : > { %v9979_v34 = vpack.c.bf16 %v9421_v52, %v9421_v52 }
0x1d18   : > { %v10843_v49 = vunpack.c.l.b16 %v10142_v46 }
0x1d19   : > { %14527 = vmatmul.msk.bf16.gmra.mxu1 %vm1262_vm5, %v15231_v32  ;;  %v10138_v32 = vpack.c.bf16 %v18882_v23, %v18882_v23  ;;  %v18973_v10 = vpop.f32.mrf.mxu2  ;;  %v15232_v23 = vld [vmem:[%s19796_s2 + $0xb38] sm:$0xff] }
0x1d1a   : > { %v10867_v4 = vpack.c.b16 %v10843_v49, %v10842_v29  ;;  %v10866_v29 = vpack.c.b16 %v10841_v1, %v10840_v45  ;;  %14607 = vmatmul.msk.bf16.gmra.mxu3 %vm1262_vm5, %v15311_v19  ;;  %v10007_v1 = vpack.c.bf16 %v18702_v6, %v18702_v6 }
0x1d1b   : > { %v10839_v26 = vunpack.c.l.b16 %v10138_v32  ;;  %v10133_v32 = vpack.c.bf16 %v18790_v5, %v18790_v5  ;;  %v20124_v5 = vpack.c.b16 %v18849_v18, %v18847_v56  ;;  %v10132_v56 = vpack.c.bf16 %v18774_v42, %v18774_v42 }
0x1d1c   : > { %v10901_v37 = vsel %vm350_vm1, %v10867_v4, 0  ;;  %v10838_v4 = vunpack.c.l.b16 %v10137_v24  ;;  %v10898_v46 = vsel %vm350_vm1, %v10866_v29, 0  ;;  %v15312_v24 = vld [vmem:[%s19796_s2 + $0xdb8] sm:$0xff]  ;;  %v10134_v29 = vpack.c.bf16 %v18808_v30, %v18808_v30 }
0x1d1d   : > { %10927 = vmatpush.bf16.xpose.msra.mxu1 %v10901_v37  ;;  %v10008_v37 = vpack.c.bf16 %v18721_v2, %v18721_v2  ;;  %v10892_v30 = vsel %vm350_vm1, %v20124_v5, 0  ;;  %v10009_v42 = vpack.c.bf16 %v18734_v50, %v18734_v50  ;;  %v10010_v5 = vpack.c.bf16 %v18753_v53, %v18753_v53 }
0x1d1e   : > { %v9423_v57 = vpop.f32.mrf.mxu1  ;;  %v10865_v25 = vpack.c.b16 %v10839_v26, %v10838_v4  ;;  %v18996_v26 = vunpack.c.l.b16 %v10007_v1  ;;  %v10835_v41 = vunpack.c.l.b16 %v10134_v29 }
0x1d1f   : > { %v19040_v53 = vunpack.c.l.b16 %v10010_v5 }
0x1d20   : > { %v10895_v45 = vsel %vm350_vm1, %v10865_v25, 0 }
0x1d21   : > { %v18981_v59 = vpop.f32.mrf.mxu2 }
0x1d25   : > { %10928 = vmatpush.bf16.xpose.msra.mxu1 %v10898_v46  ;;  %v18998_v46 = vunpack.c.l.b16 %v10008_v37 }
0x1d26   : > { %v9426_v49 = vpop.f32.mrf.mxu1 }
0x1d27   : > { %v9981_v19 = vpack.c.bf16 %v9426_v49, %v9426_v49  ;;  %v11335_v37 = vpack.c.b16 %v18998_v46, %v18996_v26 }
0x1d29   : > { %14528 = vmatmul.msk.bf16.gmra.mxu1 %vm1262_vm5, %v15232_v23  ;;  %v19001_v2 = vpop.f32.mrf.mxu2  ;;  %v9980_v23 = vpack.c.bf16 %v9423_v57, %v9423_v57  ;;  %v10371_v25 = vunpack.c.l.b16 %v9981_v19  ;;  %v15233_v57 = vld [vmem:[%s19796_s2 + $0xb40] sm:$0xff]  ;;  %v10131_v19 = vpack.c.bf16 %v18760_v9, %v18760_v9 }
0x1d2a   : > { %14608 = vmatmul.msk.bf16.gmra.mxu3 %vm1262_vm5, %v15312_v24 }
0x1d2d   : > { %10929 = vmatpush.bf16.xpose.msra.mxu1 %v10895_v45  ;;  %v10834_v45 = vunpack.c.l.b16 %v10133_v32  ;;  %v10369_v32 = vunpack.c.l.b16 %v9979_v34  ;;  %v9977_v34 = vpack.c.bf16 %v18927_v13, %v18927_v13 }
0x1d2e   : > { %v9428_v4 = vpop.f32.mrf.mxu1 }
0x1d2f   : > { %v9982_v6 = vpack.c.bf16 %v9428_v4, %v9428_v4  ;;  %v10370_v4 = vunpack.c.l.b16 %v9980_v23  ;;  %v10863_v52 = vpack.c.b16 %v10835_v41, %v10834_v45  ;;  %v10129_v45 = vpack.c.bf16 %v18732_v35, %v18732_v35  ;;  %v9831_v35 = vpop.f32.mrf.mxu3 }
0x1d31   : > { %v10372_v49 = vunpack.c.l.b16 %v9982_v6  ;;  %v19019_v29 = vpop.f32.mrf.mxu2  ;;  %v9978_v6 = vpack.c.bf16 %v18939_v31, %v18939_v31  ;;  %v10395_v23 = vpack.c.b16 %v10370_v4, %v10369_v32  ;;  %v10889_v9 = vsel %vm350_vm1, %v10863_v52, 0 }
0x1d32   : > { %v19038_v4 = vunpack.c.l.b16 %v10009_v42 }
0x1d33   : > { %v10396_v1 = vpack.c.b16 %v10372_v49, %v10371_v25  ;;  %v10832_v25 = vunpack.c.l.b16 %v10131_v19  ;;  %v10833_v49 = vunpack.c.l.b16 %v10132_v56  ;;  %v10368_v41 = vunpack.c.l.b16 %v9978_v6 }
0x1d34   : > { %v10427_v31 = vsel %vm350_vm1, %v10395_v23, 0  ;;  %v10830_v19 = vunpack.c.l.b16 %v10129_v45  ;;  %v10127_v6 = vpack.c.bf16 %v18700_v21, %v18700_v21  ;;  %v10128_v23 = vpack.c.bf16 %v18714_v28, %v18714_v28 }
0x1d35   : > { %10930 = vmatpush.bf16.xpose.msra.mxu1 %v10892_v30  ;;  %v10430_v24 = vsel %vm350_vm1, %v10396_v1, 0  ;;  %v10130_v30 = vpack.c.bf16 %v18746_v7, %v18746_v7  ;;  %v10862_v50 = vpack.c.b16 %v10833_v49, %v10832_v25  ;;  %v11336_v7 = vpack.c.b16 %v19040_v53, %v19038_v4  ;;  %v20160_v4 = vld [vmem:[#allocation90_spill] sm:$0xff]  ;;  %v20161_v53 = vld [vmem:[#allocation89_spill] sm:$0xff] }
0x1d36   : > { %v19017_v18 = vpop.f32.mrf.mxu1  ;;  %10456 = vmatpush.bf16.xpose.msra.mxu0 %v10430_v24  ;;  %v10367_v24 = vunpack.c.l.b16 %v9977_v34  ;;  %v10828_v5 = vunpack.c.l.b16 %v10127_v6  ;;  %v10829_v34 = vunpack.c.l.b16 %v10128_v23  ;;  %v20125_v21 = vpack.c.b16 %v18916_v39, %v18914_v38 }
0x1d37   : > { %v10831_v56 = vunpack.c.l.b16 %v10130_v30  ;;  %v10886_v52 = vsel %vm350_vm1, %v10862_v50, 0  ;;  %v20127_v6 = vpack.c.b16 %v18878_v36, %v18876_v60  ;;  %v20128_v60 = vpack.c.b16 %v17772_v3, %v17770_v27 }
0x1d38   : > { %v10421_v28 = vsel %vm350_vm1, %v20125_v21, 0  ;;  %v20130_v27 = vpack.c.b16 %v17740_v14, %v17738_v15  ;;  %v20133_v15 = vpack.c.b16 %v18770_v0, %v18768_v22  ;;  %v20157_v22 = vld [vmem:[#allocation26_spill] sm:$0xff] }
0x1d39   : > { %14529 = vmatmul.msk.bf16.gmra.mxu1 %vm1262_vm5, %v15233_v57  ;;  %v19042_v13 = vpop.f32.mrf.mxu2  ;;  %v10394_v57 = vpack.c.b16 %v10368_v41, %v10367_v24  ;;  %v10861_v49 = vpack.c.b16 %v10831_v56, %v10830_v19  ;;  %v10160_v56 = vld [vmem:[%s19796_s2 + $0xdc8] sm:$0xf]  ;;  %v10418_v23 = vsel %vm350_vm1, %v20127_v6, 0  ;;  %v11079_v36 = vsel %vm350_vm1, %v20128_v60, 0 }
0x1d3a   : > { %14609 = vmatmul.msk.bf16.vlgmr.msrb.gmra.mxu0 %vm350_vm1, %v10160_v56  ;;  %14610 = vmatmul.msk.bf16.vlgmr.msrb.gmra.mxu2 %vm350_vm1, %v10160_v56 }
0x1d3b   : > { %v10424_v32 = vsel %vm350_vm1, %v10394_v57, 0  ;;  %v10883_v41 = vsel %vm350_vm1, %v10861_v49, 0  ;;  %v10860_v57 = vpack.c.b16 %v10829_v34, %v10828_v5 }
0x1d3d   : > { %10931 = vmatpush.bf16.xpose.msra.mxu1 %v10889_v9  ;;  %v10143_v9 = vpack.c.bf16 %v9831_v35, %v9831_v35  ;;  %v10880_v38 = vsel %vm350_vm1, %v10860_v57, 0  ;;  %v20126_v35 = vpack.c.b16 %v17800_v63, %v17798_v33 }
0x1d3e   : > { %v19036_v1 = vpop.f32.mrf.mxu1  ;;  %10457 = vmatpush.bf16.xpose.msra.mxu0 %v10427_v31  ;;  %v9833_v31 = vpop.f32.mrf.mxu3 }
0x1d3f   : > { %v19057_v45 = vunpack.c.l.b16 %v10143_v9  ;;  %v10144_v30 = vpack.c.bf16 %v9833_v31, %v9833_v31 }
0x1d41   : > { %v19054_v42 = vpop.f32.mrf.mxu2  ;;  %v19063_v50 = vunpack.c.l.b16 %v10144_v30 }
0x1d45   : > { %10932 = vmatpush.bf16.xpose.msra.mxu1 %v10886_v52 }
0x1d46   : > { %v19052_v25 = vpop.f32.mrf.mxu1  ;;  %10458 = vmatpush.bf16.xpose.msra.mxu0 %v10424_v32  ;;  %v9836_v39 = vpop.f32.mrf.mxu3  ;;  %v11082_v32 = vsel %vm350_vm1, %v20126_v35, 0 }
0x1d47   : > { %v10145_v5 = vpack.c.bf16 %v9836_v39, %v9836_v39 }
0x1d49   : > { %v9546_v52 = vpop.f32.mrf.mxu2  ;;  %v19087_v21 = vunpack.c.l.b16 %v10145_v5 }
0x1d4a   : > { %v10029_v49 = vpack.c.bf16 %v9546_v52, %v9546_v52 }
0x1d4d   : > { %10933 = vmatpush.bf16.xpose.msra.mxu1 %v10883_v41  ;;  %v19085_v41 = vunpack.c.l.b16 %v10029_v49 }
0x1d4e   : > { %v19065_v24 = vpop.f32.mrf.mxu1  ;;  %10459 = vmatpush.bf16.xpose.msra.mxu0 %v10421_v28  ;;  %v9838_v30 = vpop.f32.mrf.mxu3  ;;  %v20129_v28 = vpack.c.b16 %v18838_v54, %v18836_v20  ;;  %v11076_v54 = vsel %vm350_vm1, %v20130_v27, 0  ;;  %v20131_v20 = vpack.c.b16 %v18804_v61, %v18802_v58  ;;  %v10409_v58 = vsel %vm350_vm1, %v20133_v15, 0 }
0x1d4f   : > { %v10146_v63 = vpack.c.bf16 %v9838_v30, %v9838_v30 }
0x1d50   : > { %v10415_v57 = vsel %vm350_vm1, %v20129_v28, 0  ;;  %v10412_v35 = vsel %vm350_vm1, %v20131_v20, 0 }
0x1d51   : > { %v9548_v34 = vpop.f32.mrf.mxu2  ;;  %v19101_v52 = vunpack.c.l.b16 %v10146_v63  ;;  %v20134_v63 = vpack.c.b16 %v17578_v62, %v17573_v16 }
0x1d52   : > { %v10030_v31 = vpack.c.bf16 %v9548_v34, %v9548_v34 }
0x1d53   : > { %v10587_v60 = vsel %vm350_vm1, %v20134_v63, 0  ;;  %v20158_v63 = vld [vmem:[#allocation25_spill] sm:$0xff] }
0x1d54   : > { %v19089_v33 = vunpack.c.l.b16 %v10030_v31  ;;  %v20132_v31 = vpack.c.b16 %v17714_v12, %v17712_v44  ;;  %v19134_v44 = vld [vmem:[%s19796_s2 + $0xe00] sm:$0xf] }
0x1d55   : > { %10934 = vmatpush.bf16.xpose.msra.mxu1 %v10880_v38 }
0x1d56   : > { %v19083_v9 = vpop.f32.mrf.mxu1  ;;  %10460 = vmatpush.bf16.xpose.msra.mxu0 %v10418_v23  ;;  %v9841_v3 = vpop.f32.mrf.mxu3  ;;  %v11073_v14 = vsel %vm350_vm1, %v20132_v31, 0 }
0x1d57   : > { %v10147_v6 = vpack.c.bf16 %v9841_v3, %v9841_v3 }
0x1d59   : > { %v19115_v49 = vunpack.c.l.b16 %v10147_v6  ;;  %v19136_v0 = vpop.f32.mrf.mxu2 }
0x1d5c   : > { %14617 = vmatmul.msk.bf16.vlgmr.msra.gmra.mxu1 %vm350_vm1, %v19134_v44 }
0x1d5d   : > { %11097 = vmatpush.bf16.xpose.msrb.mxu1 %v11082_v32 }
0x1d5e   : > { %v19103_v38 = vpop.f32.mrf.mxu1  ;;  %10461 = vmatpush.bf16.xpose.msra.mxu0 %v10415_v57  ;;  %v9843_v23 = vpop.f32.mrf.mxu3  ;;  %v20135_v57 = vpack.c.b16 %v17686_v17, %v17684_v47  ;;  %v20137_v47 = vpack.c.b16 %v17660_v11, %v17658_v43  ;;  %v20141_v43 = vld [vmem:[#allocation139_spill] sm:$0xff] }
0x1d5f   : > { %v10148_v5 = vpack.c.bf16 %v9843_v23, %v9843_v23  ;;  %v10013_v11 = vpack.c.bf16 %v20141_v43, %v20141_v43  ;;  %v20149_v43 = vld [vmem:[#allocation137_spill] sm:$0xff] }
0x1d60   : > { %v11070_v3 = vsel %vm350_vm1, %v20135_v57, 0  ;;  %v11067_v17 = vsel %vm350_vm1, %v20137_v47, 0 }
0x1d61   : > { %v19125_v61 = vunpack.c.l.b16 %v10148_v5 }
0x1d65   : > { %11098 = vmatpush.bf16.xpose.msrb.mxu1 %v11079_v36 }
0x1d66   : > { %v9446_v32 = vpop.f32.mrf.mxu1  ;;  %10462 = vmatpush.bf16.xpose.msra.mxu0 %v10412_v35 }
0x1d67   : > { %v9989_v34 = vpack.c.bf16 %v9446_v32, %v9446_v32  ;;  %v9553_v32 = vpop.f32.mrf.mxu2 }
0x1d69   : > { %v19142_v36 = vunpack.c.l.b16 %v9989_v34 }
0x1d6d   : > { %11099 = vmatpush.bf16.xpose.msrb.mxu1 %v11076_v54  ;;  %v9846_v62 = vpop.f32.mrf.mxu3  ;;  %v20136_v54 = vpack.c.b16 %v17796_v48, %v17794_v55  ;;  %v20138_v55 = vld [vmem:[#allocation34_spill] sm:$0xff]  ;;  %v20139_v48 = vld [vmem:[#allocation33_spill] sm:$0xff] }
0x1d6e   : > { %v9448_v30 = vpop.f32.mrf.mxu1  ;;  %10463 = vmatpush.bf16.xpose.msra.mxu0 %v10409_v58  ;;  %v10149_v35 = vpack.c.bf16 %v9846_v62, %v9846_v62  ;;  %v20140_v15 = vpack.c.b16 %v20138_v55, %v20139_v48  ;;  %v20142_v62 = vld [vmem:[#allocation142_spill] sm:$0xff]  ;;  %v20147_v55 = vld [vmem:[#allocation29_spill] sm:$0xff] }
0x1d6f   : > { %v9990_v12 = vpack.c.bf16 %v9448_v30, %v9448_v30  ;;  %v10584_v20 = vsel %vm350_vm1, %v20136_v54, 0  ;;  %v10014_v57 = vpack.c.bf16 %v20142_v62, %v20142_v62  ;;  %v9556_v54 = vpop.f32.mrf.mxu2  ;;  %v20150_v62 = vld [vmem:[#allocation138_spill] sm:$0xff] }
0x1d70   : > { %v19156_v23 = vunpack.c.l.b16 %v10149_v35  ;;  %v10581_v58 = vsel %vm350_vm1, %v20140_v15, 0  ;;  %v20144_v35 = vld [vmem:[#allocation23_spill] sm:$0xff] }
0x1d71   : > { %v19144_v16 = vunpack.c.l.b16 %v9990_v12  ;;  %v11314_v47 = vunpack.c.l.b16 %v10014_v57  ;;  %v10012_v57 = vpack.c.bf16 %v20150_v62, %v20150_v62 }
0x1d73   : > { %v10400_v28 = vpack.c.b16 %v19144_v16, %v19142_v36  ;;  %v11312_v39 = vunpack.c.l.b16 %v10012_v57  ;;  %v9986_v36 = vpack.c.bf16 %v19065_v24, %v19065_v24  ;;  %v20197_v24 = vld [vmem:[#allocation85_spill] sm:$0xff] }
0x1d75   : > { %11100 = vmatpush.bf16.xpose.msrb.mxu1 %v11073_v14  ;;  %v9848_v6 = vpop.f32.mrf.mxu3 }
0x1d76   : > { %10613 = vmatpush.bf16.xpose.msrb.mxu0 %v10587_v60  ;;  %v9451_v27 = vpop.f32.mrf.mxu1  ;;  %v10150_v5 = vpack.c.bf16 %v9848_v6, %v9848_v6 }
0x1d77   : > { %v9991_v34 = vpack.c.bf16 %v9451_v27, %v9451_v27 }
0x1d78   : > { %v19162_v31 = vunpack.c.l.b16 %v10150_v5 }
0x1d79   : > { %v19170_v60 = vunpack.c.l.b16 %v9991_v34  ;;  %v11313_v34 = vunpack.c.l.b16 %v10013_v11  ;;  %v10011_v11 = vpack.c.bf16 %v20149_v43, %v20149_v43 }
0x1d7b   : > { %v11311_v19 = vunpack.c.l.b16 %v10011_v11 }
0x1d7d   : > { %11101 = vmatpush.bf16.xpose.msrb.mxu1 %v11070_v3  ;;  %v9851_v3 = vpop.f32.mrf.mxu3  ;;  %v11337_v57 = vpack.c.b16 %v11312_v39, %v11311_v19 }
0x1d7e   : > { %10614 = vmatpush.bf16.xpose.msrb.mxu0 %v10584_v20  ;;  %v9453_v14 = vpop.f32.mrf.mxu1  ;;  %v20143_v20 = vld [vmem:[#allocation24_spill] sm:$0xff] }
0x1d7f   : > { %v9992_v30 = vpack.c.bf16 %v9453_v14, %v9453_v14  ;;  %v20145_v6 = vpack.c.b16 %v20143_v20, %v20144_v35  ;;  %v20146_v14 = vld [vmem:[#allocation30_spill] sm:$0xff]  ;;  %v11338_v20 = vpack.c.b16 %v11314_v47, %v11313_v34  ;;  %v20154_v34 = vld [vmem:[#allocation28_spill] sm:$0xff]  ;;  %v20155_v47 = vld [vmem:[#allocation27_spill] sm:$0xff] }
0x1d80   : > { %v20148_v48 = vpack.c.b16 %v20146_v14, %v20147_v55  ;;  %v20152_v14 = vld [vmem:[#allocation21_spill] sm:$0xff] }
0x1d81   : > { %v19172_v12 = vunpack.c.l.b16 %v9992_v30  ;;  %v11064_v5 = vsel %vm350_vm1, %v20145_v6, 0  ;;  %v19193_v30 = vld [vmem:[%s19796_s2 + $0xdd8] sm:$0xf]  ;;  %v19212_v62 = vsel %vm350_vm1, %v11338_v20, 0  ;;  %v19222_v20 = vsel %vm350_vm1, %v11337_v57, 0 }
0x1d82   : > { %v10578_v15 = vsel %vm350_vm1, %v20148_v48, 0  ;;  %14611 = vmatmul.msk.bf16.vlgmr.msra.gmra.mxu0 %vm350_vm1, %v19193_v30  ;;  %v19246_v57 = vsel %vm350_vm1, %v11335_v37, 0  ;;  %v20163_v37 = vpack.c.b16 %v18970_v8, %v18968_v51 }
0x1d83   : > { %v10401_v27 = vpack.c.b16 %v19172_v12, %v19170_v60 }
0x1d85   : > { %11102 = vmatpush.bf16.xpose.msrb.mxu1 %v11067_v17  ;;  %v9853_v35 = vpop.f32.mrf.mxu3 }
0x1d86   : > { %10615 = vmatpush.bf16.xpose.msrb.mxu0 %v10581_v58  ;;  %v19184_v17 = vpop.f32.mrf.mxu1  ;;  %v10151_v58 = vpack.c.bf16 %v9851_v3, %v9851_v3  ;;  %v20151_v3 = vld [vmem:[#allocation22_spill] sm:$0xff] }
0x1d87   : > { %v20153_v55 = vpack.c.b16 %v20151_v3, %v20152_v14  ;;  %v10033_v3 = vpack.c.bf16 %v9556_v54, %v9556_v54  ;;  %v10032_v54 = vpack.c.bf16 %v9553_v32, %v9553_v32 }
0x1d88   : > { %v19201_v6 = vunpack.c.l.b16 %v10151_v58  ;;  %v20156_v58 = vpack.c.b16 %v20154_v34, %v20155_v47  ;;  %v20159_v34 = vpack.c.b16 %v20157_v22, %v20158_v63  ;;  %v19238_v22 = vsel %vm350_vm1, %v11336_v7, 0 }
0x1d89   : > { %v11061_v48 = vsel %vm350_vm1, %v20153_v55, 0  ;;  %v10516_v14 = vunpack.c.l.b16 %v10033_v3  ;;  %v10515_v39 = vunpack.c.l.b16 %v10032_v54  ;;  %v20162_v7 = vpack.c.b16 %v20160_v4, %v20161_v53  ;;  %v20164_v54 = vld [vmem:[#allocation134_spill] sm:$0xff] }
0x1d8a   : > { %v10572_v47 = vsel %vm350_vm1, %v20159_v34, 0  ;;  %v19258_v34 = vld [vmem:[%s19796_s2 + $0xdc0] sm:$0xf] }
0x1d8d   : > { %11103 = vmatpush.bf16.xpose.msrb.mxu1 %v11064_v5  ;;  %v10152_v5 = vpack.c.bf16 %v9853_v35, %v9853_v35  ;;  %v10575_v35 = vsel %vm350_vm1, %v20156_v58, 0  ;;  %v10031_v58 = vpack.c.bf16 %v19136_v0, %v19136_v0  ;;  %v19232_v3 = vpop.f32.mrf.mxu3 }
0x1d8e   : > { %10616 = vmatpush.bf16.xpose.msrb.mxu0 %v10578_v15  ;;  %v9558_v15 = vpop.f32.mrf.mxu2  ;;  %v19209_v43 = vpop.f32.mrf.mxu1 }
0x1d8f   : > { %v19207_v56 = vunpack.c.l.b16 %v10152_v5  ;;  %v10034_v11 = vpack.c.bf16 %v9558_v15, %v9558_v15  ;;  %v10514_v19 = vunpack.c.l.b16 %v10031_v58 }
0x1d91   : > { %v10872_v5 = vpack.c.b16 %v19207_v56, %v19201_v6  ;;  %v10517_v55 = vunpack.c.l.b16 %v10034_v11  ;;  %v10546_v63 = vpack.c.b16 %v10515_v39, %v10514_v19  ;;  %v20218_v56 = vld [vmem:[#allocation47_spill] sm:$0xff] }
0x1d93   : > { %v10547_v15 = vpack.c.b16 %v10517_v55, %v10516_v14  ;;  %v10566_v0 = vsel %vm350_vm1, %v10546_v63, 0  ;;  %v10744_v14 = vsel %vm350_vm1, %v20162_v7, 0 }
0x1d95   : > { %11104 = vmatpush.bf16.xpose.msrb.mxu1 %v11061_v48  ;;  %v19253_v55 = vpop.f32.mrf.mxu3 }
0x1d96   : > { %10617 = vmatpush.bf16.xpose.msrb.mxu0 %v10575_v35  ;;  %v9461_v48 = vpop.f32.mrf.mxu1  ;;  %v10569_v35 = vsel %vm350_vm1, %v10547_v15, 0  ;;  %v20165_v15 = vld [vmem:[#allocation133_spill] sm:$0xff] }
0x1d97   : > { %v20166_v19 = vpack.c.b16 %v20164_v54, %v20165_v15  ;;  %v9995_v4 = vpack.c.bf16 %v9461_v48, %v9461_v48  ;;  %v9994_v15 = vpack.c.bf16 %v19209_v43, %v19209_v43 }
0x1d99   : > { %v10741_v39 = vsel %vm350_vm1, %v20166_v19, 0  ;;  %v10385_v54 = vunpack.c.l.b16 %v9995_v4 }
0x1d9c   : > { %14620 = vmatmul.msk.bf16.vlgmr.msrb.gmra.mxu1 %vm350_vm1, %v19258_v34 }
0x1d9d   : > { %11398 = vmatpush.bf16.xpose.msra.mxu1 %v19212_v62 }
0x1d9e   : > { %10618 = vmatpush.bf16.xpose.msrb.mxu0 %v10572_v47  ;;  %v9463_v11 = vpop.f32.mrf.mxu1  ;;  %v19266_v47 = vsel %vm350_vm1, %v20163_v37, 0 }
0x1da5   : > { %11399 = vmatpush.bf16.xpose.msra.mxu1 %v19222_v20 }
0x1da6   : > { %10619 = vmatpush.bf16.xpose.msrb.mxu0 %v10569_v35  ;;  %v9466_v32 = vpop.f32.mrf.mxu1  ;;  %v9996_v35 = vpack.c.bf16 %v9463_v11, %v9463_v11  ;;  %v20169_v11 = vld [vmem:[#allocation130_spill] sm:$0xff] }
0x1da7   : > { %v9997_v26 = vpack.c.bf16 %v9466_v32, %v9466_v32  ;;  %v19273_v32 = vpop.f32.mrf.mxu3 }
0x1da8   : > { %v10386_v51 = vunpack.c.l.b16 %v9996_v35 }
0x1da9   : > { %v10387_v63 = vunpack.c.l.b16 %v9997_v26  ;;  %v20170_v26 = vld [vmem:[#allocation129_spill] sm:$0xff] }
0x1daa   : > { %v10403_v19 = vpack.c.b16 %v10386_v51, %v10385_v54  ;;  %v20175_v51 = vld [vmem:[#allocation125_spill] sm:$0xff] }
0x1dad   : > { %11400 = vmatpush.bf16.xpose.msra.mxu1 %v19238_v22 }
0x1dae   : > { %10620 = vmatpush.bf16.xpose.msrb.mxu0 %v10566_v0  ;;  %v9468_v46 = vpop.f32.mrf.mxu1 }
0x1daf   : > { %v9998_v58 = vpack.c.bf16 %v9468_v46, %v9468_v46  ;;  %v9863_v35 = vpop.f32.mrf.mxu3 }
0x1db1   : > { %v10388_v0 = vunpack.c.l.b16 %v9998_v58  ;;  %v20171_v58 = vpack.c.b16 %v20169_v11, %v20170_v26 }
0x1db3   : > { %v10404_v53 = vpack.c.b16 %v10388_v0, %v10387_v63  ;;  %v10738_v48 = vsel %vm350_vm1, %v20171_v58, 0  ;;  %v10384_v63 = vunpack.c.l.b16 %v9994_v15  ;;  %v10451_v0 = vsel %vm350_vm1, %v10403_v19, 0  ;;  %v19306_v58 = vld [vmem:[%s19796_s2 + $0xde8] sm:$0xf] }
0x1db5   : > { %11401 = vmatpush.bf16.xpose.msra.mxu1 %v19246_v57  ;;  %v10454_v8 = vsel %vm350_vm1, %v10404_v53, 0  ;;  %v20172_v53 = vld [vmem:[#allocation152_spill] sm:$0xff]  ;;  %14613 = vmatmul.msk.bf16.vlgmr.msrb.gmra.mxu0 %vm350_vm1, %v19306_v58 }
0x1db6   : > { %10770 = vmatpush.bf16.xpose.msra.mxu0 %v10744_v14  ;;  %v9471_v7 = vpop.f32.mrf.mxu1  ;;  %10469 = vmatpush.bf16.xpose.msra.mxu2 %v10454_v8  ;;  %v20167_v14 = vld [vmem:[#allocation157_spill] sm:$0xff]  ;;  %v20173_v8 = vld [vmem:[#allocation151_spill] sm:$0xff] }
0x1db7   : > { %v20168_v46 = vpack.c.b16 %v18943_v40, %v20167_v14  ;;  %v9999_v40 = vpack.c.bf16 %v9471_v7, %v9471_v7  ;;  %v20174_v14 = vpack.c.b16 %v20172_v53, %v20173_v8  ;;  %v20179_v53 = vld [vmem:[#allocation61_spill] sm:$0xff] }
0x1db9   : > { %v19280_v37 = vsel %vm350_vm1, %v20168_v46, 0  ;;  %v19296_v46 = vsel %vm350_vm1, %v20174_v14, 0  ;;  %v11299_v26 = vunpack.c.l.b16 %v9999_v40 }
0x1dbd   : > { %11402 = vmatpush.bf16.xpose.msra.mxu1 %v19266_v47 }
0x1dbe   : > { %10771 = vmatpush.bf16.xpose.msra.mxu0 %v10741_v39  ;;  %v9993_v39 = vpack.c.bf16 %v19184_v17, %v19184_v17  ;;  %v9473_v4 = vpop.f32.mrf.mxu1  ;;  %10470 = vmatpush.bf16.xpose.msra.mxu2 %v10451_v0  ;;  %v20176_v17 = vld [vmem:[#allocation124_spill] sm:$0xff]  ;;  %v9866_v0 = vpop.f32.mrf.mxu3 }
0x1dbf   : > { %v10000_v43 = vpack.c.bf16 %v9473_v4, %v9473_v4  ;;  %v20177_v7 = vpack.c.b16 %v20175_v51, %v20176_v17  ;;  %v20178_v4 = vld [vmem:[#allocation62_spill] sm:$0xff]  ;;  %v20184_v17 = vld [vmem:[#allocation96_spill] sm:$0xff]  ;;  %v10157_v60 = vpack.c.bf16 %v9866_v0, %v9866_v0  ;;  %v20193_v0 = vld [vmem:[#allocation107_spill] sm:$0xff] }
0x1dc0   : > { %v10383_v11 = vunpack.c.l.b16 %v9993_v39  ;;  %v20180_v8 = vpack.c.b16 %v20178_v4, %v20179_v53 }
0x1dc1   : > { %v10735_v54 = vsel %vm350_vm1, %v20177_v7, 0  ;;  %v11300_v15 = vunpack.c.l.b16 %v10000_v43  ;;  %v20185_v7 = vld [vmem:[#allocation95_spill] sm:$0xff] }
0x1dc2   : > { %v11553_v14 = vsel %vm350_vm1, %v20180_v8, 0  ;;  %v9988_v8 = vpack.c.bf16 %v19103_v38, %v19103_v38 }
0x1dc3   : > { %v11331_v19 = vpack.c.b16 %v11300_v15, %v11299_v26  ;;  %v10445_v26 = vsel %vm350_vm1, %v10401_v27, 0  ;;  %v20187_v15 = vld [vmem:[#allocation113_spill] sm:$0xff]  ;;  %v9987_v27 = vpack.c.bf16 %v19083_v9, %v19083_v9 }
0x1dc5   : > { %11403 = vmatpush.bf16.xpose.msra.mxu1 %v19280_v37  ;;  %v19312_v40 = vsel %vm350_vm1, %v11331_v19, 0  ;;  %v20188_v19 = vld [vmem:[#allocation112_spill] sm:$0xff] }
0x1dc6   : > { %10772 = vmatpush.bf16.xpose.msra.mxu0 %v10738_v48  ;;  %v10402_v48 = vpack.c.b16 %v10384_v63, %v10383_v11  ;;  %v20181_v63 = vld [vmem:[#allocation119_spill] sm:$0xff]  ;;  %v20182_v11 = vld [vmem:[#allocation118_spill] sm:$0xff]  ;;  %v9868_v53 = vpop.f32.mrf.mxu3 }
0x1dc7   : > { %v20183_v43 = vpack.c.b16 %v20181_v63, %v20182_v11  ;;  %v10158_v12 = vpack.c.bf16 %v9868_v53, %v9868_v53  ;;  %v10442_v63 = vsel %vm350_vm1, %v10400_v28, 0  ;;  %v10858_v11 = vunpack.c.l.b16 %v10157_v60 }
0x1dc8   : > { %v10448_v39 = vsel %vm350_vm1, %v10402_v48, 0  ;;  %v10155_v28 = vpack.c.bf16 %v19273_v32, %v19273_v32  ;;  %v20199_v32 = vld [vmem:[#allocation102_spill] sm:$0xff] }
0x1dc9   : > { %10471 = vmatpush.bf16.xpose.msra.mxu2 %v10448_v39  ;;  %v10732_v51 = vsel %vm350_vm1, %v20183_v43, 0  ;;  %v20189_v39 = vpack.c.b16 %v20187_v15, %v20188_v19  ;;  %v10859_v43 = vunpack.c.l.b16 %v10158_v12  ;;  %v10156_v15 = vpack.c.bf16 %v9863_v35, %v9863_v35  ;;  %v20200_v35 = vld [vmem:[#allocation101_spill] sm:$0xff] }
0x1dcb   : > { %v10729_v4 = vsel %vm350_vm1, %v20189_v39, 0  ;;  %v10875_v19 = vpack.c.b16 %v10859_v43, %v10858_v11  ;;  %v9985_v39 = vpack.c.bf16 %v19052_v25, %v19052_v25  ;;  %v10857_v60 = vunpack.c.l.b16 %v10156_v15  ;;  %v20203_v15 = vld [vmem:[#allocation81_spill] sm:$0xff] }
0x1dcc   : > { %v20201_v11 = vpack.c.b16 %v20199_v32, %v20200_v35  ;;  %v9984_v25 = vpack.c.bf16 %v19036_v1, %v19036_v1  ;;  %v20212_v32 = vld [vmem:[#allocation49_spill] sm:$0xff] }
0x1dcd   : > { %11404 = vmatpush.bf16.xpose.msra.mxu1 %v19296_v46  ;;  %v10925_v12 = vsel %vm350_vm1, %v10875_v19, 0 }
0x1dce   : > { %10773 = vmatpush.bf16.xpose.msra.mxu0 %v10735_v54  ;;  %v20186_v54 = vpack.c.b16 %v20184_v17, %v20185_v7  ;;  %v20191_v17 = vld [vmem:[#allocation91_spill] sm:$0xff]  ;;  %v10723_v43 = vsel %vm350_vm1, %v20201_v11, 0 }
0x1dd0   : > { %v11550_v48 = vsel %vm350_vm1, %v20186_v54, 0  ;;  %v20194_v54 = vld [vmem:[#allocation106_spill] sm:$0xff] }
0x1dd1   : > { %10472 = vmatpush.bf16.xpose.msra.mxu2 %v10445_v26  ;;  %v20190_v26 = vld [vmem:[#allocation92_spill] sm:$0xff] }
0x1dd2   : > { %v20192_v7 = vpack.c.b16 %v20190_v26, %v20191_v17  ;;  %v10153_v17 = vpack.c.bf16 %v19232_v3, %v19232_v3 }
0x1dd4   : > { %v11547_v38 = vsel %vm350_vm1, %v20192_v7, 0  ;;  %v10154_v7 = vpack.c.bf16 %v19253_v55, %v19253_v55 }
0x1dd5   : > { %11405 = vmatpush.bf16.xpose.msra.mxu1 %v19312_v40 }
0x1dd6   : > { %10774 = vmatpush.bf16.xpose.msra.mxu0 %v10732_v51  ;;  %v10377_v51 = vunpack.c.l.b16 %v9987_v27  ;;  %v10375_v27 = vunpack.c.l.b16 %v9985_v39 }
0x1dd9   : > { %10473 = vmatpush.bf16.xpose.msra.mxu2 %v10442_v63  ;;  %v20196_v63 = vld [vmem:[#allocation86_spill] sm:$0xff] }
0x1ddd   : > { %11568 = vmatpush.bf16.xpose.msrb.mxu1 %v11553_v14  ;;  %v10378_v14 = vunpack.c.l.b16 %v9988_v8  ;;  %v10856_v8 = vunpack.c.l.b16 %v10155_v28  ;;  %v20202_v28 = vld [vmem:[#allocation82_spill] sm:$0xff] }
0x1dde   : > { %10775 = vmatpush.bf16.xpose.msra.mxu0 %v10729_v4  ;;  %v10376_v4 = vunpack.c.l.b16 %v9986_v36  ;;  %v10855_v36 = vunpack.c.l.b16 %v10154_v7  ;;  %v20204_v19 = vpack.c.b16 %v20202_v28, %v20203_v15  ;;  %v20225_v28 = vld [vmem:[#allocation43_spill] sm:$0xff] }
0x1ddf   : > { %v10399_v16 = vpack.c.b16 %v10378_v14, %v10377_v51  ;;  %v20198_v14 = vpack.c.b16 %v20196_v63, %v20197_v24  ;;  %v20209_v63 = vld [vmem:[#allocation77_spill] sm:$0xff] }
0x1de0   : > { %v10398_v26 = vpack.c.b16 %v10376_v4, %v10375_v27  ;;  %v11541_v3 = vsel %vm350_vm1, %v20204_v19, 0  ;;  %v20205_v4 = vld [vmem:[#allocation32_spill] sm:$0xff]  ;;  %v20208_v27 = vld [vmem:[#allocation78_spill] sm:$0xff] }
0x1de1   : > { %v10439_v53 = vsel %vm350_vm1, %v10399_v16, 0  ;;  %v11544_v51 = vsel %vm350_vm1, %v20198_v14, 0  ;;  %v20210_v24 = vpack.c.b16 %v20208_v27, %v20209_v63  ;;  %v20236_v63 = vld [vmem:[#allocation98_spill] sm:$0xff] }
0x1de2   : > { %10474 = vmatpush.bf16.xpose.msra.mxu2 %v10439_v53  ;;  %v20206_v53 = vld [vmem:[#allocation31_spill] sm:$0xff] }
0x1de3   : > { %v11538_v14 = vsel %vm350_vm1, %v20210_v24, 0  ;;  %v20237_v24 = vld [vmem:[#allocation97_spill] sm:$0xff] }
0x1de5   : > { %11569 = vmatpush.bf16.xpose.msrb.mxu1 %v11550_v48  ;;  %v20195_v48 = vpack.c.b16 %v20193_v0, %v20194_v54  ;;  %v9983_v0 = vpack.c.bf16 %v19017_v18, %v19017_v18  ;;  %v10374_v54 = vunpack.c.l.b16 %v9984_v25  ;;  %v20214_v25 = vld [vmem:[#allocation74_spill] sm:$0xff] }
0x1de7   : > { %v10726_v9 = vsel %vm350_vm1, %v20195_v48, 0  ;;  %v10436_v48 = vsel %vm350_vm1, %v10398_v26, 0  ;;  %v10373_v16 = vunpack.c.l.b16 %v9983_v0  ;;  %v20215_v26 = vld [vmem:[#allocation73_spill] sm:$0xff]  ;;  %v20220_v0 = vpack.c.b16 %v19162_v31, %v19156_v23  ;;  %v20228_v31 = vld [vmem:[#allocation42_spill] sm:$0xff] }
0x1de8   : > { %10776 = vmatpush.bf16.xpose.msra.mxu0 %v10726_v9  ;;  %v10854_v9 = vunpack.c.l.b16 %v10153_v17  ;;  %v20216_v17 = vpack.c.b16 %v20214_v25, %v20215_v26 }
0x1de9   : > { %v10397_v55 = vpack.c.b16 %v10374_v54, %v10373_v16  ;;  %v10913_v54 = vsel %vm350_vm1, %v20220_v0, 0  ;;  %v20224_v16 = vld [vmem:[#allocation44_spill] sm:$0xff]  ;;  %v20248_v0 = vld [vmem:[#allocation122_spill] sm:$0xff] }
0x1dea   : > { %10475 = vmatpush.bf16.xpose.msra.mxu2 %v10436_v48  ;;  %v10873_v39 = vpack.c.b16 %v10855_v36, %v10854_v9  ;;  %v11535_v7 = vsel %vm350_vm1, %v20216_v17, 0  ;;  %v20221_v48 = vld [vmem:[#allocation70_spill] sm:$0xff]  ;;  %v20222_v9 = vld [vmem:[#allocation69_spill] sm:$0xff]  ;;  %v20226_v15 = vpack.c.b16 %v20224_v16, %v20225_v28 }
0x1deb   : > { %v10433_v18 = vsel %vm350_vm1, %v10397_v55, 0  ;;  %v20223_v36 = vpack.c.b16 %v20221_v48, %v20222_v9  ;;  %v20229_v55 = vld [vmem:[#allocation41_spill] sm:$0xff]  ;;  %v20244_v17 = vld [vmem:[#allocation94_spill] sm:$0xff]  ;;  %v20249_v9 = vld [vmem:[#allocation36_spill] sm:$0xff] }
0x1dec   : > { %v10602_v19 = vsel %vm350_vm1, %v20226_v15, 0 }
0x1ded   : > { %11570 = vmatpush.bf16.xpose.msrb.mxu1 %v11547_v38  ;;  %v10874_v38 = vpack.c.b16 %v10857_v60, %v10856_v8  ;;  %v20207_v8 = vpack.c.b16 %v20205_v4, %v20206_v53  ;;  %v20231_v4 = vpack.c.b16 %v19101_v52, %v19087_v21  ;;  %v20239_v52 = vld [vmem:[#allocation123_spill] sm:$0xff] }
0x1def   : > { %v10922_v1 = vsel %vm350_vm1, %v10874_v38, 0  ;;  %v10611_v60 = vsel %vm350_vm1, %v20207_v8, 0  ;;  %v20217_v38 = vld [vmem:[#allocation48_spill] sm:$0xff]  ;;  %v10907_v53 = vsel %vm350_vm1, %v20231_v4, 0 }
0x1df0   : > { %10777 = vmatpush.bf16.xpose.msra.mxu0 %v10723_v43  ;;  %v10916_v43 = vsel %vm350_vm1, %v10872_v5, 0  ;;  %v20219_v6 = vpack.c.b16 %v20217_v38, %v20218_v56  ;;  %v20232_v8 = vld [vmem:[#allocation40_spill] sm:$0xff] }
0x1df2   : > { %10476 = vmatpush.bf16.xpose.msra.mxu2 %v10433_v18  ;;  %v10605_v5 = vsel %vm350_vm1, %v20219_v6, 0  ;;  %v20247_v6 = vld [vmem:[#allocation117_spill] sm:$0xff] }
0x1df5   : > { %11571 = vmatpush.bf16.xpose.msrb.mxu1 %v11544_v51  ;;  %v20211_v51 = vld [vmem:[#allocation50_spill] sm:$0xff] }
0x1df6   : > { %v20213_v35 = vpack.c.b16 %v20211_v51, %v20212_v32  ;;  %v10125_v51 = vpack.c.bf16 %v20239_v52, %v20239_v52  ;;  %v20240_v32 = vld [vmem:[#allocation128_spill] sm:$0xff] }
0x1df8   : > { %10940 = vmatpush.bf16.xpose.msrb.mxu0 %v10925_v12  ;;  %v10919_v12 = vsel %vm350_vm1, %v10873_v39, 0  ;;  %v10608_v11 = vsel %vm350_vm1, %v20213_v35, 0  ;;  %v20230_v39 = vpack.c.b16 %v20228_v31, %v20229_v55  ;;  %v10126_v35 = vpack.c.bf16 %v20240_v32, %v20240_v32  ;;  %v20255_v55 = vld [vmem:[#allocation111_spill] sm:$0xff] }
0x1df9   : > { %14612 = vmatmul.msk.bf16.vlgmr.msra.gmra.mxu2 %vm350_vm1, %v19193_v30  ;;  %v19408_v30 = vld [vmem:[%s19796_s2 + $0xdf8] sm:$0xf] }
0x1dfa   : > { %10626 = vmatpush.bf16.xpose.msrb.mxu2 %v10611_v60  ;;  %14615 = vmatmul.msk.bf16.vlgmr.msra.gmra.mxu0 %vm350_vm1, %v19408_v30  ;;  %v10599_v18 = vsel %vm350_vm1, %v20230_v39, 0  ;;  %v20233_v60 = vld [vmem:[#allocation39_spill] sm:$0xff]  ;;  %v10702_v26 = vunpack.c.l.b16 %v10126_v35  ;;  %v10121_v39 = vpack.c.bf16 %v20255_v55, %v20255_v55 }
0x1dfd   : > { %11572 = vmatpush.bf16.xpose.msrb.mxu1 %v11541_v3  ;;  %v20227_v3 = vpack.c.b16 %v19125_v61, %v19115_v49  ;;  %v20235_v61 = vpack.c.b16 %v19063_v50, %v19057_v45  ;;  %v10701_v50 = vunpack.c.l.b16 %v10125_v51 }
0x1dff   : > { %v10910_v23 = vsel %vm350_vm1, %v20227_v3, 0  ;;  %v10904_v27 = vsel %vm350_vm1, %v20235_v61, 0  ;;  %v10718_v48 = vpack.c.b16 %v10702_v26, %v10701_v50  ;;  %v20253_v3 = vld [vmem:[#allocation87_spill] sm:$0xff] }
0x1e00   : > { %10941 = vmatpush.bf16.xpose.msrb.mxu0 %v10922_v1  ;;  %v11532_v1 = vsel %vm350_vm1, %v20223_v36, 0  ;;  %v20250_v36 = vld [vmem:[#allocation35_spill] sm:$0xff] }
0x1e01   : > { %v10768_v15 = vsel %vm350_vm1, %v10718_v48, 0  ;;  %v20258_v61 = vld [vmem:[#allocation83_spill] sm:$0xff] }
0x1e02   : > { %10627 = vmatpush.bf16.xpose.msrb.mxu2 %v10608_v11  ;;  %v20241_v11 = vld [vmem:[#allocation38_spill] sm:$0xff] }
0x1e05   : > { %11573 = vmatpush.bf16.xpose.msrb.mxu1 %v11538_v14  ;;  %v20238_v14 = vpack.c.b16 %v20236_v63, %v20237_v24  ;;  %v20260_v24 = vld [vmem:[#allocation105_spill] sm:$0xff] }
0x1e07   : > { %v11215_v21 = vsel %vm350_vm1, %v20238_v14, 0  ;;  %v10119_v14 = vpack.c.bf16 %v20260_v24, %v20260_v24  ;;  %v10025_v24 = vpack.c.bf16 %v19001_v2, %v19001_v2 }
0x1e08   : > { %10942 = vmatpush.bf16.xpose.msrb.mxu0 %v10919_v12  ;;  %v20234_v12 = vpack.c.b16 %v20232_v8, %v20233_v60  ;;  %v10697_v8 = vunpack.c.l.b16 %v10121_v39  ;;  %v19525_v39 = vld [vmem:[%s19796_s2 + $0xde0] sm:$0xf] }
0x1e09   : > { %v10695_v32 = vunpack.c.l.b16 %v10119_v14  ;;  %14623 = vmatmul.msk.bf16.vlgmr.msra.gmra.mxu1 %vm350_vm1, %v19525_v39  ;;  %v10026_v14 = vpack.c.bf16 %v19019_v29, %v19019_v29 }
0x1e0a   : > { %10628 = vmatpush.bf16.xpose.msrb.mxu2 %v10605_v5  ;;  %v10596_v49 = vsel %vm350_vm1, %v20234_v12, 0  ;;  %v10123_v5 = vpack.c.bf16 %v20247_v6, %v20247_v6  ;;  %v19504_v6 = vpop.f32.mrf.mxu1 }
0x1e0b   : > { %v11326_v2 = vunpack.c.l.b16 %v10026_v14  ;;  %v19607_v14 = vld [vmem:[%s19796_s2 + $0xdf0] sm:$0xf] }
0x1e0c   : > { %v10699_v28 = vunpack.c.l.b16 %v10123_v5  ;;  %v20268_v5 = vld [vmem:[#allocation155_spill] sm:$0xff] }
0x1e0d   : > { %11574 = vmatpush.bf16.xpose.msrb.mxu1 %v11535_v7  ;;  %v20245_v7 = vld [vmem:[#allocation93_spill] sm:$0xff] }
0x1e0e   : > { %v20246_v38 = vpack.c.b16 %v20244_v17, %v20245_v7  ;;  %v20265_v17 = vld [vmem:[#allocation76_spill] sm:$0xff]  ;;  %v20266_v7 = vld [vmem:[#allocation75_spill] sm:$0xff] }
0x1e10   : > { %10943 = vmatpush.bf16.xpose.msrb.mxu0 %v10916_v43  ;;  %v20242_v43 = vld [vmem:[#allocation37_spill] sm:$0xff]  ;;  %v11212_v56 = vsel %vm350_vm1, %v20246_v38, 0  ;;  %v20267_v38 = vpack.c.b16 %v20265_v17, %v20266_v7 }
0x1e11   : > { %v20243_v25 = vpack.c.b16 %v20241_v11, %v20242_v43  ;;  %v20262_v11 = vld [vmem:[#allocation80_spill] sm:$0xff]  ;;  %v20263_v43 = vld [vmem:[#allocation79_spill] sm:$0xff] }
0x1e12   : > { %10629 = vmatpush.bf16.xpose.msrb.mxu2 %v10602_v19  ;;  %v20252_v19 = vld [vmem:[#allocation88_spill] sm:$0xff] }
0x1e13   : > { %v10593_v45 = vsel %vm350_vm1, %v20243_v25, 0  ;;  %v20264_v25 = vpack.c.b16 %v20262_v11, %v20263_v43  ;;  %v10023_v43 = vpack.c.bf16 %v18973_v10, %v18973_v10 }
0x1e15   : > { %11575 = vmatpush.bf16.xpose.msrb.mxu1 %v11532_v1  ;;  %v20251_v1 = vpack.c.b16 %v20249_v9, %v20250_v36  ;;  %v20271_v9 = vld [vmem:[#allocation72_spill] sm:$0xff]  ;;  %v20272_v36 = vld [vmem:[#allocation71_spill] sm:$0xff] }
0x1e17   : > { %v10590_v16 = vsel %vm350_vm1, %v20251_v1, 0  ;;  %v20273_v1 = vpack.c.b16 %v20271_v9, %v20272_v36  ;;  %v20291_v36 = vld [vmem:[#allocation159_spill] sm:$0xff] }
0x1e18   : > { %10944 = vmatpush.bf16.xpose.msrb.mxu0 %v10913_v54  ;;  %v10124_v54 = vpack.c.bf16 %v20248_v0, %v20248_v0  ;;  %v20269_v0 = vld [vmem:[#allocation154_spill] sm:$0xff] }
0x1e1a   : > { %10630 = vmatpush.bf16.xpose.msrb.mxu2 %v10599_v18  ;;  %v20256_v18 = vld [vmem:[#allocation116_spill] sm:$0xff] }
0x1e1b   : > { %v10122_v4 = vpack.c.bf16 %v20256_v18, %v20256_v18  ;;  %v20277_v18 = vld [vmem:[#allocation68_spill] sm:$0xff] }
0x1e1c   : > { %14626 = vmatmul.msk.bf16.vlgmr.msrb.gmra.mxu1 %vm350_vm1, %v19607_v14 }
0x1e1d   : > { %v10698_v60 = vunpack.c.l.b16 %v10122_v4  ;;  %v20278_v4 = vld [vmem:[#allocation67_spill] sm:$0xff] }
0x1e1f   : > { %v10716_v51 = vpack.c.b16 %v10698_v60, %v10697_v8  ;;  %v20280_v60 = vpack.c.b16 %v19089_v33, %v19085_v41  ;;  %v19551_v41 = vld [vmem:[%s19796_s2 + $0xdd0] sm:$0xf]  ;;  %v20281_v33 = vld [vmem:[#allocation145_spill] sm:$0xff] }
0x1e20   : > { %10945 = vmatpush.bf16.xpose.msrb.mxu0 %v10910_v23  ;;  %v20254_v23 = vpack.c.b16 %v20252_v19, %v20253_v3  ;;  %v10028_v19 = vpack.c.bf16 %v19054_v42, %v19054_v42  ;;  %v20274_v3 = vld [vmem:[#allocation149_spill] sm:$0xff] }
0x1e21   : > { %v10762_v35 = vsel %vm350_vm1, %v10716_v51, 0 }
0x1e22   : > { %10631 = vmatpush.bf16.xpose.msrb.mxu2 %v10596_v49  ;;  %v11209_v31 = vsel %vm350_vm1, %v20254_v23, 0  ;;  %v20257_v49 = vld [vmem:[#allocation84_spill] sm:$0xff]  ;;  %v11328_v8 = vunpack.c.l.b16 %v10028_v19 }
0x1e23   : > { %v20275_v23 = vld [vmem:[#allocation148_spill] sm:$0xff] }
0x1e28   : > { %10946 = vmatpush.bf16.xpose.msrb.mxu0 %v10907_v53 }
0x1e2a   : > { %10632 = vmatpush.bf16.xpose.msrb.mxu2 %v10593_v45  ;;  %v11203_v45 = vsel %vm350_vm1, %v20264_v25, 0  ;;  %v10024_v25 = vpack.c.bf16 %v18981_v59, %v18981_v59  ;;  %v20290_v59 = vld [vmem:[#allocation158_spill] sm:$0xff] }
0x1e2b   : > { %v10021_v9 = vpack.c.bf16 %v20290_v59, %v20290_v59 }
0x1e30   : > { %10947 = vmatpush.bf16.xpose.msrb.mxu0 %v10904_v27  ;;  %v20259_v27 = vpack.c.b16 %v20257_v49, %v20258_v61  ;;  %v19540_v61 = vpop.f32.mrf.mxu0 }
0x1e32   : > { %10633 = vmatpush.bf16.xpose.msrb.mxu2 %v10590_v16  ;;  %v11206_v63 = vsel %vm350_vm1, %v20259_v27, 0  ;;  %v11197_v16 = vsel %vm350_vm1, %v20273_v1, 0  ;;  %v10022_v1 = vpack.c.bf16 %v20291_v36, %v20291_v36 }
0x1e37   : > { %14618 = vmatmul.msk.bf16.vlgmr.msrb.gmra.mxu0 %vm350_vm1, %v19134_v44  ;;  %v10700_v44 = vunpack.c.l.b16 %v10124_v54  ;;  %v20270_v54 = vpack.c.b16 %v20268_v5, %v20269_v0 }
0x1e38   : > { %11241 = vmatpush.bf16.xpose.msra.mxu0 %v11215_v21  ;;  %v20261_v21 = vld [vmem:[#allocation110_spill] sm:$0xff]  ;;  %v10310_v29 = vpop.f32.mrf.mxu0 }
0x1e39   : > { %v10717_v53 = vpack.c.b16 %v10700_v44, %v10699_v28  ;;  %14614 = vmatmul.msk.bf16.vlgmr.msrb.gmra.mxu2 %vm350_vm1, %v19306_v58  ;;  %v10120_v52 = vpack.c.bf16 %v20261_v21, %v20261_v21  ;;  %v10756_v48 = vsel %vm350_vm1, %v20270_v54, 0  ;;  %v10321_v28 = vpop.f32.mrf.mxu2  ;;  %v10938_v44 = vpop.f32.mrf.mxu1  ;;  %v11323_v54 = vunpack.c.l.b16 %v10023_v43  ;;  %v20303_v29 = vld [vmem:[#allocation13_spill] sm:$0xff] }
0x1e3a   : > { %10783 = vmatpush.bf16.xpose.msra.mxu2 %v10768_v15  ;;  %v10027_v15 = vpack.c.bf16 %v19042_v13, %v19042_v13  ;;  %v20279_v13 = vpack.c.b16 %v20277_v18, %v20278_v4  ;;  %v20293_v44 = vld [vmem:[#allocation17_spill] sm:$0xff]  ;;  %v20296_v4 = vld [vmem:[#allocation156_spill] sm:$0xff] }
0x1e3b   : > { %v10765_v12 = vsel %vm350_vm1, %v10717_v53, 0  ;;  %v10696_v58 = vunpack.c.l.b16 %v10120_v52  ;;  %v20282_v52 = vld [vmem:[#allocation144_spill] sm:$0xff] }
0x1e3c   : > { %v11194_v53 = vsel %vm350_vm1, %v20279_v13, 0  ;;  %v11327_v42 = vunpack.c.l.b16 %v10027_v15  ;;  %v20283_v51 = vpack.c.b16 %v20281_v33, %v20282_v52  ;;  %v10020_v13 = vpack.c.bf16 %v20296_v4, %v20296_v4  ;;  %v20301_v52 = vld [vmem:[#allocation150_spill] sm:$0xff] }
0x1e3d   : > { %v10715_v50 = vpack.c.b16 %v10696_v58, %v10695_v32  ;;  %v11325_v58 = vunpack.c.l.b16 %v10025_v24 }
0x1e3e   : > { %v11345_v21 = vpack.c.b16 %v11328_v8, %v11327_v42  ;;  %v10750_v32 = vsel %vm350_vm1, %v20283_v51, 0  ;;  %v20298_v42 = vld [vmem:[#allocation15_spill] sm:$0xff]  ;;  %v10018_v51 = vpack.c.bf16 %v20301_v52, %v20301_v52 }
0x1e3f   : > { %v10759_v26 = vsel %vm350_vm1, %v10715_v50, 0  ;;  %v20284_v50 = vld [vmem:[#allocation141_spill] sm:$0xff] }
0x1e40   : > { %11242 = vmatpush.bf16.xpose.msra.mxu0 %v11212_v56  ;;  %v11200_v56 = vsel %vm350_vm1, %v20267_v38, 0  ;;  %v20287_v38 = vld [vmem:[#allocation20_spill] sm:$0xff] }
0x1e41   : > { %v10323_v49 = vpop.f32.mrf.mxu2  ;;  %v11106_v27 = vpop.f32.mrf.mxu1 }
0x1e42   : > { %10784 = vmatpush.bf16.xpose.msra.mxu2 %v10765_v12  ;;  %v19537_v12 = vsel %vm350_vm1, %v20280_v60, 0 }
0x1e48   : > { %11243 = vmatpush.bf16.xpose.msra.mxu0 %v11209_v31  ;;  %v20276_v31 = vpack.c.b16 %v20274_v3, %v20275_v23  ;;  %v11321_v3 = vunpack.c.l.b16 %v10021_v9  ;;  %v11322_v23 = vunpack.c.l.b16 %v10022_v1 }
0x1e49   : > { %v11108_v11 = vpop.f32.mrf.mxu1 }
0x1e4a   : > { %10785 = vmatpush.bf16.xpose.msra.mxu2 %v10762_v35  ;;  %v10753_v55 = vsel %vm350_vm1, %v20276_v31, 0  ;;  %v19560_v35 = vsel %vm350_vm1, %v11345_v21, 0  ;;  %v20300_v21 = vld [vmem:[#allocation147_spill] sm:$0xff] }
0x1e4b   : > { %v10017_v33 = vpack.c.bf16 %v20300_v21, %v20300_v21  ;;  %v20319_v21 = vld [vmem:[#allocation136_spill] sm:$0xff] }
0x1e50   : > { %11244 = vmatpush.bf16.xpose.msra.mxu0 %v11206_v63  ;;  %v19542_v63 = vadd.f32 %v11106_v27, %v10321_v28  ;;  %v20292_v28 = vld [vmem:[#allocation18_spill] sm:$0xff]  ;;  %v11320_v27 = vunpack.c.l.b16 %v10020_v13  ;;  %v20313_v13 = vld [vmem:[#allocation7_spill] sm:$0xff] }
0x1e51   : > { %v20294_v15 = vpack.c.b16 %v20292_v28, %v20293_v44 }
0x1e52   : > { %10786 = vmatpush.bf16.xpose.msra.mxu2 %v10759_v26  ;;  %v20285_v26 = vld [vmem:[#allocation140_spill] sm:$0xff] }
0x1e53   : > { %v20286_v17 = vpack.c.b16 %v20284_v50, %v20285_v26  ;;  %v11055_v19 = vsel %vm350_vm1, %v20294_v15, 0  ;;  %v20305_v26 = vld [vmem:[#allocation143_spill] sm:$0xff]  ;;  %v20310_v15 = vld [vmem:[#allocation10_spill] sm:$0xff] }
0x1e55   : > { %v10747_v7 = vsel %vm350_vm1, %v20286_v17, 0  ;;  %v10015_v17 = vpack.c.bf16 %v20305_v26, %v20305_v26 }
0x1e57   : > { %v11315_v9 = vunpack.c.l.b16 %v10015_v17  ;;  %v20329_v17 = vld [vmem:[#allocation120_spill] sm:$0xff] }
0x1e58   : > { %11245 = vmatpush.bf16.xpose.msra.mxu0 %v11203_v45  ;;  %v11344_v45 = vpack.c.b16 %v11326_v2, %v11325_v58  ;;  %v19616_v58 = vpop.f32.mrf.mxu0  ;;  %v20302_v2 = vld [vmem:[#allocation14_spill] sm:$0xff] }
0x1e59   : > { %v20304_v11 = vpack.c.b16 %v20302_v2, %v20303_v29 }
0x1e5a   : > { %10787 = vmatpush.bf16.xpose.msra.mxu2 %v10756_v48  ;;  %v11324_v48 = vunpack.c.l.b16 %v10024_v25  ;;  %v19576_v10 = vsel %vm350_vm1, %v11344_v45, 0  ;;  %v11317_v25 = vunpack.c.l.b16 %v10017_v33  ;;  %v11318_v45 = vunpack.c.l.b16 %v10018_v51  ;;  %v20320_v33 = vld [vmem:[#allocation135_spill] sm:$0xff] }
0x1e5b   : > { %v11049_v43 = vsel %vm350_vm1, %v20304_v11, 0  ;;  %v20321_v52 = vpack.c.b16 %v20319_v21, %v20320_v33 }
0x1e5d   : > { %v11239_v51 = vsel %vm350_vm1, %v20321_v52, 0 }
0x1e60   : > { %11246 = vmatpush.bf16.xpose.msra.mxu0 %v11200_v56  ;;  %v20288_v56 = vld [vmem:[#allocation19_spill] sm:$0xff] }
0x1e61   : > { %v20289_v5 = vpack.c.b16 %v20287_v38, %v20288_v56  ;;  %v11340_v56 = vpack.c.b16 %v11318_v45, %v11317_v25  ;;  %v20326_v25 = vld [vmem:[#allocation126_spill] sm:$0xff] }
0x1e62   : > { %10788 = vmatpush.bf16.xpose.msra.mxu2 %v10753_v55  ;;  %v20295_v55 = vld [vmem:[#allocation153_spill] sm:$0xff] }
0x1e63   : > { %v11058_v0 = vsel %vm350_vm1, %v20289_v5, 0  ;;  %v10019_v18 = vpack.c.bf16 %v20295_v55, %v20295_v55  ;;  %v10467_v5 = vpop.f32.mrf.mxu0  ;;  %v19635_v1 = vsel %vm350_vm1, %v11340_v56, 0  ;;  %v20332_v56 = vld [vmem:[#allocation114_spill] sm:$0xff] }
0x1e65   : > { %v11319_v49 = vunpack.c.l.b16 %v10019_v18 }
0x1e68   : > { %11247 = vmatpush.bf16.xpose.msra.mxu0 %v11197_v16  ;;  %v11343_v16 = vpack.c.b16 %v11324_v48, %v11323_v54  ;;  %v20308_v54 = vld [vmem:[#allocation11_spill] sm:$0xff] }
0x1e6a   : > { %10789 = vmatpush.bf16.xpose.msra.mxu2 %v10750_v32  ;;  %v19590_v31 = vsel %vm350_vm1, %v11343_v16, 0  ;;  %v11341_v32 = vpack.c.b16 %v11320_v27, %v11319_v49  ;;  %v20317_v49 = vld [vmem:[#allocation9_spill] sm:$0xff] }
0x1e6b   : > { %v10622_v44 = vpop.f32.mrf.mxu0 }
0x1e6c   : > { %v19623_v50 = vsel %vm350_vm1, %v11341_v32, 0 }
0x1e70   : > { %11248 = vmatpush.bf16.xpose.msra.mxu0 %v11194_v53  ;;  %v20297_v53 = vld [vmem:[#allocation16_spill] sm:$0xff] }
0x1e71   : > { %v20299_v8 = vpack.c.b16 %v20297_v53, %v20298_v42 }
0x1e72   : > { %10790 = vmatpush.bf16.xpose.msra.mxu2 %v10747_v7  ;;  %v20306_v7 = vld [vmem:[#allocation146_spill] sm:$0xff] }
0x1e73   : > { %v11052_v60 = vsel %vm350_vm1, %v20299_v8, 0  ;;  %v10016_v38 = vpack.c.bf16 %v20306_v7, %v20306_v7  ;;  %v10624_v4 = vpop.f32.mrf.mxu0 }
0x1e75   : > { %v11316_v36 = vunpack.c.l.b16 %v10016_v38 }
0x1e77   : > { %14621 = vmatmul.msk.bf16.vlgmr.msra.gmra.mxu0 %vm350_vm1, %v19551_v41  ;;  %v11339_v28 = vpack.c.b16 %v11316_v36, %v11315_v9 }
0x1e78   : > { %11411 = vmatpush.bf16.xpose.msrb.mxu0 %v19537_v12 }
0x1e79   : > { %14616 = vmatmul.msk.bf16.vlgmr.msra.gmra.mxu2 %vm350_vm1, %v19408_v30  ;;  %v11342_v30 = vpack.c.b16 %v11322_v23, %v11321_v3  ;;  %v19645_v55 = vsel %vm350_vm1, %v11339_v28, 0  ;;  %v20337_v28 = vld [vmem:[#allocation104_spill] sm:$0xff] }
0x1e7a   : > { %11084 = vmatpush.bf16.xpose.msrb.mxu2 %v11058_v0  ;;  %v20307_v0 = vld [vmem:[#allocation12_spill] sm:$0xff] }
0x1e7b   : > { %v19602_v24 = vsel %vm350_vm1, %v11342_v30, 0  ;;  %v20309_v48 = vpack.c.b16 %v20307_v0, %v20308_v54  ;;  %v20314_v30 = vld [vmem:[#allocation6_spill] sm:$0xff]  ;;  %v19656_v8 = vpop.f32.mrf.mxu0 }
0x1e7c   : > { %v19638_v16 = vpop.f32.mrf.mxu2  ;;  %v20315_v53 = vpack.c.b16 %v20313_v13, %v20314_v30  ;;  %v20343_v30 = vld [vmem:[#allocation46_spill] sm:$0xff] }
0x1e7d   : > { %v11046_v59 = vsel %vm350_vm1, %v20309_v48, 0  ;;  %v20334_v48 = vld [vmem:[#allocation109_spill] sm:$0xff] }
0x1e7e   : > { %v11040_v42 = vsel %vm350_vm1, %v20315_v53, 0  ;;  %v20344_v53 = vld [vmem:[#allocation45_spill] sm:$0xff] }
0x1e80   : > { %11412 = vmatpush.bf16.xpose.msrb.mxu0 %v19560_v35 }
0x1e82   : > { %11085 = vmatpush.bf16.xpose.msrb.mxu2 %v11055_v19  ;;  %v20311_v19 = vld [vmem:[#allocation8_spill] sm:$0xff] }
0x1e83   : > { %v20312_v3 = vpack.c.b16 %v20310_v15, %v20311_v19  ;;  %v10781_v32 = vpop.f32.mrf.mxu0 }
0x1e84   : > { %v10480_v18 = vpop.f32.mrf.mxu2  ;;  %v20350_v32 = vld [vmem:[#allocation63_spill] sm:$0xff] }
0x1e85   : > { %v11043_v23 = vsel %vm350_vm1, %v20312_v3, 0  ;;  %v20341_v18 = vld [vmem:[#allocation99_spill] sm:$0xff] }
0x1e86   : > { %v11407_v3 = vpop.f32.mrf.mxu1 }
0x1e88   : > { %11413 = vmatpush.bf16.xpose.msrb.mxu0 %v19576_v10 }
0x1e8a   : > { %11086 = vmatpush.bf16.xpose.msrb.mxu2 %v11052_v60  ;;  %v20316_v60 = vld [vmem:[#allocation5_spill] sm:$0xff] }
0x1e8b   : > { %v20318_v27 = vpack.c.b16 %v20316_v60, %v20317_v49  ;;  %v11589_v60 = vld [vmem:[%s19798_s4 + $0x150] ss:$0 sm:$0xff] }
0x1e8c   : > { %11592 = vperm.xlu0 %15376, %v11589_v60  }
0x1e8e   : > { %v11409_v49 = vpop.f32.mrf.mxu1 }
0x1e8f   : > { %v15326_v49 = vld [vmem:[#allocation2 + $0x464] sm:$0xf0] }
0x1e90   : > { %11414 = vmatpush.bf16.xpose.msrb.mxu0 %v19590_v31 }
0x1e92   : > { %11087 = vmatpush.bf16.xpose.msrb.mxu2 %v11049_v43  ;;  %v20325_v43 = vld [vmem:[#allocation127_spill] sm:$0xff] }
0x1e93   : > { %v20327_v45 = vpack.c.b16 %v20325_v43, %v20326_v25 }
0x1e95   : > { %v11233_v26 = vsel %vm350_vm1, %v20327_v45, 0 }
0x1e98   : > { %11415 = vmatpush.bf16.xpose.msrb.mxu0 %v19602_v24 }
0x1e99   : > { %v11577_v45 = vpop.f32.mrf.mxu1 }
0x1e9a   : > { %11088 = vmatpush.bf16.xpose.msrb.mxu2 %v11046_v59 }
0x1ea0   : > { %11416 = vmatpush.bf16.xpose.msrb.mxu0 %v19623_v50 }
0x1ea2   : > { %11089 = vmatpush.bf16.xpose.msrb.mxu2 %v11043_v23  ;;  %v19700_v23 = vadd.f32 %v11407_v3, %v10622_v44  ;;  %v11667_v3 = vld [vmem:[%s19798_s4 + $0x160] ss:$0 sm:$0xff] }
0x1ea3   : > { %11670 = vperm.xlu0 %15376, %v11667_v3  }
0x1ea8   : > { %11417 = vmatpush.bf16.xpose.msrb.mxu0 %v19635_v1 }
0x1eaa   : > { %11090 = vmatpush.bf16.xpose.msrb.mxu2 %v11040_v42  ;;  %v20345_v42 = vpack.c.b16 %v20343_v30, %v20344_v53 }
0x1eb0   : > { %11418 = vmatpush.bf16.xpose.msrb.mxu0 %v19645_v55 }
0x1eb4   : > { %v19674_v11 = vpop.f32.mrf.mxu0 }
0x1eb7   : > { %14624 = vmatmul.msk.bf16.vlgmr.msrb.gmra.mxu0 %vm350_vm1, %v19525_v39  ;;  %v20323_v39 = vld [vmem:[#allocation131_spill] sm:$0xff] }
0x1eb8   : > { %11641 = vmatpush.bf16.xpose.msra.mxu0 %v19212_v62  ;;  %v11037_v62 = vsel %vm350_vm1, %v20318_v27, 0  ;;  %v20346_v27 = vld [vmem:[#allocation66_spill] sm:$0xff] }
0x1eb9   : > { %11091 = vmatpush.bf16.xpose.msrb.mxu2 %v11037_v62  ;;  %v20347_v62 = vld [vmem:[#allocation65_spill] sm:$0xff] }
0x1eba   : > { %v20348_v21 = vpack.c.b16 %v20346_v27, %v20347_v62  ;;  %v15324_v62 = vld [vmem:[#allocation2 + $0x454] sm:$0xf0] }
0x1ebc   : > { %v10635_v54 = vpop.f32.mrf.mxu2  ;;  %v11526_v33 = vsel %vm350_vm1, %v20348_v21, 0 }
0x1ec0   : > { %11642 = vmatpush.bf16.xpose.msra.mxu0 %v19222_v20  ;;  %14619 = vmatmul.msk.bf16.vlgmr.msrb.gmra.mxu2 %vm350_vm1, %v19258_v34  ;;  %v20322_v20 = vld [vmem:[#allocation132_spill] sm:$0xff]  ;;  %v20328_v34 = vld [vmem:[#allocation121_spill] sm:$0xff] }
0x1ec1   : > { %11254 = vmatpush.bf16.xpose.msra.mxu2 %v11239_v51  ;;  %v20324_v2 = vpack.c.b16 %v20322_v20, %v20323_v39  ;;  %v20330_v7 = vpack.c.b16 %v20328_v34, %v20329_v17  ;;  %v20349_v51 = vld [vmem:[#allocation64_spill] sm:$0xff]  ;;  %v20356_v34 = vld [vmem:[#allocation57_spill] sm:$0xff] }
0x1ec2   : > { %v20351_v20 = vpack.c.b16 %v20349_v51, %v20350_v32  ;;  %v15320_v32 = vld [vmem:[#allocation2 + $0x434] sm:$0xf0] }
0x1ec3   : > { %v11236_v29 = vsel %vm350_vm1, %v20324_v2, 0  ;;  %v11230_v38 = vsel %vm350_vm1, %v20330_v7, 0  ;;  %v20352_v2 = vld [vmem:[#allocation60_spill] sm:$0xff] }
0x1ec4   : > { %v10637_v36 = vpop.f32.mrf.mxu2  ;;  %v11523_v39 = vsel %vm350_vm1, %v20351_v20, 0 }
0x1ec8   : > { %11643 = vmatpush.bf16.xpose.msra.mxu0 %v19238_v22  ;;  %v10951_v22 = vpop.f32.mrf.mxu0 }
0x1ec9   : > { %11255 = vmatpush.bf16.xpose.msra.mxu2 %v11236_v29  ;;  %v20353_v29 = vld [vmem:[#allocation59_spill] sm:$0xff]  ;;  %v20355_v22 = vld [vmem:[#allocation58_spill] sm:$0xff] }
0x1eca   : > { %v20354_v43 = vpack.c.b16 %v20352_v2, %v20353_v29  ;;  %v20357_v17 = vpack.c.b16 %v20355_v22, %v20356_v34  ;;  %v15318_v2 = vld [vmem:[#allocation2 + $0x424] sm:$0xf0] }
0x1ecc   : > { %v11520_v25 = vsel %vm350_vm1, %v20354_v43, 0  ;;  %v11517_v7 = vsel %vm350_vm1, %v20357_v17, 0  ;;  %v15337_v17 = vld [vmem:[#allocation2 + $0x4c4] sm:$0xf] }
0x1ed0   : > { %11644 = vmatpush.bf16.xpose.msra.mxu0 %v19246_v57  ;;  %v20331_v57 = vld [vmem:[#allocation115_spill] sm:$0xff] }
0x1ed1   : > { %11256 = vmatpush.bf16.xpose.msra.mxu2 %v11233_v26  ;;  %v20333_v5 = vpack.c.b16 %v20331_v57, %v20332_v56  ;;  %v11579_v57 = vpop.f32.mrf.mxu1  ;;  %v20358_v56 = vld [vmem:[#allocation56_spill] sm:$0xff] }
0x1ed2   : > { %v14721_v57 = vld [vmem:[#allocation2 + $0x4b8] sm:$0xf0] }
0x1ed3   : > { %v11227_v0 = vsel %vm350_vm1, %v20333_v5, 0  ;;  %v20359_v5 = vld [vmem:[#allocation55_spill] sm:$0xff] }
0x1ed8   : > { %11645 = vmatpush.bf16.xpose.msra.mxu0 %v19266_v47  ;;  %v20335_v47 = vld [vmem:[#allocation108_spill] sm:$0xff] }
0x1ed9   : > { %11257 = vmatpush.bf16.xpose.msra.mxu2 %v11230_v38  ;;  %v20336_v59 = vpack.c.b16 %v20334_v48, %v20335_v47  ;;  %v20361_v47 = vld [vmem:[#allocation54_spill] sm:$0xff] }
0x1edb   : > { %v11224_v9 = vsel %vm350_vm1, %v20336_v59, 0  ;;  %v20362_v59 = vld [vmem:[#allocation53_spill] sm:$0xff] }
0x1ee0   : > { %11646 = vmatpush.bf16.xpose.msra.mxu0 %v19280_v37  ;;  %v20338_v37 = vld [vmem:[#allocation103_spill] sm:$0xff] }
0x1ee1   : > { %11258 = vmatpush.bf16.xpose.msra.mxu2 %v11227_v0  ;;  %v20339_v15 = vpack.c.b16 %v20337_v28, %v20338_v37  ;;  %v20360_v0 = vpack.c.b16 %v20358_v56, %v20359_v5  ;;  %v20364_v28 = vld [vmem:[#allocation52_spill] sm:$0xff]  ;;  %v20365_v37 = vld [vmem:[#allocation51_spill] sm:$0xff]  ;;  %v15333_v5 = vld [vmem:[#allocation2 + $0x4a4] sm:$0xf] }
0x1ee3   : > { %v11221_v19 = vsel %vm350_vm1, %v20339_v15, 0  ;;  %v11514_v48 = vsel %vm350_vm1, %v20360_v0, 0  ;;  %v20366_v15 = vpack.c.b16 %v20364_v28, %v20365_v37  ;;  %v14713_v0 = vld [vmem:[#allocation2 + $0x4a8] sm:$0xf0] }
0x1ee4   : > { %v14697_v28 = vld [vmem:[#allocation2 + $0x488] sm:$0xf0] }
0x1ee8   : > { %11647 = vmatpush.bf16.xpose.msra.mxu0 %v19296_v46  ;;  %v20340_v46 = vld [vmem:[#allocation100_spill] sm:$0xff] }
0x1ee9   : > { %11259 = vmatpush.bf16.xpose.msra.mxu2 %v11224_v9  ;;  %v20342_v4 = vpack.c.b16 %v20340_v46, %v20341_v18  ;;  %v20363_v9 = vpack.c.b16 %v20361_v47, %v20362_v59  ;;  %v15331_v47 = vld [vmem:[#allocation2 + $0x494] sm:$0xf]  ;;  %v14705_v59 = vld [vmem:[#allocation2 + $0x498] sm:$0xf0] }
0x1eeb   : > { %v11218_v13 = vsel %vm350_vm1, %v20342_v4, 0  ;;  %v11511_v36 = vsel %vm350_vm1, %v20363_v9, 0  ;;  %v14708_v9 = vor.u32 %v15331_v47, %v14705_v59  ;;  %v15334_v47 = vld [vmem:[#allocation2 + $0x4a4] sm:$0xf0] }
0x1ef0   : > { %11648 = vmatpush.bf16.xpose.msra.mxu0 %v19312_v40  ;;  %v11529_v40 = vsel %vm350_vm1, %v20345_v42, 0  ;;  %v14687_v42 = vld [vmem:[#allocation2 + $0x470] sm:$0xf] }
0x1ef1   : > { %11260 = vmatpush.bf16.xpose.msra.mxu2 %v11221_v19  ;;  %v11508_v19 = vsel %vm350_vm1, %v20366_v15, 0 }
0x1ef4   : > { %v11250_v44 = vpop.f32.mrf.mxu0 }
0x1ef9   : > { %11261 = vmatpush.bf16.xpose.msra.mxu2 %v11218_v13 }
0x1efc   : > { %v11252_v52 = vpop.f32.mrf.mxu0 }
0x1efd   : > { %v14655_v52 = vld [vmem:[#allocation2 + $0x430] sm:$0xf] }
0x1f00   : > { %14622 = vmatmul.msk.bf16.vlgmr.msra.gmra.mxu2 %vm350_vm1, %v19551_v41  ;;  %v10792_v41 = vpop.f32.mrf.mxu2 }
0x1f01   : > { %11555 = vmatpush.bf16.xpose.msrb.mxu2 %v11529_v40  ;;  %v11578_v26 = vadd.f32 %v11577_v45, %v10792_v41  ;;  %v14679_v40 = vld [vmem:[#allocation2 + $0x460] sm:$0xf]  ;;  %v14737_v41 = vld [vmem:[#allocation2 + $0x4d8] sm:$0xf0]  ;;  %v14639_v45 = vld [vmem:[#allocation2 + $0x410] sm:$0xf] }
0x1f02   : > { %v14680_v27 = vor.u32 %v15326_v49, %v14679_v40 }
0x1f08   : > { %v10794_v38 = vpop.f32.mrf.mxu2 }
0x1f09   : > { %11556 = vmatpush.bf16.xpose.msrb.mxu2 %v11526_v33  ;;  %v15322_v33 = vld [vmem:[#allocation2 + $0x444] sm:$0xf0]  ;;  %v15335_v38 = vld [vmem:[#allocation2 + $0x4b4] sm:$0xf] }
0x1f0a   : > { %v14724_v56 = vor.u32 %v15335_v38, %v14721_v57  ;;  %v14633_v38 = vld [vmem:[#allocation2 + $0x408] sm:$0xf0] }
0x1f11   : > { %11557 = vmatpush.bf16.xpose.msrb.mxu2 %v11523_v39  ;;  %v15341_v39 = vld [vmem:[#allocation2 + $0x4e4] sm:$0xf] }
0x1f19   : > { %11558 = vmatpush.bf16.xpose.msrb.mxu2 %v11520_v25  ;;  %v15339_v25 = vld [vmem:[#allocation2 + $0x4d4] sm:$0xf] }
0x1f1a   : > { %v14740_v22 = vor.u32 %v15339_v25, %v14737_v41  ;;  %v15340_v25 = vld [vmem:[#allocation2 + $0x4d4] sm:$0xf0]  ;;  %v15315_v41 = vld [vmem:[#allocation2 + $0x414] sm:$0xf] }
0x1f21   : > { %11559 = vmatpush.bf16.xpose.msrb.mxu2 %v11517_v7  ;;  %v14729_v7 = vld [vmem:[#allocation2 + $0x4c8] sm:$0xf0] }
0x1f29   : > { %11560 = vmatpush.bf16.xpose.msrb.mxu2 %v11514_v48  ;;  %v14716_v48 = vor.u32 %v15333_v5, %v14713_v0  ;;  %v15336_v5 = vld [vmem:[#allocation2 + $0x4b4] sm:$0xf0] }
0x1f31   : > { %11561 = vmatpush.bf16.xpose.msrb.mxu2 %v11511_v36  ;;  %v15329_v36 = vld [vmem:[#allocation2 + $0x484] sm:$0xf] }
0x1f34   : > { %v11420_v46 = vpop.f32.mrf.mxu0 }
0x1f35   : > { %v11421_v18 = vadd.f32 %v11420_v46, %v10635_v54  ;;  %v11251_v54 = vadd.f32 %v11250_v44, %v19616_v58  ;;  %v14753_v58 = vld [vmem:[#allocation2 + $0x4f8] sm:$0xf0]  ;;  %v14663_v44 = vld [vmem:[#allocation2 + $0x440] sm:$0xf] }
0x1f36   : > { %v14664_v51 = vor.u32 %v15322_v33, %v14663_v44  ;;  %v14751_v44 = vld [vmem:[#allocation2 + $0x4f0] sm:$0xf]  ;;  %v15344_v33 = vld [vmem:[#allocation2 + $0x4f4] sm:$0xf0] }
0x1f37   : > { %v19749_v4 = vadd.f32 %v11578_v26, %v11421_v18  ;;  %v15316_v26 = vld [vmem:[#allocation2 + $0x414] sm:$0xf0]  ;;  %v19770_v18 = vpop.permute.xlu0 %11592 }
0x1f38   : > { %v14640_v34 = vor.u32 %v15316_v26, %v14639_v45  ;;  %v14641_v26 = vld [vmem:[#allocation2 + $0x418] sm:$0xf0] }
0x1f39   : > { %11562 = vmatpush.bf16.xpose.msrb.mxu2 %v11508_v19  ;;  %v14700_v19 = vor.u32 %v15329_v36, %v14697_v28  ;;  %v15332_v36 = vld [vmem:[#allocation2 + $0x494] sm:$0xf0] }
0x1f3c   : > { %v11422_v13 = vpop.f32.mrf.mxu0 }
0x1f40   : > { %14625 = vmatmul.msk.bf16.vlgmr.msrb.gmra.mxu2 %vm350_vm1, %v19607_v14 }
0x1f41   : > { %11654 = vmatpush.bf16.xpose.msra.mxu2 %v19537_v12  ;;  %v15328_v12 = vld [vmem:[#allocation2 + $0x474] sm:$0xf0] }
0x1f42   : > { %v14688_v60 = vor.u32 %v15328_v12, %v14687_v42  ;;  %v14689_v42 = vld [vmem:[#allocation2 + $0x478] sm:$0xf0] }
0x1f43   : > { %v11093_v30 = vpop.f32.mrf.mxu2 }
0x1f44   : > { %v11094_v53 = vadd.f32 %v11093_v30, %v19540_v61  ;;  %11833 = vmatpush.bf16.msra.mxu1 %v14688_v60  ;;  %v11637_v61 = vld [vmem:[%s19796_s2 + $0xe08] sm:$0x1]  ;;  %v14681_v60 = vld [vmem:[#allocation2 + $0x468] sm:$0xf0] }
0x1f45   : > { %14627 = vmatmul.msk.bf16.vlgmr.msra.gmra.mxu0 %vm350_vm1, %v11637_v61 }
0x1f46   : > { %v19756_v14 = vadd.f32 %v11251_v54, %v11094_v53  ;;  %v15327_v53 = vld [vmem:[#allocation2 + $0x474] sm:$0xf]  ;;  %v15325_v54 = vld [vmem:[#allocation2 + $0x464] sm:$0xf] }
0x1f47   : > { %v14692_v12 = vor.u32 %v15327_v53, %v14689_v42  ;;  %v14684_v49 = vor.u32 %v15325_v54, %v14681_v60 }
0x1f48   : > { %11834 = vmatpush.bf16.msra.mxu1 %v14680_v27 }
0x1f49   : > { %11655 = vmatpush.bf16.xpose.msra.mxu2 %v19560_v35  ;;  %v14671_v35 = vld [vmem:[#allocation2 + $0x450] sm:$0xf]  ;;  %11859 = vmatpush.bf16.msrb.mxu0 %v14692_v12 }
0x1f4b   : > { %v11095_v21 = vpop.f32.mrf.mxu2 }
0x1f4c   : > { %v14665_v21 = vld [vmem:[#allocation2 + $0x448] sm:$0xf0] }
0x1f4d   : > { %11860 = vmatpush.bf16.msrb.mxu0 %v14684_v49 }
0x1f51   : > { %11656 = vmatpush.bf16.xpose.msra.mxu2 %v19576_v10  ;;  %v14672_v10 = vor.u32 %v15324_v62, %v14671_v35  ;;  %v14673_v35 = vld [vmem:[#allocation2 + $0x458] sm:$0xf0]  ;;  %v15321_v62 = vld [vmem:[#allocation2 + $0x444] sm:$0xf] }
0x1f53   : > { %11835 = vmatpush.bf16.msra.mxu1 %v14672_v10  ;;  %v14668_v10 = vor.u32 %v15321_v62, %v14665_v21 }
0x1f57   : > { %11836 = vmatpush.bf16.msra.mxu1 %v14664_v51  ;;  %v14752_v51 = vor.u32 %v15344_v33, %v14751_v44 }
0x1f59   : > { %11657 = vmatpush.bf16.xpose.msra.mxu2 %v19590_v31  ;;  %v15343_v31 = vld [vmem:[#allocation2 + $0x4f4] sm:$0xf] }
0x1f5a   : > { %v14756_v20 = vor.u32 %v15343_v31, %v14753_v58  ;;  %v15314_v31 = vld [vmem:[#allocation2 + $0x404] sm:$0xf0] }
0x1f61   : > { %11658 = vmatpush.bf16.xpose.msra.mxu2 %v19602_v24  ;;  %v14656_v24 = vor.u32 %v15320_v32, %v14655_v52  ;;  %v15319_v52 = vld [vmem:[#allocation2 + $0x434] sm:$0xf]  ;;  %v14657_v32 = vld [vmem:[#allocation2 + $0x438] sm:$0xf0] }
0x1f63   : > { %11837 = vmatpush.bf16.msra.mxu1 %v14656_v24  ;;  %v14743_v24 = vld [vmem:[#allocation2 + $0x4e0] sm:$0xf] }
0x1f69   : > { %11659 = vmatpush.bf16.xpose.msra.mxu2 %v19623_v50  ;;  %v14745_v50 = vld [vmem:[#allocation2 + $0x4e8] sm:$0xf0] }
0x1f6a   : > { %v14748_v29 = vor.u32 %v15341_v39, %v14745_v50  ;;  %v15342_v39 = vld [vmem:[#allocation2 + $0x4e4] sm:$0xf0]  ;;  %v15317_v50 = vld [vmem:[#allocation2 + $0x424] sm:$0xf] }
0x1f71   : > { %11660 = vmatpush.bf16.xpose.msra.mxu2 %v19635_v1  ;;  %v14647_v1 = vld [vmem:[#allocation2 + $0x420] sm:$0xf] }
0x1f72   : > { %v14648_v43 = vor.u32 %v15318_v2, %v14647_v1  ;;  %v14744_v1 = vor.u32 %v15342_v39, %v14743_v24  ;;  %v14649_v2 = vld [vmem:[#allocation2 + $0x428] sm:$0xf0] }
0x1f74   : > { %11838 = vmatpush.bf16.msra.mxu1 %v14648_v43  ;;  %v14735_v43 = vld [vmem:[#allocation2 + $0x4d0] sm:$0xf] }
0x1f75   : > { %v14736_v45 = vor.u32 %v15340_v25, %v14735_v43 }
0x1f78   : > { %11839 = vmatpush.bf16.msra.mxu1 %v14640_v34  ;;  %v14727_v34 = vld [vmem:[#allocation2 + $0x4c0] sm:$0xf] }
0x1f79   : > { %11661 = vmatpush.bf16.xpose.msra.mxu2 %v19645_v55  ;;  %v14732_v55 = vor.u32 %v15337_v17, %v14729_v7  ;;  %v15338_v17 = vld [vmem:[#allocation2 + $0x4c4] sm:$0xf0]  ;;  %v15313_v7 = vld [vmem:[#allocation2 + $0x404] sm:$0xf] }
0x1f7a   : > { %v14636_v57 = vor.u32 %v15313_v7, %v14633_v38 }
0x1f80   : > { %14628 = vmatmul.msk.bf16.vlgmr.msra.gmra.mxu2 %vm350_vm1, %v11637_v61  ;;  %v14631_v61 = vld [vmem:[#allocation2 + $0x400] sm:$0xf] }
0x1f81   : > { %11872 = vmatpush.bf16.msrb.mxu2 %v14756_v20  ;;  %v14632_v58 = vor.u32 %v15314_v31, %v14631_v61  ;;  %v14660_v20 = vor.u32 %v15319_v52, %v14657_v32 }
0x1f83   : > { %v11263_v37 = vpop.f32.mrf.mxu2  ;;  %11840 = vmatpush.bf16.msra.mxu1 %v14632_v58 }
0x1f84   : > { %v11264_v15 = vadd.f32 %v11263_v37, %v19638_v16  ;;  %v14695_v37 = vld [vmem:[#allocation2 + $0x480] sm:$0xf] }
0x1f85   : > { %11873 = vmatpush.bf16.msrb.mxu2 %v14748_v29  ;;  %v14652_v29 = vor.u32 %v15317_v50, %v14649_v2 }
0x1f86   : > { %v11582_v3 = vadd.f32 %v11264_v15, %v19542_v63  ;;  %v15330_v15 = vld [vmem:[#allocation2 + $0x484] sm:$0xf0] }
0x1f87   : > { %11846 = vmatpush.bf16.msrb.mxu1 %v14752_v51 }
0x1f88   : > { %v11586_v46 = vadd.f32 %v19749_v4, %v11582_v3  ;;  %v15323_v4 = vld [vmem:[#allocation2 + $0x454] sm:$0xf] }
0x1f89   : > { %11874 = vmatpush.bf16.msrb.mxu2 %v14740_v22  ;;  %v14644_v22 = vor.u32 %v15315_v41, %v14641_v26 }
0x1f8a   : > { %v11588_v13 = vadd.f32 %v11586_v46, %v19674_v11  ;;  %v14676_v11 = vor.u32 %v15323_v4, %v14673_v35  ;;  %v11887_v46 = vld [vmem:[%s19798_s4 + $0x170] ss:$0 sm:$0xff] }
0x1f8b   : > { %v11265_v30 = vpop.f32.mrf.mxu2  ;;  %11847 = vmatpush.bf16.msrb.mxu1 %v14744_v1  ;;  %11890 = vperm.xlu1 %15377, %v11887_v46  }
0x1f8c   : > { %v11596_v40 = vadd.f32 %v19770_v18, %v11588_v13  ;;  %11861 = vmatpush.bf16.msrb.mxu0 %v14676_v11 }
0x1f8d   : > { %11875 = vmatpush.bf16.msrb.mxu2 %v14732_v55  ;;  %v14728_v55 = vor.u32 %v15338_v17, %v14727_v34 }
0x1f8e   : > { %vm11598_vm1 = vcmp.ge.f32.partialorder %v11596_v40, 0.0  ;;  %v11600_v16 = vmul.f32 0.2, %v11596_v40 }
0x1f8f   : > { %11848 = vmatpush.bf16.msrb.mxu1 %v14736_v45 }
0x1f90   : > { %v11602_v63 = vsel %vm11598_vm1, %v11596_v40, %v11600_v16  ;;  %11862 = vmatpush.bf16.msrb.mxu0 %v14668_v10 }
0x1f91   : > { %11876 = vmatpush.bf16.msrb.mxu2 %v14724_v56  ;;  %v19774_v27 = vpack.c.bf16 %v11602_v63, %v11602_v63  ;;  %v14719_v56 = vld [vmem:[#allocation2 + $0x4b0] sm:$0xf] }
0x1f92   : > { %v14720_v0 = vor.u32 %v15336_v5, %v14719_v56 }
0x1f93   : > { %11849 = vmatpush.bf16.msrb.mxu1 %v14728_v55 }
0x1f94   : > { %11863 = vmatpush.bf16.msrb.mxu0 %v14660_v20  ;;  %v11902_v20 = vlaneseq }
0x1f95   : > { %11877 = vmatpush.bf16.msrb.mxu2 %v14716_v48  ;;  %v14711_v48 = vld [vmem:[#allocation2 + $0x4a0] sm:$0xf] }
0x1f96   : > { %v14712_v59 = vor.u32 %v15334_v47, %v14711_v48  ;;  %vm11904_vm13 = vcmp.lt.s32.totalorder %v11902_v20, 256 }
0x1f97   : > { %11850 = vmatpush.bf16.msrb.mxu1 %v14720_v0 }
0x1f98   : > { %11864 = vmatpush.bf16.msrb.mxu0 %v14652_v29 }
0x1f99   : > { %11878 = vmatpush.bf16.msrb.mxu2 %v14708_v9  ;;  %v14703_v9 = vld [vmem:[#allocation2 + $0x490] sm:$0xf] }
0x1f9a   : > { %v14704_v28 = vor.u32 %v15332_v36, %v14703_v9 }
0x1f9b   : > { %11851 = vmatpush.bf16.msrb.mxu1 %v14712_v59 }
0x1f9c   : > { %11865 = vmatpush.bf16.msrb.mxu0 %v14644_v22 }
0x1f9d   : > { %11879 = vmatpush.bf16.msrb.mxu2 %v14700_v19  ;;  %v14696_v19 = vor.u32 %v15330_v15, %v14695_v37 }
0x1f9f   : > { %11852 = vmatpush.bf16.msrb.mxu1 %v14704_v28 }
0x1fa0   : > { %11880 = vmatmul.bf16.vlgmr.msrb.gmra.mxu2 %v19774_v27  ;;  %11866 = vmatpush.bf16.msrb.mxu0 %v14636_v57 }
0x1fa3   : > { %11853 = vmatpush.bf16.msrb.mxu1 %v14696_v19 }
0x1fc2   : > { %v11650_v4 = vpop.f32.mrf.mxu0 }
0x1fc3   : > { %v11564_v3 = vpop.f32.mrf.mxu2 }
0x1fc4   : > { %v11565_v13 = vadd.f32 %v11564_v3, %v19656_v8 }
0x1fc6   : > { %v11583_v30 = vadd.f32 %v11565_v13, %v19700_v23 }
0x1fc8   : > { %v11585_v53 = vadd.f32 %v11583_v30, %v19756_v14 }
0x1fca   : > { %v11587_v42 = vadd.f32 %v11585_v53, %v19504_v6  ;;  %v11652_v35 = vpop.f32.mrf.mxu0  ;;  %v11671_v6 = vpop.permute.xlu0 %11670 }
0x1fcb   : > { %v11566_v12 = vpop.f32.mrf.mxu2 }
0x1fcc   : > { %v11595_v40 = vadd.f32 %v19770_v18, %v11587_v42 }
0x1fce   : > { %vm11597_vm5 = vcmp.ge.f32.partialorder %v11595_v40, 0.0  ;;  %v11599_v16 = vmul.f32 0.2, %v11595_v40 }
0x1fd0   : > { %v11601_v54 = vsel %vm11597_vm5, %v11595_v40, %v11599_v16 }
0x1fd1   : > { %v11603_v60 = vpack.c.bf16 %v11601_v54, %v11601_v54 }
0x1fd3   : > { %11841 = vmatmul.bf16.vlgmr.msra.gmra.mxu1 %v11603_v60  ;;  %11867 = vmatmul.bf16.vlgmr.msrb.gmra.mxu0 %v11603_v60 }
0x1fe3   : > { %11854 = vmatmul.bf16.vlgmr.msrb.gmra.mxu1 %v19774_v27 }
0x1ffd   : > { %v11891_v31 = vpop.permute.xlu1 %11890 }
0x2003   : > { %v11663_v49 = vpop.f32.mrf.mxu2 }
0x200b   : > { %v11665_v8 = vpop.f32.mrf.mxu2 }
0x2023   : > { %v11881_v63 = vpop.f32.mrf.mxu2 }
0x202b   : > { %v11883_v23 = vpop.f32.mrf.mxu2 }
0x2050   : > { %v11842_v14 = vpop.f32.mrf.mxu1  ;;  %v11868_v11 = vpop.f32.mrf.mxu0 }
0x2051   : > { %v11869_v62 = vadd.f32 %v11868_v11, %v11671_v6  ;;  %v11843_v58 = vadd.f32 %v11842_v14, %v11671_v6 }
0x2053   : > { %v11882_v21 = vadd.f32 %v11881_v63, %v11869_v62 }
0x2055   : > { %v11886_v61 = vadd.f32 %v11882_v21, %v11663_v49 }
0x2057   : > { %v11894_v44 = vadd.f32 %v11891_v31, %v11886_v61 }
0x2058   : > { %v11844_v18 = vpop.f32.mrf.mxu1  ;;  %v11870_v10 = vpop.f32.mrf.mxu0 }
0x2059   : > { %15378 = vtanh.f32 %v11894_v44 }
0x205f   : > { %v15379_v24 = vpop.eup %15378 }
0x2060   : > { %v11855_v33 = vpop.f32.mrf.mxu1  ;;  %v11899_v39 = vrot.slane %v15379_v24, 7 }
0x2061   : > { %v11856_v27 = vadd.f32 %v11855_v33, %v11843_v58 }
0x2063   : > { %v11885_v52 = vadd.f32 %v11856_v27, %v11650_v4 }
0x2065   : > { %v11893_v51 = vadd.f32 %v11891_v31, %v11885_v52 }
0x2067   : > { %15380 = vtanh.f32 %v11893_v51 }
0x2068   : > { %v11857_v32 = vpop.f32.mrf.mxu1 }
0x206d   : > { %v15381_v50 = vpop.eup %15380 }
0x206e   : > { %v11900_v1 = vsel %vm3872_vm11, %v15381_v50, %v11899_v39 }
0x206f   : > { %11906 = vst.msk [vmem:[%s253_s17] sm:$0x3] %vm11904_vm13, %v11900_v1 }
0x2070 PF: > { %s16_s18 = sadd.s32 1, %s15422_s18  }
0x2071   : > { %p13_p7 = scmp.ge.s32.totalorder %s16_s18, 4  }
0x2073   :  { %15 = sbr.rel (!%p13_p7) target bundleno = 1 (0x1), region = 79 }
0x2078   :  { %11926 = vsyncpa [#allocation3], 1 }
0x2079   :  { %11928 = vsyncpa [#allocation3 + $0x1], 1 }

</bundles_post_ra>
